<compile_context>
chip_gen: v7x
topology: tpu7x:2x2x1
jax: 0.10.0
libtpu: 0.0.40
codegen_flags: <defaults>
</compile_context>

<pallas_src>
import jax
import jax.numpy as jnp
from jax import lax
from jax.experimental import pallas as pl
from jax.experimental.pallas import tpu as pltpu

VMEM_LIMIT = 32 * 1024 * 1024


def _round_up(n, m):
    return ((n + m - 1) // m) * m


# ----------------------------- Pallas kernels ------------------------------


def _conv1_pool_kernel(t00_ref, t01_ref, t10_ref, t11_ref, w_ref, b_ref, o_ref):
    """conv1 (im2col matmul) + bias + ReLU + 2x2 max-pool, fused.

    Each t??_ref holds the (TM, 32) bf16 im2col rows (K padded 25->32) for one
    position of the 2x2 pool window; the pool is the elementwise max of the four
    per-tap conv results.
    """
    w = w_ref[...]
    b = b_ref[...]

    def tap(t_ref):
        acc = jnp.dot(t_ref[...], w, preferred_element_type=jnp.float32)
        return jnp.maximum(acc + b, 0.0)

    pooled = jnp.maximum(jnp.maximum(tap(t00_ref), tap(t01_ref)),
                         jnp.maximum(tap(t10_ref), tap(t11_ref)))
    o_ref[...] = pooled.astype(o_ref.dtype)


def _conv2_pool_kernel(xe_ref, xo_ref, w_ref, b_ref, o_ref, patch_ref):
    """conv2 + bias + ReLU + 2x2 max-pool for one pooled output row of one image.

    xe_ref / xo_ref: (18, 10, 128) bf16 even / odd columns of the zero-padded
    conv1 activation for the current image (channels padded 32 -> 128 in glue, so
    every store below is 128-lane aligned; block stays resident across the 7
    pooled-row grid steps).  The (32, 3200) im2col patch slab is built in VMEM
    scratch (8-row groups = the four 2x2 pool taps); no amplified im2col slab ever
    touches HBM and every write is an aligned (8, 128) block.
    """
    i = pl.program_id(1)                        # pooled output row index
    for a in range(2):                          # pool-window row offset
        for di in range(5):                     # conv kernel row
            row = 2 * i + a + di
            xe_row = xe_ref[row]                # (10, 128) even input columns
            xo_row = xo_ref[row]                # (10, 128) odd  input columns
            for pb in range(2):                 # pool-window col offset
                r0 = (2 * a + pb) * 8           # 8-aligned quarter of the slab
                for dj in range(5):             # conv kernel col
                    s = pb + dj                 # input col = 2*j + s
                    src = xe_row if s % 2 == 0 else xo_row
                    k = di * 5 + dj
                    patch_ref[r0:r0 + 8, 128 * k:128 * (k + 1)] = (
                        src[s // 2:s // 2 + 8, :])
    acc = jnp.dot(patch_ref[...], w_ref[...], preferred_element_type=jnp.float32)
    acc = jnp.maximum(acc + b_ref[...], 0.0)
    pooled = jnp.maximum(jnp.maximum(acc[0:7], acc[8:15]),
                         jnp.maximum(acc[16:23], acc[24:31]))
    o_ref[...] = pooled.astype(o_ref.dtype)


def _fc_fused_kernel(x_ref, w1_ref, b1_ref, w2_ref, b2_ref, o_ref, acc_ref):
    """fc1 + bias + ReLU + fc2 fused; the hidden activation stays in VMEM.

    Grid axis 1 splits the 512 hidden units into blocks; fc2 partials accumulate
    in an f32 scratch.  fc2 is padded to 128 output lanes (lane-dense store);
    logits[:, :10] is sliced in glue.
    """
    h = pl.program_id(1)

    @pl.when(h == 0)
    def _():
        acc_ref[...] = jnp.zeros_like(acc_ref)

    hid = jnp.dot(x_ref[...], w1_ref[...], preferred_element_type=jnp.float32)
    hid = jnp.maximum(hid + b1_ref[...], 0.0)
    # TODO(synk): nn.Dropout(0.3) implemented as eval-mode identity (no RNG mask).
    acc_ref[...] += jnp.dot(hid.astype(jnp.bfloat16), w2_ref[...],
                            preferred_element_type=jnp.float32)

    @pl.when(h == pl.num_programs(1) - 1)
    def _():
        o_ref[...] = acc_ref[...] + b2_ref[...]


# ------------------------------ kernel wrappers ------------------------------


def conv1_relu_pool(taps, w1, b1):
    rows = taps[0].shape[0]
    tm = 256 if rows >= 256 else _round_up(rows, 8)        # cap tm, never tm=M blowup
    rows_p = _round_up(rows, tm)
    taps = [jnp.pad(t, ((0, rows_p - rows), (0, 0))) for t in taps]
    out = pl.pallas_call(
        _conv1_pool_kernel,
        out_shape=jax.ShapeDtypeStruct((rows_p, 32), jnp.bfloat16),
        grid_spec=pltpu.PrefetchScalarGridSpec(
            num_scalar_prefetch=0,
            grid=(rows_p // tm,),
            in_specs=[pl.BlockSpec((tm, 32), lambda r: (r, 0))] * 4 + [
                pl.BlockSpec((32, 32), lambda r: (0, 0)),
                pl.BlockSpec((1, 32), lambda r: (0, 0)),
            ],
            out_specs=pl.BlockSpec((tm, 32), lambda r: (r, 0)),
        ),
        compiler_params=pltpu.CompilerParams(
            dimension_semantics=("parallel",), vmem_limit_bytes=VMEM_LIMIT),
    )(*taps, w1, b1)
    return out[:rows]


def conv2_relu_pool(y1, w2, b2):
    """y1: (N, 14, 14, 32) bf16 pooled conv1 activation -> (N, 7, 7, 64) bf16."""
    n = y1.shape[0]
    # 'same' conv zero padding; one extra right column so in-kernel slices are 8 rows.
    yp = jnp.pad(y1, ((0, 0), (2, 2), (2, 4), (0, 0)))     # (N, 18, 20, 32)
    yp = jnp.pad(yp, ((0, 0), (0, 0), (0, 0), (0, 96)))    # channels 32 -> 128 (aligned)
    x_ev = yp[:, :, 0::2, :]                               # (N, 18, 10, 128)
    x_od = yp[:, :, 1::2, :]                               # (N, 18, 10, 128)
    return pl.pallas_call(
        _conv2_pool_kernel,
        out_shape=jax.ShapeDtypeStruct((n, 7, 7, 64), jnp.bfloat16),
        grid_spec=pltpu.PrefetchScalarGridSpec(
            num_scalar_prefetch=0,
            grid=(n, 7),
            in_specs=[
                pl.BlockSpec((None, 18, 10, 128), lambda nn, i: (nn, 0, 0, 0)),
                pl.BlockSpec((None, 18, 10, 128), lambda nn, i: (nn, 0, 0, 0)),
                pl.BlockSpec((3200, 64), lambda nn, i: (0, 0)),
                pl.BlockSpec((1, 64), lambda nn, i: (0, 0)),
            ],
            out_specs=pl.BlockSpec((None, None, 7, 64), lambda nn, i: (nn, i, 0, 0)),
            scratch_shapes=[pltpu.VMEM((32, 3200), jnp.bfloat16)],
        ),
        compiler_params=pltpu.CompilerParams(
            dimension_semantics=("parallel", "parallel"),
            vmem_limit_bytes=VMEM_LIMIT),
    )(x_ev, x_od, w2, b2)


def fc_fused(feat, w1, b1, w2, b2):
    n = feat.shape[0]
    tm = 256 if n >= 256 else _round_up(n, 8)
    rows_p = _round_up(n, tm)
    feat = jnp.pad(feat, ((0, rows_p - n), (0, 0)))
    hb = 256                                               # hidden block (of 512)
    out = pl.pallas_call(
        _fc_fused_kernel,
        out_shape=jax.ShapeDtypeStruct((rows_p, 128), jnp.float32),
        grid_spec=pltpu.PrefetchScalarGridSpec(
            num_scalar_prefetch=0,
            grid=(rows_p // tm, 512 // hb),
            in_specs=[
                pl.BlockSpec((tm, 3136), lambda r, h: (r, 0)),
                pl.BlockSpec((3136, hb), lambda r, h: (0, h)),
                pl.BlockSpec((1, hb), lambda r, h: (0, h)),
                pl.BlockSpec((hb, 128), lambda r, h: (h, 0)),
                pl.BlockSpec((1, 128), lambda r, h: (0, 0)),
            ],
            out_specs=pl.BlockSpec((tm, 128), lambda r, h: (r, 0)),
            scratch_shapes=[pltpu.VMEM((tm, 128), jnp.float32)],
        ),
        compiler_params=pltpu.CompilerParams(
            dimension_semantics=("parallel", "arbitrary"),
            vmem_limit_bytes=VMEM_LIMIT),
    )(feat, w1, b1, w2, b2)
    return out[:n, :10]


# ------------------------------- JAX glue -----------------------------------


def _conv1_tap_patches(xh):
    """xh: (N, 28, 28, 1) f32 -> four bf16 (N*196, 32) im2col slabs, one per
    2x2 pool tap (K padded 25 -> 32 for lane alignment)."""
    n = xh.shape[0]
    xp = jnp.pad(xh, ((0, 0), (2, 2), (2, 2), (0, 0)))
    cols = [xp[:, di:di + 28, dj:dj + 28, 0] for di in range(5) for dj in range(5)]
    patches = jnp.stack(cols, axis=-1)                     # (N, 28, 28, 25)
    patches = jnp.pad(patches, ((0, 0), (0, 0), (0, 0), (0, 7))).astype(jnp.bfloat16)
    return [patches[:, a::2, pb::2, :].reshape(n * 196, 32)
            for a in range(2) for pb in range(2)]


def init_params(key):
    """Parameters in PyTorch layout (interchangeable with the torch module)."""
    ks = jax.random.split(key, 8)
    return {
        "conv1_w": 0.1 * jax.random.normal(ks[0], (32, 1, 5, 5), jnp.float32),
        "conv1_b": 0.1 * jax.random.normal(ks[1], (32,), jnp.float32),
        "conv2_w": 0.05 * jax.random.normal(ks[2], (64, 32, 5, 5), jnp.float32),
        "conv2_b": 0.05 * jax.random.normal(ks[3], (64,), jnp.float32),
        "fc1_w": 0.02 * jax.random.normal(ks[4], (512, 64 * 7 * 7), jnp.float32),
        "fc1_b": 0.02 * jax.random.normal(ks[5], (512,), jnp.float32),
        "fc2_w": 0.05 * jax.random.normal(ks[6], (10, 512), jnp.float32),
        "fc2_b": 0.05 * jax.random.normal(ks[7], (10,), jnp.float32),
    }


def prepare_params(p):
    """One-time repack of torch-layout weights into kernel layout: bf16 matmul
    operands, f32 biases, conv1 K padded 25->32, conv2 K padded 800->3200 (each
    32-channel group zero-padded to 128 lanes), fc2 padded to 128 output lanes,
    fc1 rows permuted from NCHW-flatten order to the kernel's NHWC-flatten order."""
    w1 = jnp.transpose(p["conv1_w"], (2, 3, 1, 0)).reshape(25, 32)
    w1 = jnp.pad(w1, ((0, 7), (0, 0))).astype(jnp.bfloat16)
    w2 = jnp.transpose(p["conv2_w"], (2, 3, 1, 0)).reshape(25, 32, 64)
    w2 = jnp.pad(w2, ((0, 0), (0, 96), (0, 0))).reshape(3200, 64).astype(jnp.bfloat16)
    wfc1 = jnp.transpose(p["fc1_w"].reshape(512, 64, 7, 7), (2, 3, 1, 0))
    wfc1 = wfc1.reshape(3136, 512).astype(jnp.bfloat16)
    wfc2 = jnp.pad(p["fc2_w"].T, ((0, 0), (0, 118))).astype(jnp.bfloat16)
    return {
        "w1": w1, "b1": p["conv1_b"].reshape(1, 32).astype(jnp.float32),
        "w2": w2, "b2": p["conv2_b"].reshape(1, 64).astype(jnp.float32),
        "wfc1": wfc1, "bfc1": p["fc1_b"].reshape(1, 512).astype(jnp.float32),
        "wfc2": wfc2,
        "bfc2": jnp.pad(p["fc2_b"], (0, 118)).reshape(1, 128).astype(jnp.float32),
    }


def mnist_cnn_forward(x, prep):
    """x: (N, 1, 28, 28) f32, prep = prepare_params(params) -> logits (N, 10)."""
    x = x.reshape(-1, 1, 28, 28).astype(jnp.float32)       # mirrors x.view(-1, 1, 28, 28)
    n = x.shape[0]
    xh = jnp.transpose(x, (0, 2, 3, 1))                    # NCHW -> NHWC

    taps = _conv1_tap_patches(xh)
    y1 = conv1_relu_pool(taps, prep["w1"], prep["b1"])     # (N*196, 32) bf16
    y1 = y1.reshape(n, 14, 14, 32)

    y2 = conv2_relu_pool(y1, prep["w2"], prep["b2"])       # (N, 7, 7, 64) bf16

    feat = y2.reshape(n, 7 * 7 * 64)                       # NHWC flatten (wfc1 rows match)
    return fc_fused(feat, prep["wfc1"], prep["bfc1"], prep["wfc2"], prep["bfc2"])


# ------------------------- pure-JAX reference checks -------------------------


def _ref_forward_matched(x, p):
    """Reference mirroring the kernels' bf16-operand / f32-accumulate precision."""
    bf = lambda a: a.astype(jnp.bfloat16)
    n = x.shape[0]
    xh = jnp.transpose(x.reshape(n, 1, 28, 28), (0, 2, 3, 1))

    def pool(y):
        return jnp.maximum(jnp.maximum(y[:, 0::2, 0::2, :], y[:, 0::2, 1::2, :]),
                           jnp.maximum(y[:, 1::2, 0::2, :], y[:, 1::2, 1::2, :]))

    def im2col(z):
        zp = jnp.pad(z, ((0, 0), (2, 2), (2, 2), (0, 0)))
        h = z.shape[1]
        cols = [zp[:, di:di + h, dj:dj + h, :] for di in range(5) for dj in range(5)]
        return jnp.concatenate(cols, axis=-1)

    w1 = jnp.transpose(p["conv1_w"], (2, 3, 1, 0)).reshape(25, 32)
    y1 = jnp.dot(bf(im2col(xh)), bf(w1), preferred_element_type=jnp.float32)
    y1 = pool(jnp.maximum(y1 + p["conv1_b"], 0.0)).astype(jnp.bfloat16)

    w2 = jnp.transpose(p["conv2_w"], (2, 3, 1, 0)).reshape(800, 64)
    y2 = jnp.dot(bf(im2col(y1)), bf(w2), preferred_element_type=jnp.float32)
    y2 = pool(jnp.maximum(y2 + p["conv2_b"], 0.0)).astype(jnp.bfloat16)

    feat = jnp.transpose(y2, (0, 3, 1, 2)).reshape(n, 64 * 7 * 7)
    h = jnp.dot(bf(feat), bf(p["fc1_w"].T), preferred_element_type=jnp.float32)
    h = jnp.maximum(h + p["fc1_b"], 0.0).astype(jnp.bfloat16)
    logits = jnp.dot(h, bf(p["fc2_w"].T), preferred_element_type=jnp.float32)
    return logits + p["fc2_b"]


def _ref_forward_f32(x, p):
    """Torch-faithful float32 reference (loose sanity check vs the bf16 kernels)."""
    n = x.shape[0]
    xn = x.reshape(n, 1, 28, 28)
    dn = ("NCHW", "OIHW", "NCHW")
    y = lax.conv_general_dilated(xn, p["conv1_w"], (1, 1), ((2, 2), (2, 2)),
                                 dimension_numbers=dn)
    y = jnp.maximum(y + p["conv1_b"][None, :, None, None], 0.0)
    y = lax.reduce_window(y, -jnp.inf, lax.max, (1, 1, 2, 2), (1, 1, 2, 2), "VALID")
    y = lax.conv_general_dilated(y, p["conv2_w"], (1, 1), ((2, 2), (2, 2)),
                                 dimension_numbers=dn)
    y = jnp.maximum(y + p["conv2_b"][None, :, None, None], 0.0)
    y = lax.reduce_window(y, -jnp.inf, lax.max, (1, 1, 2, 2), (1, 1, 2, 2), "VALID")
    feat = y.reshape(n, 64 * 7 * 7)
    h = jnp.maximum(feat @ p["fc1_w"].T + p["fc1_b"], 0.0)
    return h @ p["fc2_w"].T + p["fc2_b"]


if __name__ == "__main__":
    key = jax.random.PRNGKey(0)
    kx, kp = jax.random.split(key)
    x = jax.random.normal(kx, (2, 1, 28, 28), jnp.float32)   # batch=2 MNIST-shaped
    params = init_params(kp)
    prep = prepare_params(params)                            # one-time weight repack

    fwd = jax.jit(mnist_cnn_forward)
    logits = jax.block_until_ready(fwd(x, prep))
    assert logits.shape == (2, 10), logits.shape

    ref_m = jax.block_until_ready(jax.jit(_ref_forward_matched)(x, params))
    ref_f = jax.block_until_ready(jax.jit(_ref_forward_f32)(x, params))

    err_matched = float(jnp.max(jnp.abs(logits - ref_m)))
    assert err_matched < 1e-2, err_matched                   # same-precision check (tight)
    err_f32 = float(jnp.max(jnp.abs(logits - ref_f)))
    assert err_f32 < 2e-1, err_f32                           # f32 fidelity check (bf16 tol)

    print("KERNEL_OK")
</pallas_src>

<mosaic_0001>
module attributes {stable_mosaic.version = 11 : i64} {
  func.func @_conv1_pool_kernel(%arg0: i32, %arg1: memref<256x32xbf16, #tpu.memory_space<vmem>>, %arg2: memref<256x32xbf16, #tpu.memory_space<vmem>>, %arg3: memref<256x32xbf16, #tpu.memory_space<vmem>>, %arg4: memref<256x32xbf16, #tpu.memory_space<vmem>>, %arg5: memref<32x32xbf16, #tpu.memory_space<vmem>>, %arg6: memref<1x32xf32, #tpu.memory_space<vmem>>, %arg7: memref<256x32xbf16, #tpu.memory_space<vmem>>) attributes {dimension_semantics = [#tpu.dimension_semantics<parallel>], iteration_bounds = array<i64: 2>, scalar_prefetch = 0 : i64, scratch_operands = 0 : i64, tpu.core_type = #tpu.core_type<tc>, window_params = [{transform_indices = @transform_0, window_bounds = array<i64: 256, 32>}, {transform_indices = @transform_1, window_bounds = array<i64: 256, 32>}, {transform_indices = @transform_2, window_bounds = array<i64: 256, 32>}, {transform_indices = @transform_3, window_bounds = array<i64: 256, 32>}, {pipeline_mode = #tpu.pipeline_mode<synchronous>, transform_indices = @transform_4, window_bounds = array<i64: 32, 32>}, {pipeline_mode = #tpu.pipeline_mode<synchronous>, transform_indices = @transform_5, window_bounds = array<i64: 1, 32>}, {transform_indices = @transform_6, window_bounds = array<i64: 256, 32>}]} {
    %c0 = arith.constant 0 : index
    %c0_0 = arith.constant 0 : index
    %0 = vector.load %arg5[%c0, %c0_0] : memref<32x32xbf16, #tpu.memory_space<vmem>>, vector<32x32xbf16>
    %c0_1 = arith.constant 0 : index
    %c0_2 = arith.constant 0 : index
    %1 = vector.load %arg6[%c0_1, %c0_2] : memref<1x32xf32, #tpu.memory_space<vmem>>, vector<1x32xf32>
    %c0_3 = arith.constant 0 : index
    %c0_4 = arith.constant 0 : index
    %2 = vector.load %arg1[%c0_3, %c0_4] : memref<256x32xbf16, #tpu.memory_space<vmem>>, vector<256x32xbf16>
    %cst = arith.constant dense<0.000000e+00> : vector<256x32xf32>
    %3 = tpu.matmul %2, %0, %cst {dimension_numbers = #tpu.dot_dimension_numbers<[1], [0], [0], [1], [0, 0, 1, 1], [], []>} : vector<256x32xbf16>, vector<32x32xbf16>, vector<256x32xf32> -> vector<256x32xf32>
    %4 = vector.broadcast %1 : vector<1x32xf32> to vector<256x32xf32>
    %5 = arith.addf %3, %4 : vector<256x32xf32>
    %cst_5 = arith.constant 0.000000e+00 : f32
    %6 = vector.broadcast %cst_5 : f32 to vector<256x32xf32>
    %7 = arith.maximumf %5, %6 : vector<256x32xf32>
    %c0_6 = arith.constant 0 : index
    %c0_7 = arith.constant 0 : index
    %8 = vector.load %arg2[%c0_6, %c0_7] : memref<256x32xbf16, #tpu.memory_space<vmem>>, vector<256x32xbf16>
    %cst_8 = arith.constant dense<0.000000e+00> : vector<256x32xf32>
    %9 = tpu.matmul %8, %0, %cst_8 {dimension_numbers = #tpu.dot_dimension_numbers<[1], [0], [0], [1], [0, 0, 1, 1], [], []>} : vector<256x32xbf16>, vector<32x32xbf16>, vector<256x32xf32> -> vector<256x32xf32>
    %10 = vector.broadcast %1 : vector<1x32xf32> to vector<256x32xf32>
    %11 = arith.addf %9, %10 : vector<256x32xf32>
    %cst_9 = arith.constant 0.000000e+00 : f32
    %12 = vector.broadcast %cst_9 : f32 to vector<256x32xf32>
    %13 = arith.maximumf %11, %12 : vector<256x32xf32>
    %14 = arith.maximumf %7, %13 : vector<256x32xf32>
    %c0_10 = arith.constant 0 : index
    %c0_11 = arith.constant 0 : index
    %15 = vector.load %arg3[%c0_10, %c0_11] : memref<256x32xbf16, #tpu.memory_space<vmem>>, vector<256x32xbf16>
    %cst_12 = arith.constant dense<0.000000e+00> : vector<256x32xf32>
    %16 = tpu.matmul %15, %0, %cst_12 {dimension_numbers = #tpu.dot_dimension_numbers<[1], [0], [0], [1], [0, 0, 1, 1], [], []>} : vector<256x32xbf16>, vector<32x32xbf16>, vector<256x32xf32> -> vector<256x32xf32>
    %17 = vector.broadcast %1 : vector<1x32xf32> to vector<256x32xf32>
    %18 = arith.addf %16, %17 : vector<256x32xf32>
    %cst_13 = arith.constant 0.000000e+00 : f32
    %19 = vector.broadcast %cst_13 : f32 to vector<256x32xf32>
    %20 = arith.maximumf %18, %19 : vector<256x32xf32>
    %c0_14 = arith.constant 0 : index
    %c0_15 = arith.constant 0 : index
    %21 = vector.load %arg4[%c0_14, %c0_15] : memref<256x32xbf16, #tpu.memory_space<vmem>>, vector<256x32xbf16>
    %cst_16 = arith.constant dense<0.000000e+00> : vector<256x32xf32>
    %22 = tpu.matmul %21, %0, %cst_16 {dimension_numbers = #tpu.dot_dimension_numbers<[1], [0], [0], [1], [0, 0, 1, 1], [], []>} : vector<256x32xbf16>, vector<32x32xbf16>, vector<256x32xf32> -> vector<256x32xf32>
    %23 = vector.broadcast %1 : vector<1x32xf32> to vector<256x32xf32>
    %24 = arith.addf %22, %23 : vector<256x32xf32>
    %cst_17 = arith.constant 0.000000e+00 : f32
    %25 = vector.broadcast %cst_17 : f32 to vector<256x32xf32>
    %26 = arith.maximumf %24, %25 : vector<256x32xf32>
    %27 = arith.maximumf %20, %26 : vector<256x32xf32>
    %28 = arith.maximumf %14, %27 : vector<256x32xf32>
    %29 = arith.truncf %28 : vector<256x32xf32> to vector<256x32xbf16>
    %c0_18 = arith.constant 0 : index
    %c0_19 = arith.constant 0 : index
    %30 = vector.load %arg7[%c0_18, %c0_19] : memref<256x32xbf16, #tpu.memory_space<vmem>>, vector<256x32xbf16>
    tpu.vector_store %arg7[%c0_18, %c0_19], %29 {strides = array<i32>} : memref<256x32xbf16, #tpu.memory_space<vmem>>, vector<256x32xbf16>,
    return
  }
  func.func @transform_0(%arg0: i32) -> (i32, i32) {
    %c0_i32 = arith.constant 0 : i32
    %c0_i32_0 = arith.constant 0 : i32
    return %arg0, %c0_i32 : i32, i32
  }
  func.func @transform_1(%arg0: i32) -> (i32, i32) {
    %c0_i32 = arith.constant 0 : i32
    %c0_i32_0 = arith.constant 0 : i32
    return %arg0, %c0_i32 : i32, i32
  }
  func.func @transform_2(%arg0: i32) -> (i32, i32) {
    %c0_i32 = arith.constant 0 : i32
    %c0_i32_0 = arith.constant 0 : i32
    return %arg0, %c0_i32 : i32, i32
  }
  func.func @transform_3(%arg0: i32) -> (i32, i32) {
    %c0_i32 = arith.constant 0 : i32
    %c0_i32_0 = arith.constant 0 : i32
    return %arg0, %c0_i32 : i32, i32
  }
  func.func @transform_4(%arg0: i32) -> (i32, i32) {
    %c0_i32 = arith.constant 0 : i32
    %c0_i32_0 = arith.constant 0 : i32
    %c0_i32_1 = arith.constant 0 : i32
    return %c0_i32, %c0_i32_0 : i32, i32
  }
  func.func @transform_5(%arg0: i32) -> (i32, i32) {
    %c0_i32 = arith.constant 0 : i32
    %c0_i32_0 = arith.constant 0 : i32
    %c0_i32_1 = arith.constant 0 : i32
    return %c0_i32, %c0_i32_0 : i32, i32
  }
  func.func @transform_6(%arg0: i32) -> (i32, i32) {
    %c0_i32 = arith.constant 0 : i32
    %c0_i32_0 = arith.constant 0 : i32
    return %arg0, %c0_i32 : i32, i32
  }
}

module attributes {stable_mosaic.version = 11 : i64} {
  func.func @_conv2_pool_kernel(%arg0: i32, %arg1: i32, %arg2: memref<1x18x10x128xbf16, #tpu.memory_space<vmem>>, %arg3: memref<1x18x10x128xbf16, #tpu.memory_space<vmem>>, %arg4: memref<3200x64xbf16, #tpu.memory_space<vmem>>, %arg5: memref<1x64xf32, #tpu.memory_space<vmem>>, %arg6: memref<1x1x7x64xbf16, #tpu.memory_space<vmem>>, %arg7: memref<32x3200xbf16, #tpu.memory_space<vmem>>) attributes {dimension_semantics = [#tpu.dimension_semantics<parallel>, #tpu.dimension_semantics<parallel>], iteration_bounds = array<i64: 2, 7>, scalar_prefetch = 0 : i64, scratch_operands = 1 : i64, tpu.core_type = #tpu.core_type<tc>, window_params = [{transform_indices = @transform_0, window_bounds = array<i64: 1, 18, 10, 128>}, {transform_indices = @transform_1, window_bounds = array<i64: 1, 18, 10, 128>}, {pipeline_mode = #tpu.pipeline_mode<synchronous>, transform_indices = @transform_2, window_bounds = array<i64: 3200, 64>}, {pipeline_mode = #tpu.pipeline_mode<synchronous>, transform_indices = @transform_3, window_bounds = array<i64: 1, 64>}, {transform_indices = @transform_4, window_bounds = array<i64: 1, 1, 7, 64>}]} {
    %c2_i32 = arith.constant 2 : i32
    %0 = arith.muli %c2_i32, %arg1 : i32
    %c0_i32 = arith.constant 0 : i32
    %1 = arith.addi %0, %c0_i32 : i32
    %c0_i32_0 = arith.constant 0 : i32
    %2 = arith.addi %1, %c0_i32_0 : i32
    %c0 = arith.constant 0 : index
    %3 = arith.index_cast %2 : i32 to index
    %c0_1 = arith.constant 0 : index
    %c0_2 = arith.constant 0 : index
    %4 = vector.load %arg2[%c0, %3, %c0_1, %c0_2] : memref<1x18x10x128xbf16, #tpu.memory_space<vmem>>, vector<1x1x10x128xbf16>
    %5 = vector.shape_cast %4 : vector<1x1x10x128xbf16> to vector<10x128xbf16>
    %c0_3 = arith.constant 0 : index
    %6 = arith.index_cast %2 : i32 to index
    %c0_4 = arith.constant 0 : index
    %c0_5 = arith.constant 0 : index
    %7 = vector.load %arg3[%c0_3, %6, %c0_4, %c0_5] : memref<1x18x10x128xbf16, #tpu.memory_space<vmem>>, vector<1x1x10x128xbf16>
    %8 = vector.shape_cast %7 : vector<1x1x10x128xbf16> to vector<10x128xbf16>
    %9 = vector.extract_strided_slice %5 {offsets = [0, 0], sizes = [8, 128], strides = [1, 1]} : vector<10x128xbf16> to vector<8x128xbf16>
    %c0_6 = arith.constant 0 : index
    %c0_7 = arith.constant 0 : index
    %10 = vector.load %arg7[%c0_6, %c0_7] : memref<32x3200xbf16, #tpu.memory_space<vmem>>, vector<8x128xbf16>
    tpu.vector_store %arg7[%c0_6, %c0_7], %9 {strides = array<i32>} : memref<32x3200xbf16, #tpu.memory_space<vmem>>, vector<8x128xbf16>,
    %11 = vector.extract_strided_slice %8 {offsets = [0, 0], sizes = [8, 128], strides = [1, 1]} : vector<10x128xbf16> to vector<8x128xbf16>
    %c0_8 = arith.constant 0 : index
    %c128 = arith.constant 128 : index
    %12 = vector.load %arg7[%c0_8, %c128] : memref<32x3200xbf16, #tpu.memory_space<vmem>>, vector<8x128xbf16>
    tpu.vector_store %arg7[%c0_8, %c128], %11 {strides = array<i32>} : memref<32x3200xbf16, #tpu.memory_space<vmem>>, vector<8x128xbf16>,
    %13 = vector.extract_strided_slice %5 {offsets = [1, 0], sizes = [8, 128], strides = [1, 1]} : vector<10x128xbf16> to vector<8x128xbf16>
    %c0_9 = arith.constant 0 : index
    %c256 = arith.constant 256 : index
    %14 = vector.load %arg7[%c0_9, %c256] : memref<32x3200xbf16, #tpu.memory_space<vmem>>, vector<8x128xbf16>
    tpu.vector_store %arg7[%c0_9, %c256], %13 {strides = array<i32>} : memref<32x3200xbf16, #tpu.memory_space<vmem>>, vector<8x128xbf16>,
    %15 = vector.extract_strided_slice %8 {offsets = [1, 0], sizes = [8, 128], strides = [1, 1]} : vector<10x128xbf16> to vector<8x128xbf16>
    %c0_10 = arith.constant 0 : index
    %c384 = arith.constant 384 : index
    %16 = vector.load %arg7[%c0_10, %c384] : memref<32x3200xbf16, #tpu.memory_space<vmem>>, vector<8x128xbf16>
    tpu.vector_store %arg7[%c0_10, %c384], %15 {strides = array<i32>} : memref<32x3200xbf16, #tpu.memory_space<vmem>>, vector<8x128xbf16>,
    %17 = vector.extract_strided_slice %5 {offsets = [2, 0], sizes = [8, 128], strides = [1, 1]} : vector<10x128xbf16> to vector<8x128xbf16>
    %c0_11 = arith.constant 0 : index
    %c512 = arith.constant 512 : index
    %18 = vector.load %arg7[%c0_11, %c512] : memref<32x3200xbf16, #tpu.memory_space<vmem>>, vector<8x128xbf16>
    tpu.vector_store %arg7[%c0_11, %c512], %17 {strides = array<i32>} : memref<32x3200xbf16, #tpu.memory_space<vmem>>, vector<8x128xbf16>,
    %19 = vector.extract_strided_slice %8 {offsets = [0, 0], sizes = [8, 128], strides = [1, 1]} : vector<10x128xbf16> to vector<8x128xbf16>
    %c8 = arith.constant 8 : index
    %c0_12 = arith.constant 0 : index
    %20 = vector.load %arg7[%c8, %c0_12] : memref<32x3200xbf16, #tpu.memory_space<vmem>>, vector<8x128xbf16>
    tpu.vector_store %arg7[%c8, %c0_12], %19 {strides = array<i32>} : memref<32x3200xbf16, #tpu.memory_space<vmem>>, vector<8x128xbf16>,
    %21 = vector.extract_strided_slice %5 {offsets = [1, 0], sizes = [8, 128], strides = [1, 1]} : vector<10x128xbf16> to vector<8x128xbf16>
    %c8_13 = arith.constant 8 : index
    %c128_14 = arith.constant 128 : index
    %22 = vector.load %arg7[%c8_13, %c128_14] : memref<32x3200xbf16, #tpu.memory_space<vmem>>, vector<8x128xbf16>
    tpu.vector_store %arg7[%c8_13, %c128_14], %21 {strides = array<i32>} : memref<32x3200xbf16, #tpu.memory_space<vmem>>, vector<8x128xbf16>,
    %23 = vector.extract_strided_slice %8 {offsets = [1, 0], sizes = [8, 128], strides = [1, 1]} : vector<10x128xbf16> to vector<8x128xbf16>
    %c8_15 = arith.constant 8 : index
    %c256_16 = arith.constant 256 : index
    %24 = vector.load %arg7[%c8_15, %c256_16] : memref<32x3200xbf16, #tpu.memory_space<vmem>>, vector<8x128xbf16>
    tpu.vector_store %arg7[%c8_15, %c256_16], %23 {strides = array<i32>} : memref<32x3200xbf16, #tpu.memory_space<vmem>>, vector<8x128xbf16>,
    %25 = vector.extract_strided_slice %5 {offsets = [2, 0], sizes = [8, 128], strides = [1, 1]} : vector<10x128xbf16> to vector<8x128xbf16>
    %c8_17 = arith.constant 8 : index
    %c384_18 = arith.constant 384 : index
    %26 = vector.load %arg7[%c8_17, %c384_18] : memref<32x3200xbf16, #tpu.memory_space<vmem>>, vector<8x128xbf16>
    tpu.vector_store %arg7[%c8_17, %c384_18], %25 {strides = array<i32>} : memref<32x3200xbf16, #tpu.memory_space<vmem>>, vector<8x128xbf16>,
    %27 = vector.extract_strided_slice %8 {offsets = [2, 0], sizes = [8, 128], strides = [1, 1]} : vector<10x128xbf16> to vector<8x128xbf16>
    %c8_19 = arith.constant 8 : index
    %c512_20 = arith.constant 512 : index
    %28 = vector.load %arg7[%c8_19, %c512_20] : memref<32x3200xbf16, #tpu.memory_space<vmem>>, vector<8x128xbf16>
    tpu.vector_store %arg7[%c8_19, %c512_20], %27 {strides = array<i32>} : memref<32x3200xbf16, #tpu.memory_space<vmem>>, vector<8x128xbf16>,
    %c2_i32_21 = arith.constant 2 : i32
    %29 = arith.muli %c2_i32_21, %arg1 : i32
    %c0_i32_22 = arith.constant 0 : i32
    %30 = arith.addi %29, %c0_i32_22 : i32
    %c1_i32 = arith.constant 1 : i32
    %31 = arith.addi %30, %c1_i32 : i32
    %c0_23 = arith.constant 0 : index
    %32 = arith.index_cast %31 : i32 to index
    %c0_24 = arith.constant 0 : index
    %c0_25 = arith.constant 0 : index
    %33 = vector.load %arg2[%c0_23, %32, %c0_24, %c0_25] : memref<1x18x10x128xbf16, #tpu.memory_space<vmem>>, vector<1x1x10x128xbf16>
    %34 = vector.shape_cast %33 : vector<1x1x10x128xbf16> to vector<10x128xbf16>
    %c0_26 = arith.constant 0 : index
    %35 = arith.index_cast %31 : i32 to index
    %c0_27 = arith.constant 0 : index
    %c0_28 = arith.constant 0 : index
    %36 = vector.load %arg3[%c0_26, %35, %c0_27, %c0_28] : memref<1x18x10x128xbf16, #tpu.memory_space<vmem>>, vector<1x1x10x128xbf16>
    %37 = vector.shape_cast %36 : vector<1x1x10x128xbf16> to vector<10x128xbf16>
    %38 = vector.extract_strided_slice %34 {offsets = [0, 0], sizes = [8, 128], strides = [1, 1]} : vector<10x128xbf16> to vector<8x128xbf16>
    %c0_29 = arith.constant 0 : index
    %c640 = arith.constant 640 : index
    %39 = vector.load %arg7[%c0_29, %c640] : memref<32x3200xbf16, #tpu.memory_space<vmem>>, vector<8x128xbf16>
    tpu.vector_store %arg7[%c0_29, %c640], %38 {strides = array<i32>} : memref<32x3200xbf16, #tpu.memory_space<vmem>>, vector<8x128xbf16>,
    %40 = vector.extract_strided_slice %37 {offsets = [0, 0], sizes = [8, 128], strides = [1, 1]} : vector<10x128xbf16> to vector<8x128xbf16>
    %c0_30 = arith.constant 0 : index
    %c768 = arith.constant 768 : index
    %41 = vector.load %arg7[%c0_30, %c768] : memref<32x3200xbf16, #tpu.memory_space<vmem>>, vector<8x128xbf16>
    tpu.vector_store %arg7[%c0_30, %c768], %40 {strides = array<i32>} : memref<32x3200xbf16, #tpu.memory_space<vmem>>, vector<8x128xbf16>,
    %42 = vector.extract_strided_slice %34 {offsets = [1, 0], sizes = [8, 128], strides = [1, 1]} : vector<10x128xbf16> to vector<8x128xbf16>
    %c0_31 = arith.constant 0 : index
    %c896 = arith.constant 896 : index
    %43 = vector.load %arg7[%c0_31, %c896] : memref<32x3200xbf16, #tpu.memory_space<vmem>>, vector<8x128xbf16>
    tpu.vector_store %arg7[%c0_31, %c896], %42 {strides = array<i32>} : memref<32x3200xbf16, #tpu.memory_space<vmem>>, vector<8x128xbf16>,
    %44 = vector.extract_strided_slice %37 {offsets = [1, 0], sizes = [8, 128], strides = [1, 1]} : vector<10x128xbf16> to vector<8x128xbf16>
    %c0_32 = arith.constant 0 : index
    %c1024 = arith.constant 1024 : index
    %45 = vector.load %arg7[%c0_32, %c1024] : memref<32x3200xbf16, #tpu.memory_space<vmem>>, vector<8x128xbf16>
    tpu.vector_store %arg7[%c0_32, %c1024], %44 {strides = array<i32>} : memref<32x3200xbf16, #tpu.memory_space<vmem>>, vector<8x128xbf16>,
    %46 = vector.extract_strided_slice %34 {offsets = [2, 0], sizes = [8, 128], strides = [1, 1]} : vector<10x128xbf16> to vector<8x128xbf16>
    %c0_33 = arith.constant 0 : index
    %c1152 = arith.constant 1152 : index
    %47 = vector.load %arg7[%c0_33, %c1152] : memref<32x3200xbf16, #tpu.memory_space<vmem>>, vector<8x128xbf16>
    tpu.vector_store %arg7[%c0_33, %c1152], %46 {strides = array<i32>} : memref<32x3200xbf16, #tpu.memory_space<vmem>>, vector<8x128xbf16>,
    %48 = vector.extract_strided_slice %37 {offsets = [0, 0], sizes = [8, 128], strides = [1, 1]} : vector<10x128xbf16> to vector<8x128xbf16>
    %c8_34 = arith.constant 8 : index
    %c640_35 = arith.constant 640 : index
    %49 = vector.load %arg7[%c8_34, %c640_35] : memref<32x3200xbf16, #tpu.memory_space<vmem>>, vector<8x128xbf16>
    tpu.vector_store %arg7[%c8_34, %c640_35], %48 {strides = array<i32>} : memref<32x3200xbf16, #tpu.memory_space<vmem>>, vector<8x128xbf16>,
    %50 = vector.extract_strided_slice %34 {offsets = [1, 0], sizes = [8, 128], strides = [1, 1]} : vector<10x128xbf16> to vector<8x128xbf16>
    %c8_36 = arith.constant 8 : index
    %c768_37 = arith.constant 768 : index
    %51 = vector.load %arg7[%c8_36, %c768_37] : memref<32x3200xbf16, #tpu.memory_space<vmem>>, vector<8x128xbf16>
    tpu.vector_store %arg7[%c8_36, %c768_37], %50 {strides = array<i32>} : memref<32x3200xbf16, #tpu.memory_space<vmem>>, vector<8x128xbf16>,
    %52 = vector.extract_strided_slice %37 {offsets = [1, 0], sizes = [8, 128], strides = [1, 1]} : vector<10x128xbf16> to vector<8x128xbf16>
    %c8_38 = arith.constant 8 : index
    %c896_39 = arith.constant 896 : index
    %53 = vector.load %arg7[%c8_38, %c896_39] : memref<32x3200xbf16, #tpu.memory_space<vmem>>, vector<8x128xbf16>
    tpu.vector_store %arg7[%c8_38, %c896_39], %52 {strides = array<i32>} : memref<32x3200xbf16, #tpu.memory_space<vmem>>, vector<8x128xbf16>,
    %54 = vector.extract_strided_slice %34 {offsets = [2, 0], sizes = [8, 128], strides = [1, 1]} : vector<10x128xbf16> to vector<8x128xbf16>
    %c8_40 = arith.constant 8 : index
    %c1024_41 = arith.constant 1024 : index
    %55 = vector.load %arg7[%c8_40, %c1024_41] : memref<32x3200xbf16, #tpu.memory_space<vmem>>, vector<8x128xbf16>
    tpu.vector_store %arg7[%c8_40, %c1024_41], %54 {strides = array<i32>} : memref<32x3200xbf16, #tpu.memory_space<vmem>>, vector<8x128xbf16>,
    %56 = vector.extract_strided_slice %37 {offsets = [2, 0], sizes = [8, 128], strides = [1, 1]} : vector<10x128xbf16> to vector<8x128xbf16>
    %c8_42 = arith.constant 8 : index
    %c1152_43 = arith.constant 1152 : index
    %57 = vector.load %arg7[%c8_42, %c1152_43] : memref<32x3200xbf16, #tpu.memory_space<vmem>>, vector<8x128xbf16>
    tpu.vector_store %arg7[%c8_42, %c1152_43], %56 {strides = array<i32>} : memref<32x3200xbf16, #tpu.memory_space<vmem>>, vector<8x128xbf16>,
    %c2_i32_44 = arith.constant 2 : i32
    %58 = arith.muli %c2_i32_44, %arg1 : i32
    %c0_i32_45 = arith.constant 0 : i32
    %59 = arith.addi %58, %c0_i32_45 : i32
    %c2_i32_46 = arith.constant 2 : i32
    %60 = arith.addi %59, %c2_i32_46 : i32
    %c0_47 = arith.constant 0 : index
    %61 = arith.index_cast %60 : i32 to index
    %c0_48 = arith.constant 0 : index
    %c0_49 = arith.constant 0 : index
    %62 = vector.load %arg2[%c0_47, %61, %c0_48, %c0_49] : memref<1x18x10x128xbf16, #tpu.memory_space<vmem>>, vector<1x1x10x128xbf16>
    %63 = vector.shape_cast %62 : vector<1x1x10x128xbf16> to vector<10x128xbf16>
    %c0_50 = arith.constant 0 : index
    %64 = arith.index_cast %60 : i32 to index
    %c0_51 = arith.constant 0 : index
    %c0_52 = arith.constant 0 : index
    %65 = vector.load %arg3[%c0_50, %64, %c0_51, %c0_52] : memref<1x18x10x128xbf16, #tpu.memory_space<vmem>>, vector<1x1x10x128xbf16>
    %66 = vector.shape_cast %65 : vector<1x1x10x128xbf16> to vector<10x128xbf16>
    %67 = vector.extract_strided_slice %63 {offsets = [0, 0], sizes = [8, 128], strides = [1, 1]} : vector<10x128xbf16> to vector<8x128xbf16>
    %c0_53 = arith.constant 0 : index
    %c1280 = arith.constant 1280 : index
    %68 = vector.load %arg7[%c0_53, %c1280] : memref<32x3200xbf16, #tpu.memory_space<vmem>>, vector<8x128xbf16>
    tpu.vector_store %arg7[%c0_53, %c1280], %67 {strides = array<i32>} : memref<32x3200xbf16, #tpu.memory_space<vmem>>, vector<8x128xbf16>,
    %69 = vector.extract_strided_slice %66 {offsets = [0, 0], sizes = [8, 128], strides = [1, 1]} : vector<10x128xbf16> to vector<8x128xbf16>
    %c0_54 = arith.constant 0 : index
    %c1408 = arith.constant 1408 : index
    %70 = vector.load %arg7[%c0_54, %c1408] : memref<32x3200xbf16, #tpu.memory_space<vmem>>, vector<8x128xbf16>
    tpu.vector_store %arg7[%c0_54, %c1408], %69 {strides = array<i32>} : memref<32x3200xbf16, #tpu.memory_space<vmem>>, vector<8x128xbf16>,
    %71 = vector.extract_strided_slice %63 {offsets = [1, 0], sizes = [8, 128], strides = [1, 1]} : vector<10x128xbf16> to vector<8x128xbf16>
    %c0_55 = arith.constant 0 : index
    %c1536 = arith.constant 1536 : index
    %72 = vector.load %arg7[%c0_55, %c1536] : memref<32x3200xbf16, #tpu.memory_space<vmem>>, vector<8x128xbf16>
    tpu.vector_store %arg7[%c0_55, %c1536], %71 {strides = array<i32>} : memref<32x3200xbf16, #tpu.memory_space<vmem>>, vector<8x128xbf16>,
    %73 = vector.extract_strided_slice %66 {offsets = [1, 0], sizes = [8, 128], strides = [1, 1]} : vector<10x128xbf16> to vector<8x128xbf16>
    %c0_56 = arith.constant 0 : index
    %c1664 = arith.constant 1664 : index
    %74 = vector.load %arg7[%c0_56, %c1664] : memref<32x3200xbf16, #tpu.memory_space<vmem>>, vector<8x128xbf16>
    tpu.vector_store %arg7[%c0_56, %c1664], %73 {strides = array<i32>} : memref<32x3200xbf16, #tpu.memory_space<vmem>>, vector<8x128xbf16>,
    %75 = vector.extract_strided_slice %63 {offsets = [2, 0], sizes = [8, 128], strides = [1, 1]} : vector<10x128xbf16> to vector<8x128xbf16>
    %c0_57 = arith.constant 0 : index
    %c1792 = arith.constant 1792 : index
    %76 = vector.load %arg7[%c0_57, %c1792] : memref<32x3200xbf16, #tpu.memory_space<vmem>>, vector<8x128xbf16>
    tpu.vector_store %arg7[%c0_57, %c1792], %75 {strides = array<i32>} : memref<32x3200xbf16, #tpu.memory_space<vmem>>, vector<8x128xbf16>,
    %77 = vector.extract_strided_slice %66 {offsets = [0, 0], sizes = [8, 128], strides = [1, 1]} : vector<10x128xbf16> to vector<8x128xbf16>
    %c8_58 = arith.constant 8 : index
    %c1280_59 = arith.constant 1280 : index
    %78 = vector.load %arg7[%c8_58, %c1280_59] : memref<32x3200xbf16, #tpu.memory_space<vmem>>, vector<8x128xbf16>
    tpu.vector_store %arg7[%c8_58, %c1280_59], %77 {strides = array<i32>} : memref<32x3200xbf16, #tpu.memory_space<vmem>>, vector<8x128xbf16>,
    %79 = vector.extract_strided_slice %63 {offsets = [1, 0], sizes = [8, 128], strides = [1, 1]} : vector<10x128xbf16> to vector<8x128xbf16>
    %c8_60 = arith.constant 8 : index
    %c1408_61 = arith.constant 1408 : index
    %80 = vector.load %arg7[%c8_60, %c1408_61] : memref<32x3200xbf16, #tpu.memory_space<vmem>>, vector<8x128xbf16>
    tpu.vector_store %arg7[%c8_60, %c1408_61], %79 {strides = array<i32>} : memref<32x3200xbf16, #tpu.memory_space<vmem>>, vector<8x128xbf16>,
    %81 = vector.extract_strided_slice %66 {offsets = [1, 0], sizes = [8, 128], strides = [1, 1]} : vector<10x128xbf16> to vector<8x128xbf16>
    %c8_62 = arith.constant 8 : index
    %c1536_63 = arith.constant 1536 : index
    %82 = vector.load %arg7[%c8_62, %c1536_63] : memref<32x3200xbf16, #tpu.memory_space<vmem>>, vector<8x128xbf16>
    tpu.vector_store %arg7[%c8_62, %c1536_63], %81 {strides = array<i32>} : memref<32x3200xbf16, #tpu.memory_space<vmem>>, vector<8x128xbf16>,
    %83 = vector.extract_strided_slice %63 {offsets = [2, 0], sizes = [8, 128], strides = [1, 1]} : vector<10x128xbf16> to vector<8x128xbf16>
    %c8_64 = arith.constant 8 : index
    %c1664_65 = arith.constant 1664 : index
    %84 = vector.load %arg7[%c8_64, %c1664_65] : memref<32x3200xbf16, #tpu.memory_space<vmem>>, vector<8x128xbf16>
    tpu.vector_store %arg7[%c8_64, %c1664_65], %83 {strides = array<i32>} : memref<32x3200xbf16, #tpu.memory_space<vmem>>, vector<8x128xbf16>,
    %85 = vector.extract_strided_slice %66 {offsets = [2, 0], sizes = [8, 128], strides = [1, 1]} : vector<10x128xbf16> to vector<8x128xbf16>
    %c8_66 = arith.constant 8 : index
    %c1792_67 = arith.constant 1792 : index
    %86 = vector.load %arg7[%c8_66, %c1792_67] : memref<32x3200xbf16, #tpu.memory_space<vmem>>, vector<8x128xbf16>
    tpu.vector_store %arg7[%c8_66, %c1792_67], %85 {strides = array<i32>} : memref<32x3200xbf16, #tpu.memory_space<vmem>>, vector<8x128xbf16>,
    %c2_i32_68 = arith.constant 2 : i32
    %87 = arith.muli %c2_i32_68, %arg1 : i32
    %c0_i32_69 = arith.constant 0 : i32
    %88 = arith.addi %87, %c0_i32_69 : i32
    %c3_i32 = arith.constant 3 : i32
    %89 = arith.addi %88, %c3_i32 : i32
    %c0_70 = arith.constant 0 : index
    %90 = arith.index_cast %89 : i32 to index
    %c0_71 = arith.constant 0 : index
    %c0_72 = arith.constant 0 : index
    %91 = vector.load %arg2[%c0_70, %90, %c0_71, %c0_72] : memref<1x18x10x128xbf16, #tpu.memory_space<vmem>>, vector<1x1x10x128xbf16>
    %92 = vector.shape_cast %91 : vector<1x1x10x128xbf16> to vector<10x128xbf16>
    %c0_73 = arith.constant 0 : index
    %93 = arith.index_cast %89 : i32 to index
    %c0_74 = arith.constant 0 : index
    %c0_75 = arith.constant 0 : index
    %94 = vector.load %arg3[%c0_73, %93, %c0_74, %c0_75] : memref<1x18x10x128xbf16, #tpu.memory_space<vmem>>, vector<1x1x10x128xbf16>
    %95 = vector.shape_cast %94 : vector<1x1x10x128xbf16> to vector<10x128xbf16>
    %96 = vector.extract_strided_slice %92 {offsets = [0, 0], sizes = [8, 128], strides = [1, 1]} : vector<10x128xbf16> to vector<8x128xbf16>
    %c0_76 = arith.constant 0 : index
    %c1920 = arith.constant 1920 : index
    %97 = vector.load %arg7[%c0_76, %c1920] : memref<32x3200xbf16, #tpu.memory_space<vmem>>, vector<8x128xbf16>
    tpu.vector_store %arg7[%c0_76, %c1920], %96 {strides = array<i32>} : memref<32x3200xbf16, #tpu.memory_space<vmem>>, vector<8x128xbf16>,
    %98 = vector.extract_strided_slice %95 {offsets = [0, 0], sizes = [8, 128], strides = [1, 1]} : vector<10x128xbf16> to vector<8x128xbf16>
    %c0_77 = arith.constant 0 : index
    %c2048 = arith.constant 2048 : index
    %99 = vector.load %arg7[%c0_77, %c2048] : memref<32x3200xbf16, #tpu.memory_space<vmem>>, vector<8x128xbf16>
    tpu.vector_store %arg7[%c0_77, %c2048], %98 {strides = array<i32>} : memref<32x3200xbf16, #tpu.memory_space<vmem>>, vector<8x128xbf16>,
    %100 = vector.extract_strided_slice %92 {offsets = [1, 0], sizes = [8, 128], strides = [1, 1]} : vector<10x128xbf16> to vector<8x128xbf16>
    %c0_78 = arith.constant 0 : index
    %c2176 = arith.constant 2176 : index
    %101 = vector.load %arg7[%c0_78, %c2176] : memref<32x3200xbf16, #tpu.memory_space<vmem>>, vector<8x128xbf16>
    tpu.vector_store %arg7[%c0_78, %c2176], %100 {strides = array<i32>} : memref<32x3200xbf16, #tpu.memory_space<vmem>>, vector<8x128xbf16>,
    %102 = vector.extract_strided_slice %95 {offsets = [1, 0], sizes = [8, 128], strides = [1, 1]} : vector<10x128xbf16> to vector<8x128xbf16>
    %c0_79 = arith.constant 0 : index
    %c2304 = arith.constant 2304 : index
    %103 = vector.load %arg7[%c0_79, %c2304] : memref<32x3200xbf16, #tpu.memory_space<vmem>>, vector<8x128xbf16>
    tpu.vector_store %arg7[%c0_79, %c2304], %102 {strides = array<i32>} : memref<32x3200xbf16, #tpu.memory_space<vmem>>, vector<8x128xbf16>,
    %104 = vector.extract_strided_slice %92 {offsets = [2, 0], sizes = [8, 128], strides = [1, 1]} : vector<10x128xbf16> to vector<8x128xbf16>
    %c0_80 = arith.constant 0 : index
    %c2432 = arith.constant 2432 : index
    %105 = vector.load %arg7[%c0_80, %c2432] : memref<32x3200xbf16, #tpu.memory_space<vmem>>, vector<8x128xbf16>
    tpu.vector_store %arg7[%c0_80, %c2432], %104 {strides = array<i32>} : memref<32x3200xbf16, #tpu.memory_space<vmem>>, vector<8x128xbf16>,
    %106 = vector.extract_strided_slice %95 {offsets = [0, 0], sizes = [8, 128], strides = [1, 1]} : vector<10x128xbf16> to vector<8x128xbf16>
    %c8_81 = arith.constant 8 : index
    %c1920_82 = arith.constant 1920 : index
    %107 = vector.load %arg7[%c8_81, %c1920_82] : memref<32x3200xbf16, #tpu.memory_space<vmem>>, vector<8x128xbf16>
    tpu.vector_store %arg7[%c8_81, %c1920_82], %106 {strides = array<i32>} : memref<32x3200xbf16, #tpu.memory_space<vmem>>, vector<8x128xbf16>,
    %108 = vector.extract_strided_slice %92 {offsets = [1, 0], sizes = [8, 128], strides = [1, 1]} : vector<10x128xbf16> to vector<8x128xbf16>
    %c8_83 = arith.constant 8 : index
    %c2048_84 = arith.constant 2048 : index
    %109 = vector.load %arg7[%c8_83, %c2048_84] : memref<32x3200xbf16, #tpu.memory_space<vmem>>, vector<8x128xbf16>
    tpu.vector_store %arg7[%c8_83, %c2048_84], %108 {strides = array<i32>} : memref<32x3200xbf16, #tpu.memory_space<vmem>>, vector<8x128xbf16>,
    %110 = vector.extract_strided_slice %95 {offsets = [1, 0], sizes = [8, 128], strides = [1, 1]} : vector<10x128xbf16> to vector<8x128xbf16>
    %c8_85 = arith.constant 8 : index
    %c2176_86 = arith.constant 2176 : index
    %111 = vector.load %arg7[%c8_85, %c2176_86] : memref<32x3200xbf16, #tpu.memory_space<vmem>>, vector<8x128xbf16>
    tpu.vector_store %arg7[%c8_85, %c2176_86], %110 {strides = array<i32>} : memref<32x3200xbf16, #tpu.memory_space<vmem>>, vector<8x128xbf16>,
    %112 = vector.extract_strided_slice %92 {offsets = [2, 0], sizes = [8, 128], strides = [1, 1]} : vector<10x128xbf16> to vector<8x128xbf16>
    %c8_87 = arith.constant 8 : index
    %c2304_88 = arith.constant 2304 : index
    %113 = vector.load %arg7[%c8_87, %c2304_88] : memref<32x3200xbf16, #tpu.memory_space<vmem>>, vector<8x128xbf16>
    tpu.vector_store %arg7[%c8_87, %c2304_88], %112 {strides = array<i32>} : memref<32x3200xbf16, #tpu.memory_space<vmem>>, vector<8x128xbf16>,
    %114 = vector.extract_strided_slice %95 {offsets = [2, 0], sizes = [8, 128], strides = [1, 1]} : vector<10x128xbf16> to vector<8x128xbf16>
    %c8_89 = arith.constant 8 : index
    %c2432_90 = arith.constant 2432 : index
    %115 = vector.load %arg7[%c8_89, %c2432_90] : memref<32x3200xbf16, #tpu.memory_space<vmem>>, vector<8x128xbf16>
    tpu.vector_store %arg7[%c8_89, %c2432_90], %114 {strides = array<i32>} : memref<32x3200xbf16, #tpu.memory_space<vmem>>, vector<8x128xbf16>,
    %c2_i32_91 = arith.constant 2 : i32
    %116 = arith.muli %c2_i32_91, %arg1 : i32
    %c0_i32_92 = arith.constant 0 : i32
    %117 = arith.addi %116, %c0_i32_92 : i32
    %c4_i32 = arith.constant 4 : i32
    %118 = arith.addi %117, %c4_i32 : i32
    %c0_93 = arith.constant 0 : index
    %119 = arith.index_cast %118 : i32 to index
    %c0_94 = arith.constant 0 : index
    %c0_95 = arith.constant 0 : index
    %120 = vector.load %arg2[%c0_93, %119, %c0_94, %c0_95] : memref<1x18x10x128xbf16, #tpu.memory_space<vmem>>, vector<1x1x10x128xbf16>
    %121 = vector.shape_cast %120 : vector<1x1x10x128xbf16> to vector<10x128xbf16>
    %c0_96 = arith.constant 0 : index
    %122 = arith.index_cast %118 : i32 to index
    %c0_97 = arith.constant 0 : index
    %c0_98 = arith.constant 0 : index
    %123 = vector.load %arg3[%c0_96, %122, %c0_97, %c0_98] : memref<1x18x10x128xbf16, #tpu.memory_space<vmem>>, vector<1x1x10x128xbf16>
    %124 = vector.shape_cast %123 : vector<1x1x10x128xbf16> to vector<10x128xbf16>
    %125 = vector.extract_strided_slice %121 {offsets = [0, 0], sizes = [8, 128], strides = [1, 1]} : vector<10x128xbf16> to vector<8x128xbf16>
    %c0_99 = arith.constant 0 : index
    %c2560 = arith.constant 2560 : index
    %126 = vector.load %arg7[%c0_99, %c2560] : memref<32x3200xbf16, #tpu.memory_space<vmem>>, vector<8x128xbf16>
    tpu.vector_store %arg7[%c0_99, %c2560], %125 {strides = array<i32>} : memref<32x3200xbf16, #tpu.memory_space<vmem>>, vector<8x128xbf16>,
    %127 = vector.extract_strided_slice %124 {offsets = [0, 0], sizes = [8, 128], strides = [1, 1]} : vector<10x128xbf16> to vector<8x128xbf16>
    %c0_100 = arith.constant 0 : index
    %c2688 = arith.constant 2688 : index
    %128 = vector.load %arg7[%c0_100, %c2688] : memref<32x3200xbf16, #tpu.memory_space<vmem>>, vector<8x128xbf16>
    tpu.vector_store %arg7[%c0_100, %c2688], %127 {strides = array<i32>} : memref<32x3200xbf16, #tpu.memory_space<vmem>>, vector<8x128xbf16>,
    %129 = vector.extract_strided_slice %121 {offsets = [1, 0], sizes = [8, 128], strides = [1, 1]} : vector<10x128xbf16> to vector<8x128xbf16>
    %c0_101 = arith.constant 0 : index
    %c2816 = arith.constant 2816 : index
    %130 = vector.load %arg7[%c0_101, %c2816] : memref<32x3200xbf16, #tpu.memory_space<vmem>>, vector<8x128xbf16>
    tpu.vector_store %arg7[%c0_101, %c2816], %129 {strides = array<i32>} : memref<32x3200xbf16, #tpu.memory_space<vmem>>, vector<8x128xbf16>,
    %131 = vector.extract_strided_slice %124 {offsets = [1, 0], sizes = [8, 128], strides = [1, 1]} : vector<10x128xbf16> to vector<8x128xbf16>
    %c0_102 = arith.constant 0 : index
    %c2944 = arith.constant 2944 : index
    %132 = vector.load %arg7[%c0_102, %c2944] : memref<32x3200xbf16, #tpu.memory_space<vmem>>, vector<8x128xbf16>
    tpu.vector_store %arg7[%c0_102, %c2944], %131 {strides = array<i32>} : memref<32x3200xbf16, #tpu.memory_space<vmem>>, vector<8x128xbf16>,
    %133 = vector.extract_strided_slice %121 {offsets = [2, 0], sizes = [8, 128], strides = [1, 1]} : vector<10x128xbf16> to vector<8x128xbf16>
    %c0_103 = arith.constant 0 : index
    %c3072 = arith.constant 3072 : index
    %134 = vector.load %arg7[%c0_103, %c3072] : memref<32x3200xbf16, #tpu.memory_space<vmem>>, vector<8x128xbf16>
    tpu.vector_store %arg7[%c0_103, %c3072], %133 {strides = array<i32>} : memref<32x3200xbf16, #tpu.memory_space<vmem>>, vector<8x128xbf16>,
    %135 = vector.extract_strided_slice %124 {offsets = [0, 0], sizes = [8, 128], strides = [1, 1]} : vector<10x128xbf16> to vector<8x128xbf16>
    %c8_104 = arith.constant 8 : index
    %c2560_105 = arith.constant 2560 : index
    %136 = vector.load %arg7[%c8_104, %c2560_105] : memref<32x3200xbf16, #tpu.memory_space<vmem>>, vector<8x128xbf16>
    tpu.vector_store %arg7[%c8_104, %c2560_105], %135 {strides = array<i32>} : memref<32x3200xbf16, #tpu.memory_space<vmem>>, vector<8x128xbf16>,
    %137 = vector.extract_strided_slice %121 {offsets = [1, 0], sizes = [8, 128], strides = [1, 1]} : vector<10x128xbf16> to vector<8x128xbf16>
    %c8_106 = arith.constant 8 : index
    %c2688_107 = arith.constant 2688 : index
    %138 = vector.load %arg7[%c8_106, %c2688_107] : memref<32x3200xbf16, #tpu.memory_space<vmem>>, vector<8x128xbf16>
    tpu.vector_store %arg7[%c8_106, %c2688_107], %137 {strides = array<i32>} : memref<32x3200xbf16, #tpu.memory_space<vmem>>, vector<8x128xbf16>,
    %139 = vector.extract_strided_slice %124 {offsets = [1, 0], sizes = [8, 128], strides = [1, 1]} : vector<10x128xbf16> to vector<8x128xbf16>
    %c8_108 = arith.constant 8 : index
    %c2816_109 = arith.constant 2816 : index
    %140 = vector.load %arg7[%c8_108, %c2816_109] : memref<32x3200xbf16, #tpu.memory_space<vmem>>, vector<8x128xbf16>
    tpu.vector_store %arg7[%c8_108, %c2816_109], %139 {strides = array<i32>} : memref<32x3200xbf16, #tpu.memory_space<vmem>>, vector<8x128xbf16>,
    %141 = vector.extract_strided_slice %121 {offsets = [2, 0], sizes = [8, 128], strides = [1, 1]} : vector<10x128xbf16> to vector<8x128xbf16>
    %c8_110 = arith.constant 8 : index
    %c2944_111 = arith.constant 2944 : index
    %142 = vector.load %arg7[%c8_110, %c2944_111] : memref<32x3200xbf16, #tpu.memory_space<vmem>>, vector<8x128xbf16>
    tpu.vector_store %arg7[%c8_110, %c2944_111], %141 {strides = array<i32>} : memref<32x3200xbf16, #tpu.memory_space<vmem>>, vector<8x128xbf16>,
    %143 = vector.extract_strided_slice %124 {offsets = [2, 0], sizes = [8, 128], strides = [1, 1]} : vector<10x128xbf16> to vector<8x128xbf16>
    %c8_112 = arith.constant 8 : index
    %c3072_113 = arith.constant 3072 : index
    %144 = vector.load %arg7[%c8_112, %c3072_113] : memref<32x3200xbf16, #tpu.memory_space<vmem>>, vector<8x128xbf16>
    tpu.vector_store %arg7[%c8_112, %c3072_113], %143 {strides = array<i32>} : memref<32x3200xbf16, #tpu.memory_space<vmem>>, vector<8x128xbf16>,
    %c2_i32_114 = arith.constant 2 : i32
    %145 = arith.muli %c2_i32_114, %arg1 : i32
    %c1_i32_115 = arith.constant 1 : i32
    %146 = arith.addi %145, %c1_i32_115 : i32
    %c0_i32_116 = arith.constant 0 : i32
    %147 = arith.addi %146, %c0_i32_116 : i32
    %c0_117 = arith.constant 0 : index
    %148 = arith.index_cast %147 : i32 to index
    %c0_118 = arith.constant 0 : index
    %c0_119 = arith.constant 0 : index
    %149 = vector.load %arg2[%c0_117, %148, %c0_118, %c0_119] : memref<1x18x10x128xbf16, #tpu.memory_space<vmem>>, vector<1x1x10x128xbf16>
    %150 = vector.shape_cast %149 : vector<1x1x10x128xbf16> to vector<10x128xbf16>
    %c0_120 = arith.constant 0 : index
    %151 = arith.index_cast %147 : i32 to index
    %c0_121 = arith.constant 0 : index
    %c0_122 = arith.constant 0 : index
    %152 = vector.load %arg3[%c0_120, %151, %c0_121, %c0_122] : memref<1x18x10x128xbf16, #tpu.memory_space<vmem>>, vector<1x1x10x128xbf16>
    %153 = vector.shape_cast %152 : vector<1x1x10x128xbf16> to vector<10x128xbf16>
    %154 = vector.extract_strided_slice %150 {offsets = [0, 0], sizes = [8, 128], strides = [1, 1]} : vector<10x128xbf16> to vector<8x128xbf16>
    %c16 = arith.constant 16 : index
    %c0_123 = arith.constant 0 : index
    %155 = vector.load %arg7[%c16, %c0_123] : memref<32x3200xbf16, #tpu.memory_space<vmem>>, vector<8x128xbf16>
    tpu.vector_store %arg7[%c16, %c0_123], %154 {strides = array<i32>} : memref<32x3200xbf16, #tpu.memory_space<vmem>>, vector<8x128xbf16>,
    %156 = vector.extract_strided_slice %153 {offsets = [0, 0], sizes = [8, 128], strides = [1, 1]} : vector<10x128xbf16> to vector<8x128xbf16>
    %c16_124 = arith.constant 16 : index
    %c128_125 = arith.constant 128 : index
    %157 = vector.load %arg7[%c16_124, %c128_125] : memref<32x3200xbf16, #tpu.memory_space<vmem>>, vector<8x128xbf16>
    tpu.vector_store %arg7[%c16_124, %c128_125], %156 {strides = array<i32>} : memref<32x3200xbf16, #tpu.memory_space<vmem>>, vector<8x128xbf16>,
    %158 = vector.extract_strided_slice %150 {offsets = [1, 0], sizes = [8, 128], strides = [1, 1]} : vector<10x128xbf16> to vector<8x128xbf16>
    %c16_126 = arith.constant 16 : index
    %c256_127 = arith.constant 256 : index
    %159 = vector.load %arg7[%c16_126, %c256_127] : memref<32x3200xbf16, #tpu.memory_space<vmem>>, vector<8x128xbf16>
    tpu.vector_store %arg7[%c16_126, %c256_127], %158 {strides = array<i32>} : memref<32x3200xbf16, #tpu.memory_space<vmem>>, vector<8x128xbf16>,
    %160 = vector.extract_strided_slice %153 {offsets = [1, 0], sizes = [8, 128], strides = [1, 1]} : vector<10x128xbf16> to vector<8x128xbf16>
    %c16_128 = arith.constant 16 : index
    %c384_129 = arith.constant 384 : index
    %161 = vector.load %arg7[%c16_128, %c384_129] : memref<32x3200xbf16, #tpu.memory_space<vmem>>, vector<8x128xbf16>
    tpu.vector_store %arg7[%c16_128, %c384_129], %160 {strides = array<i32>} : memref<32x3200xbf16, #tpu.memory_space<vmem>>, vector<8x128xbf16>,
    %162 = vector.extract_strided_slice %150 {offsets = [2, 0], sizes = [8, 128], strides = [1, 1]} : vector<10x128xbf16> to vector<8x128xbf16>
    %c16_130 = arith.constant 16 : index
    %c512_131 = arith.constant 512 : index
    %163 = vector.load %arg7[%c16_130, %c512_131] : memref<32x3200xbf16, #tpu.memory_space<vmem>>, vector<8x128xbf16>
    tpu.vector_store %arg7[%c16_130, %c512_131], %162 {strides = array<i32>} : memref<32x3200xbf16, #tpu.memory_space<vmem>>, vector<8x128xbf16>,
    %164 = vector.extract_strided_slice %153 {offsets = [0, 0], sizes = [8, 128], strides = [1, 1]} : vector<10x128xbf16> to vector<8x128xbf16>
    %c24 = arith.constant 24 : index
    %c0_132 = arith.constant 0 : index
    %165 = vector.load %arg7[%c24, %c0_132] : memref<32x3200xbf16, #tpu.memory_space<vmem>>, vector<8x128xbf16>
    tpu.vector_store %arg7[%c24, %c0_132], %164 {strides = array<i32>} : memref<32x3200xbf16, #tpu.memory_space<vmem>>, vector<8x128xbf16>,
    %166 = vector.extract_strided_slice %150 {offsets = [1, 0], sizes = [8, 128], strides = [1, 1]} : vector<10x128xbf16> to vector<8x128xbf16>
    %c24_133 = arith.constant 24 : index
    %c128_134 = arith.constant 128 : index
    %167 = vector.load %arg7[%c24_133, %c128_134] : memref<32x3200xbf16, #tpu.memory_space<vmem>>, vector<8x128xbf16>
    tpu.vector_store %arg7[%c24_133, %c128_134], %166 {strides = array<i32>} : memref<32x3200xbf16, #tpu.memory_space<vmem>>, vector<8x128xbf16>,
    %168 = vector.extract_strided_slice %153 {offsets = [1, 0], sizes = [8, 128], strides = [1, 1]} : vector<10x128xbf16> to vector<8x128xbf16>
    %c24_135 = arith.constant 24 : index
    %c256_136 = arith.constant 256 : index
    %169 = vector.load %arg7[%c24_135, %c256_136] : memref<32x3200xbf16, #tpu.memory_space<vmem>>, vector<8x128xbf16>
    tpu.vector_store %arg7[%c24_135, %c256_136], %168 {strides = array<i32>} : memref<32x3200xbf16, #tpu.memory_space<vmem>>, vector<8x128xbf16>,
    %170 = vector.extract_strided_slice %150 {offsets = [2, 0], sizes = [8, 128], strides = [1, 1]} : vector<10x128xbf16> to vector<8x128xbf16>
    %c24_137 = arith.constant 24 : index
    %c384_138 = arith.constant 384 : index
    %171 = vector.load %arg7[%c24_137, %c384_138] : memref<32x3200xbf16, #tpu.memory_space<vmem>>, vector<8x128xbf16>
    tpu.vector_store %arg7[%c24_137, %c384_138], %170 {strides = array<i32>} : memref<32x3200xbf16, #tpu.memory_space<vmem>>, vector<8x128xbf16>,
    %172 = vector.extract_strided_slice %153 {offsets = [2, 0], sizes = [8, 128], strides = [1, 1]} : vector<10x128xbf16> to vector<8x128xbf16>
    %c24_139 = arith.constant 24 : index
    %c512_140 = arith.constant 512 : index
    %173 = vector.load %arg7[%c24_139, %c512_140] : memref<32x3200xbf16, #tpu.memory_space<vmem>>, vector<8x128xbf16>
    tpu.vector_store %arg7[%c24_139, %c512_140], %172 {strides = array<i32>} : memref<32x3200xbf16, #tpu.memory_space<vmem>>, vector<8x128xbf16>,
    %c2_i32_141 = arith.constant 2 : i32
    %174 = arith.muli %c2_i32_141, %arg1 : i32
    %c1_i32_142 = arith.constant 1 : i32
    %175 = arith.addi %174, %c1_i32_142 : i32
    %c1_i32_143 = arith.constant 1 : i32
    %176 = arith.addi %175, %c1_i32_143 : i32
    %c0_144 = arith.constant 0 : index
    %177 = arith.index_cast %176 : i32 to index
    %c0_145 = arith.constant 0 : index
    %c0_146 = arith.constant 0 : index
    %178 = vector.load %arg2[%c0_144, %177, %c0_145, %c0_146] : memref<1x18x10x128xbf16, #tpu.memory_space<vmem>>, vector<1x1x10x128xbf16>
    %179 = vector.shape_cast %178 : vector<1x1x10x128xbf16> to vector<10x128xbf16>
    %c0_147 = arith.constant 0 : index
    %180 = arith.index_cast %176 : i32 to index
    %c0_148 = arith.constant 0 : index
    %c0_149 = arith.constant 0 : index
    %181 = vector.load %arg3[%c0_147, %180, %c0_148, %c0_149] : memref<1x18x10x128xbf16, #tpu.memory_space<vmem>>, vector<1x1x10x128xbf16>
    %182 = vector.shape_cast %181 : vector<1x1x10x128xbf16> to vector<10x128xbf16>
    %183 = vector.extract_strided_slice %179 {offsets = [0, 0], sizes = [8, 128], strides = [1, 1]} : vector<10x128xbf16> to vector<8x128xbf16>
    %c16_150 = arith.constant 16 : index
    %c640_151 = arith.constant 640 : index
    %184 = vector.load %arg7[%c16_150, %c640_151] : memref<32x3200xbf16, #tpu.memory_space<vmem>>, vector<8x128xbf16>
    tpu.vector_store %arg7[%c16_150, %c640_151], %183 {strides = array<i32>} : memref<32x3200xbf16, #tpu.memory_space<vmem>>, vector<8x128xbf16>,
    %185 = vector.extract_strided_slice %182 {offsets = [0, 0], sizes = [8, 128], strides = [1, 1]} : vector<10x128xbf16> to vector<8x128xbf16>
    %c16_152 = arith.constant 16 : index
    %c768_153 = arith.constant 768 : index
    %186 = vector.load %arg7[%c16_152, %c768_153] : memref<32x3200xbf16, #tpu.memory_space<vmem>>, vector<8x128xbf16>
    tpu.vector_store %arg7[%c16_152, %c768_153], %185 {strides = array<i32>} : memref<32x3200xbf16, #tpu.memory_space<vmem>>, vector<8x128xbf16>,
    %187 = vector.extract_strided_slice %179 {offsets = [1, 0], sizes = [8, 128], strides = [1, 1]} : vector<10x128xbf16> to vector<8x128xbf16>
    %c16_154 = arith.constant 16 : index
    %c896_155 = arith.constant 896 : index
    %188 = vector.load %arg7[%c16_154, %c896_155] : memref<32x3200xbf16, #tpu.memory_space<vmem>>, vector<8x128xbf16>
    tpu.vector_store %arg7[%c16_154, %c896_155], %187 {strides = array<i32>} : memref<32x3200xbf16, #tpu.memory_space<vmem>>, vector<8x128xbf16>,
    %189 = vector.extract_strided_slice %182 {offsets = [1, 0], sizes = [8, 128], strides = [1, 1]} : vector<10x128xbf16> to vector<8x128xbf16>
    %c16_156 = arith.constant 16 : index
    %c1024_157 = arith.constant 1024 : index
    %190 = vector.load %arg7[%c16_156, %c1024_157] : memref<32x3200xbf16, #tpu.memory_space<vmem>>, vector<8x128xbf16>
    tpu.vector_store %arg7[%c16_156, %c1024_157], %189 {strides = array<i32>} : memref<32x3200xbf16, #tpu.memory_space<vmem>>, vector<8x128xbf16>,
    %191 = vector.extract_strided_slice %179 {offsets = [2, 0], sizes = [8, 128], strides = [1, 1]} : vector<10x128xbf16> to vector<8x128xbf16>
    %c16_158 = arith.constant 16 : index
    %c1152_159 = arith.constant 1152 : index
    %192 = vector.load %arg7[%c16_158, %c1152_159] : memref<32x3200xbf16, #tpu.memory_space<vmem>>, vector<8x128xbf16>
    tpu.vector_store %arg7[%c16_158, %c1152_159], %191 {strides = array<i32>} : memref<32x3200xbf16, #tpu.memory_space<vmem>>, vector<8x128xbf16>,
    %193 = vector.extract_strided_slice %182 {offsets = [0, 0], sizes = [8, 128], strides = [1, 1]} : vector<10x128xbf16> to vector<8x128xbf16>
    %c24_160 = arith.constant 24 : index
    %c640_161 = arith.constant 640 : index
    %194 = vector.load %arg7[%c24_160, %c640_161] : memref<32x3200xbf16, #tpu.memory_space<vmem>>, vector<8x128xbf16>
    tpu.vector_store %arg7[%c24_160, %c640_161], %193 {strides = array<i32>} : memref<32x3200xbf16, #tpu.memory_space<vmem>>, vector<8x128xbf16>,
    %195 = vector.extract_strided_slice %179 {offsets = [1, 0], sizes = [8, 128], strides = [1, 1]} : vector<10x128xbf16> to vector<8x128xbf16>
    %c24_162 = arith.constant 24 : index
    %c768_163 = arith.constant 768 : index
    %196 = vector.load %arg7[%c24_162, %c768_163] : memref<32x3200xbf16, #tpu.memory_space<vmem>>, vector<8x128xbf16>
    tpu.vector_store %arg7[%c24_162, %c768_163], %195 {strides = array<i32>} : memref<32x3200xbf16, #tpu.memory_space<vmem>>, vector<8x128xbf16>,
    %197 = vector.extract_strided_slice %182 {offsets = [1, 0], sizes = [8, 128], strides = [1, 1]} : vector<10x128xbf16> to vector<8x128xbf16>
    %c24_164 = arith.constant 24 : index
    %c896_165 = arith.constant 896 : index
    %198 = vector.load %arg7[%c24_164, %c896_165] : memref<32x3200xbf16, #tpu.memory_space<vmem>>, vector<8x128xbf16>
    tpu.vector_store %arg7[%c24_164, %c896_165], %197 {strides = array<i32>} : memref<32x3200xbf16, #tpu.memory_space<vmem>>, vector<8x128xbf16>,
    %199 = vector.extract_strided_slice %179 {offsets = [2, 0], sizes = [8, 128], strides = [1, 1]} : vector<10x128xbf16> to vector<8x128xbf16>
    %c24_166 = arith.constant 24 : index
    %c1024_167 = arith.constant 1024 : index
    %200 = vector.load %arg7[%c24_166, %c1024_167] : memref<32x3200xbf16, #tpu.memory_space<vmem>>, vector<8x128xbf16>
    tpu.vector_store %arg7[%c24_166, %c1024_167], %199 {strides = array<i32>} : memref<32x3200xbf16, #tpu.memory_space<vmem>>, vector<8x128xbf16>,
    %201 = vector.extract_strided_slice %182 {offsets = [2, 0], sizes = [8, 128], strides = [1, 1]} : vector<10x128xbf16> to vector<8x128xbf16>
    %c24_168 = arith.constant 24 : index
    %c1152_169 = arith.constant 1152 : index
    %202 = vector.load %arg7[%c24_168, %c1152_169] : memref<32x3200xbf16, #tpu.memory_space<vmem>>, vector<8x128xbf16>
    tpu.vector_store %arg7[%c24_168, %c1152_169], %201 {strides = array<i32>} : memref<32x3200xbf16, #tpu.memory_space<vmem>>, vector<8x128xbf16>,
    %c2_i32_170 = arith.constant 2 : i32
    %203 = arith.muli %c2_i32_170, %arg1 : i32
    %c1_i32_171 = arith.constant 1 : i32
    %204 = arith.addi %203, %c1_i32_171 : i32
    %c2_i32_172 = arith.constant 2 : i32
    %205 = arith.addi %204, %c2_i32_172 : i32
    %c0_173 = arith.constant 0 : index
    %206 = arith.index_cast %205 : i32 to index
    %c0_174 = arith.constant 0 : index
    %c0_175 = arith.constant 0 : index
    %207 = vector.load %arg2[%c0_173, %206, %c0_174, %c0_175] : memref<1x18x10x128xbf16, #tpu.memory_space<vmem>>, vector<1x1x10x128xbf16>
    %208 = vector.shape_cast %207 : vector<1x1x10x128xbf16> to vector<10x128xbf16>
    %c0_176 = arith.constant 0 : index
    %209 = arith.index_cast %205 : i32 to index
    %c0_177 = arith.constant 0 : index
    %c0_178 = arith.constant 0 : index
    %210 = vector.load %arg3[%c0_176, %209, %c0_177, %c0_178] : memref<1x18x10x128xbf16, #tpu.memory_space<vmem>>, vector<1x1x10x128xbf16>
    %211 = vector.shape_cast %210 : vector<1x1x10x128xbf16> to vector<10x128xbf16>
    %212 = vector.extract_strided_slice %208 {offsets = [0, 0], sizes = [8, 128], strides = [1, 1]} : vector<10x128xbf16> to vector<8x128xbf16>
    %c16_179 = arith.constant 16 : index
    %c1280_180 = arith.constant 1280 : index
    %213 = vector.load %arg7[%c16_179, %c1280_180] : memref<32x3200xbf16, #tpu.memory_space<vmem>>, vector<8x128xbf16>
    tpu.vector_store %arg7[%c16_179, %c1280_180], %212 {strides = array<i32>} : memref<32x3200xbf16, #tpu.memory_space<vmem>>, vector<8x128xbf16>,
    %214 = vector.extract_strided_slice %211 {offsets = [0, 0], sizes = [8, 128], strides = [1, 1]} : vector<10x128xbf16> to vector<8x128xbf16>
    %c16_181 = arith.constant 16 : index
    %c1408_182 = arith.constant 1408 : index
    %215 = vector.load %arg7[%c16_181, %c1408_182] : memref<32x3200xbf16, #tpu.memory_space<vmem>>, vector<8x128xbf16>
    tpu.vector_store %arg7[%c16_181, %c1408_182], %214 {strides = array<i32>} : memref<32x3200xbf16, #tpu.memory_space<vmem>>, vector<8x128xbf16>,
    %216 = vector.extract_strided_slice %208 {offsets = [1, 0], sizes = [8, 128], strides = [1, 1]} : vector<10x128xbf16> to vector<8x128xbf16>
    %c16_183 = arith.constant 16 : index
    %c1536_184 = arith.constant 1536 : index
    %217 = vector.load %arg7[%c16_183, %c1536_184] : memref<32x3200xbf16, #tpu.memory_space<vmem>>, vector<8x128xbf16>
    tpu.vector_store %arg7[%c16_183, %c1536_184], %216 {strides = array<i32>} : memref<32x3200xbf16, #tpu.memory_space<vmem>>, vector<8x128xbf16>,
    %218 = vector.extract_strided_slice %211 {offsets = [1, 0], sizes = [8, 128], strides = [1, 1]} : vector<10x128xbf16> to vector<8x128xbf16>
    %c16_185 = arith.constant 16 : index
    %c1664_186 = arith.constant 1664 : index
    %219 = vector.load %arg7[%c16_185, %c1664_186] : memref<32x3200xbf16, #tpu.memory_space<vmem>>, vector<8x128xbf16>
    tpu.vector_store %arg7[%c16_185, %c1664_186], %218 {strides = array<i32>} : memref<32x3200xbf16, #tpu.memory_space<vmem>>, vector<8x128xbf16>,
    %220 = vector.extract_strided_slice %208 {offsets = [2, 0], sizes = [8, 128], strides = [1, 1]} : vector<10x128xbf16> to vector<8x128xbf16>
    %c16_187 = arith.constant 16 : index
    %c1792_188 = arith.constant 1792 : index
    %221 = vector.load %arg7[%c16_187, %c1792_188] : memref<32x3200xbf16, #tpu.memory_space<vmem>>, vector<8x128xbf16>
    tpu.vector_store %arg7[%c16_187, %c1792_188], %220 {strides = array<i32>} : memref<32x3200xbf16, #tpu.memory_space<vmem>>, vector<8x128xbf16>,
    %222 = vector.extract_strided_slice %211 {offsets = [0, 0], sizes = [8, 128], strides = [1, 1]} : vector<10x128xbf16> to vector<8x128xbf16>
    %c24_189 = arith.constant 24 : index
    %c1280_190 = arith.constant 1280 : index
    %223 = vector.load %arg7[%c24_189, %c1280_190] : memref<32x3200xbf16, #tpu.memory_space<vmem>>, vector<8x128xbf16>
    tpu.vector_store %arg7[%c24_189, %c1280_190], %222 {strides = array<i32>} : memref<32x3200xbf16, #tpu.memory_space<vmem>>, vector<8x128xbf16>,
    %224 = vector.extract_strided_slice %208 {offsets = [1, 0], sizes = [8, 128], strides = [1, 1]} : vector<10x128xbf16> to vector<8x128xbf16>
    %c24_191 = arith.constant 24 : index
    %c1408_192 = arith.constant 1408 : index
    %225 = vector.load %arg7[%c24_191, %c1408_192] : memref<32x3200xbf16, #tpu.memory_space<vmem>>, vector<8x128xbf16>
    tpu.vector_store %arg7[%c24_191, %c1408_192], %224 {strides = array<i32>} : memref<32x3200xbf16, #tpu.memory_space<vmem>>, vector<8x128xbf16>,
    %226 = vector.extract_strided_slice %211 {offsets = [1, 0], sizes = [8, 128], strides = [1, 1]} : vector<10x128xbf16> to vector<8x128xbf16>
    %c24_193 = arith.constant 24 : index
    %c1536_194 = arith.constant 1536 : index
    %227 = vector.load %arg7[%c24_193, %c1536_194] : memref<32x3200xbf16, #tpu.memory_space<vmem>>, vector<8x128xbf16>
    tpu.vector_store %arg7[%c24_193, %c1536_194], %226 {strides = array<i32>} : memref<32x3200xbf16, #tpu.memory_space<vmem>>, vector<8x128xbf16>,
    %228 = vector.extract_strided_slice %208 {offsets = [2, 0], sizes = [8, 128], strides = [1, 1]} : vector<10x128xbf16> to vector<8x128xbf16>
    %c24_195 = arith.constant 24 : index
    %c1664_196 = arith.constant 1664 : index
    %229 = vector.load %arg7[%c24_195, %c1664_196] : memref<32x3200xbf16, #tpu.memory_space<vmem>>, vector<8x128xbf16>
    tpu.vector_store %arg7[%c24_195, %c1664_196], %228 {strides = array<i32>} : memref<32x3200xbf16, #tpu.memory_space<vmem>>, vector<8x128xbf16>,
    %230 = vector.extract_strided_slice %211 {offsets = [2, 0], sizes = [8, 128], strides = [1, 1]} : vector<10x128xbf16> to vector<8x128xbf16>
    %c24_197 = arith.constant 24 : index
    %c1792_198 = arith.constant 1792 : index
    %231 = vector.load %arg7[%c24_197, %c1792_198] : memref<32x3200xbf16, #tpu.memory_space<vmem>>, vector<8x128xbf16>
    tpu.vector_store %arg7[%c24_197, %c1792_198], %230 {strides = array<i32>} : memref<32x3200xbf16, #tpu.memory_space<vmem>>, vector<8x128xbf16>,
    %c2_i32_199 = arith.constant 2 : i32
    %232 = arith.muli %c2_i32_199, %arg1 : i32
    %c1_i32_200 = arith.constant 1 : i32
    %233 = arith.addi %232, %c1_i32_200 : i32
    %c3_i32_201 = arith.constant 3 : i32
    %234 = arith.addi %233, %c3_i32_201 : i32
    %c0_202 = arith.constant 0 : index
    %235 = arith.index_cast %234 : i32 to index
    %c0_203 = arith.constant 0 : index
    %c0_204 = arith.constant 0 : index
    %236 = vector.load %arg2[%c0_202, %235, %c0_203, %c0_204] : memref<1x18x10x128xbf16, #tpu.memory_space<vmem>>, vector<1x1x10x128xbf16>
    %237 = vector.shape_cast %236 : vector<1x1x10x128xbf16> to vector<10x128xbf16>
    %c0_205 = arith.constant 0 : index
    %238 = arith.index_cast %234 : i32 to index
    %c0_206 = arith.constant 0 : index
    %c0_207 = arith.constant 0 : index
    %239 = vector.load %arg3[%c0_205, %238, %c0_206, %c0_207] : memref<1x18x10x128xbf16, #tpu.memory_space<vmem>>, vector<1x1x10x128xbf16>
    %240 = vector.shape_cast %239 : vector<1x1x10x128xbf16> to vector<10x128xbf16>
    %241 = vector.extract_strided_slice %237 {offsets = [0, 0], sizes = [8, 128], strides = [1, 1]} : vector<10x128xbf16> to vector<8x128xbf16>
    %c16_208 = arith.constant 16 : index
    %c1920_209 = arith.constant 1920 : index
    %242 = vector.load %arg7[%c16_208, %c1920_209] : memref<32x3200xbf16, #tpu.memory_space<vmem>>, vector<8x128xbf16>
    tpu.vector_store %arg7[%c16_208, %c1920_209], %241 {strides = array<i32>} : memref<32x3200xbf16, #tpu.memory_space<vmem>>, vector<8x128xbf16>,
    %243 = vector.extract_strided_slice %240 {offsets = [0, 0], sizes = [8, 128], strides = [1, 1]} : vector<10x128xbf16> to vector<8x128xbf16>
    %c16_210 = arith.constant 16 : index
    %c2048_211 = arith.constant 2048 : index
    %244 = vector.load %arg7[%c16_210, %c2048_211] : memref<32x3200xbf16, #tpu.memory_space<vmem>>, vector<8x128xbf16>
    tpu.vector_store %arg7[%c16_210, %c2048_211], %243 {strides = array<i32>} : memref<32x3200xbf16, #tpu.memory_space<vmem>>, vector<8x128xbf16>,
    %245 = vector.extract_strided_slice %237 {offsets = [1, 0], sizes = [8, 128], strides = [1, 1]} : vector<10x128xbf16> to vector<8x128xbf16>
    %c16_212 = arith.constant 16 : index
    %c2176_213 = arith.constant 2176 : index
    %246 = vector.load %arg7[%c16_212, %c2176_213] : memref<32x3200xbf16, #tpu.memory_space<vmem>>, vector<8x128xbf16>
    tpu.vector_store %arg7[%c16_212, %c2176_213], %245 {strides = array<i32>} : memref<32x3200xbf16, #tpu.memory_space<vmem>>, vector<8x128xbf16>,
    %247 = vector.extract_strided_slice %240 {offsets = [1, 0], sizes = [8, 128], strides = [1, 1]} : vector<10x128xbf16> to vector<8x128xbf16>
    %c16_214 = arith.constant 16 : index
    %c2304_215 = arith.constant 2304 : index
    %248 = vector.load %arg7[%c16_214, %c2304_215] : memref<32x3200xbf16, #tpu.memory_space<vmem>>, vector<8x128xbf16>
    tpu.vector_store %arg7[%c16_214, %c2304_215], %247 {strides = array<i32>} : memref<32x3200xbf16, #tpu.memory_space<vmem>>, vector<8x128xbf16>,
    %249 = vector.extract_strided_slice %237 {offsets = [2, 0], sizes = [8, 128], strides = [1, 1]} : vector<10x128xbf16> to vector<8x128xbf16>
    %c16_216 = arith.constant 16 : index
    %c2432_217 = arith.constant 2432 : index
    %250 = vector.load %arg7[%c16_216, %c2432_217] : memref<32x3200xbf16, #tpu.memory_space<vmem>>, vector<8x128xbf16>
    tpu.vector_store %arg7[%c16_216, %c2432_217], %249 {strides = array<i32>} : memref<32x3200xbf16, #tpu.memory_space<vmem>>, vector<8x128xbf16>,
    %251 = vector.extract_strided_slice %240 {offsets = [0, 0], sizes = [8, 128], strides = [1, 1]} : vector<10x128xbf16> to vector<8x128xbf16>
    %c24_218 = arith.constant 24 : index
    %c1920_219 = arith.constant 1920 : index
    %252 = vector.load %arg7[%c24_218, %c1920_219] : memref<32x3200xbf16, #tpu.memory_space<vmem>>, vector<8x128xbf16>
    tpu.vector_store %arg7[%c24_218, %c1920_219], %251 {strides = array<i32>} : memref<32x3200xbf16, #tpu.memory_space<vmem>>, vector<8x128xbf16>,
    %253 = vector.extract_strided_slice %237 {offsets = [1, 0], sizes = [8, 128], strides = [1, 1]} : vector<10x128xbf16> to vector<8x128xbf16>
    %c24_220 = arith.constant 24 : index
    %c2048_221 = arith.constant 2048 : index
    %254 = vector.load %arg7[%c24_220, %c2048_221] : memref<32x3200xbf16, #tpu.memory_space<vmem>>, vector<8x128xbf16>
    tpu.vector_store %arg7[%c24_220, %c2048_221], %253 {strides = array<i32>} : memref<32x3200xbf16, #tpu.memory_space<vmem>>, vector<8x128xbf16>,
    %255 = vector.extract_strided_slice %240 {offsets = [1, 0], sizes = [8, 128], strides = [1, 1]} : vector<10x128xbf16> to vector<8x128xbf16>
    %c24_222 = arith.constant 24 : index
    %c2176_223 = arith.constant 2176 : index
    %256 = vector.load %arg7[%c24_222, %c2176_223] : memref<32x3200xbf16, #tpu.memory_space<vmem>>, vector<8x128xbf16>
    tpu.vector_store %arg7[%c24_222, %c2176_223], %255 {strides = array<i32>} : memref<32x3200xbf16, #tpu.memory_space<vmem>>, vector<8x128xbf16>,
    %257 = vector.extract_strided_slice %237 {offsets = [2, 0], sizes = [8, 128], strides = [1, 1]} : vector<10x128xbf16> to vector<8x128xbf16>
    %c24_224 = arith.constant 24 : index
    %c2304_225 = arith.constant 2304 : index
    %258 = vector.load %arg7[%c24_224, %c2304_225] : memref<32x3200xbf16, #tpu.memory_space<vmem>>, vector<8x128xbf16>
    tpu.vector_store %arg7[%c24_224, %c2304_225], %257 {strides = array<i32>} : memref<32x3200xbf16, #tpu.memory_space<vmem>>, vector<8x128xbf16>,
    %259 = vector.extract_strided_slice %240 {offsets = [2, 0], sizes = [8, 128], strides = [1, 1]} : vector<10x128xbf16> to vector<8x128xbf16>
    %c24_226 = arith.constant 24 : index
    %c2432_227 = arith.constant 2432 : index
    %260 = vector.load %arg7[%c24_226, %c2432_227] : memref<32x3200xbf16, #tpu.memory_space<vmem>>, vector<8x128xbf16>
    tpu.vector_store %arg7[%c24_226, %c2432_227], %259 {strides = array<i32>} : memref<32x3200xbf16, #tpu.memory_space<vmem>>, vector<8x128xbf16>,
    %c2_i32_228 = arith.constant 2 : i32
    %261 = arith.muli %c2_i32_228, %arg1 : i32
    %c1_i32_229 = arith.constant 1 : i32
    %262 = arith.addi %261, %c1_i32_229 : i32
    %c4_i32_230 = arith.constant 4 : i32
    %263 = arith.addi %262, %c4_i32_230 : i32
    %c0_231 = arith.constant 0 : index
    %264 = arith.index_cast %263 : i32 to index
    %c0_232 = arith.constant 0 : index
    %c0_233 = arith.constant 0 : index
    %265 = vector.load %arg2[%c0_231, %264, %c0_232, %c0_233] : memref<1x18x10x128xbf16, #tpu.memory_space<vmem>>, vector<1x1x10x128xbf16>
    %266 = vector.shape_cast %265 : vector<1x1x10x128xbf16> to vector<10x128xbf16>
    %c0_234 = arith.constant 0 : index
    %267 = arith.index_cast %263 : i32 to index
    %c0_235 = arith.constant 0 : index
    %c0_236 = arith.constant 0 : index
    %268 = vector.load %arg3[%c0_234, %267, %c0_235, %c0_236] : memref<1x18x10x128xbf16, #tpu.memory_space<vmem>>, vector<1x1x10x128xbf16>
    %269 = vector.shape_cast %268 : vector<1x1x10x128xbf16> to vector<10x128xbf16>
    %270 = vector.extract_strided_slice %266 {offsets = [0, 0], sizes = [8, 128], strides = [1, 1]} : vector<10x128xbf16> to vector<8x128xbf16>
    %c16_237 = arith.constant 16 : index
    %c2560_238 = arith.constant 2560 : index
    %271 = vector.load %arg7[%c16_237, %c2560_238] : memref<32x3200xbf16, #tpu.memory_space<vmem>>, vector<8x128xbf16>
    tpu.vector_store %arg7[%c16_237, %c2560_238], %270 {strides = array<i32>} : memref<32x3200xbf16, #tpu.memory_space<vmem>>, vector<8x128xbf16>,
    %272 = vector.extract_strided_slice %269 {offsets = [0, 0], sizes = [8, 128], strides = [1, 1]} : vector<10x128xbf16> to vector<8x128xbf16>
    %c16_239 = arith.constant 16 : index
    %c2688_240 = arith.constant 2688 : index
    %273 = vector.load %arg7[%c16_239, %c2688_240] : memref<32x3200xbf16, #tpu.memory_space<vmem>>, vector<8x128xbf16>
    tpu.vector_store %arg7[%c16_239, %c2688_240], %272 {strides = array<i32>} : memref<32x3200xbf16, #tpu.memory_space<vmem>>, vector<8x128xbf16>,
    %274 = vector.extract_strided_slice %266 {offsets = [1, 0], sizes = [8, 128], strides = [1, 1]} : vector<10x128xbf16> to vector<8x128xbf16>
    %c16_241 = arith.constant 16 : index
    %c2816_242 = arith.constant 2816 : index
    %275 = vector.load %arg7[%c16_241, %c2816_242] : memref<32x3200xbf16, #tpu.memory_space<vmem>>, vector<8x128xbf16>
    tpu.vector_store %arg7[%c16_241, %c2816_242], %274 {strides = array<i32>} : memref<32x3200xbf16, #tpu.memory_space<vmem>>, vector<8x128xbf16>,
    %276 = vector.extract_strided_slice %269 {offsets = [1, 0], sizes = [8, 128], strides = [1, 1]} : vector<10x128xbf16> to vector<8x128xbf16>
    %c16_243 = arith.constant 16 : index
    %c2944_244 = arith.constant 2944 : index
    %277 = vector.load %arg7[%c16_243, %c2944_244] : memref<32x3200xbf16, #tpu.memory_space<vmem>>, vector<8x128xbf16>
    tpu.vector_store %arg7[%c16_243, %c2944_244], %276 {strides = array<i32>} : memref<32x3200xbf16, #tpu.memory_space<vmem>>, vector<8x128xbf16>,
    %278 = vector.extract_strided_slice %266 {offsets = [2, 0], sizes = [8, 128], strides = [1, 1]} : vector<10x128xbf16> to vector<8x128xbf16>
    %c16_245 = arith.constant 16 : index
    %c3072_246 = arith.constant 3072 : index
    %279 = vector.load %arg7[%c16_245, %c3072_246] : memref<32x3200xbf16, #tpu.memory_space<vmem>>, vector<8x128xbf16>
    tpu.vector_store %arg7[%c16_245, %c3072_246], %278 {strides = array<i32>} : memref<32x3200xbf16, #tpu.memory_space<vmem>>, vector<8x128xbf16>,
    %280 = vector.extract_strided_slice %269 {offsets = [0, 0], sizes = [8, 128], strides = [1, 1]} : vector<10x128xbf16> to vector<8x128xbf16>
    %c24_247 = arith.constant 24 : index
    %c2560_248 = arith.constant 2560 : index
    %281 = vector.load %arg7[%c24_247, %c2560_248] : memref<32x3200xbf16, #tpu.memory_space<vmem>>, vector<8x128xbf16>
    tpu.vector_store %arg7[%c24_247, %c2560_248], %280 {strides = array<i32>} : memref<32x3200xbf16, #tpu.memory_space<vmem>>, vector<8x128xbf16>,
    %282 = vector.extract_strided_slice %266 {offsets = [1, 0], sizes = [8, 128], strides = [1, 1]} : vector<10x128xbf16> to vector<8x128xbf16>
    %c24_249 = arith.constant 24 : index
    %c2688_250 = arith.constant 2688 : index
    %283 = vector.load %arg7[%c24_249, %c2688_250] : memref<32x3200xbf16, #tpu.memory_space<vmem>>, vector<8x128xbf16>
    tpu.vector_store %arg7[%c24_249, %c2688_250], %282 {strides = array<i32>} : memref<32x3200xbf16, #tpu.memory_space<vmem>>, vector<8x128xbf16>,
    %284 = vector.extract_strided_slice %269 {offsets = [1, 0], sizes = [8, 128], strides = [1, 1]} : vector<10x128xbf16> to vector<8x128xbf16>
    %c24_251 = arith.constant 24 : index
    %c2816_252 = arith.constant 2816 : index
    %285 = vector.load %arg7[%c24_251, %c2816_252] : memref<32x3200xbf16, #tpu.memory_space<vmem>>, vector<8x128xbf16>
    tpu.vector_store %arg7[%c24_251, %c2816_252], %284 {strides = array<i32>} : memref<32x3200xbf16, #tpu.memory_space<vmem>>, vector<8x128xbf16>,
    %286 = vector.extract_strided_slice %266 {offsets = [2, 0], sizes = [8, 128], strides = [1, 1]} : vector<10x128xbf16> to vector<8x128xbf16>
    %c24_253 = arith.constant 24 : index
    %c2944_254 = arith.constant 2944 : index
    %287 = vector.load %arg7[%c24_253, %c2944_254] : memref<32x3200xbf16, #tpu.memory_space<vmem>>, vector<8x128xbf16>
    tpu.vector_store %arg7[%c24_253, %c2944_254], %286 {strides = array<i32>} : memref<32x3200xbf16, #tpu.memory_space<vmem>>, vector<8x128xbf16>,
    %288 = vector.extract_strided_slice %269 {offsets = [2, 0], sizes = [8, 128], strides = [1, 1]} : vector<10x128xbf16> to vector<8x128xbf16>
    %c24_255 = arith.constant 24 : index
    %c3072_256 = arith.constant 3072 : index
    %289 = vector.load %arg7[%c24_255, %c3072_256] : memref<32x3200xbf16, #tpu.memory_space<vmem>>, vector<8x128xbf16>
    tpu.vector_store %arg7[%c24_255, %c3072_256], %288 {strides = array<i32>} : memref<32x3200xbf16, #tpu.memory_space<vmem>>, vector<8x128xbf16>,
    %c0_257 = arith.constant 0 : index
    %c0_258 = arith.constant 0 : index
    %290 = vector.load %arg7[%c0_257, %c0_258] : memref<32x3200xbf16, #tpu.memory_space<vmem>>, vector<32x3200xbf16>
    %c0_259 = arith.constant 0 : index
    %c0_260 = arith.constant 0 : index
    %291 = vector.load %arg4[%c0_259, %c0_260] : memref<3200x64xbf16, #tpu.memory_space<vmem>>, vector<3200x64xbf16>
    %cst = arith.constant dense<0.000000e+00> : vector<32x64xf32>
    %292 = tpu.matmul %290, %291, %cst {dimension_numbers = #tpu.dot_dimension_numbers<[1], [0], [0], [1], [0, 0, 1, 1], [], []>} : vector<32x3200xbf16>, vector<3200x64xbf16>, vector<32x64xf32> -> vector<32x64xf32>
    %c0_261 = arith.constant 0 : index
    %c0_262 = arith.constant 0 : index
    %293 = vector.load %arg5[%c0_261, %c0_262] : memref<1x64xf32, #tpu.memory_space<vmem>>, vector<1x64xf32>
    %294 = vector.broadcast %293 : vector<1x64xf32> to vector<32x64xf32>
    %295 = arith.addf %292, %294 : vector<32x64xf32>
    %cst_263 = arith.constant 0.000000e+00 : f32
    %296 = vector.broadcast %cst_263 : f32 to vector<32x64xf32>
    %297 = arith.maximumf %295, %296 : vector<32x64xf32>
    %298 = vector.extract_strided_slice %297 {offsets = [0, 0], sizes = [7, 64], strides = [1, 1]} : vector<32x64xf32> to vector<7x64xf32>
    %299 = vector.extract_strided_slice %297 {offsets = [8, 0], sizes = [7, 64], strides = [1, 1]} : vector<32x64xf32> to vector<7x64xf32>
    %300 = arith.maximumf %298, %299 : vector<7x64xf32>
    %301 = vector.extract_strided_slice %297 {offsets = [16, 0], sizes = [7, 64], strides = [1, 1]} : vector<32x64xf32> to vector<7x64xf32>
    %302 = vector.extract_strided_slice %297 {offsets = [24, 0], sizes = [7, 64], strides = [1, 1]} : vector<32x64xf32> to vector<7x64xf32>
    %303 = arith.maximumf %301, %302 : vector<7x64xf32>
    %304 = arith.maximumf %300, %303 : vector<7x64xf32>
    %305 = arith.truncf %304 : vector<7x64xf32> to vector<7x64xbf16>
    %c0_264 = arith.constant 0 : index
    %c0_265 = arith.constant 0 : index
    %c0_266 = arith.constant 0 : index
    %c0_267 = arith.constant 0 : index
    %306 = vector.load %arg6[%c0_264, %c0_265, %c0_266, %c0_267] : memref<1x1x7x64xbf16, #tpu.memory_space<vmem>>, vector<1x1x7x64xbf16>
    %307 = vector.shape_cast %306 : vector<1x1x7x64xbf16> to vector<7x64xbf16>
    %308 = vector.shape_cast %305 : vector<7x64xbf16> to vector<1x1x7x64xbf16>
    tpu.vector_store %arg6[%c0_264, %c0_265, %c0_266, %c0_267], %308 {strides = array<i32>} : memref<1x1x7x64xbf16, #tpu.memory_space<vmem>>, vector<1x1x7x64xbf16>,
    return
  }
  func.func @transform_0(%arg0: i32, %arg1: i32) -> (i32, i32, i32, i32) {
    %c0_i32 = arith.constant 0 : i32
    %c0_i32_0 = arith.constant 0 : i32
    %c0_i32_1 = arith.constant 0 : i32
    %c0_i32_2 = arith.constant 0 : i32
    return %arg0, %c0_i32, %c0_i32_0, %c0_i32_1 : i32, i32, i32, i32
  }
  func.func @transform_1(%arg0: i32, %arg1: i32) -> (i32, i32, i32, i32) {
    %c0_i32 = arith.constant 0 : i32
    %c0_i32_0 = arith.constant 0 : i32
    %c0_i32_1 = arith.constant 0 : i32
    %c0_i32_2 = arith.constant 0 : i32
    return %arg0, %c0_i32, %c0_i32_0, %c0_i32_1 : i32, i32, i32, i32
  }
  func.func @transform_2(%arg0: i32, %arg1: i32) -> (i32, i32) {
    %c0_i32 = arith.constant 0 : i32
    %c0_i32_0 = arith.constant 0 : i32
    %c0_i32_1 = arith.constant 0 : i32
    return %c0_i32, %c0_i32_0 : i32, i32
  }
  func.func @transform_3(%arg0: i32, %arg1: i32) -> (i32, i32) {
    %c0_i32 = arith.constant 0 : i32
    %c0_i32_0 = arith.constant 0 : i32
    %c0_i32_1 = arith.constant 0 : i32
    return %c0_i32, %c0_i32_0 : i32, i32
  }
  func.func @transform_4(%arg0: i32, %arg1: i32) -> (i32, i32, i32, i32) {
    %c0_i32 = arith.constant 0 : i32
    %c0_i32_0 = arith.constant 0 : i32
    %c0_i32_1 = arith.constant 0 : i32
    return %arg0, %arg1, %c0_i32, %c0_i32_0 : i32, i32, i32, i32
  }
}

module attributes {stable_mosaic.version = 11 : i64} {
  func.func @_fc_fused_kernel(%arg0: i32, %arg1: i32, %arg2: memref<8x3136xbf16, #tpu.memory_space<vmem>>, %arg3: memref<3136x256xbf16, #tpu.memory_space<vmem>>, %arg4: memref<1x256xf32, #tpu.memory_space<vmem>>, %arg5: memref<256x128xbf16, #tpu.memory_space<vmem>>, %arg6: memref<1x128xf32, #tpu.memory_space<vmem>>, %arg7: memref<8x128xf32, #tpu.memory_space<vmem>>, %arg8: memref<8x128xf32, #tpu.memory_space<vmem>>) attributes {dimension_semantics = [#tpu.dimension_semantics<parallel>, #tpu.dimension_semantics<arbitrary>], iteration_bounds = array<i64: 1, 2>, scalar_prefetch = 0 : i64, scratch_operands = 1 : i64, tpu.core_type = #tpu.core_type<tc>, window_params = [{transform_indices = @transform_0, window_bounds = array<i64: 8, 3136>}, {transform_indices = @transform_1, window_bounds = array<i64: 3136, 256>}, {transform_indices = @transform_2, window_bounds = array<i64: 1, 256>}, {transform_indices = @transform_3, window_bounds = array<i64: 256, 128>}, {pipeline_mode = #tpu.pipeline_mode<synchronous>, transform_indices = @transform_4, window_bounds = array<i64: 1, 128>}, {transform_indices = @transform_5, window_bounds = array<i64: 8, 128>}]} {
    %c0_i32 = arith.constant 0 : i32
    %0 = arith.cmpi eq, %arg1, %c0_i32 : i32
    %1 = arith.extui %0 : i1 to i32
    %c0_i32_0 = arith.constant 0 : i32
    %2 = arith.cmpi ne, %1, %c0_i32_0 : i32
    scf.if %2 {
      %cst_15 = arith.constant 0.000000e+00 : f32
      %20 = vector.broadcast %cst_15 : f32 to vector<8x128xf32>
      %c0_16 = arith.constant 0 : index
      %c0_17 = arith.constant 0 : index
      %21 = vector.load %arg8[%c0_16, %c0_17] : memref<8x128xf32, #tpu.memory_space<vmem>>, vector<8x128xf32>
      tpu.vector_store %arg8[%c0_16, %c0_17], %20 {strides = array<i32>} : memref<8x128xf32, #tpu.memory_space<vmem>>, vector<8x128xf32>,
    } else {
    }
    %c0 = arith.constant 0 : index
    %c0_1 = arith.constant 0 : index
    %3 = vector.load %arg2[%c0, %c0_1] : memref<8x3136xbf16, #tpu.memory_space<vmem>>, vector<8x3136xbf16>
    %c0_2 = arith.constant 0 : index
    %c0_3 = arith.constant 0 : index
    %4 = vector.load %arg3[%c0_2, %c0_3] : memref<3136x256xbf16, #tpu.memory_space<vmem>>, vector<3136x256xbf16>
    %cst = arith.constant dense<0.000000e+00> : vector<8x256xf32>
    %5 = tpu.matmul %3, %4, %cst {dimension_numbers = #tpu.dot_dimension_numbers<[1], [0], [0], [1], [0, 0, 1, 1], [], []>} : vector<8x3136xbf16>, vector<3136x256xbf16>, vector<8x256xf32> -> vector<8x256xf32>
    %c0_4 = arith.constant 0 : index
    %c0_5 = arith.constant 0 : index
    %6 = vector.load %arg4[%c0_4, %c0_5] : memref<1x256xf32, #tpu.memory_space<vmem>>, vector<1x256xf32>
    %7 = vector.broadcast %6 : vector<1x256xf32> to vector<8x256xf32>
    %8 = arith.addf %5, %7 : vector<8x256xf32>
    %cst_6 = arith.constant 0.000000e+00 : f32
    %9 = vector.broadcast %cst_6 : f32 to vector<8x256xf32>
    %10 = arith.maximumf %8, %9 : vector<8x256xf32>
    %c0_7 = arith.constant 0 : index
    %c0_8 = arith.constant 0 : index
    %11 = vector.load %arg8[%c0_7, %c0_8] : memref<8x128xf32, #tpu.memory_space<vmem>>, vector<8x128xf32>
    %12 = arith.truncf %10 : vector<8x256xf32> to vector<8x256xbf16>
    %c0_9 = arith.constant 0 : index
    %c0_10 = arith.constant 0 : index
    %13 = vector.load %arg5[%c0_9, %c0_10] : memref<256x128xbf16, #tpu.memory_space<vmem>>, vector<256x128xbf16>
    %cst_11 = arith.constant dense<0.000000e+00> : vector<8x128xf32>
    %14 = tpu.matmul %12, %13, %cst_11 {dimension_numbers = #tpu.dot_dimension_numbers<[1], [0], [0], [1], [0, 0, 1, 1], [], []>} : vector<8x256xbf16>, vector<256x128xbf16>, vector<8x128xf32> -> vector<8x128xf32>
    %15 = arith.addf %11, %14 : vector<8x128xf32>
    %c0_12 = arith.constant 0 : index
    %c0_13 = arith.constant 0 : index
    %16 = vector.load %arg8[%c0_12, %c0_13] : memref<8x128xf32, #tpu.memory_space<vmem>>, vector<8x128xf32>
    tpu.vector_store %arg8[%c0_12, %c0_13], %15 {strides = array<i32>} : memref<8x128xf32, #tpu.memory_space<vmem>>, vector<8x128xf32>,
    %c1_i32 = arith.constant 1 : i32
    %17 = arith.cmpi eq, %arg1, %c1_i32 : i32
    %18 = arith.extui %17 : i1 to i32
    %c0_i32_14 = arith.constant 0 : i32
    %19 = arith.cmpi ne, %18, %c0_i32_14 : i32
    scf.if %19 {
      %c0_15 = arith.constant 0 : index
      %c0_16 = arith.constant 0 : index
      %20 = vector.load %arg8[%c0_15, %c0_16] : memref<8x128xf32, #tpu.memory_space<vmem>>, vector<8x128xf32>
      %c0_17 = arith.constant 0 : index
      %c0_18 = arith.constant 0 : index
      %21 = vector.load %arg6[%c0_17, %c0_18] : memref<1x128xf32, #tpu.memory_space<vmem>>, vector<1x128xf32>
      %22 = vector.broadcast %21 : vector<1x128xf32> to vector<8x128xf32>
      %23 = arith.addf %20, %22 : vector<8x128xf32>
      %c0_19 = arith.constant 0 : index
      %c0_20 = arith.constant 0 : index
      %24 = vector.load %arg7[%c0_19, %c0_20] : memref<8x128xf32, #tpu.memory_space<vmem>>, vector<8x128xf32>
      tpu.vector_store %arg7[%c0_19, %c0_20], %23 {strides = array<i32>} : memref<8x128xf32, #tpu.memory_space<vmem>>, vector<8x128xf32>,
    } else {
    }
    return
  }
  func.func @transform_0(%arg0: i32, %arg1: i32) -> (i32, i32) {
    %c0_i32 = arith.constant 0 : i32
    %c0_i32_0 = arith.constant 0 : i32
    return %arg0, %c0_i32 : i32, i32
  }
  func.func @transform_1(%arg0: i32, %arg1: i32) -> (i32, i32) {
    %c0_i32 = arith.constant 0 : i32
    %c0_i32_0 = arith.constant 0 : i32
    return %c0_i32, %arg1 : i32, i32
  }
  func.func @transform_2(%arg0: i32, %arg1: i32) -> (i32, i32) {
    %c0_i32 = arith.constant 0 : i32
    %c0_i32_0 = arith.constant 0 : i32
    return %c0_i32, %arg1 : i32, i32
  }
  func.func @transform_3(%arg0: i32, %arg1: i32) -> (i32, i32) {
    %c0_i32 = arith.constant 0 : i32
    %c0_i32_0 = arith.constant 0 : i32
    return %arg1, %c0_i32 : i32, i32
  }
  func.func @transform_4(%arg0: i32, %arg1: i32) -> (i32, i32) {
    %c0_i32 = arith.constant 0 : i32
    %c0_i32_0 = arith.constant 0 : i32
    %c0_i32_1 = arith.constant 0 : i32
    return %c0_i32, %c0_i32_0 : i32, i32
  }
  func.func @transform_5(%arg0: i32, %arg1: i32) -> (i32, i32) {
    %c0_i32 = arith.constant 0 : i32
    %c0_i32_0 = arith.constant 0 : i32
    return %arg0, %c0_i32 : i32, i32
  }
}

</mosaic_0001>

<bundles_post_ra>
// kernel: mnist_cnn_forward.3
= control target key start
LH: loop header
LB: loop body
LE: loop exit
PB: predicated region body
PF: predicated region fallthrough
CT: control target
= control target key end

     0   :  { %s2653_s21 = smov 0   ;;  %s3122_s0 = inlined_call_operand.vmem [shape: bf16[512,32], index: 0, kind: input, shape index: {}]   ;;  %s3123_s1 = inlined_call_operand.vmem [shape: bf16[512,32], index: 1, kind: input, shape index: {}]   ;;  %s3124_s2 = inlined_call_operand.vmem [shape: bf16[512,32], index: 2, kind: input, shape index: {}]   ;;  %s3125_s3 = inlined_call_operand.vmem [shape: bf16[512,32], index: 3, kind: input, shape index: {}]   ;;  %s3126_s4 = inlined_call_operand.vmem [shape: bf16[32,32], index: 4, kind: input, shape index: {}]   ;;  %s3127_s5 = inlined_call_operand.vmem [shape: f32[1,32], index: 5, kind: input, shape index: {}]   ;;  %s3128_s6 = inlined_call_operand.vmem [shape: bf16[512,32], index: 6, kind: output, shape index: {}]  }
   0x1 LB: > { %s2107_s22 = sadd.s32 4294967295, %s2616_s21   ;;  %p2111_p0 = scmp.ge.s32.totalorder %s2616_s21, 1  ;;  %s2616_s21 = sphi %s2653_s21, %s16_s21  }
   0x2   : > { %p246_p1 = scmp.lt.s32.totalorder %s2616_s21, 3 }
   0x4   : > { %p247_p2 = pnand %p2111_p0, %p246_p1 }
   0x5   : > { %v2543_v0 = vld [vmem:[%s3126_s4] sm:$0xff] (!%p247_p2)   ;;  %s2112_s25 = sshll.u32 (!%p247_p2), %s2107_s22, 5  ;;  %v2544_v1 = vld [vmem:[%s3126_s4 + $0x8] sm:$0xff] (!%p247_p2)   ;;  %vm457_vm0 = vcmask (!%p247_p2), 261120   ;;  %vm1982_vm1 = vcmask (!%p247_p2), 257024  }
   0x6   : > { %250 = sbr.rel (%p247_p2) target bundleno = 366 (0x16e), region = 44  ;;  %p292_p3 = scmp.lt.s32.totalorder (!%p247_p2), %s2112_s25, 63  ;;  %2391 = vmatprep.subr.bf16.mxu0 (!%p247_p2), %v2543_v0  ;;  %2427 = vmatprep.subr.bf16.mxu1 (!%p247_p2), %v2543_v0 }
   0x7   : > { %2392 = vmatpush3.bf16.msra.mxu0 (!%p247_p2), %v2543_v0  ;;  %2428 = vmatpush3.bf16.msra.mxu1 (!%p247_p2), %v2543_v0 }
   0x8   : > { %2393 = vmatprep.subr.bf16.mxu0 (!%p247_p2), %v2544_v1  ;;  %2429 = vmatprep.subr.bf16.mxu1 (!%p247_p2), %v2544_v1 }
   0xb   : > { %2394 = vmatpush3.bf16.msra.mxu0 (!%p247_p2), %v2544_v1  ;;  %2430 = vmatpush3.bf16.msra.mxu1 (!%p247_p2), %v2544_v1 }
   0xc   : > { %2463 = vmatprep.subr.bf16.mxu0 (!%p247_p2), %v2543_v0  ;;  %2499 = vmatprep.subr.bf16.mxu1 (!%p247_p2), %v2543_v0 }
   0xd   : > { %s3130_s25 = smov (!%p292_p3, %s2112_s25), 63 }
   0xe   : > { %s2667_s28 = sshll.u32 %s3130_s25, 2 }
   0xf   : > { %s2673_s7 = scalar_lea.vmem %s3122_s0, %s2667_s28  ;;  %s2679_s10 = scalar_lea.vmem %s3123_s1, %s2667_s28 }
  0x10   : > { %v2545_v2 = vld [vmem:[%s2673_s7] sm:$0xff]   ;;  %v2547_v4 = vld [vmem:[%s2673_s7 + $0x8] sm:$0xff]   ;;  %v2549_v6 = vld [vmem:[%s2673_s7 + $0x10] sm:$0xff]   ;;  %s2722_s13 = scalar_lea.vmem %s3124_s2, %s2667_s28  ;;  %s2729_s16 = scalar_lea.vmem %s3125_s3, %s2667_s28 }
  0x11   : > { %v2546_v3 = vld [vmem:[%s2679_s10] sm:$0xff]   ;;  %2395 = vmatprep.mubr.msk.bf16.mxu0 %vm457_vm0, %v2545_v2  ;;  %v2548_v5 = vld [vmem:[%s2679_s10 + $0x8] sm:$0xff]   ;;  %v2550_v7 = vld [vmem:[%s2679_s10 + $0x10] sm:$0xff]   ;;  %s2967_s22 = scalar_lea.vmem %s3128_s6, %s2667_s28 }
  0x12   : > { %2431 = vmatprep.mubr.msk.bf16.mxu1 %vm457_vm0, %v2546_v3  ;;  %2396 = vmatmul.mubr.msk.bf16.vlgmr.msra.gmra.mrb[0].mxu0 %vm457_vm0, %v2547_v4  ;;  %v2551_v8 = vld [vmem:[%s2673_s7 + $0x18] sm:$0xff]   ;;  %v2553_v10 = vld [vmem:[%s2673_s7 + $0x20] sm:$0xff]   ;;  %v2555_v12 = vld [vmem:[%s2673_s7 + $0x28] sm:$0xff]  }
  0x13   : > { %2432 = vmatmul.mubr.msk.bf16.vlgmr.msra.gmra.mrb[0].mxu1 %vm457_vm0, %v2548_v5  ;;  %2464 = vmatpush3.bf16.msra.mxu0 %v2543_v0  ;;  %v2552_v9 = vld [vmem:[%s2679_s10 + $0x18] sm:$0xff]   ;;  %v2554_v11 = vld [vmem:[%s2679_s10 + $0x20] sm:$0xff]   ;;  %v2556_v13 = vld [vmem:[%s2679_s10 + $0x28] sm:$0xff]  }
  0x14   : > { %2500 = vmatpush3.bf16.msra.mxu1 %v2543_v0  ;;  %2399 = vmatprep.mubr.msk.bf16.mxu0 %vm457_vm0, %v2549_v6  ;;  %v2557_v14 = vld [vmem:[%s2673_s7 + $0x30] sm:$0xff]   ;;  %v2559_v16 = vld [vmem:[%s2673_s7 + $0x38] sm:$0xff]   ;;  %v2561_v18 = vld [vmem:[%s2673_s7 + $0x40] sm:$0xff]  }
  0x15   : > { %2435 = vmatprep.mubr.msk.bf16.mxu1 %vm457_vm0, %v2550_v7  ;;  %2465 = vmatprep.subr.bf16.mxu0 %v2544_v1  ;;  %v2558_v15 = vld [vmem:[%s2679_s10 + $0x30] sm:$0xff]   ;;  %v2560_v17 = vld [vmem:[%s2679_s10 + $0x38] sm:$0xff]   ;;  %v2562_v19 = vld [vmem:[%s2679_s10 + $0x40] sm:$0xff]  }
  0x16   : > { %2501 = vmatprep.subr.bf16.mxu1 %v2544_v1  ;;  %v2563_v20 = vld [vmem:[%s2673_s7 + $0x48] sm:$0xff]   ;;  %v2565_v22 = vld [vmem:[%s2673_s7 + $0x50] sm:$0xff]   ;;  %v2567_v24 = vld [vmem:[%s2673_s7 + $0x58] sm:$0xff]  }
  0x17   : > { %2466 = vmatpush3.bf16.msra.mxu0 %v2544_v1  ;;  %v2564_v21 = vld [vmem:[%s2679_s10 + $0x48] sm:$0xff]   ;;  %v2566_v23 = vld [vmem:[%s2679_s10 + $0x50] sm:$0xff]   ;;  %v2568_v25 = vld [vmem:[%s2679_s10 + $0x58] sm:$0xff]  }
  0x18   : > { %2502 = vmatpush3.bf16.msra.mxu1 %v2544_v1  ;;  %v2569_v26 = vld [vmem:[%s2673_s7 + $0x60] sm:$0xff]   ;;  %v2571_v28 = vld [vmem:[%s2673_s7 + $0x68] sm:$0xff]   ;;  %v2573_v30 = vld [vmem:[%s2673_s7 + $0x70] sm:$0xff]  }
  0x19   : > { %v2570_v27 = vld [vmem:[%s2679_s10 + $0x60] sm:$0xff]   ;;  %v2572_v29 = vld [vmem:[%s2679_s10 + $0x68] sm:$0xff]   ;;  %v2574_v31 = vld [vmem:[%s2679_s10 + $0x70] sm:$0xff]  }
  0x1a   : > { %2400 = vmatmul.mubr.msk.bf16.gmra.mrb[4].mxu0 %vm457_vm0, %v2551_v8  ;;  %v2575_v32 = vld [vmem:[%s2673_s7 + $0x78] sm:$0xff]   ;;  %v2577_v34 = vld [vmem:[%s2722_s13] sm:$0xff]   ;;  %v2579_v36 = vld [vmem:[%s2722_s13 + $0x8] sm:$0xff]  }
  0x1b   : > { %2436 = vmatmul.mubr.msk.bf16.gmra.mrb[4].mxu1 %vm457_vm0, %v2552_v9  ;;  %2403 = vmatprep.mubr.msk.bf16.mxu0 %vm457_vm0, %v2553_v10  ;;  %v2576_v33 = vld [vmem:[%s2679_s10 + $0x78] sm:$0xff]   ;;  %v2578_v35 = vld [vmem:[%s2729_s16] sm:$0xff]   ;;  %v2580_v37 = vld [vmem:[%s2729_s16 + $0x8] sm:$0xff]  }
  0x1c   : > { %2439 = vmatprep.mubr.msk.bf16.mxu1 %vm457_vm0, %v2554_v11  ;;  %v2581_v38 = vld [vmem:[%s2722_s13 + $0x10] sm:$0xff]   ;;  %v2583_v40 = vld [vmem:[%s2722_s13 + $0x18] sm:$0xff]   ;;  %v2585_v42 = vld [vmem:[%s2722_s13 + $0x20] sm:$0xff]  }
  0x1d   : > { %v2582_v39 = vld [vmem:[%s2729_s16 + $0x10] sm:$0xff]   ;;  %v2584_v41 = vld [vmem:[%s2729_s16 + $0x18] sm:$0xff]   ;;  %v2586_v43 = vld [vmem:[%s2729_s16 + $0x20] sm:$0xff]  }
  0x1e   : > { %v2587_v44 = vld [vmem:[%s2722_s13 + $0x28] sm:$0xff]   ;;  %v2589_v46 = vld [vmem:[%s2722_s13 + $0x30] sm:$0xff]   ;;  %v2591_v48 = vld [vmem:[%s2722_s13 + $0x38] sm:$0xff]  }
  0x1f   : > { %v2588_v45 = vld [vmem:[%s2729_s16 + $0x28] sm:$0xff]   ;;  %v2590_v47 = vld [vmem:[%s2729_s16 + $0x30] sm:$0xff]   ;;  %v2592_v49 = vld [vmem:[%s2729_s16 + $0x38] sm:$0xff]  }
  0x20   : > { %v2593_v50 = vld [vmem:[%s2722_s13 + $0x40] sm:$0xff]   ;;  %v2595_v52 = vld [vmem:[%s2722_s13 + $0x48] sm:$0xff]   ;;  %v2597_v54 = vld [vmem:[%s2722_s13 + $0x50] sm:$0xff]  }
  0x21   : > { %v2594_v51 = vld [vmem:[%s2729_s16 + $0x40] sm:$0xff]   ;;  %v2596_v53 = vld [vmem:[%s2729_s16 + $0x48] sm:$0xff]   ;;  %v2598_v55 = vld [vmem:[%s2729_s16 + $0x50] sm:$0xff]  }
  0x22   : > { %2404 = vmatmul.mubr.msk.bf16.gmra.mrb[8].mxu0 %vm457_vm0, %v2555_v12  ;;  %v2599_v56 = vld [vmem:[%s2722_s13 + $0x58] sm:$0xff]   ;;  %v2601_v58 = vld [vmem:[%s2722_s13 + $0x60] sm:$0xff]   ;;  %v2603_v60 = vld [vmem:[%s2722_s13 + $0x68] sm:$0xff]  }
  0x23   : > { %2440 = vmatmul.mubr.msk.bf16.gmra.mrb[8].mxu1 %vm457_vm0, %v2556_v13  ;;  %2407 = vmatprep.mubr.msk.bf16.mxu0 %vm457_vm0, %v2557_v14  ;;  %v2600_v57 = vld [vmem:[%s2729_s16 + $0x58] sm:$0xff]   ;;  %v2602_v59 = vld [vmem:[%s2729_s16 + $0x60] sm:$0xff]   ;;  %v2604_v61 = vld [vmem:[%s2729_s16 + $0x68] sm:$0xff]  }
  0x24   : > { %2443 = vmatprep.mubr.msk.bf16.mxu1 %vm457_vm0, %v2558_v15  ;;  %v2605_v62 = vld [vmem:[%s2722_s13 + $0x70] sm:$0xff]   ;;  %v2607_v0 = vld [vmem:[%s2722_s13 + $0x78] sm:$0xff]   ;;  %v2824_v2 = vld [vmem:[%s3127_s5] ss:$0 sm:$0xff] }
  0x25   : > { %v2606_v63 = vld [vmem:[%s2729_s16 + $0x70] sm:$0xff]   ;;  %v2608_v1 = vld [vmem:[%s2729_s16 + $0x78] sm:$0xff]  }
  0x2a   : > { %2408 = vmatmul.mubr.msk.bf16.gmra.mrb[12].mxu0 %vm457_vm0, %v2559_v16 }
  0x2b   : > { %2444 = vmatmul.mubr.msk.bf16.gmra.mrb[12].mxu1 %vm457_vm0, %v2560_v17  ;;  %2411 = vmatprep.mubr.msk.bf16.mxu0 %vm457_vm0, %v2561_v18 }
  0x2c   : > { %2447 = vmatprep.mubr.msk.bf16.mxu1 %vm457_vm0, %v2562_v19 }
  0x32   : > { %2412 = vmatmul.mubr.msk.bf16.gmra.mrb[16].mxu0 %vm457_vm0, %v2563_v20 }
  0x33   : > { %2448 = vmatmul.mubr.msk.bf16.gmra.mrb[16].mxu1 %vm457_vm0, %v2564_v21  ;;  %2415 = vmatprep.mubr.msk.bf16.mxu0 %vm457_vm0, %v2565_v22 }
  0x34   : > { %2451 = vmatprep.mubr.msk.bf16.mxu1 %vm457_vm0, %v2566_v23 }
  0x3a   : > { %2416 = vmatmul.mubr.msk.bf16.gmra.mrb[20].mxu0 %vm457_vm0, %v2567_v24 }
  0x3b   : > { %2452 = vmatmul.mubr.msk.bf16.gmra.mrb[20].mxu1 %vm457_vm0, %v2568_v25  ;;  %2419 = vmatprep.mubr.msk.bf16.mxu0 %vm457_vm0, %v2569_v26 }
  0x3c   : > { %2455 = vmatprep.mubr.msk.bf16.mxu1 %vm457_vm0, %v2570_v27 }
  0x42   : > { %2420 = vmatmul.mubr.msk.bf16.gmra.mrb[24].mxu0 %vm457_vm0, %v2571_v28 }
  0x43   : > { %2456 = vmatmul.mubr.msk.bf16.gmra.mrb[24].mxu1 %vm457_vm0, %v2572_v29  ;;  %2423 = vmatprep.mubr.msk.bf16.mxu0 %vm457_vm0, %v2573_v30 }
  0x44   : > { %2459 = vmatprep.mubr.msk.bf16.mxu1 %vm457_vm0, %v2574_v31 }
  0x4a   : > { %2424 = vmatmul.mubr.msk.bf16.gmra.mrb[28].mxu0 %vm457_vm0, %v2575_v32 }
  0x4b   : > { %2460 = vmatmul.mubr.msk.bf16.gmra.mrb[28].mxu1 %vm457_vm0, %v2576_v33  ;;  %2467 = vmatprep.mubr.msk.bf16.mxu0 %vm457_vm0, %v2577_v34 }
  0x4c   : > { %2503 = vmatprep.mubr.msk.bf16.mxu1 %vm457_vm0, %v2578_v35 }
  0x52   : > { %2468 = vmatmul.mubr.msk.bf16.vlgmr.msra.gmra.mrb[32].mxu0 %vm457_vm0, %v2579_v36 }
  0x53   : > { %2504 = vmatmul.mubr.msk.bf16.vlgmr.msra.gmra.mrb[32].mxu1 %vm457_vm0, %v2580_v37  ;;  %2471 = vmatprep.mubr.msk.bf16.mxu0 %vm457_vm0, %v2581_v38 }
  0x54   : > { %2507 = vmatprep.mubr.msk.bf16.mxu1 %vm457_vm0, %v2582_v39 }
  0x5a   : > { %2472 = vmatmul.mubr.msk.bf16.gmra.mrb[36].mxu0 %vm457_vm0, %v2583_v40 }
  0x5b   : > { %2508 = vmatmul.mubr.msk.bf16.gmra.mrb[36].mxu1 %vm457_vm0, %v2584_v41  ;;  %2475 = vmatprep.mubr.msk.bf16.mxu0 %vm457_vm0, %v2585_v42 }
  0x5c   : > { %2511 = vmatprep.mubr.msk.bf16.mxu1 %vm457_vm0, %v2586_v43 }
  0x62   : > { %2476 = vmatmul.mubr.msk.bf16.gmra.mrb[40].mxu0 %vm457_vm0, %v2587_v44 }
  0x63   : > { %2512 = vmatmul.mubr.msk.bf16.gmra.mrb[40].mxu1 %vm457_vm0, %v2588_v45  ;;  %2479 = vmatprep.mubr.msk.bf16.mxu0 %vm457_vm0, %v2589_v46 }
  0x64   : > { %2515 = vmatprep.mubr.msk.bf16.mxu1 %vm457_vm0, %v2590_v47 }
  0x6a   : > { %2480 = vmatmul.mubr.msk.bf16.gmra.mrb[44].mxu0 %vm457_vm0, %v2591_v48 }
  0x6b   : > { %2516 = vmatmul.mubr.msk.bf16.gmra.mrb[44].mxu1 %vm457_vm0, %v2592_v49  ;;  %2483 = vmatprep.mubr.msk.bf16.mxu0 %vm457_vm0, %v2593_v50 }
  0x6c   : > { %2519 = vmatprep.mubr.msk.bf16.mxu1 %vm457_vm0, %v2594_v51 }
  0x72   : > { %2484 = vmatmul.mubr.msk.bf16.gmra.mrb[48].mxu0 %vm457_vm0, %v2595_v52 }
  0x73   : > { %2520 = vmatmul.mubr.msk.bf16.gmra.mrb[48].mxu1 %vm457_vm0, %v2596_v53  ;;  %2487 = vmatprep.mubr.msk.bf16.mxu0 %vm457_vm0, %v2597_v54 }
  0x74   : > { %2523 = vmatprep.mubr.msk.bf16.mxu1 %vm457_vm0, %v2598_v55 }
  0x7a   : > { %2488 = vmatmul.mubr.msk.bf16.gmra.mrb[52].mxu0 %vm457_vm0, %v2599_v56 }
  0x7b   : > { %2524 = vmatmul.mubr.msk.bf16.gmra.mrb[52].mxu1 %vm457_vm0, %v2600_v57  ;;  %2491 = vmatprep.mubr.msk.bf16.mxu0 %vm457_vm0, %v2601_v58 }
  0x7c   : > { %2527 = vmatprep.mubr.msk.bf16.mxu1 %vm457_vm0, %v2602_v59 }
  0x82   : > { %2492 = vmatmul.mubr.msk.bf16.gmra.mrb[56].mxu0 %vm457_vm0, %v2603_v60 }
  0x83   : > { %2528 = vmatmul.mubr.msk.bf16.gmra.mrb[56].mxu1 %vm457_vm0, %v2604_v61  ;;  %2495 = vmatprep.mubr.msk.bf16.mxu0 %vm457_vm0, %v2605_v62 }
  0x84   : > { %2531 = vmatprep.mubr.msk.bf16.mxu1 %vm457_vm0, %v2606_v63 }
  0x8a   : > { %2496 = vmatmul.mubr.msk.bf16.gmra.mrb[60].mxu0 %vm457_vm0, %v2607_v0 }
  0x8b   : > { %2532 = vmatmul.mubr.msk.bf16.gmra.mrb[60].mxu1 %vm457_vm0, %v2608_v1 }
  0xe5   : > { %v2397_v3 = vpop.f32.mrb[0].mxu0 }
  0xe6   : > { %v549_v4 = vadd.f32 %v2397_v3, %v2824_v2  ;;  %v2433_v5 = vpop.f32.mrb[0].mxu1  ;;  %v540_v6 = vpop.f32.mrb[1].mxu0 }
  0xe7   : > { %v902_v7 = vadd.f32 %v2433_v5, %v2824_v2  ;;  %v541_v8 = vadd.f32 %v2824_v2, %v540_v6  ;;  %v893_v9 = vpop.f32.mrb[1].mxu1  ;;  %v2398_v10 = vpop.f32.mrb[2].mxu0 }
  0xe8   : > { %v669_v11 = vmax.f32 %v549_v4, 0.0  ;;  %v894_v12 = vadd.f32 %v2824_v2, %v893_v9  ;;  %v552_v13 = vadd.f32 %v2398_v10, %v2824_v2  ;;  %v2434_v14 = vpop.f32.mrb[2].mxu1  ;;  %v543_v15 = vpop.f32.mrb[3].mxu0 }
  0xe9   : > { %v1022_v16 = vmax.f32 %v902_v7, 0.0  ;;  %v667_v17 = vmax.f32 %v541_v8, 0.0  ;;  %v905_v18 = vadd.f32 %v2434_v14, %v2824_v2  ;;  %v544_v19 = vadd.f32 %v2824_v2, %v543_v15  ;;  %v896_v20 = vpop.f32.mrb[3].mxu1 }
  0xea   : > { %v1020_v21 = vmax.f32 %v894_v12, 0.0  ;;  %v670_v22 = vmax.f32 %v552_v13, 0.0  ;;  %v897_v23 = vadd.f32 %v2824_v2, %v896_v20 }
  0xeb   : > { %v2834_v24 = vmax.f32 %v669_v11, %v1022_v16  ;;  %v1023_v25 = vmax.f32 %v905_v18, 0.0  ;;  %v668_v26 = vmax.f32 %v544_v19, 0.0 }
  0xec   : > { %v2836_v27 = vmax.f32 %v667_v17, %v1020_v21  ;;  %v1021_v28 = vmax.f32 %v897_v23, 0.0 }
  0xed   : > { %v2838_v29 = vmax.f32 %v670_v22, %v1023_v25  ;;  %v2401_v30 = vpop.f32.mrb[4].mxu0 }
  0xee   : > { %v2840_v31 = vmax.f32 %v668_v26, %v1021_v28  ;;  %v565_v32 = vadd.f32 %v2401_v30, %v2824_v2  ;;  %v2437_v33 = vpop.f32.mrb[4].mxu1  ;;  %v556_v34 = vpop.f32.mrb[5].mxu0 }
  0xef   : > { %v918_v35 = vadd.f32 %v2437_v33, %v2824_v2  ;;  %v557_v36 = vadd.f32 %v2824_v2, %v556_v34  ;;  %v909_v37 = vpop.f32.mrb[5].mxu1  ;;  %v2402_v38 = vpop.f32.mrb[6].mxu0 }
  0xf0   : > { %v673_v39 = vmax.f32 %v565_v32, 0.0  ;;  %v910_v40 = vadd.f32 %v2824_v2, %v909_v37  ;;  %v568_v41 = vadd.f32 %v2402_v38, %v2824_v2  ;;  %v2438_v42 = vpop.f32.mrb[6].mxu1  ;;  %v559_v43 = vpop.f32.mrb[7].mxu0 }
  0xf1   : > { %v1026_v44 = vmax.f32 %v918_v35, 0.0  ;;  %v671_v45 = vmax.f32 %v557_v36, 0.0  ;;  %v921_v46 = vadd.f32 %v2438_v42, %v2824_v2  ;;  %v560_v47 = vadd.f32 %v2824_v2, %v559_v43  ;;  %v912_v48 = vpop.f32.mrb[7].mxu1 }
  0xf2   : > { %v1024_v49 = vmax.f32 %v910_v40, 0.0  ;;  %v674_v50 = vmax.f32 %v568_v41, 0.0  ;;  %v913_v51 = vadd.f32 %v2824_v2, %v912_v48 }
  0xf3   : > { %v2850_v52 = vmax.f32 %v673_v39, %v1026_v44  ;;  %v1027_v53 = vmax.f32 %v921_v46, 0.0  ;;  %v672_v54 = vmax.f32 %v560_v47, 0.0 }
  0xf4   : > { %v2852_v55 = vmax.f32 %v671_v45, %v1024_v49  ;;  %v1025_v56 = vmax.f32 %v913_v51, 0.0 }
  0xf5   : > { %v2854_v57 = vmax.f32 %v674_v50, %v1027_v53  ;;  %v2405_v58 = vpop.f32.mrb[8].mxu0 }
  0xf6   : > { %v2856_v59 = vmax.f32 %v672_v54, %v1025_v56  ;;  %v581_v60 = vadd.f32 %v2405_v58, %v2824_v2  ;;  %v2441_v61 = vpop.f32.mrb[8].mxu1  ;;  %v572_v62 = vpop.f32.mrb[9].mxu0 }
  0xf7   : > { %v934_v63 = vadd.f32 %v2441_v61, %v2824_v2  ;;  %v573_v0 = vadd.f32 %v2824_v2, %v572_v62  ;;  %v925_v1 = vpop.f32.mrb[9].mxu1  ;;  %v2406_v3 = vpop.f32.mrb[10].mxu0 }
  0xf8   : > { %v677_v4 = vmax.f32 %v581_v60, 0.0  ;;  %v926_v5 = vadd.f32 %v2824_v2, %v925_v1  ;;  %v584_v6 = vadd.f32 %v2406_v3, %v2824_v2  ;;  %v2442_v7 = vpop.f32.mrb[10].mxu1  ;;  %v575_v8 = vpop.f32.mrb[11].mxu0 }
  0xf9   : > { %v1030_v9 = vmax.f32 %v934_v63, 0.0  ;;  %v675_v10 = vmax.f32 %v573_v0, 0.0  ;;  %v937_v11 = vadd.f32 %v2442_v7, %v2824_v2  ;;  %v576_v12 = vadd.f32 %v2824_v2, %v575_v8  ;;  %v928_v13 = vpop.f32.mrb[11].mxu1 }
  0xfa   : > { %v1028_v14 = vmax.f32 %v926_v5, 0.0  ;;  %v678_v15 = vmax.f32 %v584_v6, 0.0  ;;  %v929_v16 = vadd.f32 %v2824_v2, %v928_v13 }
  0xfb   : > { %v2866_v17 = vmax.f32 %v677_v4, %v1030_v9  ;;  %v1031_v18 = vmax.f32 %v937_v11, 0.0  ;;  %v676_v19 = vmax.f32 %v576_v12, 0.0 }
  0xfc   : > { %v2868_v20 = vmax.f32 %v675_v10, %v1028_v14  ;;  %v1029_v21 = vmax.f32 %v929_v16, 0.0 }
  0xfd   : > { %v2870_v22 = vmax.f32 %v678_v15, %v1031_v18  ;;  %v2409_v23 = vpop.f32.mrb[12].mxu0 }
  0xfe   : > { %v2872_v25 = vmax.f32 %v676_v19, %v1029_v21  ;;  %v597_v26 = vadd.f32 %v2409_v23, %v2824_v2  ;;  %v2445_v28 = vpop.f32.mrb[12].mxu1  ;;  %v588_v30 = vpop.f32.mrb[13].mxu0 }
  0xff   : > { %v950_v32 = vadd.f32 %v2445_v28, %v2824_v2  ;;  %v589_v33 = vadd.f32 %v2824_v2, %v588_v30  ;;  %v941_v34 = vpop.f32.mrb[13].mxu1  ;;  %v2410_v35 = vpop.f32.mrb[14].mxu0 }
 0x100   : > { %v681_v36 = vmax.f32 %v597_v26, 0.0  ;;  %v942_v37 = vadd.f32 %v2824_v2, %v941_v34  ;;  %v600_v38 = vadd.f32 %v2410_v35, %v2824_v2  ;;  %v2446_v39 = vpop.f32.mrb[14].mxu1  ;;  %v591_v40 = vpop.f32.mrb[15].mxu0 }
 0x101   : > { %v1034_v41 = vmax.f32 %v950_v32, 0.0  ;;  %v679_v42 = vmax.f32 %v589_v33, 0.0  ;;  %v953_v43 = vadd.f32 %v2446_v39, %v2824_v2  ;;  %v592_v44 = vadd.f32 %v2824_v2, %v591_v40  ;;  %v944_v45 = vpop.f32.mrb[15].mxu1 }
 0x102   : > { %v1032_v46 = vmax.f32 %v942_v37, 0.0  ;;  %v682_v47 = vmax.f32 %v600_v38, 0.0  ;;  %v945_v48 = vadd.f32 %v2824_v2, %v944_v45 }
 0x103   : > { %v2882_v49 = vmax.f32 %v681_v36, %v1034_v41  ;;  %v1035_v50 = vmax.f32 %v953_v43, 0.0  ;;  %v680_v51 = vmax.f32 %v592_v44, 0.0 }
 0x104   : > { %v2884_v53 = vmax.f32 %v679_v42, %v1032_v46  ;;  %v1033_v54 = vmax.f32 %v945_v48, 0.0 }
 0x105   : > { %v2886_v56 = vmax.f32 %v682_v47, %v1035_v50  ;;  %v2413_v58 = vpop.f32.mrb[16].mxu0 }
 0x106   : > { %v2888_v60 = vmax.f32 %v680_v51, %v1033_v54  ;;  %v613_v61 = vadd.f32 %v2413_v58, %v2824_v2  ;;  %v2449_v62 = vpop.f32.mrb[16].mxu1  ;;  %v604_v63 = vpop.f32.mrb[17].mxu0 }
 0x107   : > { %v966_v0 = vadd.f32 %v2449_v62, %v2824_v2  ;;  %v605_v1 = vadd.f32 %v2824_v2, %v604_v63  ;;  %v957_v3 = vpop.f32.mrb[17].mxu1  ;;  %v2414_v4 = vpop.f32.mrb[18].mxu0 }
 0x108   : > { %v685_v5 = vmax.f32 %v613_v61, 0.0  ;;  %v958_v6 = vadd.f32 %v2824_v2, %v957_v3  ;;  %v616_v7 = vadd.f32 %v2414_v4, %v2824_v2  ;;  %v2450_v8 = vpop.f32.mrb[18].mxu1  ;;  %v607_v9 = vpop.f32.mrb[19].mxu0 }
 0x109   : > { %v1038_v10 = vmax.f32 %v966_v0, 0.0  ;;  %v683_v11 = vmax.f32 %v605_v1, 0.0  ;;  %v969_v12 = vadd.f32 %v2450_v8, %v2824_v2  ;;  %v608_v13 = vadd.f32 %v2824_v2, %v607_v9  ;;  %v960_v14 = vpop.f32.mrb[19].mxu1 }
 0x10a   : > { %v1036_v15 = vmax.f32 %v958_v6, 0.0  ;;  %v686_v16 = vmax.f32 %v616_v7, 0.0  ;;  %v961_v18 = vadd.f32 %v2824_v2, %v960_v14 }
 0x10b   : > { %v2898_v19 = vmax.f32 %v685_v5, %v1038_v10  ;;  %v1039_v21 = vmax.f32 %v969_v12, 0.0  ;;  %v684_v23 = vmax.f32 %v608_v13, 0.0 }
 0x10c   : > { %v2900_v26 = vmax.f32 %v683_v11, %v1036_v15  ;;  %v1037_v28 = vmax.f32 %v961_v18, 0.0 }
 0x10d   : > { %v2902_v30 = vmax.f32 %v686_v16, %v1039_v21  ;;  %v2417_v32 = vpop.f32.mrb[20].mxu0 }
 0x10e   : > { %v2904_v33 = vmax.f32 %v684_v23, %v1037_v28  ;;  %v629_v34 = vadd.f32 %v2417_v32, %v2824_v2  ;;  %v2453_v35 = vpop.f32.mrb[20].mxu1  ;;  %v620_v36 = vpop.f32.mrb[21].mxu0 }
 0x10f   : > { %v982_v37 = vadd.f32 %v2453_v35, %v2824_v2  ;;  %v621_v38 = vadd.f32 %v2824_v2, %v620_v36  ;;  %v973_v39 = vpop.f32.mrb[21].mxu1  ;;  %v2418_v40 = vpop.f32.mrb[22].mxu0 }
 0x110   : > { %v689_v41 = vmax.f32 %v629_v34, 0.0  ;;  %v974_v42 = vadd.f32 %v2824_v2, %v973_v39  ;;  %v632_v43 = vadd.f32 %v2418_v40, %v2824_v2  ;;  %v2454_v44 = vpop.f32.mrb[22].mxu1  ;;  %v623_v45 = vpop.f32.mrb[23].mxu0 }
 0x111   : > { %v1042_v46 = vmax.f32 %v982_v37, 0.0  ;;  %v687_v47 = vmax.f32 %v621_v38, 0.0  ;;  %v985_v48 = vadd.f32 %v2454_v44, %v2824_v2  ;;  %v624_v50 = vadd.f32 %v2824_v2, %v623_v45  ;;  %v976_v51 = vpop.f32.mrb[23].mxu1 }
 0x112   : > { %v1040_v54 = vmax.f32 %v974_v42, 0.0  ;;  %v690_v58 = vmax.f32 %v632_v43, 0.0  ;;  %v977_v61 = vadd.f32 %v2824_v2, %v976_v51 }
 0x113   : > { %v2914_v62 = vmax.f32 %v689_v41, %v1042_v46  ;;  %v1043_v63 = vmax.f32 %v985_v48, 0.0  ;;  %v688_v0 = vmax.f32 %v624_v50, 0.0 }
 0x114   : > { %v2916_v1 = vmax.f32 %v687_v47, %v1040_v54  ;;  %v1041_v3 = vmax.f32 %v977_v61, 0.0 }
 0x115   : > { %v2918_v4 = vmax.f32 %v690_v58, %v1043_v63  ;;  %v2421_v5 = vpop.f32.mrb[24].mxu0 }
 0x116   : > { %v2920_v6 = vmax.f32 %v688_v0, %v1041_v3  ;;  %v645_v7 = vadd.f32 %v2421_v5, %v2824_v2  ;;  %v2457_v8 = vpop.f32.mrb[24].mxu1  ;;  %v636_v9 = vpop.f32.mrb[25].mxu0 }
 0x117   : > { %v998_v10 = vadd.f32 %v2457_v8, %v2824_v2  ;;  %v637_v11 = vadd.f32 %v2824_v2, %v636_v9  ;;  %v989_v12 = vpop.f32.mrb[25].mxu1  ;;  %v2422_v13 = vpop.f32.mrb[26].mxu0 }
 0x118   : > { %v693_v14 = vmax.f32 %v645_v7, 0.0  ;;  %v990_v15 = vadd.f32 %v2824_v2, %v989_v12  ;;  %v648_v16 = vadd.f32 %v2422_v13, %v2824_v2  ;;  %v2458_v18 = vpop.f32.mrb[26].mxu1  ;;  %v639_v21 = vpop.f32.mrb[27].mxu0 }
 0x119   : > { %v1046_v23 = vmax.f32 %v998_v10, 0.0  ;;  %v691_v28 = vmax.f32 %v637_v11, 0.0  ;;  %v1001_v32 = vadd.f32 %v2458_v18, %v2824_v2  ;;  %v640_v34 = vadd.f32 %v2824_v2, %v639_v21  ;;  %v992_v35 = vpop.f32.mrb[27].mxu1 }
 0x11a   : > { %v1044_v36 = vmax.f32 %v990_v15, 0.0  ;;  %v694_v37 = vmax.f32 %v648_v16, 0.0  ;;  %v993_v38 = vadd.f32 %v2824_v2, %v992_v35 }
 0x11b   : > { %v2930_v39 = vmax.f32 %v693_v14, %v1046_v23  ;;  %v1047_v40 = vmax.f32 %v1001_v32, 0.0  ;;  %v692_v41 = vmax.f32 %v640_v34, 0.0 }
 0x11c   : > { %v2932_v42 = vmax.f32 %v691_v28, %v1044_v36  ;;  %v1045_v43 = vmax.f32 %v993_v38, 0.0 }
 0x11d   : > { %v2934_v44 = vmax.f32 %v694_v37, %v1047_v40  ;;  %v2425_v45 = vpop.f32.mrb[28].mxu0 }
 0x11e   : > { %v2936_v46 = vmax.f32 %v692_v41, %v1045_v43  ;;  %v661_v47 = vadd.f32 %v2425_v45, %v2824_v2  ;;  %v2461_v48 = vpop.f32.mrb[28].mxu1  ;;  %v652_v50 = vpop.f32.mrb[29].mxu0 }
 0x11f   : > { %v1014_v51 = vadd.f32 %v2461_v48, %v2824_v2  ;;  %v653_v54 = vadd.f32 %v2824_v2, %v652_v50  ;;  %v1005_v58 = vpop.f32.mrb[29].mxu1  ;;  %v2426_v61 = vpop.f32.mrb[30].mxu0 }
 0x120   : > { %v697_v63 = vmax.f32 %v661_v47, 0.0  ;;  %v1006_v0 = vadd.f32 %v2824_v2, %v1005_v58  ;;  %v664_v3 = vadd.f32 %v2426_v61, %v2824_v2  ;;  %v2462_v5 = vpop.f32.mrb[30].mxu1  ;;  %v655_v7 = vpop.f32.mrb[31].mxu0 }
 0x121   : > { %v1050_v8 = vmax.f32 %v1014_v51, 0.0  ;;  %v695_v9 = vmax.f32 %v653_v54, 0.0  ;;  %v1017_v10 = vadd.f32 %v2462_v5, %v2824_v2  ;;  %v656_v11 = vadd.f32 %v2824_v2, %v655_v7  ;;  %v1008_v12 = vpop.f32.mrb[31].mxu1 }
 0x122   : > { %v1048_v13 = vmax.f32 %v1006_v0, 0.0  ;;  %v698_v14 = vmax.f32 %v664_v3, 0.0  ;;  %v1009_v15 = vadd.f32 %v2824_v2, %v1008_v12 }
 0x123   : > { %v2946_v16 = vmax.f32 %v697_v63, %v1050_v8  ;;  %v1051_v18 = vmax.f32 %v1017_v10, 0.0  ;;  %v696_v21 = vmax.f32 %v656_v11, 0.0 }
 0x124   : > { %v2948_v23 = vmax.f32 %v695_v9, %v1048_v13  ;;  %v1049_v28 = vmax.f32 %v1009_v15, 0.0 }
 0x125   : > { %v2950_v32 = vmax.f32 %v698_v14, %v1051_v18  ;;  %v2469_v34 = vpop.f32.mrb[32].mxu0 }
 0x126   : > { %v2952_v35 = vmax.f32 %v696_v21, %v1049_v28  ;;  %v1287_v36 = vadd.f32 %v2469_v34, %v2824_v2  ;;  %v2505_v37 = vpop.f32.mrb[32].mxu1  ;;  %v1278_v38 = vpop.f32.mrb[33].mxu0 }
 0x127   : > { %v1640_v40 = vadd.f32 %v2505_v37, %v2824_v2  ;;  %v1279_v41 = vadd.f32 %v2824_v2, %v1278_v38  ;;  %v1631_v43 = vpop.f32.mrb[33].mxu1  ;;  %v2470_v45 = vpop.f32.mrb[34].mxu0 }
 0x128   : > { %v1407_v47 = vmax.f32 %v1287_v36, 0.0  ;;  %v1632_v48 = vadd.f32 %v2824_v2, %v1631_v43  ;;  %v1290_v50 = vadd.f32 %v2470_v45, %v2824_v2  ;;  %v2506_v51 = vpop.f32.mrb[34].mxu1  ;;  %v1281_v54 = vpop.f32.mrb[35].mxu0 }
 0x129   : > { %v1760_v58 = vmax.f32 %v1640_v40, 0.0  ;;  %v1405_v61 = vmax.f32 %v1279_v41, 0.0  ;;  %v1643_v63 = vadd.f32 %v2506_v51, %v2824_v2  ;;  %v1282_v0 = vadd.f32 %v2824_v2, %v1281_v54  ;;  %v1634_v3 = vpop.f32.mrb[35].mxu1 }
 0x12a   : > { %v1758_v5 = vmax.f32 %v1632_v48, 0.0  ;;  %v1408_v7 = vmax.f32 %v1290_v50, 0.0  ;;  %v1635_v8 = vadd.f32 %v2824_v2, %v1634_v3 }
 0x12b   : > { %v1792_v9 = vmax.f32 %v1407_v47, %v1760_v58  ;;  %v1761_v10 = vmax.f32 %v1643_v63, 0.0  ;;  %v1406_v11 = vmax.f32 %v1282_v0, 0.0 }
 0x12c   : > { %v1790_v12 = vmax.f32 %v1405_v61, %v1758_v5  ;;  %v1759_v13 = vmax.f32 %v1635_v8, 0.0 }
 0x12d   : > { %v1824_v14 = vmax.f32 %v2834_v24, %v1792_v9  ;;  %v1793_v15 = vmax.f32 %v1408_v7, %v1761_v10  ;;  %v2473_v18 = vpop.f32.mrb[36].mxu0 }
 0x12e   : > { %v1822_v21 = vmax.f32 %v2836_v27, %v1790_v12  ;;  %v1791_v28 = vmax.f32 %v1406_v11, %v1759_v13  ;;  %v1303_v34 = vadd.f32 %v2473_v18, %v2824_v2  ;;  %v2509_v36 = vpop.f32.mrb[36].mxu1  ;;  %v1294_v37 = vpop.f32.mrb[37].mxu0 }
 0x12f   : > { %v2289_v38 = vpack.c.bf16 %v1824_v14, %v1824_v14  ;;  %v1825_v40 = vmax.f32 %v2838_v29, %v1793_v15  ;;  %v1656_v24 = vadd.f32 %v2509_v36, %v2824_v2  ;;  %v1295_v41 = vadd.f32 %v2824_v2, %v1294_v37  ;;  %v1647_v43 = vpop.f32.mrb[37].mxu1  ;;  %v2474_v45 = vpop.f32.mrb[38].mxu0 }
 0x130   : > { %v2287_v47 = vpack.c.bf16 %v1822_v21, %v1822_v21  ;;  %v1823_v48 = vmax.f32 %v2840_v31, %v1791_v28  ;;  %v1411_v27 = vmax.f32 %v1303_v34, 0.0  ;;  %v1648_v50 = vadd.f32 %v2824_v2, %v1647_v43  ;;  %v2510_v51 = vpop.f32.mrb[38].mxu1  ;;  %v1297_v54 = vpop.f32.mrb[39].mxu0 }
 0x131   : > { %1985 = vst.msk [vmem:[%s2967_s22 + $0x8] sm:$0xf] %vm1982_vm1, %v2289_v38  ;;  %v2290_v29 = vpack.c.bf16 %v1825_v40, %v1825_v40  ;;  %v1764_v58 = vmax.f32 %v1656_v24, 0.0  ;;  %v1409_v61 = vmax.f32 %v1295_v41, 0.0  ;;  %v1306_v63 = vadd.f32 %v2474_v45, %v2824_v2  ;;  %v1650_v0 = vpop.f32.mrb[39].mxu1 }
 0x132   : > { %1983 = vst.msk [vmem:[%s2967_s22] sm:$0xf] %vm1982_vm1, %v2287_v47  ;;  %v2288_v3 = vpack.c.bf16 %v1823_v48, %v1823_v48  ;;  %v1762_v5 = vmax.f32 %v1648_v50, 0.0  ;;  %v1659_v31 = vadd.f32 %v2510_v51, %v2824_v2  ;;  %v1298_v7 = vadd.f32 %v2824_v2, %v1297_v54 }
 0x133   : > { %1986 = vst.msk [vmem:[%s2967_s22 + $0xc] sm:$0xf] %vm1982_vm1, %v2290_v29  ;;  %v1796_v8 = vmax.f32 %v1411_v27, %v1764_v58  ;;  %v1412_v9 = vmax.f32 %v1306_v63, 0.0  ;;  %v1651_v10 = vadd.f32 %v2824_v2, %v1650_v0 }
 0x134   : > { %1984 = vst.msk [vmem:[%s2967_s22 + $0x4] sm:$0xf] %vm1982_vm1, %v2288_v3  ;;  %v1794_v11 = vmax.f32 %v1409_v61, %v1762_v5  ;;  %v1765_v12 = vmax.f32 %v1659_v31, 0.0  ;;  %v1410_v13 = vmax.f32 %v1298_v7, 0.0 }
 0x135   : > { %v1828_v14 = vmax.f32 %v2850_v52, %v1796_v8  ;;  %v1763_v15 = vmax.f32 %v1651_v10, 0.0  ;;  %v2477_v18 = vpop.f32.mrb[40].mxu0 }
 0x136   : > { %v1826_v21 = vmax.f32 %v2852_v55, %v1794_v11  ;;  %v1797_v28 = vmax.f32 %v1412_v9, %v1765_v12  ;;  %v1319_v34 = vadd.f32 %v2477_v18, %v2824_v2  ;;  %v2513_v36 = vpop.f32.mrb[40].mxu1  ;;  %v1310_v37 = vpop.f32.mrb[41].mxu0 }
 0x137   : > { %v2293_v38 = vpack.c.bf16 %v1828_v14, %v1828_v14  ;;  %v1795_v40 = vmax.f32 %v1410_v13, %v1763_v15  ;;  %v1672_v24 = vadd.f32 %v2513_v36, %v2824_v2  ;;  %v1311_v41 = vadd.f32 %v2824_v2, %v1310_v37  ;;  %v1663_v43 = vpop.f32.mrb[41].mxu1  ;;  %v2478_v45 = vpop.f32.mrb[42].mxu0 }
 0x138   : > { %v2291_v52 = vpack.c.bf16 %v1826_v21, %v1826_v21  ;;  %v1829_v47 = vmax.f32 %v2854_v57, %v1797_v28  ;;  %v1415_v48 = vmax.f32 %v1319_v34, 0.0  ;;  %v1664_v55 = vadd.f32 %v2824_v2, %v1663_v43  ;;  %v2514_v27 = vpop.f32.mrb[42].mxu1  ;;  %v1313_v50 = vpop.f32.mrb[43].mxu0 }
 0x139   : > { %1989 = vst.msk [vmem:[%s2967_s22 + $0x18] sm:$0xf] %vm1982_vm1, %v2293_v38  ;;  %v1827_v51 = vmax.f32 %v2856_v59, %v1795_v40  ;;  %v1768_v54 = vmax.f32 %v1672_v24, 0.0  ;;  %v1413_v29 = vmax.f32 %v1311_v41, 0.0  ;;  %v1322_v58 = vadd.f32 %v2478_v45, %v2824_v2  ;;  %v1666_v61 = vpop.f32.mrb[43].mxu1 }
 0x13a   : > { %1987 = vst.msk [vmem:[%s2967_s22 + $0x10] sm:$0xf] %vm1982_vm1, %v2291_v52  ;;  %v2294_v63 = vpack.c.bf16 %v1829_v47, %v1829_v47  ;;  %v1766_v57 = vmax.f32 %v1664_v55, 0.0  ;;  %v1675_v0 = vadd.f32 %v2514_v27, %v2824_v2  ;;  %v1314_v3 = vadd.f32 %v2824_v2, %v1313_v50 }
 0x13b   : > { %v2292_v5 = vpack.c.bf16 %v1827_v51, %v1827_v51  ;;  %v1800_v31 = vmax.f32 %v1415_v48, %v1768_v54  ;;  %v1416_v7 = vmax.f32 %v1322_v58, 0.0  ;;  %v1667_v8 = vadd.f32 %v2824_v2, %v1666_v61 }
 0x13c   : > { %1990 = vst.msk [vmem:[%s2967_s22 + $0x1c] sm:$0xf] %vm1982_vm1, %v2294_v63  ;;  %v1798_v59 = vmax.f32 %v1413_v29, %v1766_v57  ;;  %v1769_v9 = vmax.f32 %v1675_v0, 0.0  ;;  %v1414_v10 = vmax.f32 %v1314_v3, 0.0 }
 0x13d   : > { %1988 = vst.msk [vmem:[%s2967_s22 + $0x14] sm:$0xf] %vm1982_vm1, %v2292_v5  ;;  %v1832_v11 = vmax.f32 %v2866_v17, %v1800_v31  ;;  %v1767_v12 = vmax.f32 %v1667_v8, 0.0  ;;  %v2481_v13 = vpop.f32.mrb[44].mxu0 }
 0x13e   : > { %v1830_v14 = vmax.f32 %v2868_v20, %v1798_v59  ;;  %v1801_v15 = vmax.f32 %v1416_v7, %v1769_v9  ;;  %v1335_v18 = vadd.f32 %v2481_v13, %v2824_v2  ;;  %v2517_v21 = vpop.f32.mrb[44].mxu1  ;;  %v1326_v28 = vpop.f32.mrb[45].mxu0 }
 0x13f   : > { %v2297_v34 = vpack.c.bf16 %v1832_v11, %v1832_v11  ;;  %v1799_v36 = vmax.f32 %v1414_v10, %v1767_v12  ;;  %v1688_v37 = vadd.f32 %v2517_v21, %v2824_v2  ;;  %v1327_v38 = vadd.f32 %v2824_v2, %v1326_v28  ;;  %v1679_v40 = vpop.f32.mrb[45].mxu1  ;;  %v2482_v24 = vpop.f32.mrb[46].mxu0 }
 0x140   : > { %v2295_v17 = vpack.c.bf16 %v1830_v14, %v1830_v14  ;;  %v1833_v41 = vmax.f32 %v2870_v22, %v1801_v15  ;;  %v1419_v43 = vmax.f32 %v1335_v18, 0.0  ;;  %v1680_v20 = vadd.f32 %v2824_v2, %v1679_v40  ;;  %v2518_v45 = vpop.f32.mrb[46].mxu1  ;;  %v1329_v52 = vpop.f32.mrb[47].mxu0 }
 0x141   : > { %1993 = vst.msk [vmem:[%s2967_s22 + $0x28] sm:$0xf] %vm1982_vm1, %v2297_v34  ;;  %v1831_v47 = vmax.f32 %v2872_v25, %v1799_v36  ;;  %v1772_v48 = vmax.f32 %v1688_v37, 0.0  ;;  %v1417_v55 = vmax.f32 %v1327_v38, 0.0  ;;  %v1338_v27 = vadd.f32 %v2482_v24, %v2824_v2  ;;  %v1682_v50 = vpop.f32.mrb[47].mxu1 }
 0x142   : > { %1991 = vst.msk [vmem:[%s2967_s22 + $0x20] sm:$0xf] %vm1982_vm1, %v2295_v17  ;;  %v2298_v51 = vpack.c.bf16 %v1833_v41, %v1833_v41  ;;  %v1770_v22 = vmax.f32 %v1680_v20, 0.0  ;;  %v1691_v54 = vadd.f32 %v2518_v45, %v2824_v2  ;;  %v1330_v29 = vadd.f32 %v2824_v2, %v1329_v52 }
 0x143   : > { %v2296_v58 = vpack.c.bf16 %v1831_v47, %v1831_v47  ;;  %v1804_v61 = vmax.f32 %v1419_v43, %v1772_v48  ;;  %v1420_v63 = vmax.f32 %v1338_v27, 0.0  ;;  %v1683_v57 = vadd.f32 %v2824_v2, %v1682_v50 }
 0x144   : > { %1994 = vst.msk [vmem:[%s2967_s22 + $0x2c] sm:$0xf] %vm1982_vm1, %v2298_v51  ;;  %v1802_v25 = vmax.f32 %v1417_v55, %v1770_v22  ;;  %v1773_v0 = vmax.f32 %v1691_v54, 0.0  ;;  %v1418_v3 = vmax.f32 %v1330_v29, 0.0 }
 0x145   : > { %1992 = vst.msk [vmem:[%s2967_s22 + $0x24] sm:$0xf] %vm1982_vm1, %v2296_v58  ;;  %v1836_v5 = vmax.f32 %v2882_v49, %v1804_v61  ;;  %v1771_v31 = vmax.f32 %v1683_v57, 0.0  ;;  %v2485_v7 = vpop.f32.mrb[48].mxu0 }
 0x146   : > { %v1834_v8 = vmax.f32 %v2884_v53, %v1802_v25  ;;  %v1805_v59 = vmax.f32 %v1420_v63, %v1773_v0  ;;  %v1351_v9 = vadd.f32 %v2485_v7, %v2824_v2  ;;  %v2521_v10 = vpop.f32.mrb[48].mxu1  ;;  %v1342_v11 = vpop.f32.mrb[49].mxu0 }
 0x147   : > { %v2301_v12 = vpack.c.bf16 %v1836_v5, %v1836_v5  ;;  %v1803_v13 = vmax.f32 %v1418_v3, %v1771_v31  ;;  %v1704_v14 = vadd.f32 %v2521_v10, %v2824_v2  ;;  %v1343_v15 = vadd.f32 %v2824_v2, %v1342_v11  ;;  %v1695_v18 = vpop.f32.mrb[49].mxu1  ;;  %v2486_v21 = vpop.f32.mrb[50].mxu0 }
 0x148   : > { %v2299_v49 = vpack.c.bf16 %v1834_v8, %v1834_v8  ;;  %v1837_v28 = vmax.f32 %v2886_v56, %v1805_v59  ;;  %v1423_v34 = vmax.f32 %v1351_v9, 0.0  ;;  %v1696_v53 = vadd.f32 %v2824_v2, %v1695_v18  ;;  %v2522_v36 = vpop.f32.mrb[50].mxu1  ;;  %v1345_v37 = vpop.f32.mrb[51].mxu0 }
 0x149   : > { %1997 = vst.msk [vmem:[%s2967_s22 + $0x38] sm:$0xf] %vm1982_vm1, %v2301_v12  ;;  %v1835_v38 = vmax.f32 %v2888_v60, %v1803_v13  ;;  %v1776_v40 = vmax.f32 %v1704_v14, 0.0  ;;  %v1421_v24 = vmax.f32 %v1343_v15, 0.0  ;;  %v1354_v17 = vadd.f32 %v2486_v21, %v2824_v2  ;;  %v1698_v41 = vpop.f32.mrb[51].mxu1 }
 0x14a   : > { %1995 = vst.msk [vmem:[%s2967_s22 + $0x30] sm:$0xf] %vm1982_vm1, %v2299_v49  ;;  %v2302_v43 = vpack.c.bf16 %v1837_v28, %v1837_v28  ;;  %v1774_v56 = vmax.f32 %v1696_v53, 0.0  ;;  %v1707_v20 = vadd.f32 %v2522_v36, %v2824_v2  ;;  %v1346_v45 = vadd.f32 %v2824_v2, %v1345_v37 }
 0x14b   : > { %v2300_v52 = vpack.c.bf16 %v1835_v38, %v1835_v38  ;;  %v1808_v47 = vmax.f32 %v1423_v34, %v1776_v40  ;;  %v1424_v48 = vmax.f32 %v1354_v17, 0.0  ;;  %v1699_v55 = vadd.f32 %v2824_v2, %v1698_v41 }
 0x14c   : > { %1998 = vst.msk [vmem:[%s2967_s22 + $0x3c] sm:$0xf] %vm1982_vm1, %v2302_v43  ;;  %v1806_v60 = vmax.f32 %v1421_v24, %v1774_v56  ;;  %v1777_v27 = vmax.f32 %v1707_v20, 0.0  ;;  %v1422_v50 = vmax.f32 %v1346_v45, 0.0 }
 0x14d   : > { %1996 = vst.msk [vmem:[%s2967_s22 + $0x34] sm:$0xf] %vm1982_vm1, %v2300_v52  ;;  %v1840_v51 = vmax.f32 %v2898_v19, %v1808_v47  ;;  %v1775_v22 = vmax.f32 %v1699_v55, 0.0  ;;  %v2489_v54 = vpop.f32.mrb[52].mxu0 }
 0x14e   : > { %v1838_v29 = vmax.f32 %v2900_v26, %v1806_v60  ;;  %v1809_v58 = vmax.f32 %v1424_v48, %v1777_v27  ;;  %v1367_v61 = vadd.f32 %v2489_v54, %v2824_v2  ;;  %v2525_v63 = vpop.f32.mrb[52].mxu1  ;;  %v1358_v57 = vpop.f32.mrb[53].mxu0 }
 0x14f   : > { %v2305_v25 = vpack.c.bf16 %v1840_v51, %v1840_v51  ;;  %v1807_v0 = vmax.f32 %v1422_v50, %v1775_v22  ;;  %v1720_v3 = vadd.f32 %v2525_v63, %v2824_v2  ;;  %v1359_v5 = vadd.f32 %v2824_v2, %v1358_v57  ;;  %v1711_v31 = vpop.f32.mrb[53].mxu1  ;;  %v2490_v7 = vpop.f32.mrb[54].mxu0 }
 0x150   : > { %v2303_v19 = vpack.c.bf16 %v1838_v29, %v1838_v29  ;;  %v1841_v8 = vmax.f32 %v2902_v30, %v1809_v58  ;;  %v1427_v59 = vmax.f32 %v1367_v61, 0.0  ;;  %v1712_v26 = vadd.f32 %v2824_v2, %v1711_v31  ;;  %v2526_v9 = vpop.f32.mrb[54].mxu1  ;;  %v1361_v10 = vpop.f32.mrb[55].mxu0 }
 0x151   : > { %2001 = vst.msk [vmem:[%s2967_s22 + $0x48] sm:$0xf] %vm1982_vm1, %v2305_v25  ;;  %v1839_v11 = vmax.f32 %v2904_v33, %v1807_v0  ;;  %v1780_v12 = vmax.f32 %v1720_v3, 0.0  ;;  %v1425_v13 = vmax.f32 %v1359_v5, 0.0  ;;  %v1370_v14 = vadd.f32 %v2490_v7, %v2824_v2  ;;  %v1714_v15 = vpop.f32.mrb[55].mxu1 }
 0x152   : > { %1999 = vst.msk [vmem:[%s2967_s22 + $0x40] sm:$0xf] %vm1982_vm1, %v2303_v19  ;;  %v2306_v18 = vpack.c.bf16 %v1841_v8, %v1841_v8  ;;  %v1778_v30 = vmax.f32 %v1712_v26, 0.0  ;;  %v1723_v21 = vadd.f32 %v2526_v9, %v2824_v2  ;;  %v1362_v49 = vadd.f32 %v2824_v2, %v1361_v10 }
 0x153   : > { %v2304_v28 = vpack.c.bf16 %v1839_v11, %v1839_v11  ;;  %v1812_v34 = vmax.f32 %v1427_v59, %v1780_v12  ;;  %v1428_v53 = vmax.f32 %v1370_v14, 0.0  ;;  %v1715_v36 = vadd.f32 %v2824_v2, %v1714_v15 }
 0x154   : > { %2002 = vst.msk [vmem:[%s2967_s22 + $0x4c] sm:$0xf] %vm1982_vm1, %v2306_v18  ;;  %v1810_v33 = vmax.f32 %v1425_v13, %v1778_v30  ;;  %v1781_v37 = vmax.f32 %v1723_v21, 0.0  ;;  %v1426_v38 = vmax.f32 %v1362_v49, 0.0 }
 0x155   : > { %2000 = vst.msk [vmem:[%s2967_s22 + $0x44] sm:$0xf] %vm1982_vm1, %v2304_v28  ;;  %v1844_v40 = vmax.f32 %v2914_v62, %v1812_v34  ;;  %v1779_v24 = vmax.f32 %v1715_v36, 0.0  ;;  %v2493_v17 = vpop.f32.mrb[56].mxu0 }
 0x156   : > { %v1842_v41 = vmax.f32 %v2916_v1, %v1810_v33  ;;  %v1813_v43 = vmax.f32 %v1428_v53, %v1781_v37  ;;  %v1383_v56 = vadd.f32 %v2493_v17, %v2824_v2  ;;  %v2529_v20 = vpop.f32.mrb[56].mxu1  ;;  %v1374_v45 = vpop.f32.mrb[57].mxu0  ;;  %v2609_v17 = vld [vmem:[%s3127_s5] ss:$0 sm:$0xff] }
 0x157   : > { %v2309_v52 = vpack.c.bf16 %v1844_v40, %v1844_v40  ;;  %v1811_v47 = vmax.f32 %v1426_v38, %v1779_v24  ;;  %v1736_v48 = vadd.f32 %v2529_v20, %v2824_v2  ;;  %v1375_v55 = vadd.f32 %v2824_v2, %v1374_v45  ;;  %v1727_v60 = vpop.f32.mrb[57].mxu1  ;;  %v2494_v27 = vpop.f32.mrb[58].mxu0 }
 0x158   : > { %v2307_v62 = vpack.c.bf16 %v1842_v41, %v1842_v41  ;;  %v1845_v50 = vmax.f32 %v2918_v4, %v1813_v43  ;;  %v1431_v51 = vmax.f32 %v1383_v56, 0.0  ;;  %v1728_v1 = vadd.f32 %v2824_v2, %v1727_v60  ;;  %v2530_v22 = vpop.f32.mrb[58].mxu1  ;;  %v1377_v54 = vpop.f32.mrb[59].mxu0 }
 0x159   : > { %2005 = vst.msk [vmem:[%s2967_s22 + $0x58] sm:$0xf] %vm1982_vm1, %v2309_v52  ;;  %v1843_v29 = vmax.f32 %v2920_v6, %v1811_v47  ;;  %v1784_v58 = vmax.f32 %v1736_v48, 0.0  ;;  %v1429_v61 = vmax.f32 %v1375_v55, 0.0  ;;  %v1386_v63 = vadd.f32 %v2494_v27, %v2824_v2  ;;  %v1730_v57 = vpop.f32.mrb[59].mxu1 }
 0x15a   : > { %2003 = vst.msk [vmem:[%s2967_s22 + $0x50] sm:$0xf] %vm1982_vm1, %v2307_v62  ;;  %v2310_v25 = vpack.c.bf16 %v1845_v50, %v1845_v50  ;;  %v1782_v4 = vmax.f32 %v1728_v1, 0.0  ;;  %v1739_v0 = vadd.f32 %v2530_v22, %v2824_v2  ;;  %v1378_v3 = vadd.f32 %v2824_v2, %v1377_v54 }
 0x15b   : > { %v2308_v5 = vpack.c.bf16 %v1843_v29, %v1843_v29  ;;  %v1816_v31 = vmax.f32 %v1431_v51, %v1784_v58  ;;  %v1432_v7 = vmax.f32 %v1386_v63, 0.0  ;;  %v1731_v19 = vadd.f32 %v2824_v2, %v1730_v57 }
 0x15c   : > { %2006 = vst.msk [vmem:[%s2967_s22 + $0x5c] sm:$0xf] %vm1982_vm1, %v2310_v25  ;;  %v1814_v6 = vmax.f32 %v1429_v61, %v1782_v4  ;;  %v1785_v8 = vmax.f32 %v1739_v0, 0.0  ;;  %v1430_v59 = vmax.f32 %v1378_v3, 0.0 }
 0x15d   : > { %2004 = vst.msk [vmem:[%s2967_s22 + $0x54] sm:$0xf] %vm1982_vm1, %v2308_v5  ;;  %v1848_v26 = vmax.f32 %v2930_v39, %v1816_v31  ;;  %v1783_v9 = vmax.f32 %v1731_v19, 0.0  ;;  %v2497_v10 = vpop.f32.mrb[60].mxu0 }
 0x15e   : > { %v1846_v11 = vmax.f32 %v2932_v42, %v1814_v6  ;;  %v1817_v12 = vmax.f32 %v1432_v7, %v1785_v8  ;;  %v1399_v13 = vadd.f32 %v2497_v10, %v2824_v2  ;;  %v2533_v14 = vpop.f32.mrb[60].mxu1  ;;  %v1390_v15 = vpop.f32.mrb[61].mxu0 }
 0x15f   : > { %v2313_v18 = vpack.c.bf16 %v1848_v26, %v1848_v26  ;;  %v1815_v30 = vmax.f32 %v1430_v59, %v1783_v9  ;;  %v1752_v21 = vadd.f32 %v2533_v14, %v2824_v2  ;;  %v1391_v49 = vadd.f32 %v2824_v2, %v1390_v15  ;;  %v1743_v28 = vpop.f32.mrb[61].mxu1  ;;  %v2498_v34 = vpop.f32.mrb[62].mxu0 }
 0x160   : > { %v2311_v39 = vpack.c.bf16 %v1846_v11, %v1846_v11  ;;  %v1849_v53 = vmax.f32 %v2934_v44, %v1817_v12  ;;  %v1435_v36 = vmax.f32 %v1399_v13, 0.0  ;;  %v1744_v42 = vadd.f32 %v2824_v2, %v1743_v28  ;;  %v2534_v33 = vpop.f32.mrb[62].mxu1  ;;  %v1393_v37 = vpop.f32.mrb[63].mxu0 }
 0x161   : > { %2009 = vst.msk [vmem:[%s2967_s22 + $0x68] sm:$0xf] %vm1982_vm1, %v2313_v18  ;;  %v1847_v38 = vmax.f32 %v2936_v46, %v1815_v30  ;;  %v1788_v40 = vmax.f32 %v1752_v21, 0.0  ;;  %v1433_v24 = vmax.f32 %v1391_v49, 0.0  ;;  %v1402_v41 = vadd.f32 %v2609_v17, %v2498_v34  ;;  %v1746_v43 = vpop.f32.mrb[63].mxu1 }
 0x162   : > { %2007 = vst.msk [vmem:[%s2967_s22 + $0x60] sm:$0xf] %vm1982_vm1, %v2311_v39  ;;  %v2314_v44 = vpack.c.bf16 %v1849_v53, %v1849_v53  ;;  %v1786_v2 = vmax.f32 %v1744_v42, 0.0  ;;  %v1755_v56 = vadd.f32 %v2609_v17, %v2534_v33  ;;  %v1394_v20 = vadd.f32 %v2609_v17, %v1393_v37 }
 0x163   : > { %v2312_v45 = vpack.c.bf16 %v1847_v38, %v1847_v38  ;;  %v1820_v52 = vmax.f32 %v1435_v36, %v1788_v40  ;;  %v1436_v47 = vmax.f32 %v1402_v41, 0.0  ;;  %v1747_v46 = vadd.f32 %v2609_v17, %v1746_v43 }
 0x164   : > { %2010 = vst.msk [vmem:[%s2967_s22 + $0x6c] sm:$0xf] %vm1982_vm1, %v2314_v44  ;;  %v1818_v48 = vmax.f32 %v1433_v24, %v1786_v2  ;;  %v1789_v55 = vmax.f32 %v1755_v56, 0.0  ;;  %v1434_v60 = vmax.f32 %v1394_v20, 0.0 }
 0x165   : > { %2008 = vst.msk [vmem:[%s2967_s22 + $0x64] sm:$0xf] %vm1982_vm1, %v2312_v45  ;;  %v1852_v27 = vmax.f32 %v2946_v16, %v1820_v52  ;;  %v1787_v62 = vmax.f32 %v1747_v46, 0.0 }
 0x166   : > { %v1850_v50 = vmax.f32 %v2948_v23, %v1818_v48  ;;  %v1821_v51 = vmax.f32 %v1436_v47, %v1789_v55 }
 0x167   : > { %v2317_v1 = vpack.c.bf16 %v1852_v27, %v1852_v27  ;;  %v1819_v22 = vmax.f32 %v1434_v60, %v1787_v62 }
 0x168   : > { %v2315_v54 = vpack.c.bf16 %v1850_v50, %v1850_v50  ;;  %v1853_v29 = vmax.f32 %v2950_v32, %v1821_v51 }
 0x169   : > { %2013 = vst.msk [vmem:[%s2967_s22 + $0x78] sm:$0xf] %vm1982_vm1, %v2317_v1  ;;  %v1851_v58 = vmax.f32 %v2952_v35, %v1819_v22 }
 0x16a   : > { %2011 = vst.msk [vmem:[%s2967_s22 + $0x70] sm:$0xf] %vm1982_vm1, %v2315_v54  ;;  %v2318_v61 = vpack.c.bf16 %v1853_v29, %v1853_v29 }
 0x16b   : > { %v2316_v63 = vpack.c.bf16 %v1851_v58, %v1851_v58 }
 0x16c   : > { %2014 = vst.msk [vmem:[%s2967_s22 + $0x7c] sm:$0xf] %vm1982_vm1, %v2318_v61 }
 0x16d   : > { %2012 = vst.msk [vmem:[%s2967_s22 + $0x74] sm:$0xf] %vm1982_vm1, %v2316_v63 }
 0x16e PF: > { %s16_s21 = sadd.s32 1, %s2616_s21  }
 0x16f   : > { %p13_p4 = scmp.ge.s32.totalorder %s16_s21, 4  }
 0x171   :  { %15 = sbr.rel (!%p13_p4) target bundleno = 1 (0x1), region = 83 }

// kernel: mnist_cnn_forward.4
= control target key start
LH: loop header
LB: loop body
LE: loop exit
PB: predicated region body
PF: predicated region fallthrough
CT: control target
= control target key end

     0   :  { %s4296_s15 = smov 0   ;;  %s4298_s16 = smov 0   ;;  %s5052_s0 = inlined_call_operand.vmem [shape: bf16[2,18,10,128], index: 0, kind: input, shape index: {}]   ;;  %s5053_s1 = inlined_call_operand.vmem [shape: bf16[2,18,10,128], index: 1, kind: input, shape index: {}]   ;;  %s5054_s2 = inlined_call_operand.vmem [shape: bf16[3200,64], index: 2, kind: input, shape index: {}]   ;;  %s5055_s3 = inlined_call_operand.vmem [shape: f32[1,64], index: 3, kind: input, shape index: {}]   ;;  %s5056_s4 = inlined_call_operand.vmem [shape: bf16[2,7,7,64], index: 4, kind: output, shape index: {}]  }
   0x1   :  { %s4300_s17 = smov 0   ;;  %s4302_s18 = smov 0  }
   0x2   :  { %s4304_s19 = smov 0  }
   0x3 LB: > { %s23_s20 = sadd.s32 1, %s4261_s17  ;;  %s26_s21 = sadd.s32 1, %s4265_s18  ;;  %s4269_s19 = sphi %s4304_s19, %s14_s19   ;;  %s4265_s18 = sphi %s4302_s18, %s5060_s18   ;;  %s4261_s17 = sphi %s4300_s17, %s5059_s17   ;;  %s4257_s16 = sphi %s4298_s16, %s5058_s16   ;;  %s4253_s15 = sphi %s4296_s15, %s5057_s15  }
   0x4   : > { %p24_p0 = scmp.ge.s32.totalorder %s23_s20, 7  ;;  %p3283_p1 = scmp.ge.s32.totalorder %s4269_s19, 1 }
   0x5   : > { %p186_p2 = scmp.lt.s32.totalorder %s4269_s19, 15 }
   0x6   : > { %s5062_s20 = smov (%p24_p0, %s23_s20), 0  ;;  %s5064_s21 = smov (!%p24_p0, %s26_s21), %s4265_s18 }
   0x7   : > { %p187_p3 = pnand %p3283_p1, %p186_p2  ;;  %p28_p4 = scmp.ge.s32.totalorder %s5064_s21, 2 }
   0x8   : > { %v4001_v0 = vld [vmem:[%s5054_s2 + $0x40] sm:$0xff] (!%p187_p3)   ;;  %v4005_v4 = vld [vmem:[%s5054_s2 + $0x48] sm:$0xff] (!%p187_p3)   ;;  %v4009_v8 = vld [vmem:[%s5054_s2 + $0x50] sm:$0xff] (!%p187_p3)   ;;  %p220_p5 = scmp.lt.s32.totalorder (!%p187_p3), %s4257_s16, 1  ;;  %s3581_s9 = sshll.u32 (!%p187_p3), %s4253_s15, 4  ;;  %vm3137_vm0 = vcmask (!%p187_p3), 519168  }
   0x9   : > { %s5066_s21 = smov (%p28_p4, %s5064_s21), 0  ;;  %190 = sbr.rel (%p187_p3) target bundleno = 461 (0x1cd), region = 36 }
   0xa   : > { %v4002_v1 = vld [vmem:[%s5054_s2] sm:$0xff] (!%p187_p3)   ;;  %3593 = vmatprep.subr.bf16.mxu0 (!%p187_p3), %v4001_v0  ;;  %v4006_v5 = vld [vmem:[%s5054_s2 + $0x8] sm:$0xff] (!%p187_p3)   ;;  %v4010_v9 = vld [vmem:[%s5054_s2 + $0x10] sm:$0xff] (!%p187_p3)   ;;  %p232_p6 = scmp.lt.s32.totalorder (!%p187_p3), %s4253_s15, 6  ;;  %vm3138_vm1 = vsmask.f32 (!%p187_p3), 3328 }
   0xb   : > { %v4003_v2 = vld [vmem:[%s5054_s2 + $0xc0] sm:$0xff] (!%p187_p3)   ;;  %3594 = vmatpush3.bf16.msra.mxu0 (!%p187_p3), %v4002_v1  ;;  %v4007_v6 = vld [vmem:[%s5054_s2 + $0xc8] sm:$0xff] (!%p187_p3)   ;;  %v4011_v10 = vld [vmem:[%s5054_s2 + $0xd0] sm:$0xff] (!%p187_p3)  }
   0xc   : > { %v4004_v3 = vld [vmem:[%s5054_s2 + $0x80] sm:$0xff] (!%p187_p3)   ;;  %3621 = vmatprep.subr.bf16.mxu1 (!%p187_p3), %v4003_v2  ;;  %3595 = vmatprep.subr.bf16.mxu0 (!%p187_p3), %v4005_v4  ;;  %v4008_v7 = vld [vmem:[%s5054_s2 + $0x88] sm:$0xff] (!%p187_p3)   ;;  %v4012_v11 = vld [vmem:[%s5054_s2 + $0x90] sm:$0xff] (!%p187_p3)  }
   0xd   : > { %3622 = vmatpush3.bf16.msra.mxu1 (!%p187_p3), %v4004_v3  ;;  %v4013_v12 = vld [vmem:[%s5054_s2 + $0x58] sm:$0xff] (!%p187_p3)   ;;  %v4017_v16 = vld [vmem:[%s5054_s2 + $0x60] sm:$0xff] (!%p187_p3)   ;;  %v4021_v20 = vld [vmem:[%s5054_s2 + $0x68] sm:$0xff] (!%p187_p3)  }
   0xe   : > { %3623 = vmatprep.subr.bf16.mxu1 (!%p187_p3), %v4007_v6  ;;  %v4014_v13 = vld [vmem:[%s5054_s2 + $0x18] sm:$0xff] (!%p187_p3)   ;;  %v4018_v17 = vld [vmem:[%s5054_s2 + $0x20] sm:$0xff] (!%p187_p3)   ;;  %v4022_v21 = vld [vmem:[%s5054_s2 + $0x28] sm:$0xff] (!%p187_p3)  }
   0xf   : > { %3596 = vmatpush3.bf16.msra.mxu0 (!%p187_p3), %v4006_v5  ;;  %v4015_v14 = vld [vmem:[%s5054_s2 + $0xd8] sm:$0xff] (!%p187_p3)   ;;  %v4019_v18 = vld [vmem:[%s5054_s2 + $0xe0] sm:$0xff] (!%p187_p3)   ;;  %v4023_v22 = vld [vmem:[%s5054_s2 + $0xe8] sm:$0xff] (!%p187_p3)  }
  0x10   : > { %3597 = vmatprep.subr.bf16.mxu0 %v4009_v8  ;;  %v4016_v15 = vld [vmem:[%s5054_s2 + $0x98] sm:$0xff]   ;;  %s5068_s16 = smov (!%p220_p5, %s4257_s16), 1  ;;  %v4020_v19 = vld [vmem:[%s5054_s2 + $0xa0] sm:$0xff]   ;;  %v4024_v23 = vld [vmem:[%s5054_s2 + $0xa8] sm:$0xff]   ;;  %s5070_s15 = smov (!%p232_p6, %s4253_s15), 6 }
  0x11   : > { %3624 = vmatpush3.bf16.msra.mxu1 %v4008_v7  ;;  %s3959_s28 = smul.u32 144, %s5068_s16  ;;  %v4025_v24 = vld [vmem:[%s5054_s2 + $0x70] sm:$0xff]   ;;  %v4029_v28 = vld [vmem:[%s5054_s2 + $0x78] sm:$0xff]   ;;  %v4036_v41 = vld [vmem:[%s5054_s2 + $0x140] sm:$0xff]  }
  0x12   : > { %3625 = vmatprep.subr.bf16.mxu1 %v4011_v10  ;;  %v4026_v25 = vld [vmem:[%s5054_s2 + $0x30] sm:$0xff]   ;;  %v4030_v29 = vld [vmem:[%s5054_s2 + $0x38] sm:$0xff]   ;;  %v4038_v45 = vld [vmem:[%s5054_s2 + $0x1c0] sm:$0xff]   ;;  %s3960_s10 = smul.u32 7, %s5068_s16 }
  0x13   : > { %3598 = vmatpush3.bf16.msra.mxu0 %v4010_v9  ;;  %s224_s14 = scalar_lea.vmem %s5052_s0, %s3959_s28  ;;  %s229_s24 = scalar_lea.vmem %s5053_s1, %s3959_s28  ;;  %v4027_v26 = vld [vmem:[%s5054_s2 + $0xf0] sm:$0xff]   ;;  %v4031_v30 = vld [vmem:[%s5054_s2 + $0xf8] sm:$0xff]   ;;  %v4037_v58 = vld [vmem:[%s5054_s2 + $0x100] sm:$0xff]  }
  0x14   : > { %3599 = vmatprep.subr.bf16.mxu0 %v4013_v12  ;;  %v4028_v27 = vld [vmem:[%s5054_s2 + $0xb0] sm:$0xff]   ;;  %s4429_s6 = scalar_lea.vmem %s224_s14, %s3581_s9  ;;  %s4431_s28 = scalar_lea.vmem %s229_s24, %s3581_s9  ;;  %v4034_v38 = vld [vmem:[%s5054_s2 + $0xb8] sm:$0xff]   ;;  %v4039_v59 = vld [vmem:[%s5054_s2 + $0x180] sm:$0xff]  }
  0x15   : > { %3626 = vmatpush3.bf16.msra.mxu1 %v4012_v11  ;;  %v243_v31 = vld [vmem:[%s4429_s6] sm:$0xf]  ;;  %v244_v32 = vld [vmem:[%s4429_s6 + $0x4] sm:$0x1]  ;;  %v4040_v60 = vld [vmem:[%s5054_s2 + $0x148] sm:$0xff]   ;;  %s235_s11 = sadd.s32 %s3960_s10, %s5070_s15 }
  0x16   : > { %3627 = vmatprep.subr.bf16.mxu1 %v4015_v14  ;;  %v247_v33 = vld [vmem:[%s4431_s28] sm:$0xf]  ;;  %v248_v34 = vld [vmem:[%s4431_s28 + $0x4] sm:$0x1]  ;;  %v3291_v35 = vcombine.low %v243_v31, %v244_v32  ;;  %249 = vst [vmem:[#allocation2] sm:$0xf] %v243_v31  ;;  %vm3139_vm2 = vmand %vm3137_vm0, %vm3138_vm1 }
  0x17   : > { %3600 = vmatpush3.bf16.msra.mxu0 %v4014_v13  ;;  %250 = vst [vmem:[#allocation2 + $0x8] sm:$0xf] %v247_v33  ;;  %v3293_v36 = vcombine.low %v247_v33, %v247_v33  ;;  %v3292_v37 = vcombine.low %v247_v33, %v248_v34  ;;  %v4042_v63 = vld [vmem:[%s5054_s2 + $0x1c8] sm:$0xff]   ;;  %v4044_v4 = vld [vmem:[%s5054_s2 + $0x150] sm:$0xff]   ;;  %v4048_v8 = vld [vmem:[%s5054_s2 + $0x158] sm:$0xff]   ;;  %s3286_s9 = sshll.u32 %s235_s11, 2 }
  0x18   : > { %3601 = vmatprep.subr.bf16.mxu0 %v4017_v16  ;;  %v257_v39 = vshrl.u32 %v3291_v35, 16  ;;  %v259_v40 = vshll.u32 %v3291_v35, 16  ;;  %v295_v42 = vrot.slane %v3291_v35, 5  ;;  %v279_v56 = vrot.slane %v3291_v35, 1  ;;  %v4041_v2 = vld [vmem:[%s5054_s2 + $0x108] sm:$0xff]   ;;  %v4046_v5 = vld [vmem:[%s5054_s2 + $0x1d0] sm:$0xff]   ;;  %s237_s16 = scalar_lea.vmem %s5056_s4, %s3286_s9 }
  0x19   : > { %3628 = vmatpush3.bf16.msra.mxu1 %v4016_v15  ;;  %284 = vst [vmem:[#allocation2] sm:$0xf0] %v3293_v36  ;;  %v271_v43 = vshrl.u32 %v3292_v37, 16  ;;  %v273_v44 = vshll.u32 %v3292_v37, 16  ;;  %v298_v57 = vrot.slane %v3292_v37, 5  ;;  %v4043_v3 = vld [vmem:[%s5054_s2 + $0x188] sm:$0xff]  }
  0x1a   : > { %3629 = vmatprep.subr.bf16.mxu1 %v4019_v18  ;;  %v285_v46 = vrot.slane %v257_v39, 4  ;;  %v286_v47 = vrot.slane %v259_v40, 5  ;;  %297 = vst [vmem:[#allocation2 + $0x18] sm:$0xf0] %v295_v42  ;;  %v261_v48 = vrot.slane %v259_v40, 1  ;;  %v4045_v6 = vld [vmem:[%s5054_s2 + $0x110] sm:$0xff]  }
  0x1b   : > { %3602 = vmatpush3.bf16.msra.mxu0 %v4018_v17  ;;  %v275_v49 = vrot.slane %v273_v44, 1  ;;  %v290_v50 = vrot.slane %v271_v43, 4  ;;  %v291_v51 = vrot.slane %v273_v44, 5  ;;  %281 = vst [vmem:[#allocation2 + $0x20] sm:$0xf] %v279_v56  ;;  %v4047_v7 = vld [vmem:[%s5054_s2 + $0x190] sm:$0xff]  }
  0x1c   : > { %3603 = vmatprep.subr.bf16.mxu0 %v4021_v20  ;;  %v287_v52 = vor.u32 %v286_v47, %v285_v46  ;;  %v262_v53 = vor.u32 %v261_v48, %v257_v39  ;;  %300 = vst [vmem:[#allocation2 + $0x20] sm:$0xf0] %v298_v57  ;;  %v4049_v9 = vld [vmem:[%s5054_s2 + $0x118] sm:$0xff]   ;;  %v3338_v11 = vld [vmem:[%s4429_s6 + $0x8] sm:$0xf]  ;;  %v4052_v16 = vld [vmem:[%s5054_s2 + $0x160] sm:$0xff]  }
  0x1d   : > { %3630 = vmatpush3.bf16.msra.mxu1 %v4020_v19  ;;  %v276_v54 = vor.u32 %v275_v49, %v271_v43  ;;  %v292_v55 = vor.u32 %v291_v51, %v290_v50  ;;  %v4050_v10 = vld [vmem:[%s5054_s2 + $0x1d8] sm:$0xff]   ;;  %v3339_v13 = vld [vmem:[%s4429_s6 + $0xc] sm:$0x1]  ;;  %v3340_v14 = vld [vmem:[%s4431_s28 + $0x8] sm:$0xf] }
  0x1e   : > { %3631 = vmatprep.subr.bf16.mxu1 %v4023_v22  ;;  %289 = vst [vmem:[#allocation2 + $0x8] sm:$0xf0] %v287_v52  ;;  %264 = vst [vmem:[#allocation2 + $0x10] sm:$0xf] %v262_v53  ;;  %v4051_v12 = vld [vmem:[%s5054_s2 + $0x198] sm:$0xff]   ;;  %v3342_v17 = vcombine.low %v3338_v11, %v3339_v13  ;;  %v3344_v19 = vcombine.low %v3340_v14, %v3340_v14  ;;  %v4054_v20 = vld [vmem:[%s5054_s2 + $0x1e0] sm:$0xff]  }
  0x1f   : > { %3604 = vmatpush3.bf16.msra.mxu0 %v4022_v21  ;;  %278 = vst [vmem:[#allocation2 + $0x18] sm:$0xf] %v276_v54  ;;  %294 = vst [vmem:[#allocation2 + $0x10] sm:$0xf0] %v292_v55  ;;  %v3341_v15 = vld [vmem:[%s4431_s28 + $0xc] sm:$0x1] }
  0x20   : > { %3605 = vmatprep.subr.bf16.mxu0 %v4025_v24  ;;  %v835_v61 = vld [vmem:[#allocation2] sm:$0xff]  ;;  %553 = vst [vmem:[#allocation2 + $0xc8] sm:$0xf] %v3338_v11  ;;  %554 = vst [vmem:[#allocation2 + $0xd0] sm:$0xf] %v3340_v14  ;;  %v3343_v18 = vcombine.low %v3340_v14, %v3341_v15  ;;  %v561_v22 = vshrl.u32 %v3342_v17, 16 }
  0x21   : > { %3632 = vmatpush3.bf16.msra.mxu1 %v4024_v23  ;;  %v4053_v21 = vld [vmem:[%s5054_s2 + $0x120] sm:$0xff]   ;;  %v563_v23 = vshll.u32 %v3342_v17, 16  ;;  %588 = vst [vmem:[#allocation2 + $0xc8] sm:$0xf0] %v3344_v19  ;;  %v4056_v32 = vld [vmem:[%s5054_s2 + $0x168] sm:$0xff]   ;;  %v583_v40 = vrot.slane %v3342_v17, 1 }
  0x22   : > { %3633 = vmatprep.subr.bf16.mxu1 %v4027_v26  ;;  %v575_v24 = vshrl.u32 %v3343_v18, 16  ;;  %v4055_v26 = vld [vmem:[%s5054_s2 + $0x1a0] sm:$0xff]   ;;  %v4061_v33 = vld [vmem:[%s5054_s2 + $0x1e8] sm:$0xff]   ;;  %v602_v42 = vrot.slane %v3343_v18, 5  ;;  %v4063_v44 = vld [vmem:[%s5054_s2 + $0x170] sm:$0xff]  }
  0x23   : > { %3606 = vmatpush3.bf16.msra.mxu0 %v4026_v25  ;;  %v577_v25 = vshll.u32 %v3343_v18, 16  ;;  %v565_v31 = vrot.slane %v563_v23, 1  ;;  %v4062_v43 = vld [vmem:[%s5054_s2 + $0x1a8] sm:$0xff]   ;;  %585 = vst [vmem:[#allocation2 + $0xe8] sm:$0xf] %v583_v40  ;;  %v4064_v47 = vld [vmem:[%s5054_s2 + $0x130] sm:$0xff]  }
  0x24   : > { %3607 = vmatprep.subr.bf16.mxu0 %v4029_v28  ;;  %v589_v28 = vrot.slane %v561_v22, 4  ;;  %v594_v34 = vrot.slane %v575_v24, 4  ;;  %604 = vst [vmem:[#allocation2 + $0xe8] sm:$0xf0] %v602_v42  ;;  %v3296_v46 = vld [vmem:[%s4429_s6 + $0x8] sm:$0xf] }
  0x25   : > { %3634 = vmatpush3.bf16.msra.mxu1 %v4028_v27  ;;  %v836_v62 = vld [vmem:[#allocation2 + $0x8] sm:$0xff]  ;;  %v599_v27 = vrot.slane %v3342_v17, 5  ;;  %v595_v35 = vrot.slane %v577_v25, 5  ;;  %v4066_v48 = vld [vmem:[%s5054_s2 + $0x1b0] sm:$0xff]   ;;  %311 = vst [vmem:[#allocation2 + $0x28] sm:$0xf] %v3296_v46 }
  0x26   : > { %3635 = vmatprep.subr.bf16.mxu1 %v4031_v30  ;;  %2524 = vmatprep.mubr.bf16.mxu0 %v836_v62  ;;  %v838_v0 = vld [vmem:[#allocation2 + $0x18] sm:$0xff]  ;;  %v837_v1 = vld [vmem:[#allocation2 + $0x10] sm:$0xff]  ;;  %v579_v30 = vrot.slane %v577_v25, 1  ;;  %v3297_v49 = vld [vmem:[%s4429_s6 + $0xc] sm:$0x1] }
  0x27   : > { %3608 = vmatpush3.bf16.msra.mxu0 %v4030_v29  ;;  %2573 = vmatprep.mubr.bf16.mxu1 %v838_v0  ;;  %v590_v29 = vrot.slane %v563_v23, 5  ;;  %601 = vst [vmem:[#allocation2 + $0xe0] sm:$0xf0] %v599_v27  ;;  %v596_v39 = vor.u32 %v595_v35, %v594_v34  ;;  %v3300_v50 = vld [vmem:[%s4431_s28 + $0x8] sm:$0xf]  ;;  %v3302_v53 = vcombine.low %v3296_v46, %v3297_v49  ;;  %v4067_v56 = vld [vmem:[%s5054_s2 + $0x178] sm:$0xff]  }
  0x28   : > { %3649 = vmatprep.subr.bf16.mxu0 %v4036_v41  ;;  %v580_v37 = vor.u32 %v579_v30, %v575_v24  ;;  %v4059_v41 = vld [vmem:[%s5054_s2 + $0x128] sm:$0xff]   ;;  %v3304_v55 = vcombine.low %v3300_v50, %v3300_v50  ;;  %312 = vst [vmem:[#allocation2 + $0x30] sm:$0xf] %v3300_v50  ;;  %v839_v11 = vld [vmem:[#allocation2 + $0x20] sm:$0xff]  ;;  %v3347_v23 = vld [vmem:[%s4431_s28 + $0x10] sm:$0xf] }
  0x29   : > { %3636 = vmatpush3.bf16.msra.mxu1 %v4034_v38  ;;  %v591_v36 = vor.u32 %v590_v29, %v589_v28  ;;  %v566_v38 = vor.u32 %v565_v31, %v561_v22  ;;  %598 = vst [vmem:[#allocation2 + $0xd8] sm:$0xf0] %v596_v39  ;;  %v3301_v51 = vld [vmem:[%s4431_s28 + $0xc] sm:$0x1]  ;;  %v4076_v13 = vld [vmem:[%s5054_s2 + $0x2c0] sm:$0xff]   ;;  %v341_v14 = vrot.slane %v3302_v53, 1 }
  0x2a   : > { %3677 = vmatprep.subr.bf16.mxu1 %v4038_v45  ;;  %2525 = vmatmul.mubr.bf16.vlgmr.msra.gmra.mrb[0].mxu0 %v835_v61  ;;  %582 = vst [vmem:[#allocation2 + $0xe0] sm:$0xf] %v580_v37  ;;  %v4065_v45 = vld [vmem:[%s5054_s2 + $0x1f0] sm:$0xff]   ;;  %v860_v52 = vld [vmem:[#allocation2 + $0xc8] sm:$0xff]  ;;  %v3303_v54 = vcombine.low %v3300_v50, %v3301_v51  ;;  %346 = vst [vmem:[#allocation2 + $0x28] sm:$0xf0] %v3304_v55 }
  0x2b   : > { %3650 = vmatpush3.bf16.msra.mxu0 %v4037_v58  ;;  %593 = vst [vmem:[#allocation2 + $0xd0] sm:$0xf0] %v591_v36  ;;  %568 = vst [vmem:[#allocation2 + $0xd8] sm:$0xf] %v566_v38  ;;  %v321_v61 = vshll.u32 %v3302_v53, 16  ;;  %v4075_v15 = vld [vmem:[%s5054_s2 + $0x200] sm:$0xff]  }
  0x2c   : > { %2574 = vmatmul.mubr.bf16.vlgmr.msra.gmra.mrb[0].mxu1 %v837_v1  ;;  %3651 = vmatprep.subr.bf16.mxu0 %v4040_v60  ;;  %v319_v60 = vshrl.u32 %v3302_v53, 16  ;;  %v333_v62 = vshrl.u32 %v3303_v54, 16  ;;  %v335_v0 = vshll.u32 %v3303_v54, 16  ;;  %v4068_v1 = vld [vmem:[%s5054_s2 + $0x138] sm:$0xff]   ;;  %v4078_v18 = vld [vmem:[%s5054_s2 + $0x248] sm:$0xff]   ;;  %v4077_v29 = vld [vmem:[%s5054_s2 + $0x280] sm:$0xff]  }
  0x2d   : > { %3678 = vmatpush3.bf16.msra.mxu1 %v4039_v59  ;;  %v4069_v59 = vld [vmem:[%s5054_s2 + $0x1f8] sm:$0xff]   ;;  %343 = vst [vmem:[#allocation2 + $0x48] sm:$0xf] %v341_v14  ;;  %v3346_v22 = vld [vmem:[%s4429_s6 + $0x14] sm:$0x1]  ;;  %v4079_v30 = vld [vmem:[%s5054_s2 + $0x208] sm:$0xff]  }
  0x2e   : > { %3679 = vmatprep.subr.bf16.mxu1 %v4042_v63  ;;  %v337_v19 = vrot.slane %v335_v0, 1  ;;  %v3348_v24 = vld [vmem:[%s4431_s28 + $0x14] sm:$0x1]  ;;  %610 = vst [vmem:[#allocation2 + $0xf8] sm:$0xf] %v3347_v23  ;;  %v4089_v51 = vld [vmem:[%s5054_s2 + $0x258] sm:$0xff]  }
  0x2f   : > { %3652 = vmatpush3.bf16.msra.mxu0 %v4041_v2  ;;  %v4073_v2 = vld [vmem:[%s5054_s2 + $0x1b8] sm:$0xff]   ;;  %v3350_v28 = vcombine.low %v3347_v23, %v3348_v24  ;;  %v4085_v31 = vld [vmem:[%s5054_s2 + $0x250] sm:$0xff]  }
  0x30   : > { %3653 = vmatprep.subr.bf16.mxu0 %v4044_v4  ;;  %v347_v4 = vrot.slane %v319_v60, 4  ;;  %v338_v27 = vor.u32 %v337_v19, %v333_v62  ;;  %v4108_v19 = vld [vmem:[%s5054_s2 + $0x2b8] sm:$0xff]  }
  0x31   : > { %3680 = vmatpush3.bf16.msra.mxu1 %v4043_v3  ;;  %v863_v58 = vld [vmem:[#allocation2 + $0xe0] sm:$0xff]  ;;  %v323_v3 = vrot.slane %v321_v61, 1  ;;  %v840_v17 = vld [vmem:[#allocation2 + $0x28] sm:$0xff]  ;;  %v631_v34 = vshrl.u32 %v3350_v28, 16  ;;  %v633_v35 = vshll.u32 %v3350_v28, 16 }
  0x32   : > { %3681 = vmatprep.subr.bf16.mxu1 %v4046_v5  ;;  %v861_v57 = vld [vmem:[#allocation2 + $0xd0] sm:$0xff]  ;;  %2581 = vmatprep.mubr.bf16.mxu1 %v863_v58  ;;  %v862_v63 = vld [vmem:[#allocation2 + $0xd8] sm:$0xff]  ;;  %v352_v5 = vrot.slane %v333_v62, 4  ;;  %340 = vst [vmem:[#allocation2 + $0x40] sm:$0xf] %v338_v27  ;;  %v4094_v62 = vld [vmem:[%s5054_s2 + $0x220] sm:$0xff]  }
  0x33   : > { %3654 = vmatpush3.bf16.msra.mxu0 %v4045_v6  ;;  %2532 = vmatprep.mubr.bf16.mxu0 %v861_v57  ;;  %v348_v6 = vrot.slane %v321_v61, 5  ;;  %v650_v42 = vrot.slane %v631_v34, 4  ;;  %v4090_v57 = vld [vmem:[%s5054_s2 + $0x218] sm:$0xff]   ;;  %v4114_v27 = vld [vmem:[%s5054_s2 + $0x3c0] sm:$0xff]  }
  0x34   : > { %3655 = vmatprep.subr.bf16.mxu0 %v4048_v8  ;;  %2533 = vmatmul.mubr.bf16.gmra.mrb[4].mxu0 %v860_v52  ;;  %v353_v8 = vrot.slane %v335_v0, 5  ;;  %v658_v52 = vrot.slane %v3350_v28, 5  ;;  %v4091_v61 = vld [vmem:[%s5054_s2 + $0x2d8] sm:$0xff]  }
  0x35   : > { %3682 = vmatpush3.bf16.msra.mxu1 %v4047_v7  ;;  %v4074_v7 = vld [vmem:[%s5054_s2 + $0x240] sm:$0xff]   ;;  %2622 = vmatprep.mubr.bf16.mxu0 %v840_v17  ;;  %v4092_v0 = vld [vmem:[%s5054_s2 + $0x298] sm:$0xff]  }
  0x36   : > { %3683 = vmatprep.subr.bf16.mxu1 %v4050_v10  ;;  %2582 = vmatmul.mubr.bf16.gmra.mrb[4].mxu1 %v862_v63  ;;  %v349_v10 = vor.u32 %v348_v6, %v347_v4  ;;  %660 = vst [vmem:[#allocation2 + $0x110] sm:$0xf0] %v658_v52  ;;  %v4098_v4 = vld [vmem:[%s5054_s2 + $0x228] sm:$0xff]   ;;  %v4101_v6 = vld [vmem:[%s5054_s2 + $0x270] sm:$0xff]   ;;  %v4109_v17 = vld [vmem:[%s5054_s2 + $0x340] sm:$0xff]  }
  0x37   : > { %3656 = vmatpush3.bf16.msra.mxu0 %v4049_v9  ;;  %v324_v9 = vor.u32 %v323_v3, %v319_v60  ;;  %v4093_v60 = vld [vmem:[%s5054_s2 + $0x260] sm:$0xff]   ;;  %v4123_v52 = vld [vmem:[%s5054_s2 + $0x310] sm:$0xff]  }
  0x38   : > { %3657 = vmatprep.subr.bf16.mxu0 %v4052_v16  ;;  %351 = vst [vmem:[#allocation2 + $0x30] sm:$0xf0] %v349_v10  ;;  %v360_v16 = vrot.slane %v3303_v54, 5  ;;  %v635_v54 = vrot.slane %v633_v35, 1  ;;  %v4095_v3 = vld [vmem:[%s5054_s2 + $0x2e0] sm:$0xff]   ;;  %v4105_v10 = vld [vmem:[%s5054_s2 + $0x278] sm:$0xff]  }
  0x39   : > { %3684 = vmatpush3.bf16.msra.mxu1 %v4051_v12  ;;  %v354_v12 = vor.u32 %v353_v8, %v352_v5  ;;  %326 = vst [vmem:[#allocation2 + $0x38] sm:$0xf] %v324_v9  ;;  %v4096_v5 = vld [vmem:[%s5054_s2 + $0x2a0] sm:$0xff]   ;;  %v4102_v8 = vld [vmem:[%s5054_s2 + $0x230] sm:$0xff]   ;;  %v4100_v9 = vld [vmem:[%s5054_s2 + $0x2a8] sm:$0xff]  }
  0x3a   : > { %3685 = vmatprep.subr.bf16.mxu1 %v4054_v20  ;;  %v357_v20 = vrot.slane %v3302_v53, 5  ;;  %362 = vst [vmem:[#allocation2 + $0x48] sm:$0xf0] %v360_v16  ;;  %v4087_v53 = vld [vmem:[%s5054_s2 + $0x2d0] sm:$0xff]   ;;  %v636_v58 = vor.u32 %v635_v54, %v631_v34  ;;  %v4117_v34 = vld [vmem:[%s5054_s2 + $0x308] sm:$0xff]  }
  0x3b   : > { %3658 = vmatpush3.bf16.msra.mxu0 %v4053_v21  ;;  %356 = vst [vmem:[#allocation2 + $0x38] sm:$0xf0] %v354_v12  ;;  %v3345_v21 = vld [vmem:[%s4429_s6 + $0x10] sm:$0xf] }
  0x3c   : > { %3659 = vmatprep.subr.bf16.mxu0 %v4056_v32  ;;  %609 = vst [vmem:[#allocation2 + $0xf0] sm:$0xf] %v3345_v21  ;;  %v3349_v25 = vcombine.low %v3345_v21, %v3346_v22  ;;  %359 = vst [vmem:[#allocation2 + $0x40] sm:$0xf0] %v357_v20  ;;  %v4104_v12 = vld [vmem:[%s5054_s2 + $0x2b0] sm:$0xff]  }
  0x3d   : > { %3686 = vmatpush3.bf16.msra.mxu1 %v4055_v26  ;;  %v3351_v26 = vcombine.low %v3347_v23, %v3347_v23  ;;  %638 = vst [vmem:[#allocation2 + $0x108] sm:$0xf] %v636_v58  ;;  %v3308_v20 = vld [vmem:[%s4429_s6 + $0x14] sm:$0x1]  ;;  %v3311_v21 = vld [vmem:[%s4431_s28 + $0x10] sm:$0xf] }
  0x3e   : > { %3687 = vmatprep.subr.bf16.mxu1 %v4061_v33  ;;  %v617_v32 = vshrl.u32 %v3349_v25, 16  ;;  %v619_v33 = vshll.u32 %v3349_v25, 16  ;;  %v639_v49 = vrot.slane %v3349_v25, 1  ;;  %v3312_v22 = vld [vmem:[%s4431_s28 + $0x14] sm:$0x1] }
  0x3f   : > { %3660 = vmatpush3.bf16.msra.mxu0 %v4059_v41  ;;  %644 = vst [vmem:[#allocation2 + $0xf0] sm:$0xf0] %v3351_v26  ;;  %v841_v36 = vld [vmem:[#allocation2 + $0x30] sm:$0xff]  ;;  %v4080_v41 = vld [vmem:[%s5054_s2 + $0x2c8] sm:$0xff]   ;;  %374 = vst [vmem:[#allocation2 + $0x58] sm:$0xf] %v3311_v21  ;;  %v4657_v24 = vcombine.low %v3311_v21, %v3312_v22  ;;  %v3315_v26 = vcombine.low %v3311_v21, %v3311_v21 }
  0x40   : > { %3661 = vmatprep.subr.bf16.mxu0 %v4063_v44  ;;  %v621_v37 = vrot.slane %v619_v33, 1  ;;  %v645_v38 = vrot.slane %v617_v32, 4  ;;  %v646_v39 = vrot.slane %v619_v33, 5  ;;  %v4084_v44 = vld [vmem:[%s5054_s2 + $0x288] sm:$0xff]   ;;  %641 = vst [vmem:[#allocation2 + $0x110] sm:$0xf] %v639_v49 }
  0x41   : > { %3688 = vmatpush3.bf16.msra.mxu1 %v4062_v43  ;;  %v651_v43 = vrot.slane %v633_v35, 5  ;;  %v844_v14 = vld [vmem:[#allocation2 + $0x48] sm:$0xff]  ;;  %408 = vst [vmem:[#allocation2 + $0x50] sm:$0xf0] %v3315_v26  ;;  %v3355_v49 = vld [vmem:[%s4431_s28 + $0x1c] sm:$0x1] }
  0x42   : > { %3689 = vmatprep.subr.bf16.mxu1 %v4065_v45  ;;  %v842_v40 = vld [vmem:[#allocation2 + $0x38] sm:$0xff]  ;;  %v864_v45 = vld [vmem:[#allocation2 + $0xe8] sm:$0xff]  ;;  %v622_v46 = vor.u32 %v621_v37, %v617_v32  ;;  %v397_v37 = vshll.u32 %v4657_v24, 16 }
  0x43   : > { %3662 = vmatpush3.bf16.msra.mxu0 %v4064_v47  ;;  %2671 = vmatprep.mubr.bf16.mxu1 %v842_v40  ;;  %v4086_v47 = vld [vmem:[%s5054_s2 + $0x210] sm:$0xff]   ;;  %v652_v50 = vor.u32 %v651_v43, %v650_v42  ;;  %v843_v16 = vld [vmem:[#allocation2 + $0x40] sm:$0xff]  ;;  %v4116_v33 = vld [vmem:[%s5054_s2 + $0x348] sm:$0xff]  }
  0x44   : > { %3663 = vmatprep.subr.bf16.mxu0 %v4067_v56  ;;  %624 = vst [vmem:[#allocation2 + $0x100] sm:$0xf] %v622_v46  ;;  %v655_v56 = vrot.slane %v3349_v25, 5  ;;  %v4112_v25 = vld [vmem:[%s5054_s2 + $0x300] sm:$0xff]   ;;  %v4120_v42 = vld [vmem:[%s5054_s2 + $0x350] sm:$0xff]   ;;  %v399_v43 = vrot.slane %v397_v37, 1 }
  0x45   : > { %3690 = vmatpush3.bf16.msra.mxu1 %v4066_v48  ;;  %v647_v48 = vor.u32 %v646_v39, %v645_v38  ;;  %654 = vst [vmem:[#allocation2 + $0x100] sm:$0xf0] %v652_v50  ;;  %v4135_v21 = vld [vmem:[%s5054_s2 + $0x368] sm:$0xff]  }
  0x46   : > { %3691 = vmatprep.subr.bf16.mxu1 %v4069_v59  ;;  %v865_v55 = vld [vmem:[#allocation2 + $0xf0] sm:$0xff]  ;;  %657 = vst [vmem:[#allocation2 + $0x108] sm:$0xf0] %v655_v56 }
  0x47   : > { %3664 = vmatpush3.bf16.msra.mxu0 %v4068_v1  ;;  %649 = vst [vmem:[#allocation2 + $0xf8] sm:$0xf0] %v647_v48  ;;  %v4088_v59 = vld [vmem:[%s5054_s2 + $0x290] sm:$0xff]   ;;  %v3354_v48 = vld [vmem:[%s4431_s28 + $0x18] sm:$0xf] }
  0x48   : > { %3705 = vmatprep.subr.bf16.mxu0 %v4074_v7  ;;  %v4099_v7 = vld [vmem:[%s5054_s2 + $0x2e8] sm:$0xff]   ;;  %666 = vst [vmem:[#allocation2 + $0x120] sm:$0xf] %v3354_v48 }
  0x49   : > { %3692 = vmatpush3.bf16.msra.mxu1 %v4073_v2  ;;  %v4097_v2 = vld [vmem:[%s5054_s2 + $0x268] sm:$0xff]  }
  0x4a   : > { %3733 = vmatprep.subr.bf16.mxu1 %v4076_v13  ;;  %2623 = vmatmul.mubr.bf16.vlgmr.msra.gmra.mrb[8].mxu0 %v839_v11  ;;  %v4103_v11 = vld [vmem:[%s5054_s2 + $0x2f0] sm:$0xff]   ;;  %v4106_v13 = vld [vmem:[%s5054_s2 + $0x238] sm:$0xff]  }
  0x4b   : > { %3706 = vmatpush3.bf16.msra.mxu0 %v4075_v15  ;;  %2630 = vmatprep.mubr.bf16.mxu0 %v865_v55  ;;  %v4107_v15 = vld [vmem:[%s5054_s2 + $0x2f8] sm:$0xff]  }
  0x4c   : > { %3707 = vmatprep.subr.bf16.mxu0 %v4078_v18  ;;  %2672 = vmatmul.mubr.bf16.vlgmr.msra.gmra.mrb[8].mxu1 %v841_v36  ;;  %v867_v1 = vld [vmem:[#allocation2 + $0x100] sm:$0xff]  ;;  %v3307_v18 = vld [vmem:[%s4429_s6 + $0x10] sm:$0xf] }
  0x4d   : > { %3734 = vmatpush3.bf16.msra.mxu1 %v4077_v29  ;;  %2679 = vmatprep.mubr.bf16.mxu1 %v867_v1  ;;  %373 = vst [vmem:[#allocation2 + $0x50] sm:$0xf] %v3307_v18  ;;  %v3313_v23 = vcombine.low %v3307_v18, %v3308_v20  ;;  %v869_v36 = vld [vmem:[#allocation2 + $0x110] sm:$0xff]  ;;  %v868_v38 = vld [vmem:[#allocation2 + $0x108] sm:$0xff]  ;;  %v4128_v1 = vld [vmem:[%s5054_s2 + $0x318] sm:$0xff]  }
  0x4e   : > { %3735 = vmatprep.subr.bf16.mxu1 %v4080_v41  ;;  %v866_v63 = vld [vmem:[#allocation2 + $0xf8] sm:$0xff] }
  0x4f   : > { %3708 = vmatpush3.bf16.msra.mxu0 %v4079_v30  ;;  %v381_v28 = vshrl.u32 %v3313_v23, 16  ;;  %v383_v29 = vshll.u32 %v3313_v23, 16  ;;  %v395_v30 = vshrl.u32 %v4657_v24, 16  ;;  %v419_v40 = vrot.slane %v3313_v23, 5 }
  0x50   : > { %3709 = vmatprep.subr.bf16.mxu0 %v4085_v31  ;;  %v403_v55 = vrot.slane %v3313_v23, 1  ;;  %v4136_v23 = vld [vmem:[%s5054_s2 + $0x328] sm:$0xff]  }
  0x51   : > { %3736 = vmatpush3.bf16.msra.mxu1 %v4084_v44  ;;  %v409_v31 = vrot.slane %v381_v28, 4  ;;  %v410_v32 = vrot.slane %v383_v29, 5  ;;  %v414_v39 = vrot.slane %v395_v30, 4  ;;  %v385_v41 = vrot.slane %v383_v29, 1  ;;  %v3352_v44 = vld [vmem:[%s4429_s6 + $0x18] sm:$0xf] }
  0x52   : > { %2631 = vmatmul.mubr.bf16.gmra.mrb[12].mxu0 %v864_v45  ;;  %3737 = vmatprep.subr.bf16.mxu1 %v4087_v53  ;;  %v3353_v45 = vld [vmem:[%s4429_s6 + $0x1c] sm:$0x1]  ;;  %421 = vst [vmem:[#allocation2 + $0x68] sm:$0xf0] %v419_v40  ;;  %665 = vst [vmem:[#allocation2 + $0x118] sm:$0xf] %v3352_v44  ;;  %v3358_v53 = vcombine.low %v3354_v48, %v3354_v48 }
  0x53   : > { %3710 = vmatpush3.bf16.msra.mxu0 %v4086_v47  ;;  %2720 = vmatprep.mubr.bf16.mxu0 %v844_v14  ;;  %v411_v35 = vor.u32 %v410_v32, %v409_v31  ;;  %v386_v46 = vor.u32 %v385_v41, %v381_v28  ;;  %v415_v47 = vrot.slane %v397_v37, 5  ;;  %v4680_v50 = vcombine.low %v3352_v44, %v3353_v45  ;;  %v4133_v28 = vld [vmem:[%s5054_s2 + $0x3e0] sm:$0xff]   ;;  %v4139_v29 = vld [vmem:[%s5054_s2 + $0x370] sm:$0xff]   ;;  %v4137_v32 = vld [vmem:[%s5054_s2 + $0x3e8] sm:$0xff]  }
  0x54   : > { %3711 = vmatprep.subr.bf16.mxu0 %v4089_v51  ;;  %2680 = vmatmul.mubr.bf16.gmra.mrb[12].mxu1 %v866_v63  ;;  %v400_v51 = vor.u32 %v399_v43, %v395_v30  ;;  %v845_v56 = vld [vmem:[#allocation2 + $0x50] sm:$0xff]  ;;  %700 = vst [vmem:[#allocation2 + $0x118] sm:$0xf0] %v3358_v53  ;;  %405 = vst [vmem:[#allocation2 + $0x70] sm:$0xf] %v403_v55  ;;  %v4134_v31 = vld [vmem:[%s5054_s2 + $0x3a0] sm:$0xff]  }
  0x55   : > { %3738 = vmatpush3.bf16.msra.mxu1 %v4088_v59  ;;  %413 = vst [vmem:[#allocation2 + $0x58] sm:$0xf0] %v411_v35  ;;  %388 = vst [vmem:[#allocation2 + $0x60] sm:$0xf] %v386_v46  ;;  %v416_v54 = vor.u32 %v415_v47, %v414_v39  ;;  %v673_v58 = vshrl.u32 %v4680_v50, 16  ;;  %v675_v59 = vshll.u32 %v4680_v50, 16 }
  0x56   : > { %3739 = vmatprep.subr.bf16.mxu1 %v4091_v61  ;;  %402 = vst [vmem:[#allocation2 + $0x68] sm:$0xf] %v400_v51  ;;  %v3357_v61 = vcombine.low %v3354_v48, %v3355_v49  ;;  %v695_v22 = vrot.slane %v4680_v50, 1  ;;  %v4140_v30 = vld [vmem:[%s5054_s2 + $0x330] sm:$0xff]   ;;  %v4138_v35 = vld [vmem:[%s5054_s2 + $0x3a8] sm:$0xff]   ;;  %v4147_v39 = vld [vmem:[%s5054_s2 + $0x440] sm:$0xff]  }
  0x57   : > { %3712 = vmatpush3.bf16.msra.mxu0 %v4090_v57  ;;  %v4115_v57 = vld [vmem:[%s5054_s2 + $0x380] sm:$0xff]   ;;  %418 = vst [vmem:[#allocation2 + $0x60] sm:$0xf0] %v416_v54  ;;  %v702_v63 = vrot.slane %v675_v59, 5  ;;  %v677_v14 = vrot.slane %v675_v59, 1  ;;  %v4141_v37 = vld [vmem:[%s5054_s2 + $0x3f0] sm:$0xff]  }
  0x58   : > { %3713 = vmatprep.subr.bf16.mxu0 %v4093_v60  ;;  %v4118_v60 = vld [vmem:[%s5054_s2 + $0x3c8] sm:$0xff]   ;;  %697 = vst [vmem:[#allocation2 + $0x138] sm:$0xf] %v695_v22  ;;  %v3318_v40 = vld [vmem:[%s4429_s6 + $0x18] sm:$0xf]  ;;  %v4142_v45 = vld [vmem:[%s5054_s2 + $0x3b0] sm:$0xff]  }
  0x59   : > { %3740 = vmatpush3.bf16.msra.mxu1 %v4092_v0  ;;  %v4127_v0 = vld [vmem:[%s5054_s2 + $0x358] sm:$0xff]   ;;  %435 = vst [vmem:[#allocation2 + $0x78] sm:$0xf] %v3318_v40  ;;  %v4151_v48 = vld [vmem:[%s5054_s2 + $0x400] sm:$0xff]   ;;  %v4154_v53 = vld [vmem:[%s5054_s2 + $0x448] sm:$0xff]  }
  0x5a   : > { %3741 = vmatprep.subr.bf16.mxu1 %v4095_v3  ;;  %v422_v3 = vrot.slane %v4657_v24, 5  ;;  %v3319_v41 = vld [vmem:[%s4429_s6 + $0x1c] sm:$0x1]  ;;  %v4155_v55 = vld [vmem:[%s5054_s2 + $0x408] sm:$0xff]   ;;  %v4163_v22 = vld [vmem:[%s5054_s2 + $0x4d0] sm:$0xff]  }
  0x5b   : > { %3714 = vmatpush3.bf16.msra.mxu0 %v4094_v62  ;;  %v701_v62 = vrot.slane %v673_v58, 4  ;;  %v870_v18 = vld [vmem:[#allocation2 + $0x118] sm:$0xff]  ;;  %v4763_v44 = vcombine.low %v3318_v40, %v3319_v41 }
  0x5c   : > { %3715 = vmatprep.subr.bf16.mxu0 %v4097_v2  ;;  %v846_v2 = vld [vmem:[#allocation2 + $0x58] sm:$0xff]  ;;  %424 = vst [vmem:[#allocation2 + $0x70] sm:$0xf0] %v422_v3 }
  0x5d   : > { %3742 = vmatpush3.bf16.msra.mxu1 %v4096_v5  ;;  %2769 = vmatprep.mubr.bf16.mxu1 %v846_v2  ;;  %v703_v5 = vor.u32 %v702_v63, %v701_v62  ;;  %v3323_v43 = vld [vmem:[%s4431_s28 + $0x1c] sm:$0x1]  ;;  %v443_v51 = vshrl.u32 %v4763_v44, 16 }
  0x5e   : > { %3743 = vmatprep.subr.bf16.mxu1 %v4099_v7  ;;  %v687_v7 = vshrl.u32 %v3357_v61, 16  ;;  %v4145_v49 = vld [vmem:[%s5054_s2 + $0x3f8] sm:$0xff]  }
  0x5f   : > { %3716 = vmatpush3.bf16.msra.mxu0 %v4098_v4  ;;  %v4119_v4 = vld [vmem:[%s5054_s2 + $0x388] sm:$0xff]   ;;  %705 = vst [vmem:[#allocation2 + $0x120] sm:$0xf0] %v703_v5  ;;  %v471_v63 = vrot.slane %v443_v51, 4  ;;  %v3359_v5 = vld [vmem:[%s4429_s6 + $0x20] sm:$0xf] }
  0x60   : > { %3717 = vmatprep.subr.bf16.mxu0 %v4101_v6  ;;  %v4125_v6 = vld [vmem:[%s5054_s2 + $0x3d0] sm:$0xff]   ;;  %721 = vst [vmem:[#allocation2 + $0x140] sm:$0xf] %v3359_v5  ;;  %v4168_v41 = vld [vmem:[%s5054_s2 + $0x498] sm:$0xff]  }
  0x61   : > { %3744 = vmatpush3.bf16.msra.mxu1 %v4100_v9  ;;  %v4131_v9 = vld [vmem:[%s5054_s2 + $0x360] sm:$0xff]  }
  0x62   : > { %3745 = vmatprep.subr.bf16.mxu1 %v4103_v11  ;;  %v4132_v11 = vld [vmem:[%s5054_s2 + $0x320] sm:$0xff]  }
  0x63   : > { %3718 = vmatpush3.bf16.msra.mxu0 %v4102_v8  ;;  %v689_v8 = vshll.u32 %v3357_v61, 16  ;;  %v849_v59 = vld [vmem:[#allocation2 + $0x70] sm:$0xff] }
  0x64   : > { %3719 = vmatprep.subr.bf16.mxu0 %v4105_v10  ;;  %v711_v10 = vrot.slane %v4680_v50, 5  ;;  %v4146_v50 = vld [vmem:[%s5054_s2 + $0x3b8] sm:$0xff]  }
  0x65   : > { %3746 = vmatpush3.bf16.msra.mxu1 %v4104_v12  ;;  %v691_v12 = vrot.slane %v689_v8, 1  ;;  %v707_v20 = vrot.slane %v689_v8, 5  ;;  %v3360_v8 = vld [vmem:[%s4429_s6 + $0x24] sm:$0x1] }
  0x66   : > { %3747 = vmatprep.subr.bf16.mxu1 %v4107_v15  ;;  %713 = vst [vmem:[#allocation2 + $0x130] sm:$0xf0] %v711_v10  ;;  %v4129_v15 = vld [vmem:[%s5054_s2 + $0x3d8] sm:$0xff]   ;;  %v871_v26 = vld [vmem:[#allocation2 + $0x120] sm:$0xff] }
  0x67   : > { %3720 = vmatpush3.bf16.msra.mxu0 %v4106_v13  ;;  %v4126_v13 = vld [vmem:[%s5054_s2 + $0x390] sm:$0xff]  }
  0x68   : > { %3761 = vmatprep.subr.bf16.mxu0 %v4109_v17  ;;  %v706_v17 = vrot.slane %v687_v7, 4 }
  0x69   : > { %3748 = vmatpush3.bf16.msra.mxu1 %v4108_v19  ;;  %v678_v19 = vor.u32 %v677_v14, %v673_v58 }
  0x6a   : > { %2721 = vmatmul.mubr.bf16.vlgmr.msra.gmra.mrb[16].mxu0 %v843_v16  ;;  %3789 = vmatprep.subr.bf16.mxu1 %v4114_v27  ;;  %v692_v16 = vor.u32 %v691_v12, %v687_v7  ;;  %v708_v24 = vor.u32 %v707_v20, %v706_v17  ;;  %v4130_v27 = vld [vmem:[%s5054_s2 + $0x398] sm:$0xff]   ;;  %v3362_v12 = vld [vmem:[%s4431_s28 + $0x24] sm:$0x1]  ;;  %v4162_v17 = vld [vmem:[%s5054_s2 + $0x410] sm:$0xff]  }
  0x6b   : > { %3762 = vmatpush3.bf16.msra.mxu0 %v4112_v25  ;;  %2728 = vmatprep.mubr.bf16.mxu0 %v869_v36  ;;  %680 = vst [vmem:[#allocation2 + $0x128] sm:$0xf] %v678_v19  ;;  %v714_v25 = vrot.slane %v3357_v61, 5  ;;  %v848_v36 = vld [vmem:[#allocation2 + $0x68] sm:$0xff] }
  0x6c   : > { %3763 = vmatprep.subr.bf16.mxu0 %v4116_v33  ;;  %2770 = vmatmul.mubr.bf16.vlgmr.msra.gmra.mrb[16].mxu1 %v845_v56  ;;  %694 = vst [vmem:[#allocation2 + $0x130] sm:$0xf] %v692_v16  ;;  %710 = vst [vmem:[#allocation2 + $0x128] sm:$0xf0] %v708_v24  ;;  %v4143_v33 = vld [vmem:[%s5054_s2 + $0x378] sm:$0xff]   ;;  %v4157_v20 = vld [vmem:[%s5054_s2 + $0x488] sm:$0xff]  }
  0x6d   : > { %3790 = vmatpush3.bf16.msra.mxu1 %v4115_v57  ;;  %2777 = vmatprep.mubr.bf16.mxu1 %v871_v26  ;;  %716 = vst [vmem:[#allocation2 + $0x138] sm:$0xf0] %v714_v25  ;;  %v4152_v57 = vld [vmem:[%s5054_s2 + $0x4c0] sm:$0xff]   ;;  %v4165_v25 = vld [vmem:[%s5054_s2 + $0x458] sm:$0xff]  }
  0x6e   : > { %3791 = vmatprep.subr.bf16.mxu1 %v4118_v60  ;;  %v4153_v60 = vld [vmem:[%s5054_s2 + $0x480] sm:$0xff]  }
  0x6f   : > { %3764 = vmatpush3.bf16.msra.mxu0 %v4117_v34  ;;  %v4144_v34 = vld [vmem:[%s5054_s2 + $0x338] sm:$0xff]  }
  0x70   : > { %3765 = vmatprep.subr.bf16.mxu0 %v4120_v42  ;;  %v3322_v42 = vld [vmem:[%s4431_s28 + $0x18] sm:$0xf] }
  0x71   : > { %3792 = vmatpush3.bf16.msra.mxu1 %v4119_v4  ;;  %v4768_v46 = vcombine.low %v3322_v42, %v3323_v43  ;;  %v3326_v47 = vcombine.low %v3322_v42, %v3322_v42  ;;  %436 = vst [vmem:[#allocation2 + $0x80] sm:$0xf] %v3322_v42  ;;  %v4158_v4 = vld [vmem:[%s5054_s2 + $0x450] sm:$0xff]   ;;  %v4171_v43 = vld [vmem:[%s5054_s2 + $0x4e0] sm:$0xff]  }
  0x72   : > { %2729 = vmatmul.mubr.bf16.gmra.mrb[20].mxu0 %v868_v38  ;;  %3793 = vmatprep.subr.bf16.mxu1 %v4125_v6  ;;  %v847_v38 = vld [vmem:[#allocation2 + $0x60] sm:$0xff] }
  0x73   : > { %3766 = vmatpush3.bf16.msra.mxu0 %v4123_v52  ;;  %2818 = vmatprep.mubr.bf16.mxu0 %v848_v36  ;;  %470 = vst [vmem:[#allocation2 + $0x78] sm:$0xf0] %v3326_v47  ;;  %v445_v52 = vshll.u32 %v4763_v44, 16  ;;  %v457_v54 = vshrl.u32 %v4768_v46, 16  ;;  %v459_v58 = vshll.u32 %v4768_v46, 16  ;;  %v873_v61 = vld [vmem:[#allocation2 + $0x130] sm:$0xff] }
  0x74   : > { %3767 = vmatprep.subr.bf16.mxu0 %v4127_v0  ;;  %2778 = vmatmul.mubr.bf16.gmra.mrb[20].mxu1 %v870_v18  ;;  %v4156_v0 = vld [vmem:[%s5054_s2 + $0x4c8] sm:$0xff]   ;;  %v484_v18 = vrot.slane %v4768_v46, 5 }
  0x75   : > { %3794 = vmatpush3.bf16.msra.mxu1 %v4126_v13  ;;  %v447_v56 = vrot.slane %v445_v52, 1  ;;  %v476_v2 = vrot.slane %v457_v54, 4  ;;  %v477_v3 = vrot.slane %v459_v58, 5  ;;  %v472_v6 = vrot.slane %v445_v52, 5  ;;  %v4173_v46 = vld [vmem:[%s5054_s2 + $0x468] sm:$0xff]  }
  0x76   : > { %3795 = vmatprep.subr.bf16.mxu1 %v4129_v15  ;;  %v4806_v13 = vcombine.low %v3359_v5, %v3360_v8  ;;  %v461_v19 = vrot.slane %v459_v58, 1  ;;  %486 = vst [vmem:[#allocation2 + $0x98] sm:$0xf0] %v484_v18  ;;  %v4179_v58 = vld [vmem:[%s5054_s2 + $0x4f0] sm:$0xff]   ;;  %v4189_v8 = vld [vmem:[%s5054_s2 + $0x548] sm:$0xff]  }
  0x77   : > { %3768 = vmatpush3.bf16.msra.mxu0 %v4128_v1  ;;  %v448_v62 = vor.u32 %v447_v56, %v443_v51  ;;  %v872_v1 = vld [vmem:[#allocation2 + $0x128] sm:$0xff]  ;;  %v478_v10 = vor.u32 %v477_v3, %v476_v2  ;;  %v473_v15 = vor.u32 %v472_v6, %v471_v63  ;;  %v4172_v51 = vld [vmem:[%s5054_s2 + $0x4a0] sm:$0xff]   ;;  %v4178_v56 = vld [vmem:[%s5054_s2 + $0x430] sm:$0xff]  }
  0x78   : > { %3769 = vmatprep.subr.bf16.mxu0 %v4131_v9  ;;  %v3361_v9 = vld [vmem:[%s4431_s28 + $0x20] sm:$0xf]  ;;  %v729_v24 = vshrl.u32 %v4806_v13, 16  ;;  %v731_v26 = vshll.u32 %v4806_v13, 16  ;;  %v767_v52 = vrot.slane %v4806_v13, 5  ;;  %v4195_v18 = vld [vmem:[%s5054_s2 + $0x5d0] sm:$0xff]  }
  0x79   : > { %3796 = vmatpush3.bf16.msra.mxu1 %v4130_v27  ;;  %450 = vst [vmem:[#allocation2 + $0x88] sm:$0xf] %v448_v62  ;;  %v3365_v14 = vcombine.low %v3361_v9, %v3361_v9  ;;  %722 = vst [vmem:[#allocation2 + $0x148] sm:$0xf] %v3361_v9  ;;  %v4808_v16 = vcombine.low %v3361_v9, %v3362_v12  ;;  %v4166_v27 = vld [vmem:[%s5054_s2 + $0x418] sm:$0xff]   ;;  %v4185_v2 = vld [vmem:[%s5054_s2 + $0x540] sm:$0xff]  }
  0x7a   : > { %3797 = vmatprep.subr.bf16.mxu1 %v4133_v28  ;;  %v850_v7 = vld [vmem:[#allocation2 + $0x78] sm:$0xff]  ;;  %480 = vst [vmem:[#allocation2 + $0x88] sm:$0xf0] %v478_v10  ;;  %475 = vst [vmem:[#allocation2 + $0x80] sm:$0xf0] %v473_v15  ;;  %v757_v40 = vrot.slane %v729_v24, 4 }
  0x7b   : > { %3770 = vmatpush3.bf16.msra.mxu0 %v4132_v11  ;;  %v465_v11 = vrot.slane %v4763_v44, 1  ;;  %2867 = vmatprep.mubr.bf16.mxu1 %v850_v7  ;;  %756 = vst [vmem:[#allocation2 + $0x140] sm:$0xf0] %v3365_v14  ;;  %v743_v28 = vshrl.u32 %v4808_v16, 16  ;;  %v758_v42 = vrot.slane %v731_v26, 5  ;;  %v4183_v62 = vld [vmem:[%s5054_s2 + $0x4f8] sm:$0xff]  }
  0x7c   : > { %3771 = vmatprep.subr.bf16.mxu0 %v4135_v21  ;;  %v481_v21 = vrot.slane %v4763_v44, 5  ;;  %769 = vst [vmem:[#allocation2 + $0x158] sm:$0xf0] %v767_v52  ;;  %v4187_v6 = vld [vmem:[%s5054_s2 + $0x5c0] sm:$0xff]   ;;  %v4190_v9 = vld [vmem:[%s5054_s2 + $0x508] sm:$0xff]   ;;  %v4193_v14 = vld [vmem:[%s5054_s2 + $0x550] sm:$0xff]  }
  0x7d   : > { %3798 = vmatpush3.bf16.msra.mxu1 %v4134_v31  ;;  %467 = vst [vmem:[#allocation2 + $0x98] sm:$0xf] %v465_v11  ;;  %v733_v31 = vrot.slane %v731_v26, 1  ;;  %v762_v36 = vrot.slane %v743_v28, 4  ;;  %v759_v47 = vor.u32 %v758_v42, %v757_v40  ;;  %v4188_v7 = vld [vmem:[%s5054_s2 + $0x580] sm:$0xff]   ;;  %v4191_v10 = vld [vmem:[%s5054_s2 + $0x5c8] sm:$0xff]  }
  0x7e   : > { %3799 = vmatprep.subr.bf16.mxu1 %v4137_v32  ;;  %483 = vst [vmem:[#allocation2 + $0x90] sm:$0xf0] %v481_v21  ;;  %v4167_v32 = vld [vmem:[%s5054_s2 + $0x4d8] sm:$0xff]   ;;  %v4192_v12 = vld [vmem:[%s5054_s2 + $0x588] sm:$0xff]   ;;  %v4203_v26 = vld [vmem:[%s5054_s2 + $0x5e0] sm:$0xff]  }
  0x7f   : > { %3772 = vmatpush3.bf16.msra.mxu0 %v4136_v23  ;;  %v462_v23 = vor.u32 %v461_v19, %v457_v54  ;;  %761 = vst [vmem:[#allocation2 + $0x148] sm:$0xf0] %v759_v47  ;;  %v4196_v19 = vld [vmem:[%s5054_s2 + $0x590] sm:$0xff]   ;;  %v4198_v21 = vld [vmem:[%s5054_s2 + $0x518] sm:$0xff]   ;;  %v3330_v40 = vld [vmem:[%s4429_s6 + $0x24] sm:$0x1] }
  0x80   : > { %3773 = vmatprep.subr.bf16.mxu0 %v4139_v29  ;;  %v874_v29 = vld [vmem:[#allocation2 + $0x138] sm:$0xff]  ;;  %v3334_v42 = vld [vmem:[%s4431_s28 + $0x24] sm:$0x1] }
  0x81   : > { %3800 = vmatpush3.bf16.msra.mxu1 %v4138_v35  ;;  %464 = vst [vmem:[#allocation2 + $0x90] sm:$0xf] %v462_v23  ;;  %v734_v35 = vor.u32 %v733_v31, %v729_v24  ;;  %v852_v63 = vld [vmem:[#allocation2 + $0x88] sm:$0xff]  ;;  %v4200_v23 = vld [vmem:[%s5054_s2 + $0x598] sm:$0xff]   ;;  %v4201_v24 = vld [vmem:[%s5054_s2 + $0x560] sm:$0xff]  }
  0x82   : > { %3801 = vmatprep.subr.bf16.mxu1 %v4141_v37  ;;  %v875_v37 = vld [vmem:[#allocation2 + $0x140] sm:$0xff]  ;;  %v4208_v31 = vld [vmem:[%s5054_s2 + $0x5a8] sm:$0xff]  }
  0x83   : > { %3774 = vmatpush3.bf16.msra.mxu0 %v4140_v30  ;;  %v4164_v30 = vld [vmem:[%s5054_s2 + $0x490] sm:$0xff]   ;;  %736 = vst [vmem:[#allocation2 + $0x150] sm:$0xf] %v734_v35  ;;  %v4996_v47 = vld [vmem:[%s5054_s2 + $0x600] sm:$0xff]  }
  0x84   : > { %3775 = vmatprep.subr.bf16.mxu0 %v4143_v33  ;;  %v745_v33 = vshll.u32 %v4808_v16, 16  ;;  %v854_v3 = vld [vmem:[#allocation2 + $0x98] sm:$0xff]  ;;  %v4212_v35 = vld [vmem:[%s5054_s2 + $0x5b0] sm:$0xff]  }
  0x85   : > { %3802 = vmatpush3.bf16.msra.mxu1 %v4142_v45  ;;  %v751_v45 = vrot.slane %v4806_v13, 1 }
  0x86   : > { %3803 = vmatprep.subr.bf16.mxu1 %v4145_v49  ;;  %v4174_v49 = vld [vmem:[%s5054_s2 + $0x428] sm:$0xff]  }
  0x87   : > { %3776 = vmatpush3.bf16.msra.mxu0 %v4144_v34  ;;  %v4169_v34 = vld [vmem:[%s5054_s2 + $0x460] sm:$0xff]   ;;  %753 = vst [vmem:[#allocation2 + $0x160] sm:$0xf] %v751_v45  ;;  %v876_v13 = vld [vmem:[#allocation2 + $0x148] sm:$0xff]  ;;  %v4218_v45 = vld [vmem:[%s5054_s2 + $0x5b8] sm:$0xff]  }
  0x88   : > { %3817 = vmatprep.subr.bf16.mxu0 %v4147_v39  ;;  %v763_v39 = vrot.slane %v745_v33, 5  ;;  %v853_v5 = vld [vmem:[#allocation2 + $0x90] sm:$0xff] }
  0x89   : > { %3804 = vmatpush3.bf16.msra.mxu1 %v4146_v50  ;;  %v747_v50 = vrot.slane %v745_v33, 1  ;;  %v4210_v33 = vld [vmem:[%s5054_s2 + $0x530] sm:$0xff]  }
  0x8a   : > { %2819 = vmatmul.mubr.bf16.vlgmr.msra.gmra.mrb[24].mxu0 %v847_v38  ;;  %3845 = vmatprep.subr.bf16.mxu1 %v4152_v57  ;;  %v4170_v38 = vld [vmem:[%s5054_s2 + $0x420] sm:$0xff]   ;;  %v764_v44 = vor.u32 %v763_v39, %v762_v36  ;;  %v4176_v57 = vld [vmem:[%s5054_s2 + $0x4a8] sm:$0xff]   ;;  %v4213_v36 = vld [vmem:[%s5054_s2 + $0x578] sm:$0xff]  }
  0x8b   : > { %3818 = vmatpush3.bf16.msra.mxu0 %v4151_v48  ;;  %2826 = vmatprep.mubr.bf16.mxu0 %v873_v61  ;;  %v770_v48 = vrot.slane %v4808_v16, 5  ;;  %v748_v54 = vor.u32 %v747_v50, %v743_v28  ;;  %v4182_v61 = vld [vmem:[%s5054_s2 + $0x438] sm:$0xff]   ;;  %v4194_v16 = vld [vmem:[%s5054_s2 + $0x510] sm:$0xff]   ;;  %v4205_v28 = vld [vmem:[%s5054_s2 + $0x568] sm:$0xff]  }
  0x8c   : > { %3819 = vmatprep.subr.bf16.mxu0 %v4154_v53  ;;  %2868 = vmatmul.mubr.bf16.vlgmr.msra.gmra.mrb[24].mxu1 %v849_v59  ;;  %766 = vst [vmem:[#allocation2 + $0x150] sm:$0xf0] %v764_v44  ;;  %v4175_v53 = vld [vmem:[%s5054_s2 + $0x4e8] sm:$0xff]   ;;  %v4180_v59 = vld [vmem:[%s5054_s2 + $0x4b0] sm:$0xff]   ;;  %v3329_v39 = vld [vmem:[%s4429_s6 + $0x20] sm:$0xf] }
  0x8d   : > { %3846 = vmatpush3.bf16.msra.mxu1 %v4153_v60  ;;  %2875 = vmatprep.mubr.bf16.mxu1 %v875_v37  ;;  %772 = vst [vmem:[#allocation2 + $0x160] sm:$0xf0] %v770_v48  ;;  %750 = vst [vmem:[#allocation2 + $0x158] sm:$0xf] %v748_v54  ;;  %v4181_v60 = vld [vmem:[%s5054_s2 + $0x478] sm:$0xff]  }
  0x8e   : > { %3847 = vmatprep.subr.bf16.mxu1 %v4156_v0  ;;  %v4184_v0 = vld [vmem:[%s5054_s2 + $0x4b8] sm:$0xff]   ;;  %497 = vst [vmem:[#allocation2 + $0xa0] sm:$0xf] %v3329_v39 }
  0x8f   : > { %3820 = vmatpush3.bf16.msra.mxu0 %v4155_v55  ;;  %v4177_v55 = vld [vmem:[%s5054_s2 + $0x470] sm:$0xff]   ;;  %v4214_v37 = vld [vmem:[%s5054_s2 + $0x538] sm:$0xff]  }
  0x90   : > { %3821 = vmatprep.subr.bf16.mxu0 %v4158_v4  ;;  %v4186_v4 = vld [vmem:[%s5054_s2 + $0x500] sm:$0xff]  }
  0x91   : > { %3848 = vmatpush3.bf16.msra.mxu1 %v4157_v20  ;;  %v4197_v20 = vld [vmem:[%s5054_s2 + $0x558] sm:$0xff]  }
  0x92   : > { %2827 = vmatmul.mubr.bf16.gmra.mrb[28].mxu0 %v872_v1  ;;  %3849 = vmatprep.subr.bf16.mxu1 %v4163_v22  ;;  %v851_v1 = vld [vmem:[#allocation2 + $0x80] sm:$0xff]  ;;  %v4199_v22 = vld [vmem:[%s5054_s2 + $0x5d8] sm:$0xff]  }
  0x93   : > { %3822 = vmatpush3.bf16.msra.mxu0 %v4162_v17  ;;  %2916 = vmatprep.mubr.bf16.mxu0 %v852_v63  ;;  %v877_v11 = vld [vmem:[#allocation2 + $0x150] sm:$0xff] }
  0x94   : > { %3823 = vmatprep.subr.bf16.mxu0 %v4165_v25  ;;  %2876 = vmatmul.mubr.bf16.gmra.mrb[28].mxu1 %v874_v29  ;;  %v879_v15 = vld [vmem:[#allocation2 + $0x160] sm:$0xff]  ;;  %v878_v17 = vld [vmem:[#allocation2 + $0x158] sm:$0xff]  ;;  %v4206_v29 = vld [vmem:[%s5054_s2 + $0x528] sm:$0xff]  }
  0x95   : > { %3850 = vmatpush3.bf16.msra.mxu1 %v4164_v30  ;;  %2965 = vmatprep.mubr.bf16.mxu1 %v854_v3  ;;  %v4202_v25 = vld [vmem:[%s5054_s2 + $0x520] sm:$0xff]   ;;  %v4207_v30 = vld [vmem:[%s5054_s2 + $0x5e8] sm:$0xff]  }
  0x96   : > { %3851 = vmatprep.subr.bf16.mxu1 %v4167_v32  ;;  %v4209_v32 = vld [vmem:[%s5054_s2 + $0x570] sm:$0xff]  }
  0x97   : > { %3824 = vmatpush3.bf16.msra.mxu0 %v4166_v27  ;;  %v4204_v27 = vld [vmem:[%s5054_s2 + $0x5a0] sm:$0xff]  }
  0x98   : > { %3825 = vmatprep.subr.bf16.mxu0 %v4169_v34  ;;  %v4211_v34 = vld [vmem:[%s5054_s2 + $0x5f0] sm:$0xff]  }
  0x99   : > { %3852 = vmatpush3.bf16.msra.mxu1 %v4168_v41  ;;  %v3333_v41 = vld [vmem:[%s4431_s28 + $0x20] sm:$0xf] }
  0x9a   : > { %3853 = vmatprep.subr.bf16.mxu1 %v4171_v43  ;;  %498 = vst [vmem:[#allocation2 + $0xa8] sm:$0xf] %v3333_v41  ;;  %v3335_v43 = vcombine.low %v3329_v39, %v3330_v40  ;;  %v4988_v44 = vcombine.low %v3333_v41, %v3334_v42  ;;  %v4229_v39 = vld [vmem:[%s5054_s2 + $0x630] sm:$0xff]   ;;  %v4230_v40 = vld [vmem:[%s5054_s2 + $0x638] sm:$0xff]   ;;  %v3377_v42 = vld [vmem:[%s5055_s3] ss:$0 sm:$0xff] }
  0x9b   : > { %3826 = vmatpush3.bf16.msra.mxu0 %v4170_v38  ;;  %v4215_v38 = vld [vmem:[%s5054_s2 + $0x5f8] sm:$0xff]  }
  0x9c   : > { %3827 = vmatprep.subr.bf16.mxu0 %v4173_v46  ;;  %v3337_v46 = vcombine.low %v3333_v41, %v3333_v41  ;;  %v505_v48 = vshrl.u32 %v3335_v43, 16  ;;  %v519_v50 = vshrl.u32 %v4988_v44, 16  ;;  %v543_v52 = vrot.slane %v3335_v43, 5 }
  0x9d   : > { %3854 = vmatpush3.bf16.msra.mxu1 %v4172_v51  ;;  %v521_v51 = vshll.u32 %v4988_v44, 16 }
  0x9e   : > { %3855 = vmatprep.subr.bf16.mxu1 %v4175_v53  ;;  %532 = vst [vmem:[#allocation2 + $0xa0] sm:$0xf0] %v3337_v46  ;;  %v3368_v53 = vld [vmem:[%s4429_s6 + $0x28] sm:$0xf]  ;;  %v533_v54 = vrot.slane %v505_v48, 4 }
  0x9f   : > { %3828 = vmatpush3.bf16.msra.mxu0 %v4174_v49  ;;  %v507_v49 = vshll.u32 %v3335_v43, 16  ;;  %783 = vst [vmem:[#allocation2 + $0x168] sm:$0xf] %v3368_v53  ;;  %545 = vst [vmem:[#allocation2 + $0xb8] sm:$0xf0] %v543_v52 }
  0xa0   : > { %3829 = vmatprep.subr.bf16.mxu0 %v4177_v55 }
  0xa1   : > { %3856 = vmatpush3.bf16.msra.mxu1 %v4176_v57  ;;  %v534_v55 = vrot.slane %v507_v49, 5  ;;  %v538_v57 = vrot.slane %v519_v50, 4 }
  0xa2   : > { %3857 = vmatprep.subr.bf16.mxu1 %v4179_v58  ;;  %v3369_v58 = vld [vmem:[%s4429_s6 + $0x2c] sm:$0x1] }
  0xa3   : > { %3830 = vmatpush3.bf16.msra.mxu0 %v4178_v56  ;;  %v523_v56 = vrot.slane %v521_v51, 1  ;;  %v3374_v63 = vcombine.low %v3368_v53, %v3369_v58 }
  0xa4   : > { %3831 = vmatprep.subr.bf16.mxu0 %v4181_v60  ;;  %v539_v60 = vrot.slane %v521_v51, 5 }
  0xa5   : > { %3858 = vmatpush3.bf16.msra.mxu1 %v4180_v59  ;;  %v509_v59 = vrot.slane %v507_v49, 1 }
  0xa6   : > { %3859 = vmatprep.subr.bf16.mxu1 %v4183_v62  ;;  %v3373_v62 = vld [vmem:[%s4431_s28 + $0x2c] sm:$0x1] }
  0xa7   : > { %3832 = vmatpush3.bf16.msra.mxu0 %v4182_v61  ;;  %v3372_v61 = vld [vmem:[%s4431_s28 + $0x28] sm:$0xf] }
  0xa8   : > { %3873 = vmatprep.subr.bf16.mxu0 %v4185_v2  ;;  %784 = vst [vmem:[#allocation2 + $0x170] sm:$0xf] %v3372_v61  ;;  %v3375_v2 = vcombine.low %v3372_v61, %v3373_v62  ;;  %v3376_v3 = vcombine.low %v3372_v61, %v3372_v61 }
  0xa9   : > { %3860 = vmatpush3.bf16.msra.mxu1 %v4184_v0  ;;  %v535_v0 = vor.u32 %v534_v55, %v533_v54 }
  0xaa   : > { %2917 = vmatmul.mubr.bf16.vlgmr.msra.gmra.mrb[32].mxu0 %v851_v1  ;;  %3901 = vmatprep.subr.bf16.mxu1 %v4187_v6  ;;  %v524_v1 = vor.u32 %v523_v56, %v519_v50  ;;  %v791_v6 = vshrl.u32 %v3374_v63, 16  ;;  %818 = vst [vmem:[#allocation2 + $0x168] sm:$0xf0] %v3376_v3 }
  0xab   : > { %3874 = vmatpush3.bf16.msra.mxu0 %v4186_v4  ;;  %2924 = vmatprep.mubr.bf16.mxu0 %v877_v11  ;;  %v510_v4 = vor.u32 %v509_v59, %v505_v48  ;;  %537 = vst [vmem:[#allocation2 + $0xa8] sm:$0xf0] %v535_v0 }
  0xac   : > { %3875 = vmatprep.subr.bf16.mxu0 %v4189_v8  ;;  %2966 = vmatmul.mubr.bf16.vlgmr.msra.gmra.mrb[32].mxu1 %v853_v5  ;;  %v540_v5 = vor.u32 %v539_v60, %v538_v57  ;;  %526 = vst [vmem:[#allocation2 + $0xb8] sm:$0xf] %v524_v1  ;;  %v805_v8 = vshrl.u32 %v3375_v2, 16  ;;  %v819_v11 = vrot.slane %v791_v6, 4 }
  0xad   : > { %3902 = vmatpush3.bf16.msra.mxu1 %v4188_v7  ;;  %2973 = vmatprep.mubr.bf16.mxu1 %v879_v15  ;;  %v793_v7 = vshll.u32 %v3374_v63, 16  ;;  %512 = vst [vmem:[#allocation2 + $0xb0] sm:$0xf] %v510_v4 }
  0xae   : > { %3903 = vmatprep.subr.bf16.mxu1 %v4191_v10  ;;  %v829_v10 = vrot.slane %v3374_v63, 5  ;;  %542 = vst [vmem:[#allocation2 + $0xb0] sm:$0xf0] %v540_v5  ;;  %v824_v15 = vrot.slane %v805_v8, 4 }
  0xaf   : > { %3876 = vmatpush3.bf16.msra.mxu0 %v4190_v9  ;;  %v807_v9 = vshll.u32 %v3375_v2, 16 }
  0xb0   : > { %3877 = vmatprep.subr.bf16.mxu0 %v4193_v14  ;;  %831 = vst [vmem:[#allocation2 + $0x180] sm:$0xf0] %v829_v10 }
  0xb1   : > { %3904 = vmatpush3.bf16.msra.mxu1 %v4192_v12  ;;  %v820_v12 = vrot.slane %v793_v7, 5  ;;  %v809_v14 = vrot.slane %v807_v9, 1 }
  0xb2   : > { %2925 = vmatmul.mubr.bf16.gmra.mrb[36].mxu0 %v876_v13  ;;  %3905 = vmatprep.subr.bf16.mxu1 %v4195_v18  ;;  %v795_v13 = vrot.slane %v793_v7, 1 }
  0xb3   : > { %3878 = vmatpush3.bf16.msra.mxu0 %v4194_v16  ;;  %v825_v16 = vrot.slane %v807_v9, 5 }
  0xb4   : > { %2974 = vmatmul.mubr.bf16.gmra.mrb[36].mxu1 %v878_v17  ;;  %3879 = vmatprep.subr.bf16.mxu0 %v4197_v20  ;;  %v821_v17 = vor.u32 %v820_v12, %v819_v11  ;;  %v796_v18 = vor.u32 %v795_v13, %v791_v6  ;;  %v810_v20 = vor.u32 %v809_v14, %v805_v8 }
  0xb5   : > { %3906 = vmatpush3.bf16.msra.mxu1 %v4196_v19  ;;  %v527_v19 = vrot.slane %v3335_v43, 1 }
  0xb6   : > { %3907 = vmatprep.subr.bf16.mxu1 %v4199_v22  ;;  %v546_v22 = vrot.slane %v4988_v44, 5  ;;  %823 = vst [vmem:[#allocation2 + $0x170] sm:$0xf0] %v821_v17  ;;  %798 = vst [vmem:[#allocation2 + $0x178] sm:$0xf] %v796_v18 }
  0xb7   : > { %3880 = vmatpush3.bf16.msra.mxu0 %v4198_v21  ;;  %v826_v21 = vor.u32 %v825_v16, %v824_v15  ;;  %529 = vst [vmem:[#allocation2 + $0xc0] sm:$0xf] %v527_v19  ;;  %812 = vst [vmem:[#allocation2 + $0x180] sm:$0xf] %v810_v20 }
  0xb8   : > { %3881 = vmatprep.subr.bf16.mxu0 %v4201_v24  ;;  %v832_v24 = vrot.slane %v3375_v2, 5  ;;  %548 = vst [vmem:[#allocation2 + $0xc0] sm:$0xf0] %v546_v22 }
  0xb9   : > { %3908 = vmatpush3.bf16.msra.mxu1 %v4200_v23  ;;  %v813_v23 = vrot.slane %v3374_v63, 1  ;;  %828 = vst [vmem:[#allocation2 + $0x178] sm:$0xf0] %v826_v21 }
  0xba   : > { %3909 = vmatprep.subr.bf16.mxu1 %v4203_v26  ;;  %v856_v26 = vld [vmem:[#allocation2 + $0xa8] sm:$0xff]  ;;  %834 = vst [vmem:[#allocation2 + $0x188] sm:$0xf0] %v832_v24 }
  0xbb   : > { %3882 = vmatpush3.bf16.msra.mxu0 %v4202_v25  ;;  %v855_v25 = vld [vmem:[#allocation2 + $0xa0] sm:$0xff]  ;;  %815 = vst [vmem:[#allocation2 + $0x188] sm:$0xf] %v813_v23  ;;  %3014 = vmatprep.mubr.bf16.mxu0 %v856_v26 }
  0xbc   : > { %3883 = vmatprep.subr.bf16.mxu0 %v4205_v28  ;;  %v4221_v28 = vld [vmem:[%s5054_s2 + $0x608] sm:$0xff]  }
  0xbd   : > { %3910 = vmatpush3.bf16.msra.mxu1 %v4204_v27  ;;  %v858_v27 = vld [vmem:[#allocation2 + $0xb8] sm:$0xff] }
  0xbe   : > { %3911 = vmatprep.subr.bf16.mxu1 %v4207_v30  ;;  %3063 = vmatprep.mubr.bf16.mxu1 %v858_v27  ;;  %v4225_v30 = vld [vmem:[%s5054_s2 + $0x610] sm:$0xff]  }
  0xbf   : > { %3884 = vmatpush3.bf16.msra.mxu0 %v4206_v29  ;;  %v857_v29 = vld [vmem:[#allocation2 + $0xb0] sm:$0xff] }
  0xc0   : > { %3885 = vmatprep.subr.bf16.mxu0 %v4209_v32  ;;  %v883_v32 = vld [vmem:[#allocation2 + $0x180] sm:$0xff] }
  0xc1   : > { %3912 = vmatpush3.bf16.msra.mxu1 %v4208_v31  ;;  %v881_v31 = vld [vmem:[#allocation2 + $0x170] sm:$0xff] }
  0xc2   : > { %3913 = vmatprep.subr.bf16.mxu1 %v4211_v34  ;;  %v882_v34 = vld [vmem:[#allocation2 + $0x178] sm:$0xff]  ;;  %v884_v55 = vld [vmem:[#allocation2 + $0x188] sm:$0xff] }
  0xc3   : > { %3886 = vmatpush3.bf16.msra.mxu0 %v4210_v33  ;;  %v880_v33 = vld [vmem:[#allocation2 + $0x168] sm:$0xff] }
  0xc4   : > { %3887 = vmatprep.subr.bf16.mxu0 %v4213_v36  ;;  %v859_v36 = vld [vmem:[#allocation2 + $0xc0] sm:$0xff] }
  0xc5   : > { %3914 = vmatpush3.bf16.msra.mxu1 %v4212_v35  ;;  %v4226_v35 = vld [vmem:[%s5054_s2 + $0x618] sm:$0xff]  }
  0xc6   : > { %3915 = vmatprep.subr.bf16.mxu1 %v4215_v38  ;;  %v4228_v38 = vld [vmem:[%s5054_s2 + $0x628] sm:$0xff]  }
  0xc7   : > { %3888 = vmatpush3.bf16.msra.mxu0 %v4214_v37  ;;  %v4227_v37 = vld [vmem:[%s5054_s2 + $0x620] sm:$0xff]  }
  0xc8   : > { %3939 = vmatprep.subr.bf16.mxu0 %v4996_v47 }
  0xc9   : > { %3916 = vmatpush3.bf16.msra.mxu1 %v4218_v45 }
  0xca   : > { %3015 = vmatmul.mubr.bf16.vlgmr.msra.gmra.mrb[40].mxu0 %v855_v25 }
  0xcb   : > { %3940 = vmatpush3.bf16.msra.mxu0 %v4996_v47  ;;  %3022 = vmatprep.mubr.bf16.mxu0 %v881_v31 }
  0xcc   : > { %3064 = vmatmul.mubr.bf16.vlgmr.msra.gmra.mrb[40].mxu1 %v857_v29  ;;  %3941 = vmatprep.subr.bf16.mxu0 %v4221_v28 }
  0xcd   : > { %3071 = vmatprep.mubr.bf16.mxu1 %v883_v32 }
  0xcf   : > { %3942 = vmatpush3.bf16.msra.mxu0 %v4221_v28 }
  0xd0   : > { %3943 = vmatprep.subr.bf16.mxu0 %v4225_v30 }
  0xd2   : > { %3023 = vmatmul.mubr.bf16.gmra.mrb[44].mxu0 %v880_v33 }
  0xd3   : > { %3944 = vmatpush3.bf16.msra.mxu0 %v4225_v30  ;;  %3955 = vmatprep.mubr.bf16.mxu0 %v859_v36 }
  0xd4   : > { %3072 = vmatmul.mubr.bf16.gmra.mrb[44].mxu1 %v882_v34  ;;  %3945 = vmatprep.subr.bf16.mxu0 %v4226_v35 }
  0xd7   : > { %3946 = vmatpush3.bf16.msra.mxu0 %v4226_v35 }
  0xd8   : > { %3947 = vmatprep.subr.bf16.mxu0 %v4227_v37 }
  0xdb   : > { %3948 = vmatpush3.bf16.msra.mxu0 %v4227_v37 }
  0xdc   : > { %3949 = vmatprep.subr.bf16.mxu0 %v4228_v38 }
  0xdf   : > { %3950 = vmatpush3.bf16.msra.mxu0 %v4228_v38 }
  0xe0   : > { %3951 = vmatprep.subr.bf16.mxu0 %v4229_v39 }
  0xe3   : > { %3952 = vmatpush3.bf16.msra.mxu0 %v4229_v39 }
  0xe4   : > { %3953 = vmatprep.subr.bf16.mxu0 %v4230_v40 }
  0xe7   : > { %3954 = vmatpush3.bf16.msra.mxu0 %v4230_v40 }
  0xea   : > { %3956 = vmatmul.mubr.bf16.vlgmr.msra.gmra.mrb[48].mxu0 %v884_v55 }
  0xfd   : > { %v3609_v41 = vpop.f32.mrb[0].mxu0 }
  0xfe   : > { %v3610_v43 = vpop.f32.mrb[1].mxu0 }
  0xff   : > { %v3637_v44 = vpop.f32.mrb[0].mxu1  ;;  %v3611_v45 = vadd.f32 %v3610_v43, %v3609_v41  ;;  %v3612_v46 = vpop.f32.mrb[2].mxu0 }
 0x100   : > { %v3638_v47 = vpop.f32.mrb[1].mxu1  ;;  %v3613_v48 = vpop.f32.mrb[3].mxu0 }
 0x101   : > { %v3639_v49 = vadd.f32 %v3638_v47, %v3637_v44  ;;  %v3640_v50 = vpop.f32.mrb[2].mxu1  ;;  %v2527_v51 = vadd.f32 %v3611_v45, %v3377_v42  ;;  %v3614_v52 = vadd.f32 %v3613_v48, %v3612_v46 }
 0x102   : > { %v3641_v53 = vpop.f32.mrb[3].mxu1 }
 0x103   : > { %v3642_v54 = vadd.f32 %v3641_v53, %v3640_v50  ;;  %v2530_v56 = vadd.f32 %v3614_v52, %v3377_v42  ;;  %v2576_v57 = vadd.f32 %v3639_v49, %v2527_v51 }
 0x105   : > { %v2579_v58 = vadd.f32 %v3642_v54, %v2530_v56 }
 0x107   : > { %v3615_v59 = vpop.f32.mrb[4].mxu0 }
 0x108   : > { %v3616_v61 = vpop.f32.mrb[5].mxu0 }
 0x109   : > { %v3643_v60 = vpop.f32.mrb[4].mxu1  ;;  %v3617_v63 = vadd.f32 %v3616_v61, %v3615_v59  ;;  %v3618_v0 = vpop.f32.mrb[6].mxu0 }
 0x10a   : > { %v3644_v62 = vpop.f32.mrb[5].mxu1  ;;  %v3619_v3 = vpop.f32.mrb[7].mxu0 }
 0x10b   : > { %v3645_v1 = vadd.f32 %v3644_v62, %v3643_v60  ;;  %v3646_v2 = vpop.f32.mrb[6].mxu1  ;;  %v2535_v5 = vadd.f32 %v3617_v63, %v3377_v42  ;;  %v3620_v6 = vadd.f32 %v3619_v3, %v3618_v0 }
 0x10c   : > { %v3647_v4 = vpop.f32.mrb[7].mxu1 }
 0x10d   : > { %v3648_v7 = vadd.f32 %v3647_v4, %v3646_v2  ;;  %v2538_v8 = vadd.f32 %v3620_v6, %v3377_v42  ;;  %v2584_v9 = vadd.f32 %v3645_v1, %v2535_v5 }
 0x10f   : > { %v2587_v10 = vadd.f32 %v3648_v7, %v2538_v8 }
 0x11d   : > { %v3665_v11 = vpop.f32.mrb[8].mxu0 }
 0x11e   : > { %v3666_v12 = vpop.f32.mrb[9].mxu0 }
 0x11f   : > { %v3667_v13 = vadd.f32 %v3666_v12, %v3665_v11  ;;  %v3668_v14 = vpop.f32.mrb[10].mxu0  ;;  %v3693_v18 = vpop.f32.mrb[8].mxu1 }
 0x120   : > { %v3669_v15 = vpop.f32.mrb[11].mxu0  ;;  %v3694_v20 = vpop.f32.mrb[9].mxu1 }
 0x121   : > { %v2625_v16 = vadd.f32 %v3667_v13, %v2576_v57  ;;  %v3670_v17 = vadd.f32 %v3669_v15, %v3668_v14  ;;  %v3695_v21 = vadd.f32 %v3694_v20, %v3693_v18  ;;  %v3696_v22 = vpop.f32.mrb[10].mxu1 }
 0x122   : > { %v3697_v23 = vpop.f32.mrb[11].mxu1 }
 0x123   : > { %v2628_v19 = vadd.f32 %v3670_v17, %v2579_v58  ;;  %v2674_v24 = vadd.f32 %v3695_v21, %v2625_v16  ;;  %v3698_v25 = vadd.f32 %v3697_v23, %v3696_v22 }
 0x125   : > { %v3671_v26 = vpop.f32.mrb[12].mxu0  ;;  %v2677_v28 = vadd.f32 %v3698_v25, %v2628_v19 }
 0x126   : > { %v3672_v27 = vpop.f32.mrb[13].mxu0 }
 0x127   : > { %v3673_v29 = vadd.f32 %v3672_v27, %v3671_v26  ;;  %v3674_v30 = vpop.f32.mrb[14].mxu0  ;;  %v3699_v35 = vpop.f32.mrb[12].mxu1 }
 0x128   : > { %v3675_v31 = vpop.f32.mrb[15].mxu0  ;;  %v3700_v36 = vpop.f32.mrb[13].mxu1 }
 0x129   : > { %v2633_v32 = vadd.f32 %v3673_v29, %v2584_v9  ;;  %v3676_v33 = vadd.f32 %v3675_v31, %v3674_v30  ;;  %v3701_v37 = vadd.f32 %v3700_v36, %v3699_v35  ;;  %v3702_v38 = vpop.f32.mrb[14].mxu1 }
 0x12a   : > { %v3703_v39 = vpop.f32.mrb[15].mxu1 }
 0x12b   : > { %v2636_v34 = vadd.f32 %v3676_v33, %v2587_v10  ;;  %v2682_v40 = vadd.f32 %v3701_v37, %v2633_v32  ;;  %v3704_v41 = vadd.f32 %v3703_v39, %v3702_v38 }
 0x12d   : > { %v2685_v42 = vadd.f32 %v3704_v41, %v2636_v34 }
 0x13d   : > { %v3721_v43 = vpop.f32.mrb[16].mxu0 }
 0x13e   : > { %v3722_v44 = vpop.f32.mrb[17].mxu0 }
 0x13f   : > { %v3723_v45 = vadd.f32 %v3722_v44, %v3721_v43  ;;  %v3724_v46 = vpop.f32.mrb[18].mxu0  ;;  %v3749_v59 = vpop.f32.mrb[16].mxu1 }
 0x140   : > { %v3725_v47 = vpop.f32.mrb[19].mxu0  ;;  %v3750_v60 = vpop.f32.mrb[17].mxu1 }
 0x141   : > { %v2723_v48 = vadd.f32 %v3723_v45, %v2674_v24  ;;  %v3726_v49 = vadd.f32 %v3725_v47, %v3724_v46  ;;  %v3751_v61 = vadd.f32 %v3750_v60, %v3749_v59  ;;  %v3752_v62 = vpop.f32.mrb[18].mxu1 }
 0x142   : > { %v3753_v63 = vpop.f32.mrb[19].mxu1 }
 0x143   : > { %v2726_v50 = vadd.f32 %v3726_v49, %v2677_v28  ;;  %v2772_v0 = vadd.f32 %v3751_v61, %v2723_v48  ;;  %v3754_v1 = vadd.f32 %v3753_v63, %v3752_v62 }
 0x145   : > { %v3727_v51 = vpop.f32.mrb[20].mxu0  ;;  %v2775_v2 = vadd.f32 %v3754_v1, %v2726_v50 }
 0x146   : > { %v3728_v52 = vpop.f32.mrb[21].mxu0 }
 0x147   : > { %v3729_v53 = vadd.f32 %v3728_v52, %v3727_v51  ;;  %v3730_v54 = vpop.f32.mrb[22].mxu0  ;;  %v3755_v3 = vpop.f32.mrb[20].mxu1 }
 0x148   : > { %v3731_v55 = vpop.f32.mrb[23].mxu0  ;;  %v3756_v4 = vpop.f32.mrb[21].mxu1 }
 0x149   : > { %v2731_v56 = vadd.f32 %v3729_v53, %v2682_v40  ;;  %v3732_v57 = vadd.f32 %v3731_v55, %v3730_v54  ;;  %v3757_v5 = vadd.f32 %v3756_v4, %v3755_v3  ;;  %v3758_v6 = vpop.f32.mrb[22].mxu1 }
 0x14a   : > { %v3759_v7 = vpop.f32.mrb[23].mxu1 }
 0x14b   : > { %v2734_v58 = vadd.f32 %v3732_v57, %v2685_v42  ;;  %v2780_v8 = vadd.f32 %v3757_v5, %v2731_v56  ;;  %v3760_v9 = vadd.f32 %v3759_v7, %v3758_v6 }
 0x14d   : > { %v2783_v10 = vadd.f32 %v3760_v9, %v2734_v58 }
 0x15d   : > { %v3777_v11 = vpop.f32.mrb[24].mxu0 }
 0x15e   : > { %v3778_v12 = vpop.f32.mrb[25].mxu0 }
 0x15f   : > { %v3779_v13 = vadd.f32 %v3778_v12, %v3777_v11  ;;  %v3780_v14 = vpop.f32.mrb[26].mxu0  ;;  %v3805_v21 = vpop.f32.mrb[24].mxu1 }
 0x160   : > { %v3781_v15 = vpop.f32.mrb[27].mxu0  ;;  %v3806_v24 = vpop.f32.mrb[25].mxu1 }
 0x161   : > { %v2821_v16 = vadd.f32 %v3779_v13, %v2772_v0  ;;  %v3782_v17 = vadd.f32 %v3781_v15, %v3780_v14  ;;  %v3807_v26 = vadd.f32 %v3806_v24, %v3805_v21  ;;  %v3808_v27 = vpop.f32.mrb[26].mxu1 }
 0x162   : > { %v3809_v30 = vpop.f32.mrb[27].mxu1 }
 0x163   : > { %v2824_v18 = vadd.f32 %v3782_v17, %v2775_v2  ;;  %v2870_v31 = vadd.f32 %v3807_v26, %v2821_v16  ;;  %v3810_v32 = vadd.f32 %v3809_v30, %v3808_v27 }
 0x165   : > { %v3783_v19 = vpop.f32.mrb[28].mxu0  ;;  %v2873_v34 = vadd.f32 %v3810_v32, %v2824_v18 }
 0x166   : > { %v3784_v20 = vpop.f32.mrb[29].mxu0 }
 0x167   : > { %v3785_v22 = vadd.f32 %v3784_v20, %v3783_v19  ;;  %v3786_v23 = vpop.f32.mrb[30].mxu0  ;;  %v3811_v35 = vpop.f32.mrb[28].mxu1 }
 0x168   : > { %v3787_v25 = vpop.f32.mrb[31].mxu0  ;;  %v3812_v36 = vpop.f32.mrb[29].mxu1 }
 0x169   : > { %v2829_v28 = vadd.f32 %v3785_v22, %v2780_v8  ;;  %v3788_v29 = vadd.f32 %v3787_v25, %v3786_v23  ;;  %v3813_v37 = vadd.f32 %v3812_v36, %v3811_v35  ;;  %v3814_v38 = vpop.f32.mrb[30].mxu1 }
 0x16a   : > { %v3815_v39 = vpop.f32.mrb[31].mxu1 }
 0x16b   : > { %v2832_v33 = vadd.f32 %v3788_v29, %v2783_v10  ;;  %v2878_v40 = vadd.f32 %v3813_v37, %v2829_v28  ;;  %v3816_v41 = vadd.f32 %v3815_v39, %v3814_v38 }
 0x16d   : > { %v2881_v42 = vadd.f32 %v3816_v41, %v2832_v33 }
 0x17d   : > { %v3833_v43 = vpop.f32.mrb[32].mxu0 }
 0x17e   : > { %v3834_v44 = vpop.f32.mrb[33].mxu0 }
 0x17f   : > { %v3835_v45 = vadd.f32 %v3834_v44, %v3833_v43  ;;  %v3836_v46 = vpop.f32.mrb[34].mxu0  ;;  %v3861_v50 = vpop.f32.mrb[32].mxu1 }
 0x180   : > { %v3837_v47 = vpop.f32.mrb[35].mxu0  ;;  %v3862_v52 = vpop.f32.mrb[33].mxu1 }
 0x181   : > { %v2919_v48 = vadd.f32 %v3835_v45, %v2870_v31  ;;  %v3838_v49 = vadd.f32 %v3837_v47, %v3836_v46  ;;  %v3863_v53 = vadd.f32 %v3862_v52, %v3861_v50  ;;  %v3864_v54 = vpop.f32.mrb[34].mxu1 }
 0x182   : > { %v3865_v55 = vpop.f32.mrb[35].mxu1 }
 0x183   : > { %v2922_v51 = vadd.f32 %v3838_v49, %v2873_v34  ;;  %v2968_v57 = vadd.f32 %v3863_v53, %v2919_v48  ;;  %v3866_v58 = vadd.f32 %v3865_v55, %v3864_v54 }
 0x185   : > { %v3839_v56 = vpop.f32.mrb[36].mxu0  ;;  %v2971_v62 = vadd.f32 %v3866_v58, %v2922_v51  ;;  %v3140_v58 = vld [vmem:[%s237_s16] sm:$0xf] }
 0x186   : > { %v3840_v59 = vpop.f32.mrb[37].mxu0 }
 0x187   : > { %v3841_v60 = vadd.f32 %v3840_v59, %v3839_v56  ;;  %v3842_v61 = vpop.f32.mrb[38].mxu0  ;;  %v3867_v2 = vpop.f32.mrb[36].mxu1 }
 0x188   : > { %v3843_v63 = vpop.f32.mrb[39].mxu0  ;;  %v3868_v4 = vpop.f32.mrb[37].mxu1 }
 0x189   : > { %v2927_v0 = vadd.f32 %v3841_v60, %v2878_v40  ;;  %v3844_v1 = vadd.f32 %v3843_v63, %v3842_v61  ;;  %v3869_v5 = vadd.f32 %v3868_v4, %v3867_v2  ;;  %v3870_v6 = vpop.f32.mrb[38].mxu1 }
 0x18a   : > { %v3871_v7 = vpop.f32.mrb[39].mxu1 }
 0x18b   : > { %v2930_v3 = vadd.f32 %v3844_v1, %v2881_v42  ;;  %v2976_v8 = vadd.f32 %v3869_v5, %v2927_v0  ;;  %v3872_v9 = vadd.f32 %v3871_v7, %v3870_v6 }
 0x18d   : > { %v2979_v10 = vadd.f32 %v3872_v9, %v2930_v3 }
 0x19d   : > { %v3889_v11 = vpop.f32.mrb[40].mxu0 }
 0x19e   : > { %v3890_v13 = vpop.f32.mrb[41].mxu0 }
 0x19f   : > { %v3917_v12 = vpop.f32.mrb[40].mxu1  ;;  %v3891_v15 = vadd.f32 %v3890_v13, %v3889_v11  ;;  %v3892_v16 = vpop.f32.mrb[42].mxu0 }
 0x1a0   : > { %v3918_v14 = vpop.f32.mrb[41].mxu1  ;;  %v3893_v19 = vpop.f32.mrb[43].mxu0 }
 0x1a1   : > { %v3919_v17 = vadd.f32 %v3918_v14, %v3917_v12  ;;  %v3920_v18 = vpop.f32.mrb[42].mxu1  ;;  %v3017_v21 = vadd.f32 %v3891_v15, %v2968_v57  ;;  %v3894_v22 = vadd.f32 %v3893_v19, %v3892_v16 }
 0x1a2   : > { %v3921_v20 = vpop.f32.mrb[43].mxu1 }
 0x1a3   : > { %v3922_v23 = vadd.f32 %v3921_v20, %v3920_v18  ;;  %v3020_v24 = vadd.f32 %v3894_v22, %v2971_v62  ;;  %v3066_v25 = vadd.f32 %v3919_v17, %v3017_v21 }
 0x1a5   : > { %v3895_v26 = vpop.f32.mrb[44].mxu0  ;;  %v3069_v28 = vadd.f32 %v3922_v23, %v3020_v24 }
 0x1a6   : > { %v3896_v29 = vpop.f32.mrb[45].mxu0 }
 0x1a7   : > { %v3923_v27 = vpop.f32.mrb[44].mxu1  ;;  %v3897_v31 = vadd.f32 %v3896_v29, %v3895_v26  ;;  %v3898_v32 = vpop.f32.mrb[46].mxu0 }
 0x1a8   : > { %v3924_v30 = vpop.f32.mrb[45].mxu1  ;;  %v3899_v35 = vpop.f32.mrb[47].mxu0 }
 0x1a9   : > { %v3925_v33 = vadd.f32 %v3924_v30, %v3923_v27  ;;  %v3926_v34 = vpop.f32.mrb[46].mxu1  ;;  %v3025_v37 = vadd.f32 %v3897_v31, %v2976_v8  ;;  %v3900_v38 = vadd.f32 %v3899_v35, %v3898_v32 }
 0x1aa   : > { %v3927_v36 = vpop.f32.mrb[47].mxu1 }
 0x1ab   : > { %v3928_v39 = vadd.f32 %v3927_v36, %v3926_v34  ;;  %v3028_v40 = vadd.f32 %v3900_v38, %v2979_v10  ;;  %v3074_v41 = vadd.f32 %v3925_v33, %v3025_v37 }
 0x1ad   : > { %v3077_v42 = vadd.f32 %v3928_v39, %v3028_v40 }
 0x1bd   : > { %v3957_v43 = vpop.f32.mrb[48].mxu0 }
 0x1be   : > { %v3123_v44 = vadd.f32 %v3957_v43, %v3074_v41  ;;  %v3114_v45 = vpop.f32.mrb[49].mxu0 }
 0x1bf   : > { %v3115_v46 = vadd.f32 %v3114_v45, %v3066_v25  ;;  %v3958_v47 = vpop.f32.mrb[50].mxu0 }
 0x1c0   : > { %v3126_v48 = vadd.f32 %v3958_v47, %v3077_v42  ;;  %v3117_v49 = vpop.f32.mrb[51].mxu0  ;;  %v3131_v51 = vmax.f32 %v3123_v44, 0.0 }
 0x1c1   : > { %v3118_v50 = vadd.f32 %v3117_v49, %v3069_v28  ;;  %v3129_v53 = vmax.f32 %v3115_v46, 0.0 }
 0x1c2   : > { %v3132_v52 = vmax.f32 %v3126_v48, 0.0 }
 0x1c3   : > { %v3130_v54 = vmax.f32 %v3118_v50, 0.0 }
 0x1c4   : > { %v3134_v55 = vmax.f32 %v3131_v51, %v3132_v52 }
 0x1c5   : > { %v3133_v56 = vmax.f32 %v3129_v53, %v3130_v54 }
 0x1c7   : > { %v3135_v57 = vmax.f32 %v3133_v56, %v3134_v55 }
 0x1c9   : > { %v3136_v59 = vpack.c.bf16 %v3135_v57, %v3135_v57 }
 0x1cb   : > { %v3141_v60 = vsel %vm3139_vm2, %v3136_v59, %v3140_v58 }
 0x1cc   : > { %3142 = vst [vmem:[%s237_s16] sm:$0xf] %v3141_v60 }
 0x1cd PF: > { %s14_s19 = sadd.s32 1, %s4269_s19   ;;  %s5057_s15 = smov %s4261_s17 }
 0x1ce   : > { %p11_p7 = scmp.ge.s32.totalorder %s14_s19, 16   ;;  %s5058_s16 = smov %s4265_s18 }
 0x1cf   : > { %s5059_s17 = smov %s5062_s20  ;;  %s5060_s18 = smov %s5066_s21 }
 0x1d0   :  { %13 = sbr.rel (!%p11_p7) target bundleno = 3 (0x3), region = 81 }

// kernel: mnist_cnn_forward.5
= control target key start
LH: loop header
LB: loop body
LE: loop exit
PB: predicated region body
PF: predicated region fallthrough
CT: control target
= control target key end

     0   :  { %s6459_s18 = smov 0   ;;  %s6461_s19 = smov 0   ;;  %s7843_s0 = inlined_call_operand.vmem [shape: bf16[8,3136], index: 0, kind: input, shape index: {}]   ;;  %s7844_s1 = inlined_call_operand.vmem [shape: bf16[3136,512], index: 1, kind: input, shape index: {}]   ;;  %s7845_s2 = inlined_call_operand.vmem [shape: f32[1,512], index: 2, kind: input, shape index: {}]   ;;  %s7846_s3 = inlined_call_operand.vmem [shape: bf16[512,128], index: 3, kind: input, shape index: {}]   ;;  %s7847_s4 = inlined_call_operand.vmem [shape: f32[1,128], index: 4, kind: input, shape index: {}]   ;;  %s7848_s5 = inlined_call_operand.vmem [shape: f32[8,128], index: 5, kind: output, shape index: {}]  }
   0x1   :  { %s6463_s20 = smov 0   ;;  %s6465_s21 = smov 0  }
   0x2   :  { %s6467_s22 = smov 0  }
   0x3 LB: > { %s24_s23 = sadd.s32 1, %s6421_s21  ;;  %p67_p1 = scmp.ne.s32.totalorder %s6413_s19, %s6409_s18  ;;  %s6425_s22 = sphi %s6467_s22, %s15_s22   ;;  %s6421_s21 = sphi %s6465_s21, %s7852_s21   ;;  %s6417_s20 = sphi %s6463_s20, %s7851_s20   ;;  %s6413_s19 = sphi %s6461_s19, %s7850_s19   ;;  %s6409_s18 = sphi %s6459_s18, %s7849_s18  }
   0x4   : > { %p25_p0 = scmp.ge.s32.totalorder %s24_s23, 2  ;;  %p68_p2 = scmp.eq.s32.totalorder %s6425_s22, 0 }
   0x5   : > { %s60_s25 = sadd.s32 1, %s6413_s19  ;;  %p5196_p5 = scmp.ge.s32.totalorder %s6425_s22, 2 }
   0x6   : > { %s7854_s23 = smov (%p25_p0, %s24_s23), 0  ;;  %p69_p3 = por %p68_p2, %p67_p1 }
   0x7   : > { %s57_s24 = ssub.s32 %s6421_s21, %s7854_s23  ;;  %203 = sbr.rel (%p5196_p5) target bundleno = 214 (0xd6), region = 24 }
   0x8   : > { %p58_p4 = scmp.eq.s32.totalorder %s57_s24, 0 }
   0xa   : > { %s6494_s26 = scalar_select %p58_p4, %s6413_s19, %s60_s25  }
   0xe   : > { %206 = sbr.rel (!%p69_p3) target bundleno = 214 (0xd6), region = 28  ;;  %s208_s27 = sand.u32 (%p69_p3), 1, %s6413_s19  }
   0xf   : > { %s5643_s28 = sshll.u32 (%p69_p3), %s6421_s21, 3  ;;  %s5714_s29 = smul.u32 (%p69_p3), 3136, %s208_s27 }
  0x10   : > { %s6502_s7 = scalar_lea.vmem (%p69_p3), %s7844_s1, %s5643_s28 }
  0x11   : > { %v1023_v0 = vld [vmem:[%s6502_s7] sm:$0xff] (%p69_p3)  ;;  %v1025_v1 = vld [vmem:[%s6502_s7 + $0x10] sm:$0xff] (%p69_p3)  ;;  %s6510_s8 = scalar_lea.vmem (%p69_p3), [#allocation3], %s5714_s29 }
  0x12   : > { %v1027_v2 = vld [vmem:[%s6502_s7 + $0x20] sm:$0xff] (%p69_p3)  ;;  %v1029_v3 = vld [vmem:[%s6502_s7 + $0x30] sm:$0xff] (%p69_p3)  ;;  %1024 = vst [vmem:[%s6510_s8] sm:$0xff] (%p69_p3), %v1023_v0  ;;  %1026 = vst [vmem:[%s6510_s8 + $0x8] sm:$0xff] (%p69_p3), %v1025_v1 }
  0x13   : > { %v1031_v4 = vld [vmem:[%s6502_s7 + $0x40] sm:$0xff] (%p69_p3)  ;;  %v1033_v5 = vld [vmem:[%s6502_s7 + $0x50] sm:$0xff] (%p69_p3)  ;;  %1028 = vst [vmem:[%s6510_s8 + $0x10] sm:$0xff] (%p69_p3), %v1027_v2  ;;  %1030 = vst [vmem:[%s6510_s8 + $0x18] sm:$0xff] (%p69_p3), %v1029_v3 }
  0x14   : > { %1032 = vst [vmem:[%s6510_s8 + $0x20] sm:$0xff] (%p69_p3), %v1031_v4  ;;  %1034 = vst [vmem:[%s6510_s8 + $0x28] sm:$0xff] (%p69_p3), %v1033_v5  ;;  %v1035_v6 = vld [vmem:[%s6502_s7 + $0x60] sm:$0xff] (%p69_p3)  ;;  %v1037_v7 = vld [vmem:[%s6502_s7 + $0x70] sm:$0xff] (%p69_p3) }
  0x15   : > { %v1039_v8 = vld [vmem:[%s6502_s7 + $0x80] sm:$0xff]  ;;  %1036 = vst [vmem:[%s6510_s8 + $0x30] sm:$0xff] %v1035_v6  ;;  %1038 = vst [vmem:[%s6510_s8 + $0x38] sm:$0xff] %v1037_v7  ;;  %v1041_v9 = vld [vmem:[%s6502_s7 + $0x90] sm:$0xff] }
  0x16   : > { %1040 = vst [vmem:[%s6510_s8 + $0x40] sm:$0xff] %v1039_v8  ;;  %v1043_v10 = vld [vmem:[%s6502_s7 + $0xa0] sm:$0xff]  ;;  %v1045_v11 = vld [vmem:[%s6502_s7 + $0xb0] sm:$0xff]  ;;  %1042 = vst [vmem:[%s6510_s8 + $0x48] sm:$0xff] %v1041_v9 }
  0x17   : > { %1044 = vst [vmem:[%s6510_s8 + $0x50] sm:$0xff] %v1043_v10  ;;  %1046 = vst [vmem:[%s6510_s8 + $0x58] sm:$0xff] %v1045_v11  ;;  %v1047_v12 = vld [vmem:[%s6502_s7 + $0xc0] sm:$0xff]  ;;  %v1049_v13 = vld [vmem:[%s6502_s7 + $0xd0] sm:$0xff] }
  0x18   : > { %v1051_v14 = vld [vmem:[%s6502_s7 + $0xe0] sm:$0xff]  ;;  %1048 = vst [vmem:[%s6510_s8 + $0x60] sm:$0xff] %v1047_v12  ;;  %1050 = vst [vmem:[%s6510_s8 + $0x68] sm:$0xff] %v1049_v13  ;;  %v1053_v15 = vld [vmem:[%s6502_s7 + $0xf0] sm:$0xff] }
  0x19   : > { %1052 = vst [vmem:[%s6510_s8 + $0x70] sm:$0xff] %v1051_v14  ;;  %v1055_v16 = vld [vmem:[%s6502_s7 + $0x100] sm:$0xff]  ;;  %v1057_v17 = vld [vmem:[%s6502_s7 + $0x110] sm:$0xff]  ;;  %1054 = vst [vmem:[%s6510_s8 + $0x78] sm:$0xff] %v1053_v15 }
  0x1a   : > { %1056 = vst [vmem:[%s6510_s8 + $0x80] sm:$0xff] %v1055_v16  ;;  %1058 = vst [vmem:[%s6510_s8 + $0x88] sm:$0xff] %v1057_v17  ;;  %v1059_v18 = vld [vmem:[%s6502_s7 + $0x120] sm:$0xff]  ;;  %v1061_v19 = vld [vmem:[%s6502_s7 + $0x130] sm:$0xff] }
  0x1b   : > { %v1063_v20 = vld [vmem:[%s6502_s7 + $0x140] sm:$0xff]  ;;  %1060 = vst [vmem:[%s6510_s8 + $0x90] sm:$0xff] %v1059_v18  ;;  %1062 = vst [vmem:[%s6510_s8 + $0x98] sm:$0xff] %v1061_v19  ;;  %v1065_v21 = vld [vmem:[%s6502_s7 + $0x150] sm:$0xff] }
  0x1c   : > { %1064 = vst [vmem:[%s6510_s8 + $0xa0] sm:$0xff] %v1063_v20  ;;  %v1067_v22 = vld [vmem:[%s6502_s7 + $0x160] sm:$0xff]  ;;  %v1069_v23 = vld [vmem:[%s6502_s7 + $0x170] sm:$0xff]  ;;  %1066 = vst [vmem:[%s6510_s8 + $0xa8] sm:$0xff] %v1065_v21 }
  0x1d   : > { %1068 = vst [vmem:[%s6510_s8 + $0xb0] sm:$0xff] %v1067_v22  ;;  %1070 = vst [vmem:[%s6510_s8 + $0xb8] sm:$0xff] %v1069_v23  ;;  %v1071_v24 = vld [vmem:[%s6502_s7 + $0x180] sm:$0xff]  ;;  %v1073_v25 = vld [vmem:[%s6502_s7 + $0x190] sm:$0xff] }
  0x1e   : > { %v1075_v26 = vld [vmem:[%s6502_s7 + $0x1a0] sm:$0xff]  ;;  %1072 = vst [vmem:[%s6510_s8 + $0xc0] sm:$0xff] %v1071_v24  ;;  %1074 = vst [vmem:[%s6510_s8 + $0xc8] sm:$0xff] %v1073_v25  ;;  %v1077_v27 = vld [vmem:[%s6502_s7 + $0x1b0] sm:$0xff] }
  0x1f   : > { %1076 = vst [vmem:[%s6510_s8 + $0xd0] sm:$0xff] %v1075_v26  ;;  %v1079_v28 = vld [vmem:[%s6502_s7 + $0x1c0] sm:$0xff]  ;;  %v1081_v29 = vld [vmem:[%s6502_s7 + $0x1d0] sm:$0xff]  ;;  %1078 = vst [vmem:[%s6510_s8 + $0xd8] sm:$0xff] %v1077_v27 }
  0x20   : > { %1080 = vst [vmem:[%s6510_s8 + $0xe0] sm:$0xff] %v1079_v28  ;;  %1082 = vst [vmem:[%s6510_s8 + $0xe8] sm:$0xff] %v1081_v29  ;;  %v1083_v30 = vld [vmem:[%s6502_s7 + $0x1e0] sm:$0xff]  ;;  %v1085_v31 = vld [vmem:[%s6502_s7 + $0x1f0] sm:$0xff] }
  0x21   : > { %v1087_v32 = vld [vmem:[%s6502_s7 + $0x200] sm:$0xff]  ;;  %1084 = vst [vmem:[%s6510_s8 + $0xf0] sm:$0xff] %v1083_v30  ;;  %1086 = vst [vmem:[%s6510_s8 + $0xf8] sm:$0xff] %v1085_v31  ;;  %v1089_v33 = vld [vmem:[%s6502_s7 + $0x210] sm:$0xff] }
  0x22   : > { %1088 = vst [vmem:[%s6510_s8 + $0x100] sm:$0xff] %v1087_v32  ;;  %v1091_v34 = vld [vmem:[%s6502_s7 + $0x220] sm:$0xff]  ;;  %v1093_v35 = vld [vmem:[%s6502_s7 + $0x230] sm:$0xff]  ;;  %1090 = vst [vmem:[%s6510_s8 + $0x108] sm:$0xff] %v1089_v33 }
  0x23   : > { %1092 = vst [vmem:[%s6510_s8 + $0x110] sm:$0xff] %v1091_v34  ;;  %1094 = vst [vmem:[%s6510_s8 + $0x118] sm:$0xff] %v1093_v35  ;;  %v1095_v36 = vld [vmem:[%s6502_s7 + $0x240] sm:$0xff]  ;;  %v1097_v37 = vld [vmem:[%s6502_s7 + $0x250] sm:$0xff] }
  0x24   : > { %v1099_v38 = vld [vmem:[%s6502_s7 + $0x260] sm:$0xff]  ;;  %1096 = vst [vmem:[%s6510_s8 + $0x120] sm:$0xff] %v1095_v36  ;;  %1098 = vst [vmem:[%s6510_s8 + $0x128] sm:$0xff] %v1097_v37  ;;  %v1101_v39 = vld [vmem:[%s6502_s7 + $0x270] sm:$0xff] }
  0x25   : > { %1100 = vst [vmem:[%s6510_s8 + $0x130] sm:$0xff] %v1099_v38  ;;  %v1103_v40 = vld [vmem:[%s6502_s7 + $0x280] sm:$0xff]  ;;  %v1105_v41 = vld [vmem:[%s6502_s7 + $0x290] sm:$0xff]  ;;  %1102 = vst [vmem:[%s6510_s8 + $0x138] sm:$0xff] %v1101_v39 }
  0x26   : > { %1104 = vst [vmem:[%s6510_s8 + $0x140] sm:$0xff] %v1103_v40  ;;  %1106 = vst [vmem:[%s6510_s8 + $0x148] sm:$0xff] %v1105_v41  ;;  %v1107_v42 = vld [vmem:[%s6502_s7 + $0x2a0] sm:$0xff]  ;;  %v1109_v43 = vld [vmem:[%s6502_s7 + $0x2b0] sm:$0xff] }
  0x27   : > { %v1111_v44 = vld [vmem:[%s6502_s7 + $0x2c0] sm:$0xff]  ;;  %1108 = vst [vmem:[%s6510_s8 + $0x150] sm:$0xff] %v1107_v42  ;;  %1110 = vst [vmem:[%s6510_s8 + $0x158] sm:$0xff] %v1109_v43  ;;  %v1113_v45 = vld [vmem:[%s6502_s7 + $0x2d0] sm:$0xff] }
  0x28   : > { %1112 = vst [vmem:[%s6510_s8 + $0x160] sm:$0xff] %v1111_v44  ;;  %v1115_v46 = vld [vmem:[%s6502_s7 + $0x2e0] sm:$0xff]  ;;  %v1117_v47 = vld [vmem:[%s6502_s7 + $0x2f0] sm:$0xff]  ;;  %1114 = vst [vmem:[%s6510_s8 + $0x168] sm:$0xff] %v1113_v45 }
  0x29   : > { %1116 = vst [vmem:[%s6510_s8 + $0x170] sm:$0xff] %v1115_v46  ;;  %1118 = vst [vmem:[%s6510_s8 + $0x178] sm:$0xff] %v1117_v47  ;;  %v1119_v48 = vld [vmem:[%s6502_s7 + $0x300] sm:$0xff]  ;;  %v1121_v49 = vld [vmem:[%s6502_s7 + $0x310] sm:$0xff] }
  0x2a   : > { %v1123_v50 = vld [vmem:[%s6502_s7 + $0x320] sm:$0xff]  ;;  %1120 = vst [vmem:[%s6510_s8 + $0x180] sm:$0xff] %v1119_v48  ;;  %1122 = vst [vmem:[%s6510_s8 + $0x188] sm:$0xff] %v1121_v49  ;;  %v1125_v51 = vld [vmem:[%s6502_s7 + $0x330] sm:$0xff] }
  0x2b   : > { %1124 = vst [vmem:[%s6510_s8 + $0x190] sm:$0xff] %v1123_v50  ;;  %v1127_v52 = vld [vmem:[%s6502_s7 + $0x340] sm:$0xff]  ;;  %v1129_v53 = vld [vmem:[%s6502_s7 + $0x350] sm:$0xff]  ;;  %1126 = vst [vmem:[%s6510_s8 + $0x198] sm:$0xff] %v1125_v51 }
  0x2c   : > { %1128 = vst [vmem:[%s6510_s8 + $0x1a0] sm:$0xff] %v1127_v52  ;;  %1130 = vst [vmem:[%s6510_s8 + $0x1a8] sm:$0xff] %v1129_v53  ;;  %v1131_v54 = vld [vmem:[%s6502_s7 + $0x360] sm:$0xff]  ;;  %v1133_v55 = vld [vmem:[%s6502_s7 + $0x370] sm:$0xff] }
  0x2d   : > { %v1135_v56 = vld [vmem:[%s6502_s7 + $0x380] sm:$0xff]  ;;  %1132 = vst [vmem:[%s6510_s8 + $0x1b0] sm:$0xff] %v1131_v54  ;;  %1134 = vst [vmem:[%s6510_s8 + $0x1b8] sm:$0xff] %v1133_v55  ;;  %v1137_v57 = vld [vmem:[%s6502_s7 + $0x390] sm:$0xff] }
  0x2e   : > { %1136 = vst [vmem:[%s6510_s8 + $0x1c0] sm:$0xff] %v1135_v56  ;;  %v1139_v58 = vld [vmem:[%s6502_s7 + $0x3a0] sm:$0xff]  ;;  %v1141_v59 = vld [vmem:[%s6502_s7 + $0x3b0] sm:$0xff]  ;;  %1138 = vst [vmem:[%s6510_s8 + $0x1c8] sm:$0xff] %v1137_v57 }
  0x2f   : > { %1140 = vst [vmem:[%s6510_s8 + $0x1d0] sm:$0xff] %v1139_v58  ;;  %1142 = vst [vmem:[%s6510_s8 + $0x1d8] sm:$0xff] %v1141_v59  ;;  %v1143_v60 = vld [vmem:[%s6502_s7 + $0x3c0] sm:$0xff]  ;;  %v1145_v61 = vld [vmem:[%s6502_s7 + $0x3d0] sm:$0xff] }
  0x30   : > { %v1147_v62 = vld [vmem:[%s6502_s7 + $0x3e0] sm:$0xff]  ;;  %1144 = vst [vmem:[%s6510_s8 + $0x1e0] sm:$0xff] %v1143_v60  ;;  %1146 = vst [vmem:[%s6510_s8 + $0x1e8] sm:$0xff] %v1145_v61  ;;  %v1149_v63 = vld [vmem:[%s6502_s7 + $0x3f0] sm:$0xff] }
  0x31   : > { %1148 = vst [vmem:[%s6510_s8 + $0x1f0] sm:$0xff] %v1147_v62  ;;  %v1151_v0 = vld [vmem:[%s6502_s7 + $0x400] sm:$0xff]  ;;  %v1153_v1 = vld [vmem:[%s6502_s7 + $0x410] sm:$0xff]  ;;  %1150 = vst [vmem:[%s6510_s8 + $0x1f8] sm:$0xff] %v1149_v63 }
  0x32   : > { %1152 = vst [vmem:[%s6510_s8 + $0x200] sm:$0xff] %v1151_v0  ;;  %1154 = vst [vmem:[%s6510_s8 + $0x208] sm:$0xff] %v1153_v1  ;;  %v1155_v2 = vld [vmem:[%s6502_s7 + $0x420] sm:$0xff]  ;;  %v1157_v3 = vld [vmem:[%s6502_s7 + $0x430] sm:$0xff] }
  0x33   : > { %v1159_v4 = vld [vmem:[%s6502_s7 + $0x440] sm:$0xff]  ;;  %1156 = vst [vmem:[%s6510_s8 + $0x210] sm:$0xff] %v1155_v2  ;;  %1158 = vst [vmem:[%s6510_s8 + $0x218] sm:$0xff] %v1157_v3  ;;  %v1161_v5 = vld [vmem:[%s6502_s7 + $0x450] sm:$0xff] }
  0x34   : > { %1160 = vst [vmem:[%s6510_s8 + $0x220] sm:$0xff] %v1159_v4  ;;  %v1163_v6 = vld [vmem:[%s6502_s7 + $0x460] sm:$0xff]  ;;  %v1165_v7 = vld [vmem:[%s6502_s7 + $0x470] sm:$0xff]  ;;  %1162 = vst [vmem:[%s6510_s8 + $0x228] sm:$0xff] %v1161_v5 }
  0x35   : > { %1164 = vst [vmem:[%s6510_s8 + $0x230] sm:$0xff] %v1163_v6  ;;  %1166 = vst [vmem:[%s6510_s8 + $0x238] sm:$0xff] %v1165_v7  ;;  %v1167_v8 = vld [vmem:[%s6502_s7 + $0x480] sm:$0xff]  ;;  %v1169_v9 = vld [vmem:[%s6502_s7 + $0x490] sm:$0xff] }
  0x36   : > { %v1171_v10 = vld [vmem:[%s6502_s7 + $0x4a0] sm:$0xff]  ;;  %1168 = vst [vmem:[%s6510_s8 + $0x240] sm:$0xff] %v1167_v8  ;;  %1170 = vst [vmem:[%s6510_s8 + $0x248] sm:$0xff] %v1169_v9  ;;  %v1173_v11 = vld [vmem:[%s6502_s7 + $0x4b0] sm:$0xff] }
  0x37   : > { %1172 = vst [vmem:[%s6510_s8 + $0x250] sm:$0xff] %v1171_v10  ;;  %v1175_v12 = vld [vmem:[%s6502_s7 + $0x4c0] sm:$0xff]  ;;  %v1177_v13 = vld [vmem:[%s6502_s7 + $0x4d0] sm:$0xff]  ;;  %1174 = vst [vmem:[%s6510_s8 + $0x258] sm:$0xff] %v1173_v11 }
  0x38   : > { %1176 = vst [vmem:[%s6510_s8 + $0x260] sm:$0xff] %v1175_v12  ;;  %1178 = vst [vmem:[%s6510_s8 + $0x268] sm:$0xff] %v1177_v13  ;;  %v1179_v14 = vld [vmem:[%s6502_s7 + $0x4e0] sm:$0xff]  ;;  %v1181_v15 = vld [vmem:[%s6502_s7 + $0x4f0] sm:$0xff] }
  0x39   : > { %v1183_v16 = vld [vmem:[%s6502_s7 + $0x500] sm:$0xff]  ;;  %1180 = vst [vmem:[%s6510_s8 + $0x270] sm:$0xff] %v1179_v14  ;;  %1182 = vst [vmem:[%s6510_s8 + $0x278] sm:$0xff] %v1181_v15  ;;  %v1185_v17 = vld [vmem:[%s6502_s7 + $0x510] sm:$0xff] }
  0x3a   : > { %1184 = vst [vmem:[%s6510_s8 + $0x280] sm:$0xff] %v1183_v16  ;;  %v1187_v18 = vld [vmem:[%s6502_s7 + $0x520] sm:$0xff]  ;;  %v1189_v19 = vld [vmem:[%s6502_s7 + $0x530] sm:$0xff]  ;;  %1186 = vst [vmem:[%s6510_s8 + $0x288] sm:$0xff] %v1185_v17 }
  0x3b   : > { %1188 = vst [vmem:[%s6510_s8 + $0x290] sm:$0xff] %v1187_v18  ;;  %1190 = vst [vmem:[%s6510_s8 + $0x298] sm:$0xff] %v1189_v19  ;;  %v1191_v20 = vld [vmem:[%s6502_s7 + $0x540] sm:$0xff]  ;;  %v1193_v21 = vld [vmem:[%s6502_s7 + $0x550] sm:$0xff] }
  0x3c   : > { %v1195_v22 = vld [vmem:[%s6502_s7 + $0x560] sm:$0xff]  ;;  %1192 = vst [vmem:[%s6510_s8 + $0x2a0] sm:$0xff] %v1191_v20  ;;  %1194 = vst [vmem:[%s6510_s8 + $0x2a8] sm:$0xff] %v1193_v21  ;;  %v1197_v23 = vld [vmem:[%s6502_s7 + $0x570] sm:$0xff] }
  0x3d   : > { %1196 = vst [vmem:[%s6510_s8 + $0x2b0] sm:$0xff] %v1195_v22  ;;  %v1199_v24 = vld [vmem:[%s6502_s7 + $0x580] sm:$0xff]  ;;  %v1201_v25 = vld [vmem:[%s6502_s7 + $0x590] sm:$0xff]  ;;  %1198 = vst [vmem:[%s6510_s8 + $0x2b8] sm:$0xff] %v1197_v23 }
  0x3e   : > { %1200 = vst [vmem:[%s6510_s8 + $0x2c0] sm:$0xff] %v1199_v24  ;;  %1202 = vst [vmem:[%s6510_s8 + $0x2c8] sm:$0xff] %v1201_v25  ;;  %v1203_v26 = vld [vmem:[%s6502_s7 + $0x5a0] sm:$0xff]  ;;  %v1205_v27 = vld [vmem:[%s6502_s7 + $0x5b0] sm:$0xff] }
  0x3f   : > { %v1207_v28 = vld [vmem:[%s6502_s7 + $0x5c0] sm:$0xff]  ;;  %1204 = vst [vmem:[%s6510_s8 + $0x2d0] sm:$0xff] %v1203_v26  ;;  %1206 = vst [vmem:[%s6510_s8 + $0x2d8] sm:$0xff] %v1205_v27  ;;  %v1209_v29 = vld [vmem:[%s6502_s7 + $0x5d0] sm:$0xff] }
  0x40   : > { %1208 = vst [vmem:[%s6510_s8 + $0x2e0] sm:$0xff] %v1207_v28  ;;  %v1211_v30 = vld [vmem:[%s6502_s7 + $0x5e0] sm:$0xff]  ;;  %v1213_v31 = vld [vmem:[%s6502_s7 + $0x5f0] sm:$0xff]  ;;  %1210 = vst [vmem:[%s6510_s8 + $0x2e8] sm:$0xff] %v1209_v29 }
  0x41   : > { %1212 = vst [vmem:[%s6510_s8 + $0x2f0] sm:$0xff] %v1211_v30  ;;  %1214 = vst [vmem:[%s6510_s8 + $0x2f8] sm:$0xff] %v1213_v31  ;;  %v1215_v32 = vld [vmem:[%s6502_s7 + $0x600] sm:$0xff]  ;;  %v1217_v33 = vld [vmem:[%s6502_s7 + $0x610] sm:$0xff] }
  0x42   : > { %v1219_v34 = vld [vmem:[%s6502_s7 + $0x620] sm:$0xff]  ;;  %1216 = vst [vmem:[%s6510_s8 + $0x300] sm:$0xff] %v1215_v32  ;;  %1218 = vst [vmem:[%s6510_s8 + $0x308] sm:$0xff] %v1217_v33  ;;  %v1221_v35 = vld [vmem:[%s6502_s7 + $0x630] sm:$0xff] }
  0x43   : > { %1220 = vst [vmem:[%s6510_s8 + $0x310] sm:$0xff] %v1219_v34  ;;  %v1223_v36 = vld [vmem:[%s6502_s7 + $0x640] sm:$0xff]  ;;  %v1225_v37 = vld [vmem:[%s6502_s7 + $0x650] sm:$0xff]  ;;  %1222 = vst [vmem:[%s6510_s8 + $0x318] sm:$0xff] %v1221_v35 }
  0x44   : > { %1224 = vst [vmem:[%s6510_s8 + $0x320] sm:$0xff] %v1223_v36  ;;  %1226 = vst [vmem:[%s6510_s8 + $0x328] sm:$0xff] %v1225_v37  ;;  %v1227_v38 = vld [vmem:[%s6502_s7 + $0x660] sm:$0xff]  ;;  %v1229_v39 = vld [vmem:[%s6502_s7 + $0x670] sm:$0xff] }
  0x45   : > { %v1231_v40 = vld [vmem:[%s6502_s7 + $0x680] sm:$0xff]  ;;  %1228 = vst [vmem:[%s6510_s8 + $0x330] sm:$0xff] %v1227_v38  ;;  %1230 = vst [vmem:[%s6510_s8 + $0x338] sm:$0xff] %v1229_v39  ;;  %v1233_v41 = vld [vmem:[%s6502_s7 + $0x690] sm:$0xff] }
  0x46   : > { %1232 = vst [vmem:[%s6510_s8 + $0x340] sm:$0xff] %v1231_v40  ;;  %v1235_v42 = vld [vmem:[%s6502_s7 + $0x6a0] sm:$0xff]  ;;  %v1237_v43 = vld [vmem:[%s6502_s7 + $0x6b0] sm:$0xff]  ;;  %1234 = vst [vmem:[%s6510_s8 + $0x348] sm:$0xff] %v1233_v41 }
  0x47   : > { %1236 = vst [vmem:[%s6510_s8 + $0x350] sm:$0xff] %v1235_v42  ;;  %1238 = vst [vmem:[%s6510_s8 + $0x358] sm:$0xff] %v1237_v43  ;;  %v1239_v44 = vld [vmem:[%s6502_s7 + $0x6c0] sm:$0xff]  ;;  %v1241_v45 = vld [vmem:[%s6502_s7 + $0x6d0] sm:$0xff] }
  0x48   : > { %v1243_v46 = vld [vmem:[%s6502_s7 + $0x6e0] sm:$0xff]  ;;  %1240 = vst [vmem:[%s6510_s8 + $0x360] sm:$0xff] %v1239_v44  ;;  %1242 = vst [vmem:[%s6510_s8 + $0x368] sm:$0xff] %v1241_v45  ;;  %v1245_v47 = vld [vmem:[%s6502_s7 + $0x6f0] sm:$0xff] }
  0x49   : > { %1244 = vst [vmem:[%s6510_s8 + $0x370] sm:$0xff] %v1243_v46  ;;  %v1247_v48 = vld [vmem:[%s6502_s7 + $0x700] sm:$0xff]  ;;  %v1249_v49 = vld [vmem:[%s6502_s7 + $0x710] sm:$0xff]  ;;  %1246 = vst [vmem:[%s6510_s8 + $0x378] sm:$0xff] %v1245_v47 }
  0x4a   : > { %1248 = vst [vmem:[%s6510_s8 + $0x380] sm:$0xff] %v1247_v48  ;;  %1250 = vst [vmem:[%s6510_s8 + $0x388] sm:$0xff] %v1249_v49  ;;  %v1251_v50 = vld [vmem:[%s6502_s7 + $0x720] sm:$0xff]  ;;  %v1253_v51 = vld [vmem:[%s6502_s7 + $0x730] sm:$0xff] }
  0x4b   : > { %v1255_v52 = vld [vmem:[%s6502_s7 + $0x740] sm:$0xff]  ;;  %1252 = vst [vmem:[%s6510_s8 + $0x390] sm:$0xff] %v1251_v50  ;;  %1254 = vst [vmem:[%s6510_s8 + $0x398] sm:$0xff] %v1253_v51  ;;  %v1257_v53 = vld [vmem:[%s6502_s7 + $0x750] sm:$0xff] }
  0x4c   : > { %1256 = vst [vmem:[%s6510_s8 + $0x3a0] sm:$0xff] %v1255_v52  ;;  %v1259_v54 = vld [vmem:[%s6502_s7 + $0x760] sm:$0xff]  ;;  %v1261_v55 = vld [vmem:[%s6502_s7 + $0x770] sm:$0xff]  ;;  %1258 = vst [vmem:[%s6510_s8 + $0x3a8] sm:$0xff] %v1257_v53 }
  0x4d   : > { %1260 = vst [vmem:[%s6510_s8 + $0x3b0] sm:$0xff] %v1259_v54  ;;  %1262 = vst [vmem:[%s6510_s8 + $0x3b8] sm:$0xff] %v1261_v55  ;;  %v1263_v56 = vld [vmem:[%s6502_s7 + $0x780] sm:$0xff]  ;;  %v1265_v57 = vld [vmem:[%s6502_s7 + $0x790] sm:$0xff] }
  0x4e   : > { %v1267_v58 = vld [vmem:[%s6502_s7 + $0x7a0] sm:$0xff]  ;;  %1264 = vst [vmem:[%s6510_s8 + $0x3c0] sm:$0xff] %v1263_v56  ;;  %1266 = vst [vmem:[%s6510_s8 + $0x3c8] sm:$0xff] %v1265_v57  ;;  %v1269_v59 = vld [vmem:[%s6502_s7 + $0x7b0] sm:$0xff] }
  0x4f   : > { %1268 = vst [vmem:[%s6510_s8 + $0x3d0] sm:$0xff] %v1267_v58  ;;  %v1271_v60 = vld [vmem:[%s6502_s7 + $0x7c0] sm:$0xff]  ;;  %v1273_v61 = vld [vmem:[%s6502_s7 + $0x7d0] sm:$0xff]  ;;  %1270 = vst [vmem:[%s6510_s8 + $0x3d8] sm:$0xff] %v1269_v59 }
  0x50   : > { %1272 = vst [vmem:[%s6510_s8 + $0x3e0] sm:$0xff] %v1271_v60  ;;  %1274 = vst [vmem:[%s6510_s8 + $0x3e8] sm:$0xff] %v1273_v61  ;;  %v1275_v62 = vld [vmem:[%s6502_s7 + $0x7e0] sm:$0xff]  ;;  %v1277_v63 = vld [vmem:[%s6502_s7 + $0x7f0] sm:$0xff] }
  0x51   : > { %v1279_v0 = vld [vmem:[%s6502_s7 + $0x800] sm:$0xff]  ;;  %1276 = vst [vmem:[%s6510_s8 + $0x3f0] sm:$0xff] %v1275_v62  ;;  %1278 = vst [vmem:[%s6510_s8 + $0x3f8] sm:$0xff] %v1277_v63  ;;  %v1281_v1 = vld [vmem:[%s6502_s7 + $0x810] sm:$0xff] }
  0x52   : > { %1280 = vst [vmem:[%s6510_s8 + $0x400] sm:$0xff] %v1279_v0  ;;  %v1283_v2 = vld [vmem:[%s6502_s7 + $0x820] sm:$0xff]  ;;  %v1285_v3 = vld [vmem:[%s6502_s7 + $0x830] sm:$0xff]  ;;  %1282 = vst [vmem:[%s6510_s8 + $0x408] sm:$0xff] %v1281_v1 }
  0x53   : > { %1284 = vst [vmem:[%s6510_s8 + $0x410] sm:$0xff] %v1283_v2  ;;  %1286 = vst [vmem:[%s6510_s8 + $0x418] sm:$0xff] %v1285_v3  ;;  %v1287_v4 = vld [vmem:[%s6502_s7 + $0x840] sm:$0xff]  ;;  %v1289_v5 = vld [vmem:[%s6502_s7 + $0x850] sm:$0xff] }
  0x54   : > { %v1291_v6 = vld [vmem:[%s6502_s7 + $0x860] sm:$0xff]  ;;  %1288 = vst [vmem:[%s6510_s8 + $0x420] sm:$0xff] %v1287_v4  ;;  %1290 = vst [vmem:[%s6510_s8 + $0x428] sm:$0xff] %v1289_v5  ;;  %v1293_v7 = vld [vmem:[%s6502_s7 + $0x870] sm:$0xff] }
  0x55   : > { %1292 = vst [vmem:[%s6510_s8 + $0x430] sm:$0xff] %v1291_v6  ;;  %v1295_v8 = vld [vmem:[%s6502_s7 + $0x880] sm:$0xff]  ;;  %v1297_v9 = vld [vmem:[%s6502_s7 + $0x890] sm:$0xff]  ;;  %1294 = vst [vmem:[%s6510_s8 + $0x438] sm:$0xff] %v1293_v7 }
  0x56   : > { %1296 = vst [vmem:[%s6510_s8 + $0x440] sm:$0xff] %v1295_v8  ;;  %1298 = vst [vmem:[%s6510_s8 + $0x448] sm:$0xff] %v1297_v9  ;;  %v1299_v10 = vld [vmem:[%s6502_s7 + $0x8a0] sm:$0xff]  ;;  %v1301_v11 = vld [vmem:[%s6502_s7 + $0x8b0] sm:$0xff] }
  0x57   : > { %v1303_v12 = vld [vmem:[%s6502_s7 + $0x8c0] sm:$0xff]  ;;  %1300 = vst [vmem:[%s6510_s8 + $0x450] sm:$0xff] %v1299_v10  ;;  %1302 = vst [vmem:[%s6510_s8 + $0x458] sm:$0xff] %v1301_v11  ;;  %v1305_v13 = vld [vmem:[%s6502_s7 + $0x8d0] sm:$0xff] }
  0x58   : > { %1304 = vst [vmem:[%s6510_s8 + $0x460] sm:$0xff] %v1303_v12  ;;  %v1307_v14 = vld [vmem:[%s6502_s7 + $0x8e0] sm:$0xff]  ;;  %v1309_v15 = vld [vmem:[%s6502_s7 + $0x8f0] sm:$0xff]  ;;  %1306 = vst [vmem:[%s6510_s8 + $0x468] sm:$0xff] %v1305_v13 }
  0x59   : > { %1308 = vst [vmem:[%s6510_s8 + $0x470] sm:$0xff] %v1307_v14  ;;  %1310 = vst [vmem:[%s6510_s8 + $0x478] sm:$0xff] %v1309_v15  ;;  %v1311_v16 = vld [vmem:[%s6502_s7 + $0x900] sm:$0xff]  ;;  %v1313_v17 = vld [vmem:[%s6502_s7 + $0x910] sm:$0xff] }
  0x5a   : > { %v1315_v18 = vld [vmem:[%s6502_s7 + $0x920] sm:$0xff]  ;;  %1312 = vst [vmem:[%s6510_s8 + $0x480] sm:$0xff] %v1311_v16  ;;  %1314 = vst [vmem:[%s6510_s8 + $0x488] sm:$0xff] %v1313_v17  ;;  %v1317_v19 = vld [vmem:[%s6502_s7 + $0x930] sm:$0xff] }
  0x5b   : > { %1316 = vst [vmem:[%s6510_s8 + $0x490] sm:$0xff] %v1315_v18  ;;  %v1319_v20 = vld [vmem:[%s6502_s7 + $0x940] sm:$0xff]  ;;  %v1321_v21 = vld [vmem:[%s6502_s7 + $0x950] sm:$0xff]  ;;  %1318 = vst [vmem:[%s6510_s8 + $0x498] sm:$0xff] %v1317_v19 }
  0x5c   : > { %1320 = vst [vmem:[%s6510_s8 + $0x4a0] sm:$0xff] %v1319_v20  ;;  %1322 = vst [vmem:[%s6510_s8 + $0x4a8] sm:$0xff] %v1321_v21  ;;  %v1323_v22 = vld [vmem:[%s6502_s7 + $0x960] sm:$0xff]  ;;  %v1325_v23 = vld [vmem:[%s6502_s7 + $0x970] sm:$0xff] }
  0x5d   : > { %v1327_v24 = vld [vmem:[%s6502_s7 + $0x980] sm:$0xff]  ;;  %1324 = vst [vmem:[%s6510_s8 + $0x4b0] sm:$0xff] %v1323_v22  ;;  %1326 = vst [vmem:[%s6510_s8 + $0x4b8] sm:$0xff] %v1325_v23  ;;  %v1329_v25 = vld [vmem:[%s6502_s7 + $0x990] sm:$0xff] }
  0x5e   : > { %1328 = vst [vmem:[%s6510_s8 + $0x4c0] sm:$0xff] %v1327_v24  ;;  %v1331_v26 = vld [vmem:[%s6502_s7 + $0x9a0] sm:$0xff]  ;;  %v1333_v27 = vld [vmem:[%s6502_s7 + $0x9b0] sm:$0xff]  ;;  %1330 = vst [vmem:[%s6510_s8 + $0x4c8] sm:$0xff] %v1329_v25 }
  0x5f   : > { %1332 = vst [vmem:[%s6510_s8 + $0x4d0] sm:$0xff] %v1331_v26  ;;  %1334 = vst [vmem:[%s6510_s8 + $0x4d8] sm:$0xff] %v1333_v27  ;;  %v1335_v28 = vld [vmem:[%s6502_s7 + $0x9c0] sm:$0xff]  ;;  %v1337_v29 = vld [vmem:[%s6502_s7 + $0x9d0] sm:$0xff] }
  0x60   : > { %v1339_v30 = vld [vmem:[%s6502_s7 + $0x9e0] sm:$0xff]  ;;  %1336 = vst [vmem:[%s6510_s8 + $0x4e0] sm:$0xff] %v1335_v28  ;;  %1338 = vst [vmem:[%s6510_s8 + $0x4e8] sm:$0xff] %v1337_v29  ;;  %v1341_v31 = vld [vmem:[%s6502_s7 + $0x9f0] sm:$0xff] }
  0x61   : > { %1340 = vst [vmem:[%s6510_s8 + $0x4f0] sm:$0xff] %v1339_v30  ;;  %v1343_v32 = vld [vmem:[%s6502_s7 + $0xa00] sm:$0xff]  ;;  %v1345_v33 = vld [vmem:[%s6502_s7 + $0xa10] sm:$0xff]  ;;  %1342 = vst [vmem:[%s6510_s8 + $0x4f8] sm:$0xff] %v1341_v31 }
  0x62   : > { %1344 = vst [vmem:[%s6510_s8 + $0x500] sm:$0xff] %v1343_v32  ;;  %1346 = vst [vmem:[%s6510_s8 + $0x508] sm:$0xff] %v1345_v33  ;;  %v1347_v34 = vld [vmem:[%s6502_s7 + $0xa20] sm:$0xff]  ;;  %v1349_v35 = vld [vmem:[%s6502_s7 + $0xa30] sm:$0xff] }
  0x63   : > { %v1351_v36 = vld [vmem:[%s6502_s7 + $0xa40] sm:$0xff]  ;;  %1348 = vst [vmem:[%s6510_s8 + $0x510] sm:$0xff] %v1347_v34  ;;  %1350 = vst [vmem:[%s6510_s8 + $0x518] sm:$0xff] %v1349_v35  ;;  %v1353_v37 = vld [vmem:[%s6502_s7 + $0xa50] sm:$0xff] }
  0x64   : > { %1352 = vst [vmem:[%s6510_s8 + $0x520] sm:$0xff] %v1351_v36  ;;  %v1355_v38 = vld [vmem:[%s6502_s7 + $0xa60] sm:$0xff]  ;;  %v1357_v39 = vld [vmem:[%s6502_s7 + $0xa70] sm:$0xff]  ;;  %1354 = vst [vmem:[%s6510_s8 + $0x528] sm:$0xff] %v1353_v37 }
  0x65   : > { %1356 = vst [vmem:[%s6510_s8 + $0x530] sm:$0xff] %v1355_v38  ;;  %1358 = vst [vmem:[%s6510_s8 + $0x538] sm:$0xff] %v1357_v39  ;;  %v1359_v40 = vld [vmem:[%s6502_s7 + $0xa80] sm:$0xff]  ;;  %v1361_v41 = vld [vmem:[%s6502_s7 + $0xa90] sm:$0xff] }
  0x66   : > { %v1363_v42 = vld [vmem:[%s6502_s7 + $0xaa0] sm:$0xff]  ;;  %1360 = vst [vmem:[%s6510_s8 + $0x540] sm:$0xff] %v1359_v40  ;;  %1362 = vst [vmem:[%s6510_s8 + $0x548] sm:$0xff] %v1361_v41  ;;  %v1365_v43 = vld [vmem:[%s6502_s7 + $0xab0] sm:$0xff] }
  0x67   : > { %1364 = vst [vmem:[%s6510_s8 + $0x550] sm:$0xff] %v1363_v42  ;;  %v1367_v44 = vld [vmem:[%s6502_s7 + $0xac0] sm:$0xff]  ;;  %v1369_v45 = vld [vmem:[%s6502_s7 + $0xad0] sm:$0xff]  ;;  %1366 = vst [vmem:[%s6510_s8 + $0x558] sm:$0xff] %v1365_v43 }
  0x68   : > { %1368 = vst [vmem:[%s6510_s8 + $0x560] sm:$0xff] %v1367_v44  ;;  %1370 = vst [vmem:[%s6510_s8 + $0x568] sm:$0xff] %v1369_v45  ;;  %v1371_v46 = vld [vmem:[%s6502_s7 + $0xae0] sm:$0xff]  ;;  %v1373_v47 = vld [vmem:[%s6502_s7 + $0xaf0] sm:$0xff] }
  0x69   : > { %v1375_v48 = vld [vmem:[%s6502_s7 + $0xb00] sm:$0xff]  ;;  %1372 = vst [vmem:[%s6510_s8 + $0x570] sm:$0xff] %v1371_v46  ;;  %1374 = vst [vmem:[%s6510_s8 + $0x578] sm:$0xff] %v1373_v47  ;;  %v1377_v49 = vld [vmem:[%s6502_s7 + $0xb10] sm:$0xff] }
  0x6a   : > { %1376 = vst [vmem:[%s6510_s8 + $0x580] sm:$0xff] %v1375_v48  ;;  %v1379_v50 = vld [vmem:[%s6502_s7 + $0xb20] sm:$0xff]  ;;  %v1381_v51 = vld [vmem:[%s6502_s7 + $0xb30] sm:$0xff]  ;;  %1378 = vst [vmem:[%s6510_s8 + $0x588] sm:$0xff] %v1377_v49 }
  0x6b   : > { %1380 = vst [vmem:[%s6510_s8 + $0x590] sm:$0xff] %v1379_v50  ;;  %1382 = vst [vmem:[%s6510_s8 + $0x598] sm:$0xff] %v1381_v51  ;;  %v1383_v52 = vld [vmem:[%s6502_s7 + $0xb40] sm:$0xff]  ;;  %v1385_v53 = vld [vmem:[%s6502_s7 + $0xb50] sm:$0xff] }
  0x6c   : > { %v1387_v54 = vld [vmem:[%s6502_s7 + $0xb60] sm:$0xff]  ;;  %1384 = vst [vmem:[%s6510_s8 + $0x5a0] sm:$0xff] %v1383_v52  ;;  %1386 = vst [vmem:[%s6510_s8 + $0x5a8] sm:$0xff] %v1385_v53  ;;  %v1389_v55 = vld [vmem:[%s6502_s7 + $0xb70] sm:$0xff] }
  0x6d   : > { %1388 = vst [vmem:[%s6510_s8 + $0x5b0] sm:$0xff] %v1387_v54  ;;  %v1391_v56 = vld [vmem:[%s6502_s7 + $0xb80] sm:$0xff]  ;;  %v1393_v57 = vld [vmem:[%s6502_s7 + $0xb90] sm:$0xff]  ;;  %1390 = vst [vmem:[%s6510_s8 + $0x5b8] sm:$0xff] %v1389_v55 }
  0x6e   : > { %1392 = vst [vmem:[%s6510_s8 + $0x5c0] sm:$0xff] %v1391_v56  ;;  %1394 = vst [vmem:[%s6510_s8 + $0x5c8] sm:$0xff] %v1393_v57  ;;  %v1395_v58 = vld [vmem:[%s6502_s7 + $0xba0] sm:$0xff]  ;;  %v1397_v59 = vld [vmem:[%s6502_s7 + $0xbb0] sm:$0xff] }
  0x6f   : > { %v1399_v60 = vld [vmem:[%s6502_s7 + $0xbc0] sm:$0xff]  ;;  %1396 = vst [vmem:[%s6510_s8 + $0x5d0] sm:$0xff] %v1395_v58  ;;  %1398 = vst [vmem:[%s6510_s8 + $0x5d8] sm:$0xff] %v1397_v59  ;;  %v1401_v61 = vld [vmem:[%s6502_s7 + $0xbd0] sm:$0xff] }
  0x70   : > { %1400 = vst [vmem:[%s6510_s8 + $0x5e0] sm:$0xff] %v1399_v60  ;;  %v1403_v62 = vld [vmem:[%s6502_s7 + $0xbe0] sm:$0xff]  ;;  %v1405_v63 = vld [vmem:[%s6502_s7 + $0xbf0] sm:$0xff]  ;;  %1402 = vst [vmem:[%s6510_s8 + $0x5e8] sm:$0xff] %v1401_v61 }
  0x71   : > { %1404 = vst [vmem:[%s6510_s8 + $0x5f0] sm:$0xff] %v1403_v62  ;;  %1406 = vst [vmem:[%s6510_s8 + $0x5f8] sm:$0xff] %v1405_v63  ;;  %v1407_v0 = vld [vmem:[%s6502_s7 + $0xc00] sm:$0xff]  ;;  %v1409_v1 = vld [vmem:[%s6502_s7 + $0xc10] sm:$0xff] }
  0x72   : > { %v1411_v2 = vld [vmem:[%s6502_s7 + $0xc20] sm:$0xff]  ;;  %1408 = vst [vmem:[%s6510_s8 + $0x600] sm:$0xff] %v1407_v0  ;;  %1410 = vst [vmem:[%s6510_s8 + $0x608] sm:$0xff] %v1409_v1  ;;  %v1413_v3 = vld [vmem:[%s6502_s7 + $0xc30] sm:$0xff] }
  0x73   : > { %1412 = vst [vmem:[%s6510_s8 + $0x610] sm:$0xff] %v1411_v2  ;;  %v1415_v4 = vld [vmem:[%s6502_s7 + $0xc40] sm:$0xff]  ;;  %v1417_v5 = vld [vmem:[%s6502_s7 + $0xc50] sm:$0xff]  ;;  %1414 = vst [vmem:[%s6510_s8 + $0x618] sm:$0xff] %v1413_v3 }
  0x74   : > { %1416 = vst [vmem:[%s6510_s8 + $0x620] sm:$0xff] %v1415_v4  ;;  %1418 = vst [vmem:[%s6510_s8 + $0x628] sm:$0xff] %v1417_v5  ;;  %v1419_v6 = vld [vmem:[%s6502_s7 + $0xc60] sm:$0xff]  ;;  %v1421_v7 = vld [vmem:[%s6502_s7 + $0xc70] sm:$0xff] }
  0x75   : > { %v1423_v8 = vld [vmem:[%s6502_s7 + $0xc80] sm:$0xff]  ;;  %1420 = vst [vmem:[%s6510_s8 + $0x630] sm:$0xff] %v1419_v6  ;;  %1422 = vst [vmem:[%s6510_s8 + $0x638] sm:$0xff] %v1421_v7  ;;  %v1425_v9 = vld [vmem:[%s6502_s7 + $0xc90] sm:$0xff] }
  0x76   : > { %1424 = vst [vmem:[%s6510_s8 + $0x640] sm:$0xff] %v1423_v8  ;;  %v1427_v10 = vld [vmem:[%s6502_s7 + $0xca0] sm:$0xff]  ;;  %v1429_v11 = vld [vmem:[%s6502_s7 + $0xcb0] sm:$0xff]  ;;  %1426 = vst [vmem:[%s6510_s8 + $0x648] sm:$0xff] %v1425_v9 }
  0x77   : > { %1428 = vst [vmem:[%s6510_s8 + $0x650] sm:$0xff] %v1427_v10  ;;  %1430 = vst [vmem:[%s6510_s8 + $0x658] sm:$0xff] %v1429_v11  ;;  %v1431_v12 = vld [vmem:[%s6502_s7 + $0xcc0] sm:$0xff]  ;;  %v1433_v13 = vld [vmem:[%s6502_s7 + $0xcd0] sm:$0xff] }
  0x78   : > { %v1435_v14 = vld [vmem:[%s6502_s7 + $0xce0] sm:$0xff]  ;;  %1432 = vst [vmem:[%s6510_s8 + $0x660] sm:$0xff] %v1431_v12  ;;  %1434 = vst [vmem:[%s6510_s8 + $0x668] sm:$0xff] %v1433_v13  ;;  %v1437_v15 = vld [vmem:[%s6502_s7 + $0xcf0] sm:$0xff] }
  0x79   : > { %1436 = vst [vmem:[%s6510_s8 + $0x670] sm:$0xff] %v1435_v14  ;;  %v1439_v16 = vld [vmem:[%s6502_s7 + $0xd00] sm:$0xff]  ;;  %v1441_v17 = vld [vmem:[%s6502_s7 + $0xd10] sm:$0xff]  ;;  %1438 = vst [vmem:[%s6510_s8 + $0x678] sm:$0xff] %v1437_v15 }
  0x7a   : > { %1440 = vst [vmem:[%s6510_s8 + $0x680] sm:$0xff] %v1439_v16  ;;  %1442 = vst [vmem:[%s6510_s8 + $0x688] sm:$0xff] %v1441_v17  ;;  %v1443_v18 = vld [vmem:[%s6502_s7 + $0xd20] sm:$0xff]  ;;  %v1445_v19 = vld [vmem:[%s6502_s7 + $0xd30] sm:$0xff] }
  0x7b   : > { %v1447_v20 = vld [vmem:[%s6502_s7 + $0xd40] sm:$0xff]  ;;  %1444 = vst [vmem:[%s6510_s8 + $0x690] sm:$0xff] %v1443_v18  ;;  %1446 = vst [vmem:[%s6510_s8 + $0x698] sm:$0xff] %v1445_v19  ;;  %v1449_v21 = vld [vmem:[%s6502_s7 + $0xd50] sm:$0xff] }
  0x7c   : > { %1448 = vst [vmem:[%s6510_s8 + $0x6a0] sm:$0xff] %v1447_v20  ;;  %v1451_v22 = vld [vmem:[%s6502_s7 + $0xd60] sm:$0xff]  ;;  %v1453_v23 = vld [vmem:[%s6502_s7 + $0xd70] sm:$0xff]  ;;  %1450 = vst [vmem:[%s6510_s8 + $0x6a8] sm:$0xff] %v1449_v21 }
  0x7d   : > { %1452 = vst [vmem:[%s6510_s8 + $0x6b0] sm:$0xff] %v1451_v22  ;;  %1454 = vst [vmem:[%s6510_s8 + $0x6b8] sm:$0xff] %v1453_v23  ;;  %v1455_v24 = vld [vmem:[%s6502_s7 + $0xd80] sm:$0xff]  ;;  %v1457_v25 = vld [vmem:[%s6502_s7 + $0xd90] sm:$0xff] }
  0x7e   : > { %v1459_v26 = vld [vmem:[%s6502_s7 + $0xda0] sm:$0xff]  ;;  %1456 = vst [vmem:[%s6510_s8 + $0x6c0] sm:$0xff] %v1455_v24  ;;  %1458 = vst [vmem:[%s6510_s8 + $0x6c8] sm:$0xff] %v1457_v25  ;;  %v1461_v27 = vld [vmem:[%s6502_s7 + $0xdb0] sm:$0xff] }
  0x7f   : > { %1460 = vst [vmem:[%s6510_s8 + $0x6d0] sm:$0xff] %v1459_v26  ;;  %v1463_v28 = vld [vmem:[%s6502_s7 + $0xdc0] sm:$0xff]  ;;  %v1465_v29 = vld [vmem:[%s6502_s7 + $0xdd0] sm:$0xff]  ;;  %1462 = vst [vmem:[%s6510_s8 + $0x6d8] sm:$0xff] %v1461_v27 }
  0x80   : > { %1464 = vst [vmem:[%s6510_s8 + $0x6e0] sm:$0xff] %v1463_v28  ;;  %1466 = vst [vmem:[%s6510_s8 + $0x6e8] sm:$0xff] %v1465_v29  ;;  %v1467_v30 = vld [vmem:[%s6502_s7 + $0xde0] sm:$0xff]  ;;  %v1469_v31 = vld [vmem:[%s6502_s7 + $0xdf0] sm:$0xff] }
  0x81   : > { %v1471_v32 = vld [vmem:[%s6502_s7 + $0xe00] sm:$0xff]  ;;  %1468 = vst [vmem:[%s6510_s8 + $0x6f0] sm:$0xff] %v1467_v30  ;;  %1470 = vst [vmem:[%s6510_s8 + $0x6f8] sm:$0xff] %v1469_v31  ;;  %v1473_v33 = vld [vmem:[%s6502_s7 + $0xe10] sm:$0xff] }
  0x82   : > { %1472 = vst [vmem:[%s6510_s8 + $0x700] sm:$0xff] %v1471_v32  ;;  %v1475_v34 = vld [vmem:[%s6502_s7 + $0xe20] sm:$0xff]  ;;  %v1477_v35 = vld [vmem:[%s6502_s7 + $0xe30] sm:$0xff]  ;;  %1474 = vst [vmem:[%s6510_s8 + $0x708] sm:$0xff] %v1473_v33 }
  0x83   : > { %1476 = vst [vmem:[%s6510_s8 + $0x710] sm:$0xff] %v1475_v34  ;;  %1478 = vst [vmem:[%s6510_s8 + $0x718] sm:$0xff] %v1477_v35  ;;  %v1479_v36 = vld [vmem:[%s6502_s7 + $0xe40] sm:$0xff]  ;;  %v1481_v37 = vld [vmem:[%s6502_s7 + $0xe50] sm:$0xff] }
  0x84   : > { %v1483_v38 = vld [vmem:[%s6502_s7 + $0xe60] sm:$0xff]  ;;  %1480 = vst [vmem:[%s6510_s8 + $0x720] sm:$0xff] %v1479_v36  ;;  %1482 = vst [vmem:[%s6510_s8 + $0x728] sm:$0xff] %v1481_v37  ;;  %v1485_v39 = vld [vmem:[%s6502_s7 + $0xe70] sm:$0xff] }
  0x85   : > { %1484 = vst [vmem:[%s6510_s8 + $0x730] sm:$0xff] %v1483_v38  ;;  %v1487_v40 = vld [vmem:[%s6502_s7 + $0xe80] sm:$0xff]  ;;  %v1489_v41 = vld [vmem:[%s6502_s7 + $0xe90] sm:$0xff]  ;;  %1486 = vst [vmem:[%s6510_s8 + $0x738] sm:$0xff] %v1485_v39 }
  0x86   : > { %1488 = vst [vmem:[%s6510_s8 + $0x740] sm:$0xff] %v1487_v40  ;;  %1490 = vst [vmem:[%s6510_s8 + $0x748] sm:$0xff] %v1489_v41  ;;  %v1491_v42 = vld [vmem:[%s6502_s7 + $0xea0] sm:$0xff]  ;;  %v1493_v43 = vld [vmem:[%s6502_s7 + $0xeb0] sm:$0xff] }
  0x87   : > { %v1495_v44 = vld [vmem:[%s6502_s7 + $0xec0] sm:$0xff]  ;;  %1492 = vst [vmem:[%s6510_s8 + $0x750] sm:$0xff] %v1491_v42  ;;  %1494 = vst [vmem:[%s6510_s8 + $0x758] sm:$0xff] %v1493_v43  ;;  %v1497_v45 = vld [vmem:[%s6502_s7 + $0xed0] sm:$0xff] }
  0x88   : > { %1496 = vst [vmem:[%s6510_s8 + $0x760] sm:$0xff] %v1495_v44  ;;  %v1499_v46 = vld [vmem:[%s6502_s7 + $0xee0] sm:$0xff]  ;;  %v1501_v47 = vld [vmem:[%s6502_s7 + $0xef0] sm:$0xff]  ;;  %1498 = vst [vmem:[%s6510_s8 + $0x768] sm:$0xff] %v1497_v45 }
  0x89   : > { %1500 = vst [vmem:[%s6510_s8 + $0x770] sm:$0xff] %v1499_v46  ;;  %1502 = vst [vmem:[%s6510_s8 + $0x778] sm:$0xff] %v1501_v47  ;;  %v1503_v48 = vld [vmem:[%s6502_s7 + $0xf00] sm:$0xff]  ;;  %v1505_v49 = vld [vmem:[%s6502_s7 + $0xf10] sm:$0xff] }
  0x8a   : > { %v1507_v50 = vld [vmem:[%s6502_s7 + $0xf20] sm:$0xff]  ;;  %1504 = vst [vmem:[%s6510_s8 + $0x780] sm:$0xff] %v1503_v48  ;;  %1506 = vst [vmem:[%s6510_s8 + $0x788] sm:$0xff] %v1505_v49  ;;  %v1509_v51 = vld [vmem:[%s6502_s7 + $0xf30] sm:$0xff] }
  0x8b   : > { %1508 = vst [vmem:[%s6510_s8 + $0x790] sm:$0xff] %v1507_v50  ;;  %v1511_v52 = vld [vmem:[%s6502_s7 + $0xf40] sm:$0xff]  ;;  %v1513_v53 = vld [vmem:[%s6502_s7 + $0xf50] sm:$0xff]  ;;  %1510 = vst [vmem:[%s6510_s8 + $0x798] sm:$0xff] %v1509_v51 }
  0x8c   : > { %1512 = vst [vmem:[%s6510_s8 + $0x7a0] sm:$0xff] %v1511_v52  ;;  %1514 = vst [vmem:[%s6510_s8 + $0x7a8] sm:$0xff] %v1513_v53  ;;  %v1515_v54 = vld [vmem:[%s6502_s7 + $0xf60] sm:$0xff]  ;;  %v1517_v55 = vld [vmem:[%s6502_s7 + $0xf70] sm:$0xff] }
  0x8d   : > { %v1519_v56 = vld [vmem:[%s6502_s7 + $0xf80] sm:$0xff]  ;;  %1516 = vst [vmem:[%s6510_s8 + $0x7b0] sm:$0xff] %v1515_v54  ;;  %1518 = vst [vmem:[%s6510_s8 + $0x7b8] sm:$0xff] %v1517_v55  ;;  %v1521_v57 = vld [vmem:[%s6502_s7 + $0xf90] sm:$0xff] }
  0x8e   : > { %1520 = vst [vmem:[%s6510_s8 + $0x7c0] sm:$0xff] %v1519_v56  ;;  %v1523_v58 = vld [vmem:[%s6502_s7 + $0xfa0] sm:$0xff]  ;;  %v1525_v59 = vld [vmem:[%s6502_s7 + $0xfb0] sm:$0xff]  ;;  %1522 = vst [vmem:[%s6510_s8 + $0x7c8] sm:$0xff] %v1521_v57 }
  0x8f   : > { %1524 = vst [vmem:[%s6510_s8 + $0x7d0] sm:$0xff] %v1523_v58  ;;  %1526 = vst [vmem:[%s6510_s8 + $0x7d8] sm:$0xff] %v1525_v59  ;;  %v1527_v60 = vld [vmem:[%s6502_s7 + $0xfc0] sm:$0xff]  ;;  %v1529_v61 = vld [vmem:[%s6502_s7 + $0xfd0] sm:$0xff] }
  0x90   : > { %v1531_v62 = vld [vmem:[%s6502_s7 + $0xfe0] sm:$0xff]  ;;  %1528 = vst [vmem:[%s6510_s8 + $0x7e0] sm:$0xff] %v1527_v60  ;;  %1530 = vst [vmem:[%s6510_s8 + $0x7e8] sm:$0xff] %v1529_v61  ;;  %v1533_v63 = vld [vmem:[%s6502_s7 + $0xff0] sm:$0xff] }
  0x91   : > { %1532 = vst [vmem:[%s6510_s8 + $0x7f0] sm:$0xff] %v1531_v62  ;;  %v1535_v0 = vld [vmem:[%s6502_s7 + $0x1000] sm:$0xff]  ;;  %v1537_v1 = vld [vmem:[%s6502_s7 + $0x1010] sm:$0xff]  ;;  %1534 = vst [vmem:[%s6510_s8 + $0x7f8] sm:$0xff] %v1533_v63 }
  0x92   : > { %1536 = vst [vmem:[%s6510_s8 + $0x800] sm:$0xff] %v1535_v0  ;;  %1538 = vst [vmem:[%s6510_s8 + $0x808] sm:$0xff] %v1537_v1  ;;  %v1539_v2 = vld [vmem:[%s6502_s7 + $0x1020] sm:$0xff]  ;;  %v1541_v3 = vld [vmem:[%s6502_s7 + $0x1030] sm:$0xff] }
  0x93   : > { %v1543_v4 = vld [vmem:[%s6502_s7 + $0x1040] sm:$0xff]  ;;  %1540 = vst [vmem:[%s6510_s8 + $0x810] sm:$0xff] %v1539_v2  ;;  %1542 = vst [vmem:[%s6510_s8 + $0x818] sm:$0xff] %v1541_v3  ;;  %v1545_v5 = vld [vmem:[%s6502_s7 + $0x1050] sm:$0xff] }
  0x94   : > { %1544 = vst [vmem:[%s6510_s8 + $0x820] sm:$0xff] %v1543_v4  ;;  %v1547_v6 = vld [vmem:[%s6502_s7 + $0x1060] sm:$0xff]  ;;  %v1549_v7 = vld [vmem:[%s6502_s7 + $0x1070] sm:$0xff]  ;;  %1546 = vst [vmem:[%s6510_s8 + $0x828] sm:$0xff] %v1545_v5 }
  0x95   : > { %1548 = vst [vmem:[%s6510_s8 + $0x830] sm:$0xff] %v1547_v6  ;;  %1550 = vst [vmem:[%s6510_s8 + $0x838] sm:$0xff] %v1549_v7  ;;  %v1551_v8 = vld [vmem:[%s6502_s7 + $0x1080] sm:$0xff]  ;;  %v1553_v9 = vld [vmem:[%s6502_s7 + $0x1090] sm:$0xff] }
  0x96   : > { %v1555_v10 = vld [vmem:[%s6502_s7 + $0x10a0] sm:$0xff]  ;;  %1552 = vst [vmem:[%s6510_s8 + $0x840] sm:$0xff] %v1551_v8  ;;  %1554 = vst [vmem:[%s6510_s8 + $0x848] sm:$0xff] %v1553_v9  ;;  %v1557_v11 = vld [vmem:[%s6502_s7 + $0x10b0] sm:$0xff] }
  0x97   : > { %1556 = vst [vmem:[%s6510_s8 + $0x850] sm:$0xff] %v1555_v10  ;;  %v1559_v12 = vld [vmem:[%s6502_s7 + $0x10c0] sm:$0xff]  ;;  %v1561_v13 = vld [vmem:[%s6502_s7 + $0x10d0] sm:$0xff]  ;;  %1558 = vst [vmem:[%s6510_s8 + $0x858] sm:$0xff] %v1557_v11 }
  0x98   : > { %1560 = vst [vmem:[%s6510_s8 + $0x860] sm:$0xff] %v1559_v12  ;;  %1562 = vst [vmem:[%s6510_s8 + $0x868] sm:$0xff] %v1561_v13  ;;  %v1563_v14 = vld [vmem:[%s6502_s7 + $0x10e0] sm:$0xff]  ;;  %v1565_v15 = vld [vmem:[%s6502_s7 + $0x10f0] sm:$0xff] }
  0x99   : > { %v1567_v16 = vld [vmem:[%s6502_s7 + $0x1100] sm:$0xff]  ;;  %1564 = vst [vmem:[%s6510_s8 + $0x870] sm:$0xff] %v1563_v14  ;;  %1566 = vst [vmem:[%s6510_s8 + $0x878] sm:$0xff] %v1565_v15  ;;  %v1569_v17 = vld [vmem:[%s6502_s7 + $0x1110] sm:$0xff] }
  0x9a   : > { %1568 = vst [vmem:[%s6510_s8 + $0x880] sm:$0xff] %v1567_v16  ;;  %v1571_v18 = vld [vmem:[%s6502_s7 + $0x1120] sm:$0xff]  ;;  %v1573_v19 = vld [vmem:[%s6502_s7 + $0x1130] sm:$0xff]  ;;  %1570 = vst [vmem:[%s6510_s8 + $0x888] sm:$0xff] %v1569_v17 }
  0x9b   : > { %1572 = vst [vmem:[%s6510_s8 + $0x890] sm:$0xff] %v1571_v18  ;;  %1574 = vst [vmem:[%s6510_s8 + $0x898] sm:$0xff] %v1573_v19  ;;  %v1575_v20 = vld [vmem:[%s6502_s7 + $0x1140] sm:$0xff]  ;;  %v1577_v21 = vld [vmem:[%s6502_s7 + $0x1150] sm:$0xff] }
  0x9c   : > { %v1579_v22 = vld [vmem:[%s6502_s7 + $0x1160] sm:$0xff]  ;;  %1576 = vst [vmem:[%s6510_s8 + $0x8a0] sm:$0xff] %v1575_v20  ;;  %1578 = vst [vmem:[%s6510_s8 + $0x8a8] sm:$0xff] %v1577_v21  ;;  %v1581_v23 = vld [vmem:[%s6502_s7 + $0x1170] sm:$0xff] }
  0x9d   : > { %1580 = vst [vmem:[%s6510_s8 + $0x8b0] sm:$0xff] %v1579_v22  ;;  %v1583_v24 = vld [vmem:[%s6502_s7 + $0x1180] sm:$0xff]  ;;  %v1585_v25 = vld [vmem:[%s6502_s7 + $0x1190] sm:$0xff]  ;;  %1582 = vst [vmem:[%s6510_s8 + $0x8b8] sm:$0xff] %v1581_v23 }
  0x9e   : > { %1584 = vst [vmem:[%s6510_s8 + $0x8c0] sm:$0xff] %v1583_v24  ;;  %1586 = vst [vmem:[%s6510_s8 + $0x8c8] sm:$0xff] %v1585_v25  ;;  %v1587_v26 = vld [vmem:[%s6502_s7 + $0x11a0] sm:$0xff]  ;;  %v1589_v27 = vld [vmem:[%s6502_s7 + $0x11b0] sm:$0xff] }
  0x9f   : > { %v1591_v28 = vld [vmem:[%s6502_s7 + $0x11c0] sm:$0xff]  ;;  %1588 = vst [vmem:[%s6510_s8 + $0x8d0] sm:$0xff] %v1587_v26  ;;  %1590 = vst [vmem:[%s6510_s8 + $0x8d8] sm:$0xff] %v1589_v27  ;;  %v1593_v29 = vld [vmem:[%s6502_s7 + $0x11d0] sm:$0xff] }
  0xa0   : > { %1592 = vst [vmem:[%s6510_s8 + $0x8e0] sm:$0xff] %v1591_v28  ;;  %v1595_v30 = vld [vmem:[%s6502_s7 + $0x11e0] sm:$0xff]  ;;  %v1597_v31 = vld [vmem:[%s6502_s7 + $0x11f0] sm:$0xff]  ;;  %1594 = vst [vmem:[%s6510_s8 + $0x8e8] sm:$0xff] %v1593_v29 }
  0xa1   : > { %1596 = vst [vmem:[%s6510_s8 + $0x8f0] sm:$0xff] %v1595_v30  ;;  %1598 = vst [vmem:[%s6510_s8 + $0x8f8] sm:$0xff] %v1597_v31  ;;  %v1599_v32 = vld [vmem:[%s6502_s7 + $0x1200] sm:$0xff]  ;;  %v1601_v33 = vld [vmem:[%s6502_s7 + $0x1210] sm:$0xff] }
  0xa2   : > { %v1603_v34 = vld [vmem:[%s6502_s7 + $0x1220] sm:$0xff]  ;;  %1600 = vst [vmem:[%s6510_s8 + $0x900] sm:$0xff] %v1599_v32  ;;  %1602 = vst [vmem:[%s6510_s8 + $0x908] sm:$0xff] %v1601_v33  ;;  %v1605_v35 = vld [vmem:[%s6502_s7 + $0x1230] sm:$0xff] }
  0xa3   : > { %1604 = vst [vmem:[%s6510_s8 + $0x910] sm:$0xff] %v1603_v34  ;;  %v1607_v36 = vld [vmem:[%s6502_s7 + $0x1240] sm:$0xff]  ;;  %v1609_v37 = vld [vmem:[%s6502_s7 + $0x1250] sm:$0xff]  ;;  %1606 = vst [vmem:[%s6510_s8 + $0x918] sm:$0xff] %v1605_v35 }
  0xa4   : > { %1608 = vst [vmem:[%s6510_s8 + $0x920] sm:$0xff] %v1607_v36  ;;  %1610 = vst [vmem:[%s6510_s8 + $0x928] sm:$0xff] %v1609_v37  ;;  %v1611_v38 = vld [vmem:[%s6502_s7 + $0x1260] sm:$0xff]  ;;  %v1613_v39 = vld [vmem:[%s6502_s7 + $0x1270] sm:$0xff] }
  0xa5   : > { %v1615_v40 = vld [vmem:[%s6502_s7 + $0x1280] sm:$0xff]  ;;  %1612 = vst [vmem:[%s6510_s8 + $0x930] sm:$0xff] %v1611_v38  ;;  %1614 = vst [vmem:[%s6510_s8 + $0x938] sm:$0xff] %v1613_v39  ;;  %v1617_v41 = vld [vmem:[%s6502_s7 + $0x1290] sm:$0xff] }
  0xa6   : > { %1616 = vst [vmem:[%s6510_s8 + $0x940] sm:$0xff] %v1615_v40  ;;  %v1619_v42 = vld [vmem:[%s6502_s7 + $0x12a0] sm:$0xff]  ;;  %v1621_v43 = vld [vmem:[%s6502_s7 + $0x12b0] sm:$0xff]  ;;  %1618 = vst [vmem:[%s6510_s8 + $0x948] sm:$0xff] %v1617_v41 }
  0xa7   : > { %1620 = vst [vmem:[%s6510_s8 + $0x950] sm:$0xff] %v1619_v42  ;;  %1622 = vst [vmem:[%s6510_s8 + $0x958] sm:$0xff] %v1621_v43  ;;  %v1623_v44 = vld [vmem:[%s6502_s7 + $0x12c0] sm:$0xff]  ;;  %v1625_v45 = vld [vmem:[%s6502_s7 + $0x12d0] sm:$0xff] }
  0xa8   : > { %v1627_v46 = vld [vmem:[%s6502_s7 + $0x12e0] sm:$0xff]  ;;  %1624 = vst [vmem:[%s6510_s8 + $0x960] sm:$0xff] %v1623_v44  ;;  %1626 = vst [vmem:[%s6510_s8 + $0x968] sm:$0xff] %v1625_v45  ;;  %v1629_v47 = vld [vmem:[%s6502_s7 + $0x12f0] sm:$0xff] }
  0xa9   : > { %1628 = vst [vmem:[%s6510_s8 + $0x970] sm:$0xff] %v1627_v46  ;;  %v1631_v48 = vld [vmem:[%s6502_s7 + $0x1300] sm:$0xff]  ;;  %v1633_v49 = vld [vmem:[%s6502_s7 + $0x1310] sm:$0xff]  ;;  %1630 = vst [vmem:[%s6510_s8 + $0x978] sm:$0xff] %v1629_v47 }
  0xaa   : > { %1632 = vst [vmem:[%s6510_s8 + $0x980] sm:$0xff] %v1631_v48  ;;  %1634 = vst [vmem:[%s6510_s8 + $0x988] sm:$0xff] %v1633_v49  ;;  %v1635_v50 = vld [vmem:[%s6502_s7 + $0x1320] sm:$0xff]  ;;  %v1637_v51 = vld [vmem:[%s6502_s7 + $0x1330] sm:$0xff] }
  0xab   : > { %v1639_v52 = vld [vmem:[%s6502_s7 + $0x1340] sm:$0xff]  ;;  %1636 = vst [vmem:[%s6510_s8 + $0x990] sm:$0xff] %v1635_v50  ;;  %1638 = vst [vmem:[%s6510_s8 + $0x998] sm:$0xff] %v1637_v51  ;;  %v1641_v53 = vld [vmem:[%s6502_s7 + $0x1350] sm:$0xff] }
  0xac   : > { %1640 = vst [vmem:[%s6510_s8 + $0x9a0] sm:$0xff] %v1639_v52  ;;  %v1643_v54 = vld [vmem:[%s6502_s7 + $0x1360] sm:$0xff]  ;;  %v1645_v55 = vld [vmem:[%s6502_s7 + $0x1370] sm:$0xff]  ;;  %1642 = vst [vmem:[%s6510_s8 + $0x9a8] sm:$0xff] %v1641_v53 }
  0xad   : > { %1644 = vst [vmem:[%s6510_s8 + $0x9b0] sm:$0xff] %v1643_v54  ;;  %1646 = vst [vmem:[%s6510_s8 + $0x9b8] sm:$0xff] %v1645_v55  ;;  %v1647_v56 = vld [vmem:[%s6502_s7 + $0x1380] sm:$0xff]  ;;  %v1649_v57 = vld [vmem:[%s6502_s7 + $0x1390] sm:$0xff] }
  0xae   : > { %v1651_v58 = vld [vmem:[%s6502_s7 + $0x13a0] sm:$0xff]  ;;  %1648 = vst [vmem:[%s6510_s8 + $0x9c0] sm:$0xff] %v1647_v56  ;;  %1650 = vst [vmem:[%s6510_s8 + $0x9c8] sm:$0xff] %v1649_v57  ;;  %v1653_v59 = vld [vmem:[%s6502_s7 + $0x13b0] sm:$0xff] }
  0xaf   : > { %1652 = vst [vmem:[%s6510_s8 + $0x9d0] sm:$0xff] %v1651_v58  ;;  %v1655_v60 = vld [vmem:[%s6502_s7 + $0x13c0] sm:$0xff]  ;;  %v1657_v61 = vld [vmem:[%s6502_s7 + $0x13d0] sm:$0xff]  ;;  %1654 = vst [vmem:[%s6510_s8 + $0x9d8] sm:$0xff] %v1653_v59 }
  0xb0   : > { %1656 = vst [vmem:[%s6510_s8 + $0x9e0] sm:$0xff] %v1655_v60  ;;  %1658 = vst [vmem:[%s6510_s8 + $0x9e8] sm:$0xff] %v1657_v61  ;;  %v1659_v62 = vld [vmem:[%s6502_s7 + $0x13e0] sm:$0xff]  ;;  %v1661_v63 = vld [vmem:[%s6502_s7 + $0x13f0] sm:$0xff] }
  0xb1   : > { %v1663_v0 = vld [vmem:[%s6502_s7 + $0x1400] sm:$0xff]  ;;  %1660 = vst [vmem:[%s6510_s8 + $0x9f0] sm:$0xff] %v1659_v62  ;;  %1662 = vst [vmem:[%s6510_s8 + $0x9f8] sm:$0xff] %v1661_v63  ;;  %v1665_v1 = vld [vmem:[%s6502_s7 + $0x1410] sm:$0xff] }
  0xb2   : > { %1664 = vst [vmem:[%s6510_s8 + $0xa00] sm:$0xff] %v1663_v0  ;;  %v1667_v2 = vld [vmem:[%s6502_s7 + $0x1420] sm:$0xff]  ;;  %v1669_v3 = vld [vmem:[%s6502_s7 + $0x1430] sm:$0xff]  ;;  %1666 = vst [vmem:[%s6510_s8 + $0xa08] sm:$0xff] %v1665_v1 }
  0xb3   : > { %1668 = vst [vmem:[%s6510_s8 + $0xa10] sm:$0xff] %v1667_v2  ;;  %1670 = vst [vmem:[%s6510_s8 + $0xa18] sm:$0xff] %v1669_v3  ;;  %v1671_v4 = vld [vmem:[%s6502_s7 + $0x1440] sm:$0xff]  ;;  %v1673_v5 = vld [vmem:[%s6502_s7 + $0x1450] sm:$0xff] }
  0xb4   : > { %v1675_v6 = vld [vmem:[%s6502_s7 + $0x1460] sm:$0xff]  ;;  %1672 = vst [vmem:[%s6510_s8 + $0xa20] sm:$0xff] %v1671_v4  ;;  %1674 = vst [vmem:[%s6510_s8 + $0xa28] sm:$0xff] %v1673_v5  ;;  %v1677_v7 = vld [vmem:[%s6502_s7 + $0x1470] sm:$0xff] }
  0xb5   : > { %1676 = vst [vmem:[%s6510_s8 + $0xa30] sm:$0xff] %v1675_v6  ;;  %v1679_v8 = vld [vmem:[%s6502_s7 + $0x1480] sm:$0xff]  ;;  %v1681_v9 = vld [vmem:[%s6502_s7 + $0x1490] sm:$0xff]  ;;  %1678 = vst [vmem:[%s6510_s8 + $0xa38] sm:$0xff] %v1677_v7 }
  0xb6   : > { %1680 = vst [vmem:[%s6510_s8 + $0xa40] sm:$0xff] %v1679_v8  ;;  %1682 = vst [vmem:[%s6510_s8 + $0xa48] sm:$0xff] %v1681_v9  ;;  %v1683_v10 = vld [vmem:[%s6502_s7 + $0x14a0] sm:$0xff]  ;;  %v1685_v11 = vld [vmem:[%s6502_s7 + $0x14b0] sm:$0xff] }
  0xb7   : > { %v1687_v12 = vld [vmem:[%s6502_s7 + $0x14c0] sm:$0xff]  ;;  %1684 = vst [vmem:[%s6510_s8 + $0xa50] sm:$0xff] %v1683_v10  ;;  %1686 = vst [vmem:[%s6510_s8 + $0xa58] sm:$0xff] %v1685_v11  ;;  %v1689_v13 = vld [vmem:[%s6502_s7 + $0x14d0] sm:$0xff] }
  0xb8   : > { %1688 = vst [vmem:[%s6510_s8 + $0xa60] sm:$0xff] %v1687_v12  ;;  %v1691_v14 = vld [vmem:[%s6502_s7 + $0x14e0] sm:$0xff]  ;;  %v1693_v15 = vld [vmem:[%s6502_s7 + $0x14f0] sm:$0xff]  ;;  %1690 = vst [vmem:[%s6510_s8 + $0xa68] sm:$0xff] %v1689_v13 }
  0xb9   : > { %1692 = vst [vmem:[%s6510_s8 + $0xa70] sm:$0xff] %v1691_v14  ;;  %1694 = vst [vmem:[%s6510_s8 + $0xa78] sm:$0xff] %v1693_v15  ;;  %v1695_v16 = vld [vmem:[%s6502_s7 + $0x1500] sm:$0xff]  ;;  %v1697_v17 = vld [vmem:[%s6502_s7 + $0x1510] sm:$0xff] }
  0xba   : > { %v1699_v18 = vld [vmem:[%s6502_s7 + $0x1520] sm:$0xff]  ;;  %1696 = vst [vmem:[%s6510_s8 + $0xa80] sm:$0xff] %v1695_v16  ;;  %1698 = vst [vmem:[%s6510_s8 + $0xa88] sm:$0xff] %v1697_v17  ;;  %v1701_v19 = vld [vmem:[%s6502_s7 + $0x1530] sm:$0xff] }
  0xbb   : > { %1700 = vst [vmem:[%s6510_s8 + $0xa90] sm:$0xff] %v1699_v18  ;;  %v1703_v20 = vld [vmem:[%s6502_s7 + $0x1540] sm:$0xff]  ;;  %v1705_v21 = vld [vmem:[%s6502_s7 + $0x1550] sm:$0xff]  ;;  %1702 = vst [vmem:[%s6510_s8 + $0xa98] sm:$0xff] %v1701_v19 }
  0xbc   : > { %1704 = vst [vmem:[%s6510_s8 + $0xaa0] sm:$0xff] %v1703_v20  ;;  %1706 = vst [vmem:[%s6510_s8 + $0xaa8] sm:$0xff] %v1705_v21  ;;  %v1707_v22 = vld [vmem:[%s6502_s7 + $0x1560] sm:$0xff]  ;;  %v1709_v23 = vld [vmem:[%s6502_s7 + $0x1570] sm:$0xff] }
  0xbd   : > { %v1711_v24 = vld [vmem:[%s6502_s7 + $0x1580] sm:$0xff]  ;;  %1708 = vst [vmem:[%s6510_s8 + $0xab0] sm:$0xff] %v1707_v22  ;;  %1710 = vst [vmem:[%s6510_s8 + $0xab8] sm:$0xff] %v1709_v23  ;;  %v1713_v25 = vld [vmem:[%s6502_s7 + $0x1590] sm:$0xff] }
  0xbe   : > { %1712 = vst [vmem:[%s6510_s8 + $0xac0] sm:$0xff] %v1711_v24  ;;  %v1715_v26 = vld [vmem:[%s6502_s7 + $0x15a0] sm:$0xff]  ;;  %v1717_v27 = vld [vmem:[%s6502_s7 + $0x15b0] sm:$0xff]  ;;  %1714 = vst [vmem:[%s6510_s8 + $0xac8] sm:$0xff] %v1713_v25 }
  0xbf   : > { %1716 = vst [vmem:[%s6510_s8 + $0xad0] sm:$0xff] %v1715_v26  ;;  %1718 = vst [vmem:[%s6510_s8 + $0xad8] sm:$0xff] %v1717_v27  ;;  %v1719_v28 = vld [vmem:[%s6502_s7 + $0x15c0] sm:$0xff]  ;;  %v1721_v29 = vld [vmem:[%s6502_s7 + $0x15d0] sm:$0xff] }
  0xc0   : > { %v1723_v30 = vld [vmem:[%s6502_s7 + $0x15e0] sm:$0xff]  ;;  %1720 = vst [vmem:[%s6510_s8 + $0xae0] sm:$0xff] %v1719_v28  ;;  %1722 = vst [vmem:[%s6510_s8 + $0xae8] sm:$0xff] %v1721_v29  ;;  %v1725_v31 = vld [vmem:[%s6502_s7 + $0x15f0] sm:$0xff] }
  0xc1   : > { %1724 = vst [vmem:[%s6510_s8 + $0xaf0] sm:$0xff] %v1723_v30  ;;  %v1727_v32 = vld [vmem:[%s6502_s7 + $0x1600] sm:$0xff]  ;;  %v1729_v33 = vld [vmem:[%s6502_s7 + $0x1610] sm:$0xff]  ;;  %1726 = vst [vmem:[%s6510_s8 + $0xaf8] sm:$0xff] %v1725_v31 }
  0xc2   : > { %1728 = vst [vmem:[%s6510_s8 + $0xb00] sm:$0xff] %v1727_v32  ;;  %1730 = vst [vmem:[%s6510_s8 + $0xb08] sm:$0xff] %v1729_v33  ;;  %v1731_v34 = vld [vmem:[%s6502_s7 + $0x1620] sm:$0xff]  ;;  %v1733_v35 = vld [vmem:[%s6502_s7 + $0x1630] sm:$0xff] }
  0xc3   : > { %v1735_v36 = vld [vmem:[%s6502_s7 + $0x1640] sm:$0xff]  ;;  %1732 = vst [vmem:[%s6510_s8 + $0xb10] sm:$0xff] %v1731_v34  ;;  %1734 = vst [vmem:[%s6510_s8 + $0xb18] sm:$0xff] %v1733_v35  ;;  %v1737_v37 = vld [vmem:[%s6502_s7 + $0x1650] sm:$0xff] }
  0xc4   : > { %1736 = vst [vmem:[%s6510_s8 + $0xb20] sm:$0xff] %v1735_v36  ;;  %v1739_v38 = vld [vmem:[%s6502_s7 + $0x1660] sm:$0xff]  ;;  %v1741_v39 = vld [vmem:[%s6502_s7 + $0x1670] sm:$0xff]  ;;  %1738 = vst [vmem:[%s6510_s8 + $0xb28] sm:$0xff] %v1737_v37 }
  0xc5   : > { %1740 = vst [vmem:[%s6510_s8 + $0xb30] sm:$0xff] %v1739_v38  ;;  %1742 = vst [vmem:[%s6510_s8 + $0xb38] sm:$0xff] %v1741_v39  ;;  %v1743_v40 = vld [vmem:[%s6502_s7 + $0x1680] sm:$0xff]  ;;  %v1745_v41 = vld [vmem:[%s6502_s7 + $0x1690] sm:$0xff] }
  0xc6   : > { %v1747_v42 = vld [vmem:[%s6502_s7 + $0x16a0] sm:$0xff]  ;;  %1744 = vst [vmem:[%s6510_s8 + $0xb40] sm:$0xff] %v1743_v40  ;;  %1746 = vst [vmem:[%s6510_s8 + $0xb48] sm:$0xff] %v1745_v41  ;;  %v1749_v43 = vld [vmem:[%s6502_s7 + $0x16b0] sm:$0xff] }
  0xc7   : > { %1748 = vst [vmem:[%s6510_s8 + $0xb50] sm:$0xff] %v1747_v42  ;;  %v1751_v44 = vld [vmem:[%s6502_s7 + $0x16c0] sm:$0xff]  ;;  %v1753_v45 = vld [vmem:[%s6502_s7 + $0x16d0] sm:$0xff]  ;;  %1750 = vst [vmem:[%s6510_s8 + $0xb58] sm:$0xff] %v1749_v43 }
  0xc8   : > { %1752 = vst [vmem:[%s6510_s8 + $0xb60] sm:$0xff] %v1751_v44  ;;  %1754 = vst [vmem:[%s6510_s8 + $0xb68] sm:$0xff] %v1753_v45  ;;  %v1755_v46 = vld [vmem:[%s6502_s7 + $0x16e0] sm:$0xff]  ;;  %v1757_v47 = vld [vmem:[%s6502_s7 + $0x16f0] sm:$0xff] }
  0xc9   : > { %v1759_v48 = vld [vmem:[%s6502_s7 + $0x1700] sm:$0xff]  ;;  %1756 = vst [vmem:[%s6510_s8 + $0xb70] sm:$0xff] %v1755_v46  ;;  %1758 = vst [vmem:[%s6510_s8 + $0xb78] sm:$0xff] %v1757_v47  ;;  %v1761_v49 = vld [vmem:[%s6502_s7 + $0x1710] sm:$0xff] }
  0xca   : > { %1760 = vst [vmem:[%s6510_s8 + $0xb80] sm:$0xff] %v1759_v48  ;;  %v1763_v50 = vld [vmem:[%s6502_s7 + $0x1720] sm:$0xff]  ;;  %v1765_v51 = vld [vmem:[%s6502_s7 + $0x1730] sm:$0xff]  ;;  %1762 = vst [vmem:[%s6510_s8 + $0xb88] sm:$0xff] %v1761_v49 }
  0xcb   : > { %1764 = vst [vmem:[%s6510_s8 + $0xb90] sm:$0xff] %v1763_v50  ;;  %1766 = vst [vmem:[%s6510_s8 + $0xb98] sm:$0xff] %v1765_v51  ;;  %v1767_v52 = vld [vmem:[%s6502_s7 + $0x1740] sm:$0xff]  ;;  %v1769_v53 = vld [vmem:[%s6502_s7 + $0x1750] sm:$0xff] }
  0xcc   : > { %v1771_v54 = vld [vmem:[%s6502_s7 + $0x1760] sm:$0xff]  ;;  %1768 = vst [vmem:[%s6510_s8 + $0xba0] sm:$0xff] %v1767_v52  ;;  %1770 = vst [vmem:[%s6510_s8 + $0xba8] sm:$0xff] %v1769_v53  ;;  %v1773_v55 = vld [vmem:[%s6502_s7 + $0x1770] sm:$0xff] }
  0xcd   : > { %1772 = vst [vmem:[%s6510_s8 + $0xbb0] sm:$0xff] %v1771_v54  ;;  %v1775_v56 = vld [vmem:[%s6502_s7 + $0x1780] sm:$0xff]  ;;  %v1777_v57 = vld [vmem:[%s6502_s7 + $0x1790] sm:$0xff]  ;;  %1774 = vst [vmem:[%s6510_s8 + $0xbb8] sm:$0xff] %v1773_v55 }
  0xce   : > { %1776 = vst [vmem:[%s6510_s8 + $0xbc0] sm:$0xff] %v1775_v56  ;;  %1778 = vst [vmem:[%s6510_s8 + $0xbc8] sm:$0xff] %v1777_v57  ;;  %v1779_v58 = vld [vmem:[%s6502_s7 + $0x17a0] sm:$0xff]  ;;  %v1781_v59 = vld [vmem:[%s6502_s7 + $0x17b0] sm:$0xff] }
  0xcf   : > { %v1783_v60 = vld [vmem:[%s6502_s7 + $0x17c0] sm:$0xff]  ;;  %1780 = vst [vmem:[%s6510_s8 + $0xbd0] sm:$0xff] %v1779_v58  ;;  %1782 = vst [vmem:[%s6510_s8 + $0xbd8] sm:$0xff] %v1781_v59  ;;  %v1785_v61 = vld [vmem:[%s6502_s7 + $0x17d0] sm:$0xff] }
  0xd0   : > { %1784 = vst [vmem:[%s6510_s8 + $0xbe0] sm:$0xff] %v1783_v60  ;;  %v1787_v62 = vld [vmem:[%s6502_s7 + $0x17e0] sm:$0xff]  ;;  %v1789_v63 = vld [vmem:[%s6502_s7 + $0x17f0] sm:$0xff]  ;;  %1786 = vst [vmem:[%s6510_s8 + $0xbe8] sm:$0xff] %v1785_v61 }
  0xd1   : > { %1788 = vst [vmem:[%s6510_s8 + $0xbf0] sm:$0xff] %v1787_v62  ;;  %1790 = vst [vmem:[%s6510_s8 + $0xbf8] sm:$0xff] %v1789_v63  ;;  %v1791_v0 = vld [vmem:[%s6502_s7 + $0x1800] sm:$0xff]  ;;  %v1793_v1 = vld [vmem:[%s6502_s7 + $0x1810] sm:$0xff] }
  0xd2   : > { %v1795_v2 = vld [vmem:[%s6502_s7 + $0x1820] sm:$0xff]  ;;  %1792 = vst [vmem:[%s6510_s8 + $0xc00] sm:$0xff] %v1791_v0  ;;  %1794 = vst [vmem:[%s6510_s8 + $0xc08] sm:$0xff] %v1793_v1  ;;  %v1797_v3 = vld [vmem:[%s6502_s7 + $0x1830] sm:$0xff] }
  0xd3   : > { %1796 = vst [vmem:[%s6510_s8 + $0xc10] sm:$0xff] %v1795_v2  ;;  %v1799_v4 = vld [vmem:[%s6502_s7 + $0x1840] sm:$0xff]  ;;  %v1801_v5 = vld [vmem:[%s6502_s7 + $0x1850] sm:$0xff]  ;;  %1798 = vst [vmem:[%s6510_s8 + $0xc18] sm:$0xff] %v1797_v3 }
  0xd4   : > { %1800 = vst [vmem:[%s6510_s8 + $0xc20] sm:$0xff] %v1799_v4  ;;  %1802 = vst [vmem:[%s6510_s8 + $0xc28] sm:$0xff] %v1801_v5  ;;  %v1803_v6 = vld [vmem:[%s6502_s7 + $0x1860] sm:$0xff]  ;;  %v1805_v7 = vld [vmem:[%s6502_s7 + $0x1870] sm:$0xff] }
  0xd5   : > { %1804 = vst [vmem:[%s6510_s8 + $0xc30] sm:$0xff] %v1803_v6  ;;  %1806 = vst [vmem:[%s6510_s8 + $0xc38] sm:$0xff] %v1805_v7 }
  0xd6 PF: > { %p5199_p6 = scmp.ge.s32.totalorder %s6425_s22, 1  ;;  %p1828_p7 = scmp.lt.s32.totalorder %s6425_s22, 3 }
  0xd8   : > { %p1829_p8 = pnand %p5199_p6, %p1828_p7 }
  0xd9   : > { %s1835_s9 = sand.u32 (!%p1829_p8), 1, %s6409_s18   ;;  %s5200_s10 = sshll.u32 (!%p1829_p8), %s6417_s20, 1 }
  0xda   : > { %1832 = sbr.rel (%p1829_p8) target bundleno = 1084 (0x43c), region = 74  ;;  %p1882_p9 = scmp.lt.s32.totalorder (!%p1829_p8), %s5200_s10, 3 }
  0xdb   : > { %s5715_s11 = smul.u32 (!%p1829_p8), 3136, %s1835_s9  ;;  %s5201_s12 = sshll.u32 (!%p1829_p8), %s6417_s20, 5 }
  0xdc   : > { %p1887_p10 = scmp.lt.s32.totalorder (!%p1829_p8), %s5201_s12, 63  ;;  %p5203_p11 = scmp.ne.s32.totalorder (!%p1829_p8), %s6417_s20, 0 }
  0xdd   : > { %s7306_s18 = scalar_lea.vmem (!%p1829_p8), [#allocation3], %s5715_s11 }
  0xe1   : > { %s7856_s10 = smov (!%p1882_p9, %s5200_s10), 3  ;;  %s7858_s12 = smov (!%p1887_p10, %s5201_s12), 63 }
  0xe2   : > { %s1884_s15 = scalar_lea.vmem %s7845_s2, %s7856_s10  ;;  %s5202_s16 = sshll.u32 %s7858_s12, 2  ;;  %v6427_v8 = vmov (!%p5203_p11), 0.0  }
  0xe3   : > { %s7304_s25 = scalar_lea.vmem %s7846_s3, %s5202_s16  ;;  %1900 = sbr.rel (%p5203_p11) target bundleno = 234 (0xea), region = 82  ;;  %1901 = vst [vmem:[#allocation2] sm:$0xff] (!%p5203_p11), %v6427_v8 }
  0xea PF: > { %v5758_v9 = vld [vmem:[%s7306_s18 + $0x4] ss:$8 sps:$4 sm:$0xff]   ;;  %v5762_v11 = vld [vmem:[%s7306_s18] ss:$8 sps:$4 sm:$0xff]   ;;  %v5764_v13 = vld [vmem:[%s7306_s18 + $0x14] ss:$8 sps:$4 sm:$0xff]  }
  0xeb   : > { %v5760_v10 = vld [vmem:[%s7306_s18 + $0x604] ss:$8 sps:$4 sm:$0xff]   ;;  %4370 = vmatprep.subr.bf16.mxu1 %v5758_v9  ;;  %v5763_v12 = vld [vmem:[%s7306_s18 + $0x600] ss:$8 sps:$4 sm:$0xff]   ;;  %v5766_v14 = vld [vmem:[%s7306_s18 + $0x614] ss:$8 sps:$4 sm:$0xff]  }
  0xec   : > { %4616 = vmatprep.subr.bf16.mxu0 %v5760_v10  ;;  %4371 = vmatpush1.bf16.msra.mxu1 %v5762_v11  ;;  %v5768_v15 = vld [vmem:[%s7306_s18 + $0x10] ss:$8 sps:$4 sm:$0xff]   ;;  %v5770_v17 = vld [vmem:[%s7306_s18 + $0x24] ss:$8 sps:$4 sm:$0xff]   ;;  %v5774_v19 = vld [vmem:[%s7306_s18 + $0x20] ss:$8 sps:$4 sm:$0xff]  }
  0xed   : > { %4617 = vmatpush1.bf16.msra.mxu0 %v5763_v12  ;;  %4372 = vmatprep.subr.bf16.mxu1 %v5764_v13  ;;  %v5769_v16 = vld [vmem:[%s7306_s18 + $0x610] ss:$8 sps:$4 sm:$0xff]   ;;  %v5772_v18 = vld [vmem:[%s7306_s18 + $0x624] ss:$8 sps:$4 sm:$0xff]   ;;  %v5775_v20 = vld [vmem:[%s7306_s18 + $0x620] ss:$8 sps:$4 sm:$0xff]  }
  0xee   : > { %4618 = vmatprep.subr.bf16.mxu0 %v5766_v14  ;;  %v5776_v21 = vld [vmem:[%s7306_s18 + $0x34] ss:$8 sps:$4 sm:$0xff]   ;;  %v5780_v23 = vld [vmem:[%s7306_s18 + $0x30] ss:$8 sps:$4 sm:$0xff]   ;;  %v5782_v25 = vld [vmem:[%s7306_s18 + $0x44] ss:$8 sps:$4 sm:$0xff]  }
  0xef   : > { %v5778_v22 = vld [vmem:[%s7306_s18 + $0x634] ss:$8 sps:$4 sm:$0xff]   ;;  %v5781_v24 = vld [vmem:[%s7306_s18 + $0x630] ss:$8 sps:$4 sm:$0xff]   ;;  %v5784_v26 = vld [vmem:[%s7306_s18 + $0x644] ss:$8 sps:$4 sm:$0xff]  }
  0xf0   : > { %4373 = vmatpush1.bf16.msra.mxu1 %v5768_v15  ;;  %v5786_v27 = vld [vmem:[%s7306_s18 + $0x40] ss:$8 sps:$4 sm:$0xff]   ;;  %v5788_v29 = vld [vmem:[%s7306_s18 + $0x54] ss:$8 sps:$4 sm:$0xff]   ;;  %v5792_v31 = vld [vmem:[%s7306_s18 + $0x50] ss:$8 sps:$4 sm:$0xff]  }
  0xf1   : > { %4619 = vmatpush1.bf16.msra.mxu0 %v5769_v16  ;;  %4374 = vmatprep.subr.bf16.mxu1 %v5770_v17  ;;  %v5787_v28 = vld [vmem:[%s7306_s18 + $0x640] ss:$8 sps:$4 sm:$0xff]   ;;  %v5790_v30 = vld [vmem:[%s7306_s18 + $0x654] ss:$8 sps:$4 sm:$0xff]   ;;  %v5793_v32 = vld [vmem:[%s7306_s18 + $0x650] ss:$8 sps:$4 sm:$0xff]  }
  0xf2   : > { %4620 = vmatprep.subr.bf16.mxu0 %v5772_v18  ;;  %v5794_v33 = vld [vmem:[%s7306_s18 + $0x64] ss:$8 sps:$4 sm:$0xff]   ;;  %v5798_v35 = vld [vmem:[%s7306_s18 + $0x60] ss:$8 sps:$4 sm:$0xff]   ;;  %v5800_v37 = vld [vmem:[%s7306_s18 + $0x74] ss:$8 sps:$4 sm:$0xff]  }
  0xf3   : > { %v5796_v34 = vld [vmem:[%s7306_s18 + $0x664] ss:$8 sps:$4 sm:$0xff]   ;;  %v5799_v36 = vld [vmem:[%s7306_s18 + $0x660] ss:$8 sps:$4 sm:$0xff]   ;;  %v5802_v38 = vld [vmem:[%s7306_s18 + $0x674] ss:$8 sps:$4 sm:$0xff]  }
  0xf4   : > { %4375 = vmatpush1.bf16.msra.mxu1 %v5774_v19  ;;  %v5804_v39 = vld [vmem:[%s7306_s18 + $0x70] ss:$8 sps:$4 sm:$0xff]   ;;  %v5806_v41 = vld [vmem:[%s7306_s18 + $0x84] ss:$8 sps:$4 sm:$0xff]   ;;  %v5810_v43 = vld [vmem:[%s7306_s18 + $0x80] ss:$8 sps:$4 sm:$0xff]  }
  0xf5   : > { %4621 = vmatpush1.bf16.msra.mxu0 %v5775_v20  ;;  %4376 = vmatprep.subr.bf16.mxu1 %v5776_v21  ;;  %v5805_v40 = vld [vmem:[%s7306_s18 + $0x670] ss:$8 sps:$4 sm:$0xff]   ;;  %v5808_v42 = vld [vmem:[%s7306_s18 + $0x684] ss:$8 sps:$4 sm:$0xff]   ;;  %v5811_v44 = vld [vmem:[%s7306_s18 + $0x680] ss:$8 sps:$4 sm:$0xff]  }
  0xf6   : > { %4622 = vmatprep.subr.bf16.mxu0 %v5778_v22  ;;  %v5812_v45 = vld [vmem:[%s7306_s18 + $0x94] ss:$8 sps:$4 sm:$0xff]   ;;  %v5816_v47 = vld [vmem:[%s7306_s18 + $0x90] ss:$8 sps:$4 sm:$0xff]   ;;  %v5818_v49 = vld [vmem:[%s7306_s18 + $0xa4] ss:$8 sps:$4 sm:$0xff]  }
  0xf7   : > { %v5814_v46 = vld [vmem:[%s7306_s18 + $0x694] ss:$8 sps:$4 sm:$0xff]   ;;  %v5817_v48 = vld [vmem:[%s7306_s18 + $0x690] ss:$8 sps:$4 sm:$0xff]   ;;  %v5820_v50 = vld [vmem:[%s7306_s18 + $0x6a4] ss:$8 sps:$4 sm:$0xff]  }
  0xf8   : > { %4377 = vmatpush1.bf16.msra.mxu1 %v5780_v23  ;;  %v5822_v51 = vld [vmem:[%s7306_s18 + $0xa0] ss:$8 sps:$4 sm:$0xff]   ;;  %v5824_v53 = vld [vmem:[%s7306_s18 + $0xb4] ss:$8 sps:$4 sm:$0xff]   ;;  %v5828_v56 = vld [vmem:[%s7306_s18 + $0xb0] ss:$8 sps:$4 sm:$0xff]  }
  0xf9   : > { %4623 = vmatpush1.bf16.msra.mxu0 %v5781_v24  ;;  %4378 = vmatprep.subr.bf16.mxu1 %v5782_v25  ;;  %v5823_v52 = vld [vmem:[%s7306_s18 + $0x6a0] ss:$8 sps:$4 sm:$0xff]   ;;  %v5826_v54 = vld [vmem:[%s7306_s18 + $0x6b4] ss:$8 sps:$4 sm:$0xff]   ;;  %v5829_v58 = vld [vmem:[%s7306_s18 + $0x6b0] ss:$8 sps:$4 sm:$0xff]  }
  0xfa   : > { %4624 = vmatprep.subr.bf16.mxu0 %v5784_v26  ;;  %v1902_v55 = vld [vmem:[%s7843_s0] sm:$0xff]  ;;  %v1908_v59 = vld [vmem:[%s7843_s0 + $0x30] sm:$0xff]  ;;  %vm4366_vm0 = vcmask 523264   ;;  %p5638_p12 = scmp.ne.s32.totalorder %s6417_s20, 1 }
  0xfb   : > { %v5205_v57 = vcombine.high %v1902_v55, %v1902_v55  ;;  %v5830_v60 = vld [vmem:[%s7306_s18 + $0xc4] ss:$8 sps:$4 sm:$0xff]   ;;  %v5217_v62 = vcombine.high %v1908_v59, %v1908_v59  ;;  %v5834_v63 = vld [vmem:[%s7306_s18 + $0xc0] ss:$8 sps:$4 sm:$0xff]   ;;  %v5836_v1 = vld [vmem:[%s7306_s18 + $0xd4] ss:$8 sps:$4 sm:$0xff]   ;;  %v5204_v15 = vcombine.low %v1902_v55, %v1902_v55  ;;  %v5216_v16 = vcombine.low %v1908_v59, %v1908_v59 }
  0xfc   : > { %4379 = vmatpush1.bf16.msra.mxu1 %v5786_v27  ;;  %v5832_v61 = vld [vmem:[%s7306_s18 + $0x6c4] ss:$8 sps:$4 sm:$0xff]   ;;  %v5835_v0 = vld [vmem:[%s7306_s18 + $0x6c0] ss:$8 sps:$4 sm:$0xff]   ;;  %v5838_v2 = vld [vmem:[%s7306_s18 + $0x6d4] ss:$8 sps:$4 sm:$0xff]  }
  0xfd   : > { %4625 = vmatpush1.bf16.msra.mxu0 %v5787_v28  ;;  %4380 = vmatprep.subr.bf16.mxu1 %v5788_v29  ;;  %v5840_v3 = vld [vmem:[%s7306_s18 + $0xd0] ss:$8 sps:$4 sm:$0xff]   ;;  %v5842_v5 = vld [vmem:[%s7306_s18 + $0xe4] ss:$8 sps:$4 sm:$0xff]   ;;  %v5846_v7 = vld [vmem:[%s7306_s18 + $0xe0] ss:$8 sps:$4 sm:$0xff]  }
  0xfe   : > { %4626 = vmatprep.subr.bf16.mxu0 %v5790_v30  ;;  %4402 = vmatprep.mubr.bf16.mxu1 %v5205_v57  ;;  %v5841_v4 = vld [vmem:[%s7306_s18 + $0x6d0] ss:$8 sps:$4 sm:$0xff]   ;;  %v5844_v6 = vld [vmem:[%s7306_s18 + $0x6e4] ss:$8 sps:$4 sm:$0xff]   ;;  %v5847_v8 = vld [vmem:[%s7306_s18 + $0x6e0] ss:$8 sps:$4 sm:$0xff]  }
  0xff   : > { %4648 = vmatprep.mubr.bf16.mxu0 %v5217_v62  ;;  %v5848_v9 = vld [vmem:[%s7306_s18 + $0xf4] ss:$8 sps:$4 sm:$0xff]   ;;  %v5852_v11 = vld [vmem:[%s7306_s18 + $0xf0] ss:$8 sps:$4 sm:$0xff]   ;;  %v5858_v13 = vld [vmem:[%s7306_s18 + $0x104] ss:$8 sps:$4 sm:$0xff]  }
 0x100   : > { %4381 = vmatpush1.bf16.msra.mxu1 %v5792_v31  ;;  %v5850_v10 = vld [vmem:[%s7306_s18 + $0x6f4] ss:$8 sps:$4 sm:$0xff]   ;;  %v5853_v12 = vld [vmem:[%s7306_s18 + $0x6f0] ss:$8 sps:$4 sm:$0xff]   ;;  %v5863_v14 = vld [vmem:[%s7306_s18 + $0x704] ss:$8 sps:$4 sm:$0xff]  }
 0x101   : > { %4627 = vmatpush1.bf16.msra.mxu0 %v5793_v32  ;;  %4382 = vmatprep.subr.bf16.mxu1 %v5794_v33  ;;  %v5856_v17 = vld [vmem:[%s7306_s18 + $0x100] ss:$8 sps:$4 sm:$0xff]   ;;  %v5866_v19 = vld [vmem:[%s7306_s18 + $0x114] ss:$8 sps:$4 sm:$0xff]   ;;  %v5864_v21 = vld [vmem:[%s7306_s18 + $0x110] ss:$8 sps:$4 sm:$0xff]  }
 0x102   : > { %4628 = vmatprep.subr.bf16.mxu0 %v5796_v34  ;;  %v5861_v18 = vld [vmem:[%s7306_s18 + $0x700] ss:$8 sps:$4 sm:$0xff]   ;;  %v5869_v20 = vld [vmem:[%s7306_s18 + $0x714] ss:$8 sps:$4 sm:$0xff]   ;;  %v5867_v22 = vld [vmem:[%s7306_s18 + $0x710] ss:$8 sps:$4 sm:$0xff]  }
 0x103   : > { %v5872_v23 = vld [vmem:[%s7306_s18 + $0x124] ss:$8 sps:$4 sm:$0xff]   ;;  %v5870_v25 = vld [vmem:[%s7306_s18 + $0x120] ss:$8 sps:$4 sm:$0xff]   ;;  %v5878_v27 = vld [vmem:[%s7306_s18 + $0x134] ss:$8 sps:$4 sm:$0xff]  }
 0x104   : > { %4383 = vmatpush1.bf16.msra.mxu1 %v5798_v35  ;;  %v5875_v24 = vld [vmem:[%s7306_s18 + $0x724] ss:$8 sps:$4 sm:$0xff]   ;;  %v5873_v26 = vld [vmem:[%s7306_s18 + $0x720] ss:$8 sps:$4 sm:$0xff]   ;;  %v5881_v28 = vld [vmem:[%s7306_s18 + $0x734] ss:$8 sps:$4 sm:$0xff]  }
 0x105   : > { %4629 = vmatpush1.bf16.msra.mxu0 %v5799_v36  ;;  %4384 = vmatprep.subr.bf16.mxu1 %v5800_v37  ;;  %v5876_v29 = vld [vmem:[%s7306_s18 + $0x130] ss:$8 sps:$4 sm:$0xff]   ;;  %v5884_v31 = vld [vmem:[%s7306_s18 + $0x144] ss:$8 sps:$4 sm:$0xff]   ;;  %v5882_v33 = vld [vmem:[%s7306_s18 + $0x140] ss:$8 sps:$4 sm:$0xff]  }
 0x106   : > { %4630 = vmatprep.subr.bf16.mxu0 %v5802_v38  ;;  %v5879_v30 = vld [vmem:[%s7306_s18 + $0x730] ss:$8 sps:$4 sm:$0xff]   ;;  %v5887_v32 = vld [vmem:[%s7306_s18 + $0x744] ss:$8 sps:$4 sm:$0xff]   ;;  %v5885_v34 = vld [vmem:[%s7306_s18 + $0x740] ss:$8 sps:$4 sm:$0xff]  }
 0x107   : > { %v5890_v35 = vld [vmem:[%s7306_s18 + $0x154] ss:$8 sps:$4 sm:$0xff]   ;;  %v5888_v37 = vld [vmem:[%s7306_s18 + $0x150] ss:$8 sps:$4 sm:$0xff]   ;;  %v5920_v59 = vld [vmem:[%s7306_s18 + $0x1a4] ss:$8 sps:$4 sm:$0xff]  }
 0x108   : > { %4385 = vmatpush1.bf16.msra.mxu1 %v5804_v39  ;;  %v5893_v36 = vld [vmem:[%s7306_s18 + $0x754] ss:$8 sps:$4 sm:$0xff]   ;;  %v5891_v38 = vld [vmem:[%s7306_s18 + $0x750] ss:$8 sps:$4 sm:$0xff]   ;;  %v5896_v39 = vld [vmem:[%s7306_s18 + $0x164] ss:$8 sps:$4 sm:$0xff]  }
 0x109   : > { %4631 = vmatpush1.bf16.msra.mxu0 %v5805_v40  ;;  %4386 = vmatprep.subr.bf16.mxu1 %v5806_v41  ;;  %v5899_v40 = vld [vmem:[%s7306_s18 + $0x764] ss:$8 sps:$4 sm:$0xff]   ;;  %v5914_v55 = vld [vmem:[%s7306_s18 + $0x194] ss:$8 sps:$4 sm:$0xff]   ;;  %v5912_v57 = vld [vmem:[%s7306_s18 + $0x190] ss:$8 sps:$4 sm:$0xff]  }
 0x10a   : > { %4632 = vmatprep.subr.bf16.mxu0 %v5808_v42  ;;  %v7408_v41 = vld [vmem:[%s7843_s0 + $0x8] sm:$0xff] }
 0x10b   : > { %v5894_v42 = vld [vmem:[%s7306_s18 + $0x160] ss:$8 sps:$4 sm:$0xff]  }
 0x10c   : > { %4387 = vmatpush1.bf16.msra.mxu1 %v5810_v43  ;;  %v5897_v43 = vld [vmem:[%s7306_s18 + $0x760] ss:$8 sps:$4 sm:$0xff]  }
 0x10d   : > { %4633 = vmatpush1.bf16.msra.mxu0 %v5811_v44  ;;  %4388 = vmatprep.subr.bf16.mxu1 %v5812_v45  ;;  %v5207_v44 = vcombine.high %v7408_v41, %v7408_v41  ;;  %v7417_v45 = vld [vmem:[%s7843_s0 + $0x38] sm:$0xff]  ;;  %v5921_v62 = vld [vmem:[%s7306_s18 + $0x7a0] ss:$8 sps:$4 sm:$0xff]  }
 0x10e   : > { %4634 = vmatprep.subr.bf16.mxu0 %v5814_v46  ;;  %v5902_v46 = vld [vmem:[%s7306_s18 + $0x174] ss:$8 sps:$4 sm:$0xff]  }
 0x110   : > { %4389 = vmatpush1.bf16.msra.mxu1 %v5816_v47  ;;  %v5219_v47 = vcombine.high %v7417_v45, %v7417_v45 }
 0x111   : > { %4635 = vmatpush1.bf16.msra.mxu0 %v5817_v48  ;;  %4390 = vmatprep.subr.bf16.mxu1 %v5818_v49  ;;  %v5905_v48 = vld [vmem:[%s7306_s18 + $0x774] ss:$8 sps:$4 sm:$0xff]   ;;  %v5900_v49 = vld [vmem:[%s7306_s18 + $0x170] ss:$8 sps:$4 sm:$0xff]  }
 0x112   : > { %4636 = vmatprep.subr.bf16.mxu0 %v5820_v50  ;;  %v5903_v50 = vld [vmem:[%s7306_s18 + $0x770] ss:$8 sps:$4 sm:$0xff]  }
 0x114   : > { %4391 = vmatpush1.bf16.msra.mxu1 %v5822_v51  ;;  %v5908_v51 = vld [vmem:[%s7306_s18 + $0x184] ss:$8 sps:$4 sm:$0xff]  }
 0x115   : > { %4637 = vmatpush1.bf16.msra.mxu0 %v5823_v52  ;;  %4392 = vmatprep.subr.bf16.mxu1 %v5824_v53  ;;  %v5911_v52 = vld [vmem:[%s7306_s18 + $0x784] ss:$8 sps:$4 sm:$0xff]   ;;  %v5906_v53 = vld [vmem:[%s7306_s18 + $0x180] ss:$8 sps:$4 sm:$0xff]  }
 0x116   : > { %4638 = vmatprep.subr.bf16.mxu0 %v5826_v54  ;;  %v5909_v54 = vld [vmem:[%s7306_s18 + $0x780] ss:$8 sps:$4 sm:$0xff]  }
 0x118   : > { %4393 = vmatpush1.bf16.msra.mxu1 %v5828_v56  ;;  %v5917_v56 = vld [vmem:[%s7306_s18 + $0x794] ss:$8 sps:$4 sm:$0xff]  }
 0x119   : > { %4639 = vmatpush1.bf16.msra.mxu0 %v5829_v58  ;;  %4394 = vmatprep.subr.bf16.mxu1 %v5830_v60  ;;  %v5915_v58 = vld [vmem:[%s7306_s18 + $0x790] ss:$8 sps:$4 sm:$0xff]   ;;  %v5923_v60 = vld [vmem:[%s7306_s18 + $0x7a4] ss:$8 sps:$4 sm:$0xff]  }
 0x11a   : > { %4640 = vmatprep.subr.bf16.mxu0 %v5832_v61  ;;  %v5918_v61 = vld [vmem:[%s7306_s18 + $0x1a0] ss:$8 sps:$4 sm:$0xff]  }
 0x11c   : > { %4395 = vmatpush1.bf16.msra.mxu1 %v5834_v63  ;;  %v5926_v63 = vld [vmem:[%s7306_s18 + $0x1b4] ss:$8 sps:$4 sm:$0xff]  }
 0x11d   : > { %4641 = vmatpush1.bf16.msra.mxu0 %v5835_v0  ;;  %4396 = vmatprep.subr.bf16.mxu1 %v5836_v1  ;;  %v5929_v0 = vld [vmem:[%s7306_s18 + $0x7b4] ss:$8 sps:$4 sm:$0xff]   ;;  %v5924_v1 = vld [vmem:[%s7306_s18 + $0x1b0] ss:$8 sps:$4 sm:$0xff]  }
 0x11e   : > { %4642 = vmatprep.subr.bf16.mxu0 %v5838_v2  ;;  %v5927_v2 = vld [vmem:[%s7306_s18 + $0x7b0] ss:$8 sps:$4 sm:$0xff]  }
 0x120   : > { %4397 = vmatpush1.bf16.msra.mxu1 %v5840_v3  ;;  %v5932_v3 = vld [vmem:[%s7306_s18 + $0x1c4] ss:$8 sps:$4 sm:$0xff]  }
 0x121   : > { %4643 = vmatpush1.bf16.msra.mxu0 %v5841_v4  ;;  %4398 = vmatprep.subr.bf16.mxu1 %v5842_v5  ;;  %v5935_v4 = vld [vmem:[%s7306_s18 + $0x7c4] ss:$8 sps:$4 sm:$0xff]   ;;  %v5930_v5 = vld [vmem:[%s7306_s18 + $0x1c0] ss:$8 sps:$4 sm:$0xff]  }
 0x122   : > { %4644 = vmatprep.subr.bf16.mxu0 %v5844_v6  ;;  %v5933_v6 = vld [vmem:[%s7306_s18 + $0x7c0] ss:$8 sps:$4 sm:$0xff]  }
 0x124   : > { %4399 = vmatpush1.bf16.msra.mxu1 %v5846_v7  ;;  %v5938_v7 = vld [vmem:[%s7306_s18 + $0x1d4] ss:$8 sps:$4 sm:$0xff]  }
 0x125   : > { %4645 = vmatpush1.bf16.msra.mxu0 %v5847_v8  ;;  %4400 = vmatprep.subr.bf16.mxu1 %v5848_v9  ;;  %v5941_v8 = vld [vmem:[%s7306_s18 + $0x7d4] ss:$8 sps:$4 sm:$0xff]   ;;  %v5936_v9 = vld [vmem:[%s7306_s18 + $0x1d0] ss:$8 sps:$4 sm:$0xff]  }
 0x126   : > { %4646 = vmatprep.subr.bf16.mxu0 %v5850_v10  ;;  %v5939_v10 = vld [vmem:[%s7306_s18 + $0x7d0] ss:$8 sps:$4 sm:$0xff]  }
 0x128   : > { %4401 = vmatpush1.bf16.msra.mxu1 %v5852_v11  ;;  %v5944_v11 = vld [vmem:[%s7306_s18 + $0x1e4] ss:$8 sps:$4 sm:$0xff]  }
 0x129   : > { %4647 = vmatpush1.bf16.msra.mxu0 %v5853_v12  ;;  %4411 = vmatprep.subr.bf16.mxu1 %v5858_v13  ;;  %v5947_v12 = vld [vmem:[%s7306_s18 + $0x7e4] ss:$8 sps:$4 sm:$0xff]   ;;  %v5942_v13 = vld [vmem:[%s7306_s18 + $0x1e0] ss:$8 sps:$4 sm:$0xff]  }
 0x12a   : > { %4657 = vmatprep.subr.bf16.mxu0 %v5863_v14  ;;  %v5945_v14 = vld [vmem:[%s7306_s18 + $0x7e0] ss:$8 sps:$4 sm:$0xff]  }
 0x12b   : > { %4403 = vmatmul.mubr.bf16.vlgmr.msra.gmra.mrb[0].mxu1 %v5204_v15  ;;  %v5950_v15 = vld [vmem:[%s7306_s18 + $0x1f4] ss:$8 sps:$4 sm:$0xff]  }
 0x12c   : > { %4649 = vmatmul.mubr.bf16.vlgmr.msra.gmra.mrb[0].mxu0 %v5216_v16  ;;  %4412 = vmatpush1.bf16.msra.mxu1 %v5856_v17  ;;  %v5953_v16 = vld [vmem:[%s7306_s18 + $0x7f4] ss:$8 sps:$4 sm:$0xff]   ;;  %v5948_v17 = vld [vmem:[%s7306_s18 + $0x1f0] ss:$8 sps:$4 sm:$0xff]  }
 0x12d   : > { %4658 = vmatpush1.bf16.msra.mxu0 %v5861_v18  ;;  %4413 = vmatprep.subr.bf16.mxu1 %v5866_v19  ;;  %v5951_v18 = vld [vmem:[%s7306_s18 + $0x7f0] ss:$8 sps:$4 sm:$0xff]   ;;  %v5958_v19 = vld [vmem:[%s7306_s18 + $0x204] ss:$8 sps:$4 sm:$0xff]  }
 0x12e   : > { %4659 = vmatprep.subr.bf16.mxu0 %v5869_v20  ;;  %4443 = vmatprep.mubr.bf16.mxu1 %v5207_v44  ;;  %v5963_v20 = vld [vmem:[%s7306_s18 + $0x804] ss:$8 sps:$4 sm:$0xff]   ;;  %v5985_v44 = vld [vmem:[%s7306_s18 + $0x840] ss:$8 sps:$4 sm:$0xff]  }
 0x12f   : > { %4689 = vmatprep.mubr.bf16.mxu0 %v5219_v47  ;;  %v5988_v47 = vld [vmem:[%s7306_s18 + $0x250] ss:$8 sps:$4 sm:$0xff]  }
 0x130   : > { %4414 = vmatpush1.bf16.msra.mxu1 %v5864_v21  ;;  %v5206_v21 = vcombine.low %v7408_v41, %v7408_v41  ;;  %v5984_v41 = vld [vmem:[%s7306_s18 + $0x244] ss:$8 sps:$4 sm:$0xff]  }
 0x131   : > { %4660 = vmatpush1.bf16.msra.mxu0 %v5867_v22  ;;  %4415 = vmatprep.subr.bf16.mxu1 %v5872_v23  ;;  %v5956_v22 = vld [vmem:[%s7306_s18 + $0x200] ss:$8 sps:$4 sm:$0xff]   ;;  %v5218_v23 = vcombine.low %v7417_v45, %v7417_v45  ;;  %v5990_v45 = vld [vmem:[%s7306_s18 + $0x254] ss:$8 sps:$4 sm:$0xff]  }
 0x132   : > { %4661 = vmatprep.subr.bf16.mxu0 %v5875_v24  ;;  %v5961_v24 = vld [vmem:[%s7306_s18 + $0x800] ss:$8 sps:$4 sm:$0xff]  }
 0x134   : > { %4416 = vmatpush1.bf16.msra.mxu1 %v5870_v25  ;;  %v5966_v25 = vld [vmem:[%s7306_s18 + $0x214] ss:$8 sps:$4 sm:$0xff]  }
 0x135   : > { %4662 = vmatpush1.bf16.msra.mxu0 %v5873_v26  ;;  %4417 = vmatprep.subr.bf16.mxu1 %v5878_v27  ;;  %v5969_v26 = vld [vmem:[%s7306_s18 + $0x814] ss:$8 sps:$4 sm:$0xff]   ;;  %v7470_v27 = vld [vmem:[%s7843_s0 + $0x10] sm:$0xff] }
 0x136   : > { %4663 = vmatprep.subr.bf16.mxu0 %v5881_v28  ;;  %v5209_v28 = vcombine.high %v7470_v27, %v7470_v27 }
 0x138   : > { %4418 = vmatpush1.bf16.msra.mxu1 %v5876_v29  ;;  %v7477_v29 = vld [vmem:[%s7843_s0 + $0x40] sm:$0xff] }
 0x139   : > { %4664 = vmatpush1.bf16.msra.mxu0 %v5879_v30  ;;  %4419 = vmatprep.subr.bf16.mxu1 %v5884_v31  ;;  %v5964_v30 = vld [vmem:[%s7306_s18 + $0x210] ss:$8 sps:$4 sm:$0xff]  }
 0x13a   : > { %4665 = vmatprep.subr.bf16.mxu0 %v5887_v32  ;;  %v5967_v31 = vld [vmem:[%s7306_s18 + $0x810] ss:$8 sps:$4 sm:$0xff]   ;;  %v5221_v32 = vcombine.high %v7477_v29, %v7477_v29 }
 0x13c   : > { %4420 = vmatpush1.bf16.msra.mxu1 %v5882_v33  ;;  %v5972_v33 = vld [vmem:[%s7306_s18 + $0x224] ss:$8 sps:$4 sm:$0xff]  }
 0x13d   : > { %4666 = vmatpush1.bf16.msra.mxu0 %v5885_v34  ;;  %4421 = vmatprep.subr.bf16.mxu1 %v5890_v35  ;;  %v5975_v34 = vld [vmem:[%s7306_s18 + $0x824] ss:$8 sps:$4 sm:$0xff]   ;;  %v5970_v35 = vld [vmem:[%s7306_s18 + $0x220] ss:$8 sps:$4 sm:$0xff]  }
 0x13e   : > { %4667 = vmatprep.subr.bf16.mxu0 %v5893_v36  ;;  %v5973_v36 = vld [vmem:[%s7306_s18 + $0x820] ss:$8 sps:$4 sm:$0xff]  }
 0x140   : > { %4422 = vmatpush1.bf16.msra.mxu1 %v5888_v37  ;;  %v5978_v37 = vld [vmem:[%s7306_s18 + $0x234] ss:$8 sps:$4 sm:$0xff]  }
 0x141   : > { %4668 = vmatpush1.bf16.msra.mxu0 %v5891_v38  ;;  %4423 = vmatprep.subr.bf16.mxu1 %v5896_v39  ;;  %v5981_v38 = vld [vmem:[%s7306_s18 + $0x834] ss:$8 sps:$4 sm:$0xff]   ;;  %v5976_v39 = vld [vmem:[%s7306_s18 + $0x230] ss:$8 sps:$4 sm:$0xff]  }
 0x142   : > { %4669 = vmatprep.subr.bf16.mxu0 %v5899_v40  ;;  %v5979_v40 = vld [vmem:[%s7306_s18 + $0x830] ss:$8 sps:$4 sm:$0xff]  }
 0x144   : > { %4424 = vmatpush1.bf16.msra.mxu1 %v5894_v42  ;;  %v5987_v42 = vld [vmem:[%s7306_s18 + $0x844] ss:$8 sps:$4 sm:$0xff]  }
 0x145   : > { %4670 = vmatpush1.bf16.msra.mxu0 %v5897_v43  ;;  %4425 = vmatprep.subr.bf16.mxu1 %v5902_v46  ;;  %v5982_v43 = vld [vmem:[%s7306_s18 + $0x240] ss:$8 sps:$4 sm:$0xff]   ;;  %v5993_v46 = vld [vmem:[%s7306_s18 + $0x854] ss:$8 sps:$4 sm:$0xff]  }
 0x146   : > { %4671 = vmatprep.subr.bf16.mxu0 %v5905_v48  ;;  %v5991_v48 = vld [vmem:[%s7306_s18 + $0x850] ss:$8 sps:$4 sm:$0xff]  }
 0x148   : > { %4426 = vmatpush1.bf16.msra.mxu1 %v5900_v49  ;;  %v5996_v49 = vld [vmem:[%s7306_s18 + $0x264] ss:$8 sps:$4 sm:$0xff]  }
 0x149   : > { %4672 = vmatpush1.bf16.msra.mxu0 %v5903_v50  ;;  %4427 = vmatprep.subr.bf16.mxu1 %v5908_v51  ;;  %v5999_v50 = vld [vmem:[%s7306_s18 + $0x864] ss:$8 sps:$4 sm:$0xff]   ;;  %v5994_v51 = vld [vmem:[%s7306_s18 + $0x260] ss:$8 sps:$4 sm:$0xff]  }
 0x14a   : > { %4673 = vmatprep.subr.bf16.mxu0 %v5911_v52  ;;  %v5997_v52 = vld [vmem:[%s7306_s18 + $0x860] ss:$8 sps:$4 sm:$0xff]  }
 0x14c   : > { %4428 = vmatpush1.bf16.msra.mxu1 %v5906_v53  ;;  %v6002_v53 = vld [vmem:[%s7306_s18 + $0x274] ss:$8 sps:$4 sm:$0xff]  }
 0x14d   : > { %4674 = vmatpush1.bf16.msra.mxu0 %v5909_v54  ;;  %4429 = vmatprep.subr.bf16.mxu1 %v5914_v55  ;;  %v6005_v54 = vld [vmem:[%s7306_s18 + $0x874] ss:$8 sps:$4 sm:$0xff]   ;;  %v6000_v55 = vld [vmem:[%s7306_s18 + $0x270] ss:$8 sps:$4 sm:$0xff]  }
 0x14e   : > { %4675 = vmatprep.subr.bf16.mxu0 %v5917_v56  ;;  %v6003_v56 = vld [vmem:[%s7306_s18 + $0x870] ss:$8 sps:$4 sm:$0xff]  }
 0x150   : > { %4430 = vmatpush1.bf16.msra.mxu1 %v5912_v57  ;;  %v6008_v57 = vld [vmem:[%s7306_s18 + $0x284] ss:$8 sps:$4 sm:$0xff]  }
 0x151   : > { %4676 = vmatpush1.bf16.msra.mxu0 %v5915_v58  ;;  %4431 = vmatprep.subr.bf16.mxu1 %v5920_v59  ;;  %v6011_v58 = vld [vmem:[%s7306_s18 + $0x884] ss:$8 sps:$4 sm:$0xff]   ;;  %v6006_v59 = vld [vmem:[%s7306_s18 + $0x280] ss:$8 sps:$4 sm:$0xff]  }
 0x152   : > { %4677 = vmatprep.subr.bf16.mxu0 %v5923_v60  ;;  %v6009_v60 = vld [vmem:[%s7306_s18 + $0x880] ss:$8 sps:$4 sm:$0xff]  }
 0x154   : > { %4432 = vmatpush1.bf16.msra.mxu1 %v5918_v61  ;;  %v6014_v61 = vld [vmem:[%s7306_s18 + $0x294] ss:$8 sps:$4 sm:$0xff]  }
 0x155   : > { %4678 = vmatpush1.bf16.msra.mxu0 %v5921_v62  ;;  %4433 = vmatprep.subr.bf16.mxu1 %v5926_v63  ;;  %v6017_v62 = vld [vmem:[%s7306_s18 + $0x894] ss:$8 sps:$4 sm:$0xff]   ;;  %v6012_v63 = vld [vmem:[%s7306_s18 + $0x290] ss:$8 sps:$4 sm:$0xff]  }
 0x156   : > { %4679 = vmatprep.subr.bf16.mxu0 %v5929_v0  ;;  %v6015_v0 = vld [vmem:[%s7306_s18 + $0x890] ss:$8 sps:$4 sm:$0xff]  }
 0x158   : > { %4434 = vmatpush1.bf16.msra.mxu1 %v5924_v1  ;;  %v6020_v1 = vld [vmem:[%s7306_s18 + $0x2a4] ss:$8 sps:$4 sm:$0xff]  }
 0x159   : > { %4680 = vmatpush1.bf16.msra.mxu0 %v5927_v2  ;;  %4435 = vmatprep.subr.bf16.mxu1 %v5932_v3  ;;  %v6023_v2 = vld [vmem:[%s7306_s18 + $0x8a4] ss:$8 sps:$4 sm:$0xff]   ;;  %v6018_v3 = vld [vmem:[%s7306_s18 + $0x2a0] ss:$8 sps:$4 sm:$0xff]  }
 0x15a   : > { %4681 = vmatprep.subr.bf16.mxu0 %v5935_v4  ;;  %v6021_v4 = vld [vmem:[%s7306_s18 + $0x8a0] ss:$8 sps:$4 sm:$0xff]  }
 0x15c   : > { %4436 = vmatpush1.bf16.msra.mxu1 %v5930_v5  ;;  %v6026_v5 = vld [vmem:[%s7306_s18 + $0x2b4] ss:$8 sps:$4 sm:$0xff]  }
 0x15d   : > { %4682 = vmatpush1.bf16.msra.mxu0 %v5933_v6  ;;  %4437 = vmatprep.subr.bf16.mxu1 %v5938_v7  ;;  %v6029_v6 = vld [vmem:[%s7306_s18 + $0x8b4] ss:$8 sps:$4 sm:$0xff]   ;;  %v6024_v7 = vld [vmem:[%s7306_s18 + $0x2b0] ss:$8 sps:$4 sm:$0xff]  }
 0x15e   : > { %4683 = vmatprep.subr.bf16.mxu0 %v5941_v8  ;;  %v6027_v8 = vld [vmem:[%s7306_s18 + $0x8b0] ss:$8 sps:$4 sm:$0xff]  }
 0x160   : > { %4438 = vmatpush1.bf16.msra.mxu1 %v5936_v9  ;;  %v6032_v9 = vld [vmem:[%s7306_s18 + $0x2c4] ss:$8 sps:$4 sm:$0xff]  }
 0x161   : > { %4684 = vmatpush1.bf16.msra.mxu0 %v5939_v10  ;;  %4439 = vmatprep.subr.bf16.mxu1 %v5944_v11  ;;  %v6035_v10 = vld [vmem:[%s7306_s18 + $0x8c4] ss:$8 sps:$4 sm:$0xff]   ;;  %v6030_v11 = vld [vmem:[%s7306_s18 + $0x2c0] ss:$8 sps:$4 sm:$0xff]  }
 0x162   : > { %4685 = vmatprep.subr.bf16.mxu0 %v5947_v12  ;;  %v6033_v12 = vld [vmem:[%s7306_s18 + $0x8c0] ss:$8 sps:$4 sm:$0xff]  }
 0x164   : > { %4440 = vmatpush1.bf16.msra.mxu1 %v5942_v13  ;;  %v6038_v13 = vld [vmem:[%s7306_s18 + $0x2d4] ss:$8 sps:$4 sm:$0xff]  }
 0x165   : > { %4686 = vmatpush1.bf16.msra.mxu0 %v5945_v14  ;;  %4441 = vmatprep.subr.bf16.mxu1 %v5950_v15  ;;  %v6041_v14 = vld [vmem:[%s7306_s18 + $0x8d4] ss:$8 sps:$4 sm:$0xff]   ;;  %v6036_v15 = vld [vmem:[%s7306_s18 + $0x2d0] ss:$8 sps:$4 sm:$0xff]  }
 0x166   : > { %4687 = vmatprep.subr.bf16.mxu0 %v5953_v16  ;;  %v6039_v16 = vld [vmem:[%s7306_s18 + $0x8d0] ss:$8 sps:$4 sm:$0xff]  }
 0x168   : > { %4442 = vmatpush1.bf16.msra.mxu1 %v5948_v17  ;;  %v6044_v17 = vld [vmem:[%s7306_s18 + $0x2e4] ss:$8 sps:$4 sm:$0xff]  }
 0x169   : > { %4688 = vmatpush1.bf16.msra.mxu0 %v5951_v18  ;;  %4452 = vmatprep.subr.bf16.mxu1 %v5958_v19  ;;  %v6047_v18 = vld [vmem:[%s7306_s18 + $0x8e4] ss:$8 sps:$4 sm:$0xff]   ;;  %v6042_v19 = vld [vmem:[%s7306_s18 + $0x2e0] ss:$8 sps:$4 sm:$0xff]  }
 0x16a   : > { %4698 = vmatprep.subr.bf16.mxu0 %v5963_v20  ;;  %v6045_v20 = vld [vmem:[%s7306_s18 + $0x8e0] ss:$8 sps:$4 sm:$0xff]  }
 0x16b   : > { %4444 = vmatmul.mubr.bf16.vlgmr.msra.gmra.mrb[0].mxu1 %v5206_v21  ;;  %v6050_v21 = vld [vmem:[%s7306_s18 + $0x2f4] ss:$8 sps:$4 sm:$0xff]  }
 0x16c   : > { %4690 = vmatmul.mubr.bf16.vlgmr.msra.gmra.mrb[0].mxu0 %v5218_v23  ;;  %4453 = vmatpush1.bf16.msra.mxu1 %v5956_v22  ;;  %v6053_v22 = vld [vmem:[%s7306_s18 + $0x8f4] ss:$8 sps:$4 sm:$0xff]   ;;  %v6048_v23 = vld [vmem:[%s7306_s18 + $0x2f0] ss:$8 sps:$4 sm:$0xff]  }
 0x16d   : > { %4699 = vmatpush1.bf16.msra.mxu0 %v5961_v24  ;;  %4454 = vmatprep.subr.bf16.mxu1 %v5966_v25  ;;  %v6051_v24 = vld [vmem:[%s7306_s18 + $0x8f0] ss:$8 sps:$4 sm:$0xff]   ;;  %v6058_v25 = vld [vmem:[%s7306_s18 + $0x304] ss:$8 sps:$4 sm:$0xff]  }
 0x16e   : > { %4700 = vmatprep.subr.bf16.mxu0 %v5969_v26  ;;  %4484 = vmatprep.mubr.bf16.mxu1 %v5209_v28  ;;  %v6063_v26 = vld [vmem:[%s7306_s18 + $0x904] ss:$8 sps:$4 sm:$0xff]   ;;  %v6056_v28 = vld [vmem:[%s7306_s18 + $0x300] ss:$8 sps:$4 sm:$0xff]  }
 0x16f   : > { %4730 = vmatprep.mubr.bf16.mxu0 %v5221_v32  ;;  %v5220_v32 = vcombine.low %v7477_v29, %v7477_v29 }
 0x170   : > { %4455 = vmatpush1.bf16.msra.mxu1 %v5964_v30  ;;  %v6061_v30 = vld [vmem:[%s7306_s18 + $0x900] ss:$8 sps:$4 sm:$0xff]  }
 0x171   : > { %4701 = vmatpush1.bf16.msra.mxu0 %v5967_v31  ;;  %4456 = vmatprep.subr.bf16.mxu1 %v5972_v33  ;;  %v5208_v31 = vcombine.low %v7470_v27, %v7470_v27  ;;  %v7550_v33 = vld [vmem:[%s7843_s0 + $0x18] sm:$0xff] }
 0x172   : > { %4702 = vmatprep.subr.bf16.mxu0 %v5975_v34  ;;  %v7555_v34 = vld [vmem:[%s7843_s0 + $0x48] sm:$0xff]  ;;  %v6069_v27 = vld [vmem:[%s7306_s18 + $0x914] ss:$8 sps:$4 sm:$0xff]   ;;  %v5211_v29 = vcombine.high %v7550_v33, %v7550_v33 }
 0x174   : > { %4457 = vmatpush1.bf16.msra.mxu1 %v5970_v35  ;;  %v6066_v35 = vld [vmem:[%s7306_s18 + $0x314] ss:$8 sps:$4 sm:$0xff]  }
 0x175   : > { %4703 = vmatpush1.bf16.msra.mxu0 %v5973_v36  ;;  %4458 = vmatprep.subr.bf16.mxu1 %v5978_v37  ;;  %v5223_v36 = vcombine.high %v7555_v34, %v7555_v34  ;;  %v6064_v37 = vld [vmem:[%s7306_s18 + $0x310] ss:$8 sps:$4 sm:$0xff]  }
 0x176   : > { %4704 = vmatprep.subr.bf16.mxu0 %v5981_v38  ;;  %v6067_v38 = vld [vmem:[%s7306_s18 + $0x910] ss:$8 sps:$4 sm:$0xff]  }
 0x178   : > { %4459 = vmatpush1.bf16.msra.mxu1 %v5976_v39  ;;  %v6072_v39 = vld [vmem:[%s7306_s18 + $0x324] ss:$8 sps:$4 sm:$0xff]  }
 0x179   : > { %4705 = vmatpush1.bf16.msra.mxu0 %v5979_v40  ;;  %4460 = vmatprep.subr.bf16.mxu1 %v5984_v41  ;;  %v6075_v40 = vld [vmem:[%s7306_s18 + $0x924] ss:$8 sps:$4 sm:$0xff]   ;;  %v6070_v41 = vld [vmem:[%s7306_s18 + $0x320] ss:$8 sps:$4 sm:$0xff]  }
 0x17a   : > { %4706 = vmatprep.subr.bf16.mxu0 %v5987_v42  ;;  %v6073_v42 = vld [vmem:[%s7306_s18 + $0x920] ss:$8 sps:$4 sm:$0xff]  }
 0x17c   : > { %4461 = vmatpush1.bf16.msra.mxu1 %v5982_v43  ;;  %v6078_v43 = vld [vmem:[%s7306_s18 + $0x334] ss:$8 sps:$4 sm:$0xff]  }
 0x17d   : > { %4707 = vmatpush1.bf16.msra.mxu0 %v5985_v44  ;;  %4462 = vmatprep.subr.bf16.mxu1 %v5990_v45  ;;  %v6081_v44 = vld [vmem:[%s7306_s18 + $0x934] ss:$8 sps:$4 sm:$0xff]   ;;  %v6076_v45 = vld [vmem:[%s7306_s18 + $0x330] ss:$8 sps:$4 sm:$0xff]  }
 0x17e   : > { %4708 = vmatprep.subr.bf16.mxu0 %v5993_v46  ;;  %v6079_v46 = vld [vmem:[%s7306_s18 + $0x930] ss:$8 sps:$4 sm:$0xff]  }
 0x180   : > { %4463 = vmatpush1.bf16.msra.mxu1 %v5988_v47  ;;  %v6084_v47 = vld [vmem:[%s7306_s18 + $0x344] ss:$8 sps:$4 sm:$0xff]  }
 0x181   : > { %4709 = vmatpush1.bf16.msra.mxu0 %v5991_v48  ;;  %4464 = vmatprep.subr.bf16.mxu1 %v5996_v49  ;;  %v6087_v48 = vld [vmem:[%s7306_s18 + $0x944] ss:$8 sps:$4 sm:$0xff]   ;;  %v6082_v49 = vld [vmem:[%s7306_s18 + $0x340] ss:$8 sps:$4 sm:$0xff]  }
 0x182   : > { %4710 = vmatprep.subr.bf16.mxu0 %v5999_v50  ;;  %v6085_v50 = vld [vmem:[%s7306_s18 + $0x940] ss:$8 sps:$4 sm:$0xff]  }
 0x184   : > { %4465 = vmatpush1.bf16.msra.mxu1 %v5994_v51  ;;  %v6090_v51 = vld [vmem:[%s7306_s18 + $0x354] ss:$8 sps:$4 sm:$0xff]  }
 0x185   : > { %4711 = vmatpush1.bf16.msra.mxu0 %v5997_v52  ;;  %4466 = vmatprep.subr.bf16.mxu1 %v6002_v53  ;;  %v6093_v52 = vld [vmem:[%s7306_s18 + $0x954] ss:$8 sps:$4 sm:$0xff]   ;;  %v6088_v53 = vld [vmem:[%s7306_s18 + $0x350] ss:$8 sps:$4 sm:$0xff]  }
 0x186   : > { %4712 = vmatprep.subr.bf16.mxu0 %v6005_v54  ;;  %v6091_v54 = vld [vmem:[%s7306_s18 + $0x950] ss:$8 sps:$4 sm:$0xff]  }
 0x188   : > { %4467 = vmatpush1.bf16.msra.mxu1 %v6000_v55  ;;  %v6096_v55 = vld [vmem:[%s7306_s18 + $0x364] ss:$8 sps:$4 sm:$0xff]  }
 0x189   : > { %4713 = vmatpush1.bf16.msra.mxu0 %v6003_v56  ;;  %4468 = vmatprep.subr.bf16.mxu1 %v6008_v57  ;;  %v6099_v56 = vld [vmem:[%s7306_s18 + $0x964] ss:$8 sps:$4 sm:$0xff]   ;;  %v6094_v57 = vld [vmem:[%s7306_s18 + $0x360] ss:$8 sps:$4 sm:$0xff]  }
 0x18a   : > { %4714 = vmatprep.subr.bf16.mxu0 %v6011_v58  ;;  %v6097_v58 = vld [vmem:[%s7306_s18 + $0x960] ss:$8 sps:$4 sm:$0xff]  }
 0x18c   : > { %4469 = vmatpush1.bf16.msra.mxu1 %v6006_v59  ;;  %v6102_v59 = vld [vmem:[%s7306_s18 + $0x374] ss:$8 sps:$4 sm:$0xff]  }
 0x18d   : > { %4715 = vmatpush1.bf16.msra.mxu0 %v6009_v60  ;;  %4470 = vmatprep.subr.bf16.mxu1 %v6014_v61  ;;  %v6105_v60 = vld [vmem:[%s7306_s18 + $0x974] ss:$8 sps:$4 sm:$0xff]   ;;  %v6100_v61 = vld [vmem:[%s7306_s18 + $0x370] ss:$8 sps:$4 sm:$0xff]  }
 0x18e   : > { %4716 = vmatprep.subr.bf16.mxu0 %v6017_v62  ;;  %v6103_v62 = vld [vmem:[%s7306_s18 + $0x970] ss:$8 sps:$4 sm:$0xff]  }
 0x190   : > { %4471 = vmatpush1.bf16.msra.mxu1 %v6012_v63  ;;  %v6108_v63 = vld [vmem:[%s7306_s18 + $0x384] ss:$8 sps:$4 sm:$0xff]  }
 0x191   : > { %4717 = vmatpush1.bf16.msra.mxu0 %v6015_v0  ;;  %4472 = vmatprep.subr.bf16.mxu1 %v6020_v1  ;;  %v6111_v0 = vld [vmem:[%s7306_s18 + $0x984] ss:$8 sps:$4 sm:$0xff]   ;;  %v6106_v1 = vld [vmem:[%s7306_s18 + $0x380] ss:$8 sps:$4 sm:$0xff]  }
 0x192   : > { %4718 = vmatprep.subr.bf16.mxu0 %v6023_v2  ;;  %v6109_v2 = vld [vmem:[%s7306_s18 + $0x980] ss:$8 sps:$4 sm:$0xff]  }
 0x194   : > { %4473 = vmatpush1.bf16.msra.mxu1 %v6018_v3  ;;  %v6114_v3 = vld [vmem:[%s7306_s18 + $0x394] ss:$8 sps:$4 sm:$0xff]  }
 0x195   : > { %4719 = vmatpush1.bf16.msra.mxu0 %v6021_v4  ;;  %4474 = vmatprep.subr.bf16.mxu1 %v6026_v5  ;;  %v6117_v4 = vld [vmem:[%s7306_s18 + $0x994] ss:$8 sps:$4 sm:$0xff]   ;;  %v6112_v5 = vld [vmem:[%s7306_s18 + $0x390] ss:$8 sps:$4 sm:$0xff]  }
 0x196   : > { %4720 = vmatprep.subr.bf16.mxu0 %v6029_v6  ;;  %v6115_v6 = vld [vmem:[%s7306_s18 + $0x990] ss:$8 sps:$4 sm:$0xff]  }
 0x198   : > { %4475 = vmatpush1.bf16.msra.mxu1 %v6024_v7  ;;  %v6120_v7 = vld [vmem:[%s7306_s18 + $0x3a4] ss:$8 sps:$4 sm:$0xff]  }
 0x199   : > { %4721 = vmatpush1.bf16.msra.mxu0 %v6027_v8  ;;  %4476 = vmatprep.subr.bf16.mxu1 %v6032_v9  ;;  %v6123_v8 = vld [vmem:[%s7306_s18 + $0x9a4] ss:$8 sps:$4 sm:$0xff]   ;;  %v6118_v9 = vld [vmem:[%s7306_s18 + $0x3a0] ss:$8 sps:$4 sm:$0xff]  }
 0x19a   : > { %4722 = vmatprep.subr.bf16.mxu0 %v6035_v10  ;;  %v6121_v10 = vld [vmem:[%s7306_s18 + $0x9a0] ss:$8 sps:$4 sm:$0xff]  }
 0x19c   : > { %4477 = vmatpush1.bf16.msra.mxu1 %v6030_v11  ;;  %v6126_v11 = vld [vmem:[%s7306_s18 + $0x3b4] ss:$8 sps:$4 sm:$0xff]  }
 0x19d   : > { %4723 = vmatpush1.bf16.msra.mxu0 %v6033_v12  ;;  %4478 = vmatprep.subr.bf16.mxu1 %v6038_v13  ;;  %v6129_v12 = vld [vmem:[%s7306_s18 + $0x9b4] ss:$8 sps:$4 sm:$0xff]   ;;  %v6124_v13 = vld [vmem:[%s7306_s18 + $0x3b0] ss:$8 sps:$4 sm:$0xff]  }
 0x19e   : > { %4724 = vmatprep.subr.bf16.mxu0 %v6041_v14  ;;  %v6127_v14 = vld [vmem:[%s7306_s18 + $0x9b0] ss:$8 sps:$4 sm:$0xff]  }
 0x1a0   : > { %4479 = vmatpush1.bf16.msra.mxu1 %v6036_v15  ;;  %v6132_v15 = vld [vmem:[%s7306_s18 + $0x3c4] ss:$8 sps:$4 sm:$0xff]  }
 0x1a1   : > { %4725 = vmatpush1.bf16.msra.mxu0 %v6039_v16  ;;  %4480 = vmatprep.subr.bf16.mxu1 %v6044_v17  ;;  %v6135_v16 = vld [vmem:[%s7306_s18 + $0x9c4] ss:$8 sps:$4 sm:$0xff]   ;;  %v6130_v17 = vld [vmem:[%s7306_s18 + $0x3c0] ss:$8 sps:$4 sm:$0xff]  }
 0x1a2   : > { %4726 = vmatprep.subr.bf16.mxu0 %v6047_v18  ;;  %v6133_v18 = vld [vmem:[%s7306_s18 + $0x9c0] ss:$8 sps:$4 sm:$0xff]  }
 0x1a4   : > { %4481 = vmatpush1.bf16.msra.mxu1 %v6042_v19  ;;  %v6138_v19 = vld [vmem:[%s7306_s18 + $0x3d4] ss:$8 sps:$4 sm:$0xff]  }
 0x1a5   : > { %4727 = vmatpush1.bf16.msra.mxu0 %v6045_v20  ;;  %4482 = vmatprep.subr.bf16.mxu1 %v6050_v21  ;;  %v6141_v20 = vld [vmem:[%s7306_s18 + $0x9d4] ss:$8 sps:$4 sm:$0xff]   ;;  %v6136_v21 = vld [vmem:[%s7306_s18 + $0x3d0] ss:$8 sps:$4 sm:$0xff]  }
 0x1a6   : > { %4728 = vmatprep.subr.bf16.mxu0 %v6053_v22  ;;  %v6139_v22 = vld [vmem:[%s7306_s18 + $0x9d0] ss:$8 sps:$4 sm:$0xff]  }
 0x1a8   : > { %4483 = vmatpush1.bf16.msra.mxu1 %v6048_v23  ;;  %v6144_v23 = vld [vmem:[%s7306_s18 + $0x3e4] ss:$8 sps:$4 sm:$0xff]  }
 0x1a9   : > { %4729 = vmatpush1.bf16.msra.mxu0 %v6051_v24  ;;  %4493 = vmatprep.subr.bf16.mxu1 %v6058_v25  ;;  %v6147_v24 = vld [vmem:[%s7306_s18 + $0x9e4] ss:$8 sps:$4 sm:$0xff]   ;;  %v6142_v25 = vld [vmem:[%s7306_s18 + $0x3e0] ss:$8 sps:$4 sm:$0xff]  }
 0x1aa   : > { %4739 = vmatprep.subr.bf16.mxu0 %v6063_v26  ;;  %v6145_v26 = vld [vmem:[%s7306_s18 + $0x9e0] ss:$8 sps:$4 sm:$0xff]  }
 0x1ab   : > { %4485 = vmatmul.mubr.bf16.vlgmr.msra.gmra.mrb[0].mxu1 %v5208_v31  ;;  %v6148_v31 = vld [vmem:[%s7306_s18 + $0x3f0] ss:$8 sps:$4 sm:$0xff]  }
 0x1ac   : > { %4731 = vmatmul.mubr.bf16.vlgmr.msra.gmra.mrb[0].mxu0 %v5220_v32  ;;  %4494 = vmatpush1.bf16.msra.mxu1 %v6056_v28  ;;  %v6150_v28 = vld [vmem:[%s7306_s18 + $0x3f4] ss:$8 sps:$4 sm:$0xff]   ;;  %v6151_v32 = vld [vmem:[%s7306_s18 + $0x9f0] ss:$8 sps:$4 sm:$0xff]  }
 0x1ad   : > { %4740 = vmatpush1.bf16.msra.mxu0 %v6061_v30  ;;  %4495 = vmatprep.subr.bf16.mxu1 %v6066_v35  ;;  %v6153_v30 = vld [vmem:[%s7306_s18 + $0x9f4] ss:$8 sps:$4 sm:$0xff]   ;;  %v6158_v35 = vld [vmem:[%s7306_s18 + $0x404] ss:$8 sps:$4 sm:$0xff]  }
 0x1ae   : > { %4741 = vmatprep.subr.bf16.mxu0 %v6069_v27  ;;  %4525 = vmatprep.mubr.bf16.mxu1 %v5211_v29  ;;  %v6163_v27 = vld [vmem:[%s7306_s18 + $0xa04] ss:$8 sps:$4 sm:$0xff]   ;;  %v7626_v29 = vld [vmem:[%s7843_s0 + $0x20] sm:$0xff] }
 0x1af   : > { %4771 = vmatprep.mubr.bf16.mxu0 %v5223_v36  ;;  %v5210_v36 = vcombine.low %v7550_v33, %v7550_v33  ;;  %v6166_v33 = vld [vmem:[%s7306_s18 + $0x414] ss:$8 sps:$4 sm:$0xff]  }
 0x1b0   : > { %4496 = vmatpush1.bf16.msra.mxu1 %v6064_v37  ;;  %v5222_v37 = vcombine.low %v7555_v34, %v7555_v34  ;;  %v5213_v34 = vcombine.high %v7626_v29, %v7626_v29 }
 0x1b1   : > { %4742 = vmatpush1.bf16.msra.mxu0 %v6067_v38  ;;  %4497 = vmatprep.subr.bf16.mxu1 %v6072_v39  ;;  %v7635_v38 = vld [vmem:[%s7843_s0 + $0x50] sm:$0xff] }
 0x1b2   : > { %4743 = vmatprep.subr.bf16.mxu0 %v6075_v40  ;;  %v6156_v39 = vld [vmem:[%s7306_s18 + $0x400] ss:$8 sps:$4 sm:$0xff]  }
 0x1b3   : > { %v6161_v40 = vld [vmem:[%s7306_s18 + $0xa00] ss:$8 sps:$4 sm:$0xff]  }
 0x1b4   : > { %4498 = vmatpush1.bf16.msra.mxu1 %v6070_v41  ;;  %v6169_v41 = vld [vmem:[%s7306_s18 + $0xa14] ss:$8 sps:$4 sm:$0xff]  }
 0x1b5   : > { %4744 = vmatpush1.bf16.msra.mxu0 %v6073_v42  ;;  %4499 = vmatprep.subr.bf16.mxu1 %v6078_v43  ;;  %v5225_v42 = vcombine.high %v7635_v38, %v7635_v38  ;;  %v6164_v43 = vld [vmem:[%s7306_s18 + $0x410] ss:$8 sps:$4 sm:$0xff]  }
 0x1b6   : > { %4745 = vmatprep.subr.bf16.mxu0 %v6081_v44  ;;  %v6167_v44 = vld [vmem:[%s7306_s18 + $0xa10] ss:$8 sps:$4 sm:$0xff]  }
 0x1b8   : > { %4500 = vmatpush1.bf16.msra.mxu1 %v6076_v45  ;;  %v6172_v45 = vld [vmem:[%s7306_s18 + $0x424] ss:$8 sps:$4 sm:$0xff]  }
 0x1b9   : > { %4746 = vmatpush1.bf16.msra.mxu0 %v6079_v46  ;;  %4501 = vmatprep.subr.bf16.mxu1 %v6084_v47  ;;  %v6175_v46 = vld [vmem:[%s7306_s18 + $0xa24] ss:$8 sps:$4 sm:$0xff]   ;;  %v6170_v47 = vld [vmem:[%s7306_s18 + $0x420] ss:$8 sps:$4 sm:$0xff]  }
 0x1ba   : > { %4747 = vmatprep.subr.bf16.mxu0 %v6087_v48  ;;  %v6173_v48 = vld [vmem:[%s7306_s18 + $0xa20] ss:$8 sps:$4 sm:$0xff]  }
 0x1bc   : > { %4502 = vmatpush1.bf16.msra.mxu1 %v6082_v49  ;;  %v6178_v49 = vld [vmem:[%s7306_s18 + $0x434] ss:$8 sps:$4 sm:$0xff]  }
 0x1bd   : > { %4748 = vmatpush1.bf16.msra.mxu0 %v6085_v50  ;;  %4503 = vmatprep.subr.bf16.mxu1 %v6090_v51  ;;  %v6181_v50 = vld [vmem:[%s7306_s18 + $0xa34] ss:$8 sps:$4 sm:$0xff]   ;;  %v6176_v51 = vld [vmem:[%s7306_s18 + $0x430] ss:$8 sps:$4 sm:$0xff]  }
 0x1be   : > { %4749 = vmatprep.subr.bf16.mxu0 %v6093_v52  ;;  %v6179_v52 = vld [vmem:[%s7306_s18 + $0xa30] ss:$8 sps:$4 sm:$0xff]  }
 0x1c0   : > { %4504 = vmatpush1.bf16.msra.mxu1 %v6088_v53  ;;  %v6184_v53 = vld [vmem:[%s7306_s18 + $0x444] ss:$8 sps:$4 sm:$0xff]  }
 0x1c1   : > { %4750 = vmatpush1.bf16.msra.mxu0 %v6091_v54  ;;  %4505 = vmatprep.subr.bf16.mxu1 %v6096_v55  ;;  %v6187_v54 = vld [vmem:[%s7306_s18 + $0xa44] ss:$8 sps:$4 sm:$0xff]   ;;  %v6182_v55 = vld [vmem:[%s7306_s18 + $0x440] ss:$8 sps:$4 sm:$0xff]  }
 0x1c2   : > { %4751 = vmatprep.subr.bf16.mxu0 %v6099_v56  ;;  %v6185_v56 = vld [vmem:[%s7306_s18 + $0xa40] ss:$8 sps:$4 sm:$0xff]  }
 0x1c4   : > { %4506 = vmatpush1.bf16.msra.mxu1 %v6094_v57  ;;  %v6190_v57 = vld [vmem:[%s7306_s18 + $0x454] ss:$8 sps:$4 sm:$0xff]  }
 0x1c5   : > { %4752 = vmatpush1.bf16.msra.mxu0 %v6097_v58  ;;  %4507 = vmatprep.subr.bf16.mxu1 %v6102_v59  ;;  %v6193_v58 = vld [vmem:[%s7306_s18 + $0xa54] ss:$8 sps:$4 sm:$0xff]   ;;  %v6188_v59 = vld [vmem:[%s7306_s18 + $0x450] ss:$8 sps:$4 sm:$0xff]  }
 0x1c6   : > { %4753 = vmatprep.subr.bf16.mxu0 %v6105_v60  ;;  %v6191_v60 = vld [vmem:[%s7306_s18 + $0xa50] ss:$8 sps:$4 sm:$0xff]  }
 0x1c8   : > { %4508 = vmatpush1.bf16.msra.mxu1 %v6100_v61  ;;  %v6196_v61 = vld [vmem:[%s7306_s18 + $0x464] ss:$8 sps:$4 sm:$0xff]  }
 0x1c9   : > { %4754 = vmatpush1.bf16.msra.mxu0 %v6103_v62  ;;  %4509 = vmatprep.subr.bf16.mxu1 %v6108_v63  ;;  %v6199_v62 = vld [vmem:[%s7306_s18 + $0xa64] ss:$8 sps:$4 sm:$0xff]   ;;  %v6194_v63 = vld [vmem:[%s7306_s18 + $0x460] ss:$8 sps:$4 sm:$0xff]  }
 0x1ca   : > { %4755 = vmatprep.subr.bf16.mxu0 %v6111_v0  ;;  %v6197_v0 = vld [vmem:[%s7306_s18 + $0xa60] ss:$8 sps:$4 sm:$0xff]  }
 0x1cc   : > { %4510 = vmatpush1.bf16.msra.mxu1 %v6106_v1  ;;  %v6202_v1 = vld [vmem:[%s7306_s18 + $0x474] ss:$8 sps:$4 sm:$0xff]  }
 0x1cd   : > { %4756 = vmatpush1.bf16.msra.mxu0 %v6109_v2  ;;  %4511 = vmatprep.subr.bf16.mxu1 %v6114_v3  ;;  %v6205_v2 = vld [vmem:[%s7306_s18 + $0xa74] ss:$8 sps:$4 sm:$0xff]   ;;  %v6200_v3 = vld [vmem:[%s7306_s18 + $0x470] ss:$8 sps:$4 sm:$0xff]  }
 0x1ce   : > { %4757 = vmatprep.subr.bf16.mxu0 %v6117_v4  ;;  %v6203_v4 = vld [vmem:[%s7306_s18 + $0xa70] ss:$8 sps:$4 sm:$0xff]  }
 0x1d0   : > { %4512 = vmatpush1.bf16.msra.mxu1 %v6112_v5  ;;  %v6208_v5 = vld [vmem:[%s7306_s18 + $0x484] ss:$8 sps:$4 sm:$0xff]  }
 0x1d1   : > { %4758 = vmatpush1.bf16.msra.mxu0 %v6115_v6  ;;  %4513 = vmatprep.subr.bf16.mxu1 %v6120_v7  ;;  %v6211_v6 = vld [vmem:[%s7306_s18 + $0xa84] ss:$8 sps:$4 sm:$0xff]   ;;  %v6206_v7 = vld [vmem:[%s7306_s18 + $0x480] ss:$8 sps:$4 sm:$0xff]  }
 0x1d2   : > { %4759 = vmatprep.subr.bf16.mxu0 %v6123_v8  ;;  %v6209_v8 = vld [vmem:[%s7306_s18 + $0xa80] ss:$8 sps:$4 sm:$0xff]  }
 0x1d4   : > { %4514 = vmatpush1.bf16.msra.mxu1 %v6118_v9  ;;  %v6214_v9 = vld [vmem:[%s7306_s18 + $0x494] ss:$8 sps:$4 sm:$0xff]  }
 0x1d5   : > { %4760 = vmatpush1.bf16.msra.mxu0 %v6121_v10  ;;  %4515 = vmatprep.subr.bf16.mxu1 %v6126_v11  ;;  %v6217_v10 = vld [vmem:[%s7306_s18 + $0xa94] ss:$8 sps:$4 sm:$0xff]   ;;  %v6212_v11 = vld [vmem:[%s7306_s18 + $0x490] ss:$8 sps:$4 sm:$0xff]  }
 0x1d6   : > { %4761 = vmatprep.subr.bf16.mxu0 %v6129_v12  ;;  %v6215_v12 = vld [vmem:[%s7306_s18 + $0xa90] ss:$8 sps:$4 sm:$0xff]  }
 0x1d8   : > { %4516 = vmatpush1.bf16.msra.mxu1 %v6124_v13  ;;  %v6220_v13 = vld [vmem:[%s7306_s18 + $0x4a4] ss:$8 sps:$4 sm:$0xff]  }
 0x1d9   : > { %4762 = vmatpush1.bf16.msra.mxu0 %v6127_v14  ;;  %4517 = vmatprep.subr.bf16.mxu1 %v6132_v15  ;;  %v6223_v14 = vld [vmem:[%s7306_s18 + $0xaa4] ss:$8 sps:$4 sm:$0xff]   ;;  %v6218_v15 = vld [vmem:[%s7306_s18 + $0x4a0] ss:$8 sps:$4 sm:$0xff]  }
 0x1da   : > { %4763 = vmatprep.subr.bf16.mxu0 %v6135_v16  ;;  %v6221_v16 = vld [vmem:[%s7306_s18 + $0xaa0] ss:$8 sps:$4 sm:$0xff]  }
 0x1dc   : > { %4518 = vmatpush1.bf16.msra.mxu1 %v6130_v17  ;;  %v6226_v17 = vld [vmem:[%s7306_s18 + $0x4b4] ss:$8 sps:$4 sm:$0xff]  }
 0x1dd   : > { %4764 = vmatpush1.bf16.msra.mxu0 %v6133_v18  ;;  %4519 = vmatprep.subr.bf16.mxu1 %v6138_v19  ;;  %v6229_v18 = vld [vmem:[%s7306_s18 + $0xab4] ss:$8 sps:$4 sm:$0xff]   ;;  %v6224_v19 = vld [vmem:[%s7306_s18 + $0x4b0] ss:$8 sps:$4 sm:$0xff]  }
 0x1de   : > { %4765 = vmatprep.subr.bf16.mxu0 %v6141_v20  ;;  %v6227_v20 = vld [vmem:[%s7306_s18 + $0xab0] ss:$8 sps:$4 sm:$0xff]  }
 0x1e0   : > { %4520 = vmatpush1.bf16.msra.mxu1 %v6136_v21  ;;  %v6232_v21 = vld [vmem:[%s7306_s18 + $0x4c4] ss:$8 sps:$4 sm:$0xff]  }
 0x1e1   : > { %4766 = vmatpush1.bf16.msra.mxu0 %v6139_v22  ;;  %4521 = vmatprep.subr.bf16.mxu1 %v6144_v23  ;;  %v6235_v22 = vld [vmem:[%s7306_s18 + $0xac4] ss:$8 sps:$4 sm:$0xff]   ;;  %v6230_v23 = vld [vmem:[%s7306_s18 + $0x4c0] ss:$8 sps:$4 sm:$0xff]  }
 0x1e2   : > { %4767 = vmatprep.subr.bf16.mxu0 %v6147_v24  ;;  %v6233_v24 = vld [vmem:[%s7306_s18 + $0xac0] ss:$8 sps:$4 sm:$0xff]  }
 0x1e4   : > { %4522 = vmatpush1.bf16.msra.mxu1 %v6142_v25  ;;  %v6238_v25 = vld [vmem:[%s7306_s18 + $0x4d4] ss:$8 sps:$4 sm:$0xff]  }
 0x1e5   : > { %4768 = vmatpush1.bf16.msra.mxu0 %v6145_v26  ;;  %4523 = vmatprep.subr.bf16.mxu1 %v6150_v28  ;;  %v6241_v26 = vld [vmem:[%s7306_s18 + $0xad4] ss:$8 sps:$4 sm:$0xff]   ;;  %v6236_v28 = vld [vmem:[%s7306_s18 + $0x4d0] ss:$8 sps:$4 sm:$0xff]  }
 0x1e6   : > { %4769 = vmatprep.subr.bf16.mxu0 %v6153_v30  ;;  %v6239_v30 = vld [vmem:[%s7306_s18 + $0xad0] ss:$8 sps:$4 sm:$0xff]  }
 0x1e8   : > { %4524 = vmatpush1.bf16.msra.mxu1 %v6148_v31  ;;  %v6244_v31 = vld [vmem:[%s7306_s18 + $0x4e4] ss:$8 sps:$4 sm:$0xff]  }
 0x1e9   : > { %4770 = vmatpush1.bf16.msra.mxu0 %v6151_v32  ;;  %4534 = vmatprep.subr.bf16.mxu1 %v6158_v35  ;;  %v6247_v32 = vld [vmem:[%s7306_s18 + $0xae4] ss:$8 sps:$4 sm:$0xff]   ;;  %v6242_v35 = vld [vmem:[%s7306_s18 + $0x4e0] ss:$8 sps:$4 sm:$0xff]  }
 0x1ea   : > { %4780 = vmatprep.subr.bf16.mxu0 %v6163_v27  ;;  %v6245_v27 = vld [vmem:[%s7306_s18 + $0xae0] ss:$8 sps:$4 sm:$0xff]  }
 0x1eb   : > { %4526 = vmatmul.mubr.bf16.vlgmr.msra.gmra.mrb[0].mxu1 %v5210_v36  ;;  %v6250_v36 = vld [vmem:[%s7306_s18 + $0x4f4] ss:$8 sps:$4 sm:$0xff]  }
 0x1ec   : > { %4772 = vmatmul.mubr.bf16.vlgmr.msra.gmra.mrb[0].mxu0 %v5222_v37  ;;  %4535 = vmatpush1.bf16.msra.mxu1 %v6156_v39  ;;  %v6253_v37 = vld [vmem:[%s7306_s18 + $0xaf4] ss:$8 sps:$4 sm:$0xff]   ;;  %v6248_v39 = vld [vmem:[%s7306_s18 + $0x4f0] ss:$8 sps:$4 sm:$0xff]  }
 0x1ed   : > { %4781 = vmatpush1.bf16.msra.mxu0 %v6161_v40  ;;  %4536 = vmatprep.subr.bf16.mxu1 %v6166_v33  ;;  %v6251_v40 = vld [vmem:[%s7306_s18 + $0xaf0] ss:$8 sps:$4 sm:$0xff]   ;;  %v6258_v33 = vld [vmem:[%s7306_s18 + $0x504] ss:$8 sps:$4 sm:$0xff]  }
 0x1ee   : > { %4782 = vmatprep.subr.bf16.mxu0 %v6169_v41  ;;  %4566 = vmatprep.mubr.bf16.mxu1 %v5213_v34  ;;  %v6263_v41 = vld [vmem:[%s7306_s18 + $0xb04] ss:$8 sps:$4 sm:$0xff]   ;;  %v5212_v34 = vcombine.low %v7626_v29, %v7626_v29  ;;  %v6261_v29 = vld [vmem:[%s7306_s18 + $0xb00] ss:$8 sps:$4 sm:$0xff]  }
 0x1ef   : > { %4812 = vmatprep.mubr.bf16.mxu0 %v5225_v42  ;;  %v5224_v42 = vcombine.low %v7635_v38, %v7635_v38  ;;  %v6266_v38 = vld [vmem:[%s7306_s18 + $0x514] ss:$8 sps:$4 sm:$0xff]  }
 0x1f0   : > { %4537 = vmatpush1.bf16.msra.mxu1 %v6164_v43  ;;  %v7712_v43 = vld [vmem:[%s7843_s0 + $0x28] sm:$0xff] }
 0x1f1   : > { %4783 = vmatpush1.bf16.msra.mxu0 %v6167_v44  ;;  %4538 = vmatprep.subr.bf16.mxu1 %v6172_v45  ;;  %v7717_v44 = vld [vmem:[%s7843_s0 + $0x58] sm:$0xff]  ;;  %v6256_v45 = vld [vmem:[%s7306_s18 + $0x500] ss:$8 sps:$4 sm:$0xff]  }
 0x1f2   : > { %4784 = vmatprep.subr.bf16.mxu0 %v6175_v46  ;;  %v6269_v46 = vld [vmem:[%s7306_s18 + $0xb14] ss:$8 sps:$4 sm:$0xff]  }
 0x1f4   : > { %4539 = vmatpush1.bf16.msra.mxu1 %v6170_v47  ;;  %v5215_v47 = vcombine.high %v7712_v43, %v7712_v43 }
 0x1f5   : > { %4785 = vmatpush1.bf16.msra.mxu0 %v6173_v48  ;;  %4540 = vmatprep.subr.bf16.mxu1 %v6178_v49  ;;  %v5227_v48 = vcombine.high %v7717_v44, %v7717_v44  ;;  %v6264_v49 = vld [vmem:[%s7306_s18 + $0x510] ss:$8 sps:$4 sm:$0xff]  }
 0x1f6   : > { %4786 = vmatprep.subr.bf16.mxu0 %v6181_v50  ;;  %v6267_v50 = vld [vmem:[%s7306_s18 + $0xb10] ss:$8 sps:$4 sm:$0xff]  }
 0x1f8   : > { %4541 = vmatpush1.bf16.msra.mxu1 %v6176_v51  ;;  %v6272_v51 = vld [vmem:[%s7306_s18 + $0x524] ss:$8 sps:$4 sm:$0xff]  }
 0x1f9   : > { %4787 = vmatpush1.bf16.msra.mxu0 %v6179_v52  ;;  %4542 = vmatprep.subr.bf16.mxu1 %v6184_v53  ;;  %v6275_v52 = vld [vmem:[%s7306_s18 + $0xb24] ss:$8 sps:$4 sm:$0xff]   ;;  %v6270_v53 = vld [vmem:[%s7306_s18 + $0x520] ss:$8 sps:$4 sm:$0xff]  }
 0x1fa   : > { %4788 = vmatprep.subr.bf16.mxu0 %v6187_v54  ;;  %v6273_v54 = vld [vmem:[%s7306_s18 + $0xb20] ss:$8 sps:$4 sm:$0xff]  }
 0x1fc   : > { %4543 = vmatpush1.bf16.msra.mxu1 %v6182_v55  ;;  %v6278_v55 = vld [vmem:[%s7306_s18 + $0x534] ss:$8 sps:$4 sm:$0xff]  }
 0x1fd   : > { %4789 = vmatpush1.bf16.msra.mxu0 %v6185_v56  ;;  %4544 = vmatprep.subr.bf16.mxu1 %v6190_v57  ;;  %v6281_v56 = vld [vmem:[%s7306_s18 + $0xb34] ss:$8 sps:$4 sm:$0xff]   ;;  %v6276_v57 = vld [vmem:[%s7306_s18 + $0x530] ss:$8 sps:$4 sm:$0xff]  }
 0x1fe   : > { %4790 = vmatprep.subr.bf16.mxu0 %v6193_v58  ;;  %v6279_v58 = vld [vmem:[%s7306_s18 + $0xb30] ss:$8 sps:$4 sm:$0xff]  }
 0x200   : > { %4545 = vmatpush1.bf16.msra.mxu1 %v6188_v59  ;;  %v6284_v59 = vld [vmem:[%s7306_s18 + $0x544] ss:$8 sps:$4 sm:$0xff]  }
 0x201   : > { %4791 = vmatpush1.bf16.msra.mxu0 %v6191_v60  ;;  %4546 = vmatprep.subr.bf16.mxu1 %v6196_v61  ;;  %v6287_v60 = vld [vmem:[%s7306_s18 + $0xb44] ss:$8 sps:$4 sm:$0xff]   ;;  %v6282_v61 = vld [vmem:[%s7306_s18 + $0x540] ss:$8 sps:$4 sm:$0xff]  }
 0x202   : > { %4792 = vmatprep.subr.bf16.mxu0 %v6199_v62  ;;  %v6285_v62 = vld [vmem:[%s7306_s18 + $0xb40] ss:$8 sps:$4 sm:$0xff]  }
 0x204   : > { %4547 = vmatpush1.bf16.msra.mxu1 %v6194_v63  ;;  %v6290_v63 = vld [vmem:[%s7306_s18 + $0x554] ss:$8 sps:$4 sm:$0xff]  }
 0x205   : > { %4793 = vmatpush1.bf16.msra.mxu0 %v6197_v0  ;;  %4548 = vmatprep.subr.bf16.mxu1 %v6202_v1  ;;  %v6293_v0 = vld [vmem:[%s7306_s18 + $0xb54] ss:$8 sps:$4 sm:$0xff]   ;;  %v6288_v1 = vld [vmem:[%s7306_s18 + $0x550] ss:$8 sps:$4 sm:$0xff]  }
 0x206   : > { %4794 = vmatprep.subr.bf16.mxu0 %v6205_v2  ;;  %v6291_v2 = vld [vmem:[%s7306_s18 + $0xb50] ss:$8 sps:$4 sm:$0xff]  }
 0x208   : > { %4549 = vmatpush1.bf16.msra.mxu1 %v6200_v3  ;;  %v6296_v3 = vld [vmem:[%s7306_s18 + $0x564] ss:$8 sps:$4 sm:$0xff]  }
 0x209   : > { %4795 = vmatpush1.bf16.msra.mxu0 %v6203_v4  ;;  %4550 = vmatprep.subr.bf16.mxu1 %v6208_v5  ;;  %v6299_v4 = vld [vmem:[%s7306_s18 + $0xb64] ss:$8 sps:$4 sm:$0xff]   ;;  %v6294_v5 = vld [vmem:[%s7306_s18 + $0x560] ss:$8 sps:$4 sm:$0xff]  }
 0x20a   : > { %4796 = vmatprep.subr.bf16.mxu0 %v6211_v6  ;;  %v6297_v6 = vld [vmem:[%s7306_s18 + $0xb60] ss:$8 sps:$4 sm:$0xff]  }
 0x20c   : > { %4551 = vmatpush1.bf16.msra.mxu1 %v6206_v7  ;;  %v6302_v7 = vld [vmem:[%s7306_s18 + $0x574] ss:$8 sps:$4 sm:$0xff]  }
 0x20d   : > { %4797 = vmatpush1.bf16.msra.mxu0 %v6209_v8  ;;  %4552 = vmatprep.subr.bf16.mxu1 %v6214_v9  ;;  %v6305_v8 = vld [vmem:[%s7306_s18 + $0xb74] ss:$8 sps:$4 sm:$0xff]   ;;  %v6300_v9 = vld [vmem:[%s7306_s18 + $0x570] ss:$8 sps:$4 sm:$0xff]  }
 0x20e   : > { %4798 = vmatprep.subr.bf16.mxu0 %v6217_v10  ;;  %v6303_v10 = vld [vmem:[%s7306_s18 + $0xb70] ss:$8 sps:$4 sm:$0xff]  }
 0x210   : > { %4553 = vmatpush1.bf16.msra.mxu1 %v6212_v11  ;;  %v6308_v11 = vld [vmem:[%s7306_s18 + $0x584] ss:$8 sps:$4 sm:$0xff]  }
 0x211   : > { %4799 = vmatpush1.bf16.msra.mxu0 %v6215_v12  ;;  %4554 = vmatprep.subr.bf16.mxu1 %v6220_v13  ;;  %v6311_v12 = vld [vmem:[%s7306_s18 + $0xb84] ss:$8 sps:$4 sm:$0xff]   ;;  %v6306_v13 = vld [vmem:[%s7306_s18 + $0x580] ss:$8 sps:$4 sm:$0xff]  }
 0x212   : > { %4800 = vmatprep.subr.bf16.mxu0 %v6223_v14  ;;  %v6309_v14 = vld [vmem:[%s7306_s18 + $0xb80] ss:$8 sps:$4 sm:$0xff]  }
 0x214   : > { %4555 = vmatpush1.bf16.msra.mxu1 %v6218_v15  ;;  %v6314_v15 = vld [vmem:[%s7306_s18 + $0x594] ss:$8 sps:$4 sm:$0xff]  }
 0x215   : > { %4801 = vmatpush1.bf16.msra.mxu0 %v6221_v16  ;;  %4556 = vmatprep.subr.bf16.mxu1 %v6226_v17  ;;  %v6317_v16 = vld [vmem:[%s7306_s18 + $0xb94] ss:$8 sps:$4 sm:$0xff]   ;;  %v6312_v17 = vld [vmem:[%s7306_s18 + $0x590] ss:$8 sps:$4 sm:$0xff]  }
 0x216   : > { %4802 = vmatprep.subr.bf16.mxu0 %v6229_v18  ;;  %v6315_v18 = vld [vmem:[%s7306_s18 + $0xb90] ss:$8 sps:$4 sm:$0xff]  }
 0x218   : > { %4557 = vmatpush1.bf16.msra.mxu1 %v6224_v19  ;;  %v6320_v19 = vld [vmem:[%s7306_s18 + $0x5a4] ss:$8 sps:$4 sm:$0xff]  }
 0x219   : > { %4803 = vmatpush1.bf16.msra.mxu0 %v6227_v20  ;;  %4558 = vmatprep.subr.bf16.mxu1 %v6232_v21  ;;  %v6323_v20 = vld [vmem:[%s7306_s18 + $0xba4] ss:$8 sps:$4 sm:$0xff]   ;;  %v6318_v21 = vld [vmem:[%s7306_s18 + $0x5a0] ss:$8 sps:$4 sm:$0xff]  }
 0x21a   : > { %4804 = vmatprep.subr.bf16.mxu0 %v6235_v22  ;;  %v6321_v22 = vld [vmem:[%s7306_s18 + $0xba0] ss:$8 sps:$4 sm:$0xff]  }
 0x21c   : > { %4559 = vmatpush1.bf16.msra.mxu1 %v6230_v23  ;;  %v6326_v23 = vld [vmem:[%s7306_s18 + $0x5b4] ss:$8 sps:$4 sm:$0xff]  }
 0x21d   : > { %4805 = vmatpush1.bf16.msra.mxu0 %v6233_v24  ;;  %4560 = vmatprep.subr.bf16.mxu1 %v6238_v25  ;;  %v6329_v24 = vld [vmem:[%s7306_s18 + $0xbb4] ss:$8 sps:$4 sm:$0xff]   ;;  %v6324_v25 = vld [vmem:[%s7306_s18 + $0x5b0] ss:$8 sps:$4 sm:$0xff]  }
 0x21e   : > { %4806 = vmatprep.subr.bf16.mxu0 %v6241_v26  ;;  %v6327_v26 = vld [vmem:[%s7306_s18 + $0xbb0] ss:$8 sps:$4 sm:$0xff]  }
 0x220   : > { %4561 = vmatpush1.bf16.msra.mxu1 %v6236_v28  ;;  %v6332_v28 = vld [vmem:[%s7306_s18 + $0x5c4] ss:$8 sps:$4 sm:$0xff]  }
 0x221   : > { %4807 = vmatpush1.bf16.msra.mxu0 %v6239_v30  ;;  %4562 = vmatprep.subr.bf16.mxu1 %v6244_v31  ;;  %v6335_v30 = vld [vmem:[%s7306_s18 + $0xbc4] ss:$8 sps:$4 sm:$0xff]   ;;  %v6330_v31 = vld [vmem:[%s7306_s18 + $0x5c0] ss:$8 sps:$4 sm:$0xff]  }
 0x222   : > { %4808 = vmatprep.subr.bf16.mxu0 %v6247_v32  ;;  %v6333_v32 = vld [vmem:[%s7306_s18 + $0xbc0] ss:$8 sps:$4 sm:$0xff]  }
 0x224   : > { %4563 = vmatpush1.bf16.msra.mxu1 %v6242_v35  ;;  %v6338_v35 = vld [vmem:[%s7306_s18 + $0x5d4] ss:$8 sps:$4 sm:$0xff]  }
 0x225   : > { %4809 = vmatpush1.bf16.msra.mxu0 %v6245_v27  ;;  %4564 = vmatprep.subr.bf16.mxu1 %v6250_v36  ;;  %v6341_v27 = vld [vmem:[%s7306_s18 + $0xbd4] ss:$8 sps:$4 sm:$0xff]   ;;  %v6336_v36 = vld [vmem:[%s7306_s18 + $0x5d0] ss:$8 sps:$4 sm:$0xff]  }
 0x226   : > { %4810 = vmatprep.subr.bf16.mxu0 %v6253_v37  ;;  %v6339_v37 = vld [vmem:[%s7306_s18 + $0xbd0] ss:$8 sps:$4 sm:$0xff]  }
 0x228   : > { %4565 = vmatpush1.bf16.msra.mxu1 %v6248_v39  ;;  %v6344_v39 = vld [vmem:[%s7306_s18 + $0x5e4] ss:$8 sps:$4 sm:$0xff]  }
 0x229   : > { %4811 = vmatpush1.bf16.msra.mxu0 %v6251_v40  ;;  %4575 = vmatprep.subr.bf16.mxu1 %v6258_v33  ;;  %v6347_v40 = vld [vmem:[%s7306_s18 + $0xbe4] ss:$8 sps:$4 sm:$0xff]   ;;  %v6342_v33 = vld [vmem:[%s7306_s18 + $0x5e0] ss:$8 sps:$4 sm:$0xff]  }
 0x22a   : > { %4821 = vmatprep.subr.bf16.mxu0 %v6263_v41  ;;  %v6345_v41 = vld [vmem:[%s7306_s18 + $0xbe0] ss:$8 sps:$4 sm:$0xff]  }
 0x22b   : > { %4567 = vmatmul.mubr.bf16.vlgmr.msra.gmra.mrb[0].mxu1 %v5212_v34  ;;  %v6350_v34 = vld [vmem:[%s7306_s18 + $0x5f4] ss:$8 sps:$4 sm:$0xff]  }
 0x22c   : > { %4813 = vmatmul.mubr.bf16.vlgmr.msra.gmra.mrb[0].mxu0 %v5224_v42  ;;  %4576 = vmatpush1.bf16.msra.mxu1 %v6256_v45  ;;  %v6353_v42 = vld [vmem:[%s7306_s18 + $0xbf4] ss:$8 sps:$4 sm:$0xff]   ;;  %v6348_v45 = vld [vmem:[%s7306_s18 + $0x5f0] ss:$8 sps:$4 sm:$0xff]  }
 0x22d   : > { %4822 = vmatpush1.bf16.msra.mxu0 %v6261_v29  ;;  %4577 = vmatprep.subr.bf16.mxu1 %v6266_v38  ;;  %v6351_v29 = vld [vmem:[%s7306_s18 + $0xbf0] ss:$8 sps:$4 sm:$0xff]   ;;  %v6360_v38 = vld [vmem:[%s7306_s18 + $0xc04] ss:$8 sps:$4 sm:$0xff]  }
 0x22e   : > { %4823 = vmatprep.subr.bf16.mxu0 %v6269_v46  ;;  %4607 = vmatprep.mubr.bf16.mxu1 %v5215_v47  ;;  %v6371_v46 = vld [vmem:[%s7304_s25 + $0x40] sm:$0xff]   ;;  %v5214_v47 = vcombine.low %v7712_v43, %v7712_v43 }
 0x22f   : > { %4853 = vmatprep.mubr.bf16.mxu0 %v5227_v48  ;;  %v5226_v48 = vcombine.low %v7717_v44, %v7717_v44  ;;  %v6361_v43 = vld [vmem:[%s7306_s18 + $0xc10] ss:$8 sps:$4 sm:$0xff]   ;;  %v6366_v44 = vld [vmem:[%s7306_s18 + $0xc24] ss:$8 sps:$4 sm:$0xff]  }
 0x230   : > { %4578 = vmatpush1.bf16.msra.mxu1 %v6264_v49  ;;  %v6358_v49 = vld [vmem:[%s7306_s18 + $0xc00] ss:$8 sps:$4 sm:$0xff]  }
 0x231   : > { %4824 = vmatpush1.bf16.msra.mxu0 %v6267_v50  ;;  %4579 = vmatprep.subr.bf16.mxu1 %v6272_v51  ;;  %v6363_v50 = vld [vmem:[%s7306_s18 + $0xc14] ss:$8 sps:$4 sm:$0xff]  }
 0x232   : > { %4825 = vmatprep.subr.bf16.mxu0 %v6275_v52  ;;  %v6372_v51 = vld [vmem:[%s7304_s25] sm:$0xff]   ;;  %v6373_v52 = vld [vmem:[%s7304_s25 + $0x48] sm:$0xff]  }
 0x234   : > { %4580 = vmatpush1.bf16.msra.mxu1 %v6270_v53  ;;  %v6428_v53 = vmov 0  }
 0x235   : > { %4826 = vmatpush1.bf16.msra.mxu0 %v6273_v54  ;;  %4581 = vmatprep.subr.bf16.mxu1 %v6278_v55  ;;  %v6374_v54 = vld [vmem:[%s7304_s25 + $0x8] sm:$0xff]  }
 0x236   : > { %4827 = vmatprep.subr.bf16.mxu0 %v6281_v56  ;;  %v6364_v55 = vld [vmem:[%s7306_s18 + $0xc20] ss:$8 sps:$4 sm:$0xff]   ;;  %v6369_v56 = vld [vmem:[%s7306_s18 + $0xc34] ss:$8 sps:$4 sm:$0xff]  }
 0x238   : > { %4582 = vmatpush1.bf16.msra.mxu1 %v6276_v57  ;;  %v6367_v57 = vld [vmem:[%s7306_s18 + $0xc30] ss:$8 sps:$4 sm:$0xff]  }
 0x239   : > { %4828 = vmatpush1.bf16.msra.mxu0 %v6279_v58  ;;  %4583 = vmatprep.subr.bf16.mxu1 %v6284_v59  ;;  %v6370_v58 = vld [vmem:[%s7843_s0 + $0x60] ss:$0 sps:$4 sm:$0xff]   ;;  %v6375_v59 = vld [vmem:[%s7304_s25 + $0x50] sm:$0xff]  }
 0x23a   : > { %4829 = vmatprep.subr.bf16.mxu0 %v6287_v60  ;;  %v6376_v60 = vld [vmem:[%s7304_s25 + $0x10] sm:$0xff]  }
 0x23c   : > { %4584 = vmatpush1.bf16.msra.mxu1 %v6282_v61  ;;  %v6377_v61 = vld [vmem:[%s7304_s25 + $0x58] sm:$0xff]  }
 0x23d   : > { %4830 = vmatpush1.bf16.msra.mxu0 %v6285_v62  ;;  %4585 = vmatprep.subr.bf16.mxu1 %v6290_v63  ;;  %v6378_v62 = vld [vmem:[%s7304_s25 + $0x18] sm:$0xff]   ;;  %v6379_v63 = vld [vmem:[%s7304_s25 + $0x60] sm:$0xff]  }
 0x23e   : > { %4831 = vmatprep.subr.bf16.mxu0 %v6293_v0  ;;  %v6380_v0 = vld [vmem:[%s7304_s25 + $0x20] sm:$0xff]  }
 0x240   : > { %4586 = vmatpush1.bf16.msra.mxu1 %v6288_v1  ;;  %v6381_v1 = vld [vmem:[%s7304_s25 + $0x68] sm:$0xff]  }
 0x241   : > { %4832 = vmatpush1.bf16.msra.mxu0 %v6291_v2  ;;  %4587 = vmatprep.subr.bf16.mxu1 %v6296_v3  ;;  %v6382_v2 = vld [vmem:[%s7304_s25 + $0x28] sm:$0xff]   ;;  %v6383_v3 = vld [vmem:[%s7304_s25 + $0x70] sm:$0xff]  }
 0x242   : > { %4833 = vmatprep.subr.bf16.mxu0 %v6299_v4  ;;  %v6384_v4 = vld [vmem:[%s7304_s25 + $0x30] sm:$0xff]  }
 0x244   : > { %4588 = vmatpush1.bf16.msra.mxu1 %v6294_v5  ;;  %v6385_v5 = vld [vmem:[%s7304_s25 + $0x78] sm:$0xff]  }
 0x245   : > { %4834 = vmatpush1.bf16.msra.mxu0 %v6297_v6  ;;  %4589 = vmatprep.subr.bf16.mxu1 %v6302_v7  ;;  %v6386_v6 = vld [vmem:[%s7304_s25 + $0x38] sm:$0xff]   ;;  %v2309_v7 = vlaneseq }
 0x246   : > { %4835 = vmatprep.subr.bf16.mxu0 %v6305_v8 }
 0x248   : > { %4590 = vmatpush1.bf16.msra.mxu1 %v6300_v9 }
 0x249   : > { %4836 = vmatpush1.bf16.msra.mxu0 %v6303_v10  ;;  %4591 = vmatprep.subr.bf16.mxu1 %v6308_v11  ;;  %v2310_v11 = vshrl.u32 %v2309_v7, 7 }
 0x24a   : > { %4837 = vmatprep.subr.bf16.mxu0 %v6311_v12 }
 0x24c   : > { %4592 = vmatpush1.bf16.msra.mxu1 %v6306_v13  ;;  %v2311_v13 = vsub.s32 0, %v2310_v11 }
 0x24d   : > { %4838 = vmatpush1.bf16.msra.mxu0 %v6309_v14  ;;  %4593 = vmatprep.subr.bf16.mxu1 %v6314_v15  ;;  %v2307_v14 = vld [vmem:[%s1884_s15] sm:$0x3]  ;;  %v2315_v15 = vsub.s32 1, %v2310_v11 }
 0x24e   : > { %4839 = vmatprep.subr.bf16.mxu0 %v6317_v16  ;;  %v2312_v16 = vrot.slane %v2307_v14, %v2311_v13 }
 0x250   : > { %4594 = vmatpush1.bf16.msra.mxu1 %v6312_v17  ;;  %v2316_v17 = vrot.slane %v2307_v14, %v2315_v15 }
 0x251   : > { %4840 = vmatpush1.bf16.msra.mxu0 %v6315_v18  ;;  %4595 = vmatprep.subr.bf16.mxu1 %v6320_v19 }
 0x252   : > { %4841 = vmatprep.subr.bf16.mxu0 %v6323_v20 }
 0x254   : > { %4596 = vmatpush1.bf16.msra.mxu1 %v6318_v21 }
 0x255   : > { %4842 = vmatpush1.bf16.msra.mxu0 %v6321_v22  ;;  %4597 = vmatprep.subr.bf16.mxu1 %v6326_v23 }
 0x256   : > { %4843 = vmatprep.subr.bf16.mxu0 %v6329_v24 }
 0x258   : > { %4598 = vmatpush1.bf16.msra.mxu1 %v6324_v25 }
 0x259   : > { %4844 = vmatpush1.bf16.msra.mxu0 %v6327_v26  ;;  %4599 = vmatprep.subr.bf16.mxu1 %v6332_v28 }
 0x25a   : > { %4845 = vmatprep.subr.bf16.mxu0 %v6335_v30 }
 0x25c   : > { %4600 = vmatpush1.bf16.msra.mxu1 %v6330_v31 }
 0x25d   : > { %4846 = vmatpush1.bf16.msra.mxu0 %v6333_v32  ;;  %4601 = vmatprep.subr.bf16.mxu1 %v6338_v35  ;;  %v4905_v35 = vld [vmem:[#allocation2] sm:$0xff] }
 0x25e   : > { %4847 = vmatprep.subr.bf16.mxu0 %v6341_v27 }
 0x260   : > { %4602 = vmatpush1.bf16.msra.mxu1 %v6336_v36 }
 0x261   : > { %4848 = vmatpush1.bf16.msra.mxu0 %v6339_v37  ;;  %4603 = vmatprep.subr.bf16.mxu1 %v6344_v39 }
 0x262   : > { %4849 = vmatprep.subr.bf16.mxu0 %v6347_v40 }
 0x264   : > { %4604 = vmatpush1.bf16.msra.mxu1 %v6342_v33 }
 0x265   : > { %4850 = vmatpush1.bf16.msra.mxu0 %v6345_v41  ;;  %4605 = vmatprep.subr.bf16.mxu1 %v6350_v34  ;;  %v5639_v41 = vld [vmem:[%s7847_s4] ss:$0 sm:$0xff] (!%p5638_p12) }
 0x266   : > { %4851 = vmatprep.subr.bf16.mxu0 %v6353_v42 }
 0x268   : > { %4606 = vmatpush1.bf16.msra.mxu1 %v6348_v45 }
 0x269   : > { %4852 = vmatpush1.bf16.msra.mxu0 %v6351_v29  ;;  %5644 = vmatprep.subr.bf16.mxu1 %v6371_v46 }
 0x26a   : > { %4862 = vmatprep.subr.bf16.mxu0 %v6360_v38 }
 0x26b   : > { %4608 = vmatmul.mubr.bf16.vlgmr.msra.gmra.mrb[0].mxu1 %v5214_v47 }
 0x26c   : > { %4854 = vmatmul.mubr.bf16.vlgmr.msra.gmra.mrb[0].mxu0 %v5226_v48  ;;  %5645 = vmatpush3.bf16.msra.mxu1 %v6372_v51 }
 0x26d   : > { %4863 = vmatpush1.bf16.msra.mxu0 %v6358_v49  ;;  %4894 = vmatprep.mubr.bf16.mxu0 %v6428_v53 }
 0x26e   : > { %4864 = vmatprep.subr.bf16.mxu0 %v6363_v50  ;;  %5646 = vmatprep.subr.bf16.mxu1 %v6373_v52 }
 0x270   : > { %5647 = vmatpush3.bf16.msra.mxu1 %v6374_v54 }
 0x271   : > { %4865 = vmatpush1.bf16.msra.mxu0 %v6361_v43  ;;  %5648 = vmatprep.subr.bf16.mxu1 %v6375_v59 }
 0x272   : > { %4866 = vmatprep.subr.bf16.mxu0 %v6366_v44 }
 0x274   : > { %5649 = vmatpush3.bf16.msra.mxu1 %v6376_v60 }
 0x275   : > { %4867 = vmatpush1.bf16.msra.mxu0 %v6364_v55  ;;  %5650 = vmatprep.subr.bf16.mxu1 %v6377_v61 }
 0x276   : > { %4868 = vmatprep.subr.bf16.mxu0 %v6369_v56 }
 0x278   : > { %5651 = vmatpush3.bf16.msra.mxu1 %v6378_v62 }
 0x279   : > { %4869 = vmatpush1.bf16.msra.mxu0 %v6367_v57  ;;  %5652 = vmatprep.subr.bf16.mxu1 %v6379_v63 }
 0x27c   : > { %5621 = vmatmul.mubr.msk.bf16.vlgmr.msra.gmra.mrb[0].mxu0 %vm4366_vm0, %v6370_v58  ;;  %5653 = vmatpush3.bf16.msra.mxu1 %v6380_v0 }
 0x27d   : > { %5654 = vmatprep.subr.bf16.mxu1 %v6381_v1 }
 0x280   : > { %5655 = vmatpush3.bf16.msra.mxu1 %v6382_v2 }
 0x281   : > { %5656 = vmatprep.subr.bf16.mxu1 %v6383_v3 }
 0x284   : > { %5657 = vmatpush3.bf16.msra.mxu1 %v6384_v4 }
 0x285   : > { %5658 = vmatprep.subr.bf16.mxu1 %v6385_v5 }
 0x288   : > { %5659 = vmatpush3.bf16.msra.mxu1 %v6386_v6 }
 0x33e   : > { %v4609_v8 = vpop.f32.mrb[0].mxu1 }
 0x33f   : > { %v4611_v9 = vpop.f32.mrb[1].mxu1  ;;  %v5666_v18 = vadd.f32 %v4609_v8, %v2312_v16 }
 0x340   : > { %v4613_v10 = vpop.f32.mrb[2].mxu1  ;;  %v5668_v19 = vadd.f32 %v4611_v9, %v2316_v17 }
 0x341   : > { %v4614_v12 = vpop.f32.mrb[3].mxu1 }
 0x34f   : > { %v4896_v20 = vpop.f32.mrb[0].mxu0 }
 0x350   : > { %v5667_v21 = vadd.f32 %v5666_v18, %v4896_v20  ;;  %v4898_v22 = vpop.f32.mrb[1].mxu0 }
 0x351   : > { %v5669_v23 = vadd.f32 %v5668_v19, %v4898_v22  ;;  %v4900_v24 = vpop.f32.mrb[2].mxu0 }
 0x352   : > { %v4903_v25 = vmax.f32 %v5667_v21, 0.0  ;;  %v4901_v26 = vpop.f32.mrb[3].mxu0 }
 0x353   : > { %v4904_v28 = vmax.f32 %v5669_v23, 0.0 }
 0x354   : > { %v4906_v31 = vpack.c.bf16 %v4903_v25, %v4903_v25 }
 0x355   : > { %v4907_v30 = vpack.c.bf16 %v4904_v28, %v4904_v28 }
 0x357   : > { %5068 = vmatprep.mubr.bf16.mxu1 %v4907_v30 }
 0x358   : > { %5069 = vmatmul.mubr.bf16.vlgmr.msra.gmra.mrb[4].mxu1 %v4906_v31 }
 0x42b   : > { %v5660_v32 = vpop.f32.mrb[4].mxu1  ;;  %5081 = sbr.rel (%p5638_p12) target bundleno = 1084 (0x43c), region = 86 }
 0x42c   : > { %v5661_v27 = vpop.f32.mrb[5].mxu1 }
 0x42d   : > { %v5662_v36 = vadd.f32 %v5661_v27, %v5660_v32  ;;  %v5663_v37 = vpop.f32.mrb[6].mxu1 }
 0x42e   : > { %v5664_v39 = vpop.f32.mrb[7].mxu1 }
 0x42f   : > { %v5076_v40 = vadd.f32 %v5662_v36, %v4905_v35 }
 0x431   : > { %5077 = vst [vmem:[#allocation2] sm:$0xff] %v5076_v40 }
 0x438   : > { %v5082_v33 = vld [vmem:[#allocation2] sm:$0xff] }
 0x439   : > { %v5090_v34 = vadd.f32 %v5639_v41, %v5082_v33 }
 0x43b   : > { %5091 = vst [vmem:[%s7848_s5] sm:$0xff] %v5090_v34 }
 0x43c PF: > { %s15_s22 = sadd.s32 1, %s6425_s22   ;;  %s7849_s18 = smov %s6413_s19 }
 0x43d   : > { %p12_p13 = scmp.ge.s32.totalorder %s15_s22, 4   ;;  %s7850_s19 = smov %s6494_s26 }
 0x43e   : > { %s7851_s20 = smov %s6421_s21  ;;  %s7852_s21 = smov %s7854_s23 }
 0x43f   :  { %14 = sbr.rel (!%p12_p13) target bundleno = 3 (0x3), region = 130 }

</bundles_post_ra>
